<compile_context>
chip_gen: v7x
topology: tpu7x:2x2x1
jax: 0.10.0
libtpu: 0.0.40
codegen_flags: <defaults>
</compile_context>

<pallas_src>
import functools

import numpy as np
import jax
import jax.numpy as jnp
from jax import lax
from jax.experimental import pallas as pl
from jax.experimental.pallas import tpu as pltpu


# ------------------- constant 0/1 helper operators (numpy) -------------------

def build_shift_mats(Ho, Wo):
    """z[k] (S,S): (x @ z[k])[c, s] == x[c, shifted(s)] for 3x3 tap k, 0 outside."""
    S = Ho * Wo
    z = np.zeros((9, S, S), np.float32)
    for k in range(9):
        dy, dx = k // 3 - 1, k % 3 - 1
        for y in range(Ho):
            yy = y + dy
            if not (0 <= yy < Ho):
                continue
            for x in range(Wo):
                xx = x + dx
                if 0 <= xx < Wo:
                    z[k, yy * Wo + xx, y * Wo + x] = 1.0
    return z


def build_spread_mats(H, W):
    """g[t] (H*W, 4*H*W): scatters column i*W+j to output column (2i+dy)*2W+(2j+dx)."""
    Wo = 2 * W
    S = 4 * H * W
    g = np.zeros((4, H * W, S), np.float32)
    for dy in range(2):
        for dx in range(2):
            t = dy * 2 + dx
            for i in range(H):
                for j in range(W):
                    g[t, i * W + j, (2 * i + dy) * Wo + (2 * j + dx)] = 1.0
    return g


# ------------------------------ Pallas kernels --------------------------------

def _upconv_skip_kernel(x_ref, skip_ref, w_ref, g_ref, b_ref, o_ref):
    # x_ref:(1,Cin2,Sin) bf16   skip_ref:(1,Cout,S) f32   w_ref:(4*Cout,Cin2) bf16
    # g_ref:(4,Sin,S) bf16      b_ref:(Cout,1) f32        o_ref:(1,Cout,S) f32
    cout = o_ref.shape[1]
    # one MXU matmul for all 4 (dy,dx) taps of the k=2, s=2 transposed conv
    y = jnp.dot(w_ref[...], x_ref[0], preferred_element_type=jnp.float32)  # (4*Cout, Sin)
    acc = b_ref[...] + skip_ref[0]                                         # (Cout, S)
    for t in range(4):  # scatter each tap onto its stride-2 sub-grid (exact 0/1 matmul)
        yt = y[t * cout:(t + 1) * cout, :].astype(jnp.bfloat16)
        acc = acc + jnp.dot(yt, g_ref[t], preferred_element_type=jnp.float32)
    o_ref[0] = acc.astype(o_ref.dtype)


def _res_block_kernel(h_ref, z_ref, w1_ref, b1_ref, tb_ref, w2_ref, b2_ref,
                      *rest, heads):
    # h_ref:(1,C,S) f32   z_ref:(9,S,S) bf16   w*:(C,9C) bf16   b*:(C,1) f32
    # tb_ref:(1,C,1) f32  [wqkv:(3C,C) bf16, bqkv:(3C,1), woT:(C,C) bf16, bo:(C,1)]
    if heads:
        wqkv_ref, bqkv_ref, wo_ref, bo_ref, o_ref = rest
    else:
        (o_ref,) = rest
    C = h_ref.shape[1]
    h = h_ref[0]                                            # (C, S) f32, stays in VMEM

    def im2col(x_f32):
        # 9 exact shift-selects (bf16 values copied verbatim) -> (9C, S) patches.
        xb = x_f32.astype(jnp.bfloat16)
        taps = [jnp.dot(xb, z_ref[k], preferred_element_type=jnp.float32)
                .astype(jnp.bfloat16) for k in range(9)]
        return jnp.concatenate(taps, axis=0)

    # conv1 (single K=9C matmul) + time bias + SiLU, all in f32
    r = jnp.dot(w1_ref[...], im2col(h), preferred_element_type=jnp.float32)
    r = r + b1_ref[...] + tb_ref[0]
    r = r * jax.nn.sigmoid(r)
    # conv2 + residual add
    r = jnp.dot(w2_ref[...], im2col(r), preferred_element_type=jnp.float32)
    h = h + r + b2_ref[...]

    if heads:
        dh = C // heads
        scale = 1.0 / float(np.sqrt(dh))
        qkv = jnp.dot(wqkv_ref[...], h.astype(jnp.bfloat16),
                      preferred_element_type=jnp.float32) + bqkv_ref[...]   # (3C, S)
        outs = []
        for i in range(heads):
            q = qkv[i * dh:(i + 1) * dh, :].astype(jnp.bfloat16)            # (dh, S)
            k = qkv[C + i * dh:C + (i + 1) * dh, :].astype(jnp.bfloat16)
            v = qkv[2 * C + i * dh:2 * C + (i + 1) * dh, :].astype(jnp.bfloat16)
            s = lax.dot_general(q, k, (((0,), (0,)), ((), ())),
                                preferred_element_type=jnp.float32) * scale  # (S, S)
            s = s - jnp.max(s, axis=-1, keepdims=True)
            p = jnp.exp(s)
            p = p * pl.reciprocal(jnp.sum(p, axis=-1, keepdims=True), approx=True)
            o = lax.dot_general(v, p.astype(jnp.bfloat16), (((1,), (1,)), ((), ())),
                                preferred_element_type=jnp.float32)          # (dh, S)
            outs.append(o)
        o = jnp.concatenate(outs, axis=0)                                    # (C, S)
        o = jnp.dot(wo_ref[...], o.astype(jnp.bfloat16),
                    preferred_element_type=jnp.float32) + bo_ref[...]
        h = h + o

    o_ref[0] = h.astype(o_ref.dtype)


# --------------------------------- parameters ---------------------------------

def init_params(key, residual_blocks, width, time_dim, attention_heads):
    def nrm(k, shape, scale=0.1):
        return scale * jax.random.normal(k, shape, jnp.float32)

    keys = jax.random.split(key, 2 + residual_blocks)
    params = {
        # ConvTranspose2d(2*width, width, kernel_size=2, stride=2): (Cin, Cout, kH, kW)
        "up_w": nrm(keys[0], (2 * width, width, 2, 2)),
        "up_b": nrm(keys[1], (width,), 0.01),
        "blocks": [],
    }
    for i in range(residual_blocks):
        sk = jax.random.split(keys[2 + i], 12)
        blk = {
            "conv1_w": nrm(sk[0], (3, 3, width, width)),      # HWIO
            "conv1_b": nrm(sk[1], (width,), 0.01),
            "time_w": nrm(sk[2], (time_dim, width)),
            "time_b": nrm(sk[3], (width,), 0.01),
            "conv2_w": nrm(sk[4], (3, 3, width, width)),
            "conv2_b": nrm(sk[5], (width,), 0.01),
        }
        if attention_heads:
            blk.update({
                "wq": nrm(sk[6], (width, width)), "bq": nrm(sk[7], (width,), 0.01),
                "wk": nrm(sk[8], (width, width)), "bk": jnp.zeros((width,), jnp.float32),
                "wv": nrm(sk[9], (width, width)), "bv": jnp.zeros((width,), jnp.float32),
                "wo": nrm(sk[10], (width, width)), "bo": nrm(sk[11], (width,), 0.01),
            })
        params["blocks"].append(blk)
    return params


# ------------------------------ Pallas forward ---------------------------------

def upscaling_block_forward(params, images_nchw, skip_nchw, times, attention_heads):
    N, C2, H, W = images_nchw.shape
    width = C2 // 2
    Ho, Wo = 2 * H, 2 * W
    S = Ho * Wo
    f32, bf16 = jnp.float32, jnp.bfloat16

    # NCHW -> (N, C, H*W): pure reshapes, no transposes.
    x = images_nchw.reshape(N, C2, H * W).astype(bf16)
    skip = skip_nchw.reshape(N, width, S).astype(f32)

    # ---- fused transposed conv (k=2, s=2) + de-interleave + skip add ----
    wstack = jnp.transpose(params["up_w"], (2, 3, 1, 0)).reshape(4 * width, C2).astype(bf16)
    g = jnp.asarray(build_spread_mats(H, W), bf16)
    bup = params["up_b"].reshape(width, 1).astype(f32)

    h = pl.pallas_call(
        _upconv_skip_kernel,
        out_shape=jax.ShapeDtypeStruct((N, width, S), f32),
        grid=(N,),
        in_specs=[pl.BlockSpec((1, C2, H * W), lambda n: (n, 0, 0)),
                  pl.BlockSpec((1, width, S), lambda n: (n, 0, 0)),
                  pl.BlockSpec((4 * width, C2), lambda n: (0, 0)),
                  pl.BlockSpec((4, H * W, S), lambda n: (0, 0, 0)),
                  pl.BlockSpec((width, 1), lambda n: (0, 0))],
        out_specs=pl.BlockSpec((1, width, S), lambda n: (n, 0, 0)),
        compiler_params=pltpu.CompilerParams(dimension_semantics=("parallel",)),
    )(x, skip, wstack, g, bup)

    nblk = len(params["blocks"])
    if nblk == 0:
        return h.reshape(N, width, Ho, Wo)

    # Hoisted time conditioning for all blocks: one plain XLA matmul.
    wt_cat = jnp.concatenate([b["time_w"] for b in params["blocks"]], axis=1)
    bt_cat = jnp.concatenate([b["time_b"] for b in params["blocks"]], axis=0)
    tb_all = (times @ wt_cat + bt_cat).reshape(N, nblk, width, 1).astype(f32)

    z = jnp.asarray(build_shift_mats(Ho, Wo), bf16)        # (9, S, S) exact 0/1 shifts

    for bi, blk in enumerate(params["blocks"]):
        w1 = jnp.transpose(blk["conv1_w"], (3, 0, 1, 2)).reshape(width, 9 * width).astype(bf16)
        w2 = jnp.transpose(blk["conv2_w"], (3, 0, 1, 2)).reshape(width, 9 * width).astype(bf16)
        b1 = blk["conv1_b"].reshape(width, 1).astype(f32)
        b2 = blk["conv2_b"].reshape(width, 1).astype(f32)
        tb = tb_all[:, bi]                                  # (N, width, 1)

        args = [h, z, w1, b1, tb, w2, b2]
        in_specs = [
            pl.BlockSpec((1, width, S), lambda n: (n, 0, 0)),
            pl.BlockSpec((9, S, S), lambda n: (0, 0, 0)),
            pl.BlockSpec((width, 9 * width), lambda n: (0, 0)),
            pl.BlockSpec((width, 1), lambda n: (0, 0)),
            pl.BlockSpec((1, width, 1), lambda n: (n, 0, 0)),
            pl.BlockSpec((width, 9 * width), lambda n: (0, 0)),
            pl.BlockSpec((width, 1), lambda n: (0, 0)),
        ]
        if attention_heads:
            wqkv = jnp.concatenate([blk["wq"].T, blk["wk"].T, blk["wv"].T],
                                   axis=0).astype(bf16)                        # (3C, C)
            bqkv = jnp.concatenate([blk["bq"], blk["bk"], blk["bv"]]
                                   ).reshape(3 * width, 1).astype(f32)
            woT = blk["wo"].T.astype(bf16)
            bo = blk["bo"].reshape(width, 1).astype(f32)
            args += [wqkv, bqkv, woT, bo]
            in_specs += [
                pl.BlockSpec((3 * width, width), lambda n: (0, 0)),
                pl.BlockSpec((3 * width, 1), lambda n: (0, 0)),
                pl.BlockSpec((width, width), lambda n: (0, 0)),
                pl.BlockSpec((width, 1), lambda n: (0, 0)),
            ]

        kern = functools.partial(_res_block_kernel, heads=attention_heads or 0)
        h = pl.pallas_call(
            kern,
            out_shape=jax.ShapeDtypeStruct((N, width, S), f32),
            grid=(N,),
            in_specs=in_specs,
            out_specs=pl.BlockSpec((1, width, S), lambda n: (n, 0, 0)),
            compiler_params=pltpu.CompilerParams(dimension_semantics=("parallel",)),
        )(*args)

    return h.reshape(N, width, Ho, Wo)                      # (N, C, Ho*Wo) is NCHW-flat


# ----------------------------- pure-JAX reference ------------------------------

def upscaling_block_reference(params, images_nchw, skip_nchw, times, attention_heads):
    N, C2, H, W = images_nchw.shape
    width = C2 // 2
    x = jnp.transpose(images_nchw, (0, 2, 3, 1))
    skip = jnp.transpose(skip_nchw, (0, 2, 3, 1))
    up = jnp.einsum("nijc,coyx->niyjxo", x, params["up_w"]).reshape(
        N, 2 * H, 2 * W, width) + params["up_b"]
    h = up + skip
    dn = ("NHWC", "HWIO", "NHWC")
    for blk in params["blocks"]:
        tb = times @ blk["time_w"] + blk["time_b"]
        r = lax.conv_general_dilated(h, blk["conv1_w"], (1, 1), "SAME",
                                     dimension_numbers=dn)
        r = jax.nn.silu(r + blk["conv1_b"] + tb[:, None, None, :])
        r = lax.conv_general_dilated(r, blk["conv2_w"], (1, 1), "SAME",
                                     dimension_numbers=dn) + blk["conv2_b"]
        h = h + r
        if attention_heads:
            S = (2 * H) * (2 * W)
            dh = width // attention_heads
            t = h.reshape(N, S, width)
            def heads(z):
                return z.reshape(N, S, attention_heads, dh).transpose(0, 2, 1, 3)
            q = heads(t @ blk["wq"] + blk["bq"])
            k = heads(t @ blk["wk"] + blk["bk"])
            v = heads(t @ blk["wv"] + blk["bv"])
            s = jnp.einsum("nhqd,nhkd->nhqk", q, k) / np.sqrt(dh)
            p = jax.nn.softmax(s, axis=-1)
            o = jnp.einsum("nhqk,nhkd->nhqd", p, v).transpose(0, 2, 1, 3).reshape(N, S, width)
            o = o @ blk["wo"] + blk["bo"]
            h = h + o.reshape(N, 2 * H, 2 * W, width)
    return jnp.transpose(h, (0, 3, 1, 2))


# ------------------------------------ main -------------------------------------

if __name__ == "__main__":
    residual_blocks = 2
    width = 16
    attention_heads = 2
    time_dim = 32
    N, H, W = 2, 8, 8          # low-res input: (N, 2*width, H, W) -> out spatial 16x16

    key = jax.random.PRNGKey(0)
    kp, ki, ks, kt = jax.random.split(key, 4)
    params = init_params(kp, residual_blocks, width, time_dim, attention_heads)
    images = jax.random.normal(ki, (N, 2 * width, H, W), jnp.float32)         # NCHW
    skip_connections = jax.random.normal(ks, (N, width, 2 * H, 2 * W), jnp.float32)
    times = jax.random.normal(kt, (N, time_dim), jnp.float32)

    fwd = jax.jit(upscaling_block_forward, static_argnums=(4,))
    out = fwd(params, images, skip_connections, times, attention_heads)
    out = jax.block_until_ready(out)
    assert out.shape == (N, width, 2 * H, 2 * W), out.shape

    ref = upscaling_block_reference(params, images, skip_connections, times,
                                    attention_heads)
    # bf16 MXU operands (f32 accumulation) vs f32 reference -> modest tolerance;
    # any structural/indexing bug would produce O(1) discrepancies, far above this.
    np.testing.assert_allclose(np.asarray(out), np.asarray(ref), atol=5e-2, rtol=5e-2)
    print("KERNEL_OK")
</pallas_src>

<mosaic_0001>
module attributes {stable_mosaic.version = 11 : i64} {
  func.func @_upconv_skip_kernel(%arg0: i32, %arg1: memref<1x32x64xbf16, #tpu.memory_space<vmem>>, %arg2: memref<1x16x256xf32, #tpu.memory_space<vmem>>, %arg3: memref<64x32xbf16, #tpu.memory_space<vmem>>, %arg4: memref<4x64x256xbf16, #tpu.memory_space<vmem>>, %arg5: memref<16x1xf32, #tpu.memory_space<vmem>>, %arg6: memref<1x16x256xf32, #tpu.memory_space<vmem>>) attributes {dimension_semantics = [#tpu.dimension_semantics<parallel>], iteration_bounds = array<i64: 2>, scalar_prefetch = 0 : i64, scratch_operands = 0 : i64, tpu.core_type = #tpu.core_type<tc>, window_params = [{transform_indices = @transform_0, window_bounds = array<i64: 1, 32, 64>}, {transform_indices = @transform_1, window_bounds = array<i64: 1, 16, 256>}, {pipeline_mode = #tpu.pipeline_mode<synchronous>, transform_indices = @transform_2, window_bounds = array<i64: 64, 32>}, {pipeline_mode = #tpu.pipeline_mode<synchronous>, transform_indices = @transform_3, window_bounds = array<i64: 4, 64, 256>}, {pipeline_mode = #tpu.pipeline_mode<synchronous>, transform_indices = @transform_4, window_bounds = array<i64: 16, 1>}, {transform_indices = @transform_5, window_bounds = array<i64: 1, 16, 256>}]} {
    %c0 = arith.constant 0 : index
    %c0_0 = arith.constant 0 : index
    %0 = vector.load %arg3[%c0, %c0_0] : memref<64x32xbf16, #tpu.memory_space<vmem>>, vector<64x32xbf16>
    %c0_1 = arith.constant 0 : index
    %c0_2 = arith.constant 0 : index
    %c0_3 = arith.constant 0 : index
    %1 = vector.load %arg1[%c0_1, %c0_2, %c0_3] : memref<1x32x64xbf16, #tpu.memory_space<vmem>>, vector<1x32x64xbf16>
    %2 = vector.shape_cast %1 : vector<1x32x64xbf16> to vector<32x64xbf16>
    %cst = arith.constant dense<0.000000e+00> : vector<64x64xf32>
    %3 = tpu.matmul %0, %2, %cst {dimension_numbers = #tpu.dot_dimension_numbers<[1], [0], [0], [1], [0, 0, 1, 1], [], []>} : vector<64x32xbf16>, vector<32x64xbf16>, vector<64x64xf32> -> vector<64x64xf32>
    %c0_4 = arith.constant 0 : index
    %c0_5 = arith.constant 0 : index
    %4 = vector.load %arg5[%c0_4, %c0_5] : memref<16x1xf32, #tpu.memory_space<vmem>>, vector<16x1xf32>
    %c0_6 = arith.constant 0 : index
    %c0_7 = arith.constant 0 : index
    %c0_8 = arith.constant 0 : index
    %5 = vector.load %arg2[%c0_6, %c0_7, %c0_8] : memref<1x16x256xf32, #tpu.memory_space<vmem>>, vector<1x16x256xf32>
    %6 = vector.shape_cast %5 : vector<1x16x256xf32> to vector<16x256xf32>
    %7 = vector.broadcast %4 : vector<16x1xf32> to vector<16x256xf32>
    %8 = arith.addf %7, %6 : vector<16x256xf32>
    %9 = vector.extract_strided_slice %3 {offsets = [0, 0], sizes = [16, 64], strides = [1, 1]} : vector<64x64xf32> to vector<16x64xf32>
    %10 = arith.truncf %9 : vector<16x64xf32> to vector<16x64xbf16>
    %c0_9 = arith.constant 0 : index
    %c0_10 = arith.constant 0 : index
    %c0_11 = arith.constant 0 : index
    %11 = vector.load %arg4[%c0_9, %c0_10, %c0_11] : memref<4x64x256xbf16, #tpu.memory_space<vmem>>, vector<1x64x256xbf16>
    %12 = vector.shape_cast %11 : vector<1x64x256xbf16> to vector<64x256xbf16>
    %cst_12 = arith.constant dense<0.000000e+00> : vector<16x256xf32>
    %13 = tpu.matmul %10, %12, %cst_12 {dimension_numbers = #tpu.dot_dimension_numbers<[1], [0], [0], [1], [0, 0, 1, 1], [], []>} : vector<16x64xbf16>, vector<64x256xbf16>, vector<16x256xf32> -> vector<16x256xf32>
    %14 = arith.addf %8, %13 : vector<16x256xf32>
    %15 = vector.extract_strided_slice %3 {offsets = [16, 0], sizes = [16, 64], strides = [1, 1]} : vector<64x64xf32> to vector<16x64xf32>
    %16 = arith.truncf %15 : vector<16x64xf32> to vector<16x64xbf16>
    %c1 = arith.constant 1 : index
    %c0_13 = arith.constant 0 : index
    %c0_14 = arith.constant 0 : index
    %17 = vector.load %arg4[%c1, %c0_13, %c0_14] : memref<4x64x256xbf16, #tpu.memory_space<vmem>>, vector<1x64x256xbf16>
    %18 = vector.shape_cast %17 : vector<1x64x256xbf16> to vector<64x256xbf16>
    %cst_15 = arith.constant dense<0.000000e+00> : vector<16x256xf32>
    %19 = tpu.matmul %16, %18, %cst_15 {dimension_numbers = #tpu.dot_dimension_numbers<[1], [0], [0], [1], [0, 0, 1, 1], [], []>} : vector<16x64xbf16>, vector<64x256xbf16>, vector<16x256xf32> -> vector<16x256xf32>
    %20 = arith.addf %14, %19 : vector<16x256xf32>
    %21 = vector.extract_strided_slice %3 {offsets = [32, 0], sizes = [16, 64], strides = [1, 1]} : vector<64x64xf32> to vector<16x64xf32>
    %22 = arith.truncf %21 : vector<16x64xf32> to vector<16x64xbf16>
    %c2 = arith.constant 2 : index
    %c0_16 = arith.constant 0 : index
    %c0_17 = arith.constant 0 : index
    %23 = vector.load %arg4[%c2, %c0_16, %c0_17] : memref<4x64x256xbf16, #tpu.memory_space<vmem>>, vector<1x64x256xbf16>
    %24 = vector.shape_cast %23 : vector<1x64x256xbf16> to vector<64x256xbf16>
    %cst_18 = arith.constant dense<0.000000e+00> : vector<16x256xf32>
    %25 = tpu.matmul %22, %24, %cst_18 {dimension_numbers = #tpu.dot_dimension_numbers<[1], [0], [0], [1], [0, 0, 1, 1], [], []>} : vector<16x64xbf16>, vector<64x256xbf16>, vector<16x256xf32> -> vector<16x256xf32>
    %26 = arith.addf %20, %25 : vector<16x256xf32>
    %27 = vector.extract_strided_slice %3 {offsets = [48, 0], sizes = [16, 64], strides = [1, 1]} : vector<64x64xf32> to vector<16x64xf32>
    %28 = arith.truncf %27 : vector<16x64xf32> to vector<16x64xbf16>
    %c3 = arith.constant 3 : index
    %c0_19 = arith.constant 0 : index
    %c0_20 = arith.constant 0 : index
    %29 = vector.load %arg4[%c3, %c0_19, %c0_20] : memref<4x64x256xbf16, #tpu.memory_space<vmem>>, vector<1x64x256xbf16>
    %30 = vector.shape_cast %29 : vector<1x64x256xbf16> to vector<64x256xbf16>
    %cst_21 = arith.constant dense<0.000000e+00> : vector<16x256xf32>
    %31 = tpu.matmul %28, %30, %cst_21 {dimension_numbers = #tpu.dot_dimension_numbers<[1], [0], [0], [1], [0, 0, 1, 1], [], []>} : vector<16x64xbf16>, vector<64x256xbf16>, vector<16x256xf32> -> vector<16x256xf32>
    %32 = arith.addf %26, %31 : vector<16x256xf32>
    %c0_22 = arith.constant 0 : index
    %c0_23 = arith.constant 0 : index
    %c0_24 = arith.constant 0 : index
    %33 = vector.load %arg6[%c0_22, %c0_23, %c0_24] : memref<1x16x256xf32, #tpu.memory_space<vmem>>, vector<1x16x256xf32>
    %34 = vector.shape_cast %33 : vector<1x16x256xf32> to vector<16x256xf32>
    %35 = vector.shape_cast %32 : vector<16x256xf32> to vector<1x16x256xf32>
    tpu.vector_store %arg6[%c0_22, %c0_23, %c0_24], %35 {strides = array<i32>} : memref<1x16x256xf32, #tpu.memory_space<vmem>>, vector<1x16x256xf32>,
    return
  }
  func.func @transform_0(%arg0: i32) -> (i32, i32, i32) {
    %c0_i32 = arith.constant 0 : i32
    %c0_i32_0 = arith.constant 0 : i32
    %c0_i32_1 = arith.constant 0 : i32
    return %arg0, %c0_i32, %c0_i32_0 : i32, i32, i32
  }
  func.func @transform_1(%arg0: i32) -> (i32, i32, i32) {
    %c0_i32 = arith.constant 0 : i32
    %c0_i32_0 = arith.constant 0 : i32
    %c0_i32_1 = arith.constant 0 : i32
    return %arg0, %c0_i32, %c0_i32_0 : i32, i32, i32
  }
  func.func @transform_2(%arg0: i32) -> (i32, i32) {
    %c0_i32 = arith.constant 0 : i32
    %c0_i32_0 = arith.constant 0 : i32
    %c0_i32_1 = arith.constant 0 : i32
    return %c0_i32, %c0_i32_0 : i32, i32
  }
  func.func @transform_3(%arg0: i32) -> (i32, i32, i32) {
    %c0_i32 = arith.constant 0 : i32
    %c0_i32_0 = arith.constant 0 : i32
    %c0_i32_1 = arith.constant 0 : i32
    %c0_i32_2 = arith.constant 0 : i32
    return %c0_i32, %c0_i32_0, %c0_i32_1 : i32, i32, i32
  }
  func.func @transform_4(%arg0: i32) -> (i32, i32) {
    %c0_i32 = arith.constant 0 : i32
    %c0_i32_0 = arith.constant 0 : i32
    %c0_i32_1 = arith.constant 0 : i32
    return %c0_i32, %c0_i32_0 : i32, i32
  }
  func.func @transform_5(%arg0: i32) -> (i32, i32, i32) {
    %c0_i32 = arith.constant 0 : i32
    %c0_i32_0 = arith.constant 0 : i32
    %c0_i32_1 = arith.constant 0 : i32
    return %arg0, %c0_i32, %c0_i32_0 : i32, i32, i32
  }
}

module attributes {stable_mosaic.version = 11 : i64} {
  func.func @_res_block_kernel(%arg0: i32, %arg1: memref<1x16x256xf32, #tpu.memory_space<vmem>>, %arg2: memref<9x256x256xbf16, #tpu.memory_space<vmem>>, %arg3: memref<16x144xbf16, #tpu.memory_space<vmem>>, %arg4: memref<16x1xf32, #tpu.memory_space<vmem>>, %arg5: memref<1x16x1xf32, #tpu.memory_space<vmem>>, %arg6: memref<16x144xbf16, #tpu.memory_space<vmem>>, %arg7: memref<16x1xf32, #tpu.memory_space<vmem>>, %arg8: memref<48x16xbf16, #tpu.memory_space<vmem>>, %arg9: memref<48x1xf32, #tpu.memory_space<vmem>>, %arg10: memref<16x16xbf16, #tpu.memory_space<vmem>>, %arg11: memref<16x1xf32, #tpu.memory_space<vmem>>, %arg12: memref<1x16x256xf32, #tpu.memory_space<vmem>>) attributes {dimension_semantics = [#tpu.dimension_semantics<parallel>], iteration_bounds = array<i64: 2>, scalar_prefetch = 0 : i64, scratch_operands = 0 : i64, tpu.core_type = #tpu.core_type<tc>, window_params = [{transform_indices = @transform_0, window_bounds = array<i64: 1, 16, 256>}, {pipeline_mode = #tpu.pipeline_mode<synchronous>, transform_indices = @transform_1, window_bounds = array<i64: 9, 256, 256>}, {pipeline_mode = #tpu.pipeline_mode<synchronous>, transform_indices = @transform_2, window_bounds = array<i64: 16, 144>}, {pipeline_mode = #tpu.pipeline_mode<synchronous>, transform_indices = @transform_3, window_bounds = array<i64: 16, 1>}, {transform_indices = @transform_4, window_bounds = array<i64: 1, 16, 1>}, {pipeline_mode = #tpu.pipeline_mode<synchronous>, transform_indices = @transform_5, window_bounds = array<i64: 16, 144>}, {pipeline_mode = #tpu.pipeline_mode<synchronous>, transform_indices = @transform_6, window_bounds = array<i64: 16, 1>}, {pipeline_mode = #tpu.pipeline_mode<synchronous>, transform_indices = @transform_7, window_bounds = array<i64: 48, 16>}, {pipeline_mode = #tpu.pipeline_mode<synchronous>, transform_indices = @transform_8, window_bounds = array<i64: 48, 1>}, {pipeline_mode = #tpu.pipeline_mode<synchronous>, transform_indices = @transform_9, window_bounds = array<i64: 16, 16>}, {pipeline_mode = #tpu.pipeline_mode<synchronous>, transform_indices = @transform_10, window_bounds = array<i64: 16, 1>}, {transform_indices = @transform_11, window_bounds = array<i64: 1, 16, 256>}]} {
    %c0 = arith.constant 0 : index
    %c0_0 = arith.constant 0 : index
    %c0_1 = arith.constant 0 : index
    %0 = vector.load %arg1[%c0, %c0_0, %c0_1] : memref<1x16x256xf32, #tpu.memory_space<vmem>>, vector<1x16x256xf32>
    %1 = vector.shape_cast %0 : vector<1x16x256xf32> to vector<16x256xf32>
    %c0_2 = arith.constant 0 : index
    %c0_3 = arith.constant 0 : index
    %2 = vector.load %arg3[%c0_2, %c0_3] : memref<16x144xbf16, #tpu.memory_space<vmem>>, vector<16x144xbf16>
    %3 = arith.truncf %1 : vector<16x256xf32> to vector<16x256xbf16>
    %c0_4 = arith.constant 0 : index
    %c0_5 = arith.constant 0 : index
    %c0_6 = arith.constant 0 : index
    %4 = vector.load %arg2[%c0_4, %c0_5, %c0_6] : memref<9x256x256xbf16, #tpu.memory_space<vmem>>, vector<1x256x256xbf16>
    %5 = vector.shape_cast %4 : vector<1x256x256xbf16> to vector<256x256xbf16>
    %cst = arith.constant dense<0.000000e+00> : vector<16x256xf32>
    %6 = tpu.matmul %3, %5, %cst {dimension_numbers = #tpu.dot_dimension_numbers<[1], [0], [0], [1], [0, 0, 1, 1], [], []>} : vector<16x256xbf16>, vector<256x256xbf16>, vector<16x256xf32> -> vector<16x256xf32>
    %7 = arith.truncf %6 : vector<16x256xf32> to vector<16x256xbf16>
    %c1 = arith.constant 1 : index
    %c0_7 = arith.constant 0 : index
    %c0_8 = arith.constant 0 : index
    %8 = vector.load %arg2[%c1, %c0_7, %c0_8] : memref<9x256x256xbf16, #tpu.memory_space<vmem>>, vector<1x256x256xbf16>
    %9 = vector.shape_cast %8 : vector<1x256x256xbf16> to vector<256x256xbf16>
    %cst_9 = arith.constant dense<0.000000e+00> : vector<16x256xf32>
    %10 = tpu.matmul %3, %9, %cst_9 {dimension_numbers = #tpu.dot_dimension_numbers<[1], [0], [0], [1], [0, 0, 1, 1], [], []>} : vector<16x256xbf16>, vector<256x256xbf16>, vector<16x256xf32> -> vector<16x256xf32>
    %11 = arith.truncf %10 : vector<16x256xf32> to vector<16x256xbf16>
    %c2 = arith.constant 2 : index
    %c0_10 = arith.constant 0 : index
    %c0_11 = arith.constant 0 : index
    %12 = vector.load %arg2[%c2, %c0_10, %c0_11] : memref<9x256x256xbf16, #tpu.memory_space<vmem>>, vector<1x256x256xbf16>
    %13 = vector.shape_cast %12 : vector<1x256x256xbf16> to vector<256x256xbf16>
    %cst_12 = arith.constant dense<0.000000e+00> : vector<16x256xf32>
    %14 = tpu.matmul %3, %13, %cst_12 {dimension_numbers = #tpu.dot_dimension_numbers<[1], [0], [0], [1], [0, 0, 1, 1], [], []>} : vector<16x256xbf16>, vector<256x256xbf16>, vector<16x256xf32> -> vector<16x256xf32>
    %15 = arith.truncf %14 : vector<16x256xf32> to vector<16x256xbf16>
    %c3 = arith.constant 3 : index
    %c0_13 = arith.constant 0 : index
    %c0_14 = arith.constant 0 : index
    %16 = vector.load %arg2[%c3, %c0_13, %c0_14] : memref<9x256x256xbf16, #tpu.memory_space<vmem>>, vector<1x256x256xbf16>
    %17 = vector.shape_cast %16 : vector<1x256x256xbf16> to vector<256x256xbf16>
    %cst_15 = arith.constant dense<0.000000e+00> : vector<16x256xf32>
    %18 = tpu.matmul %3, %17, %cst_15 {dimension_numbers = #tpu.dot_dimension_numbers<[1], [0], [0], [1], [0, 0, 1, 1], [], []>} : vector<16x256xbf16>, vector<256x256xbf16>, vector<16x256xf32> -> vector<16x256xf32>
    %19 = arith.truncf %18 : vector<16x256xf32> to vector<16x256xbf16>
    %c4 = arith.constant 4 : index
    %c0_16 = arith.constant 0 : index
    %c0_17 = arith.constant 0 : index
    %20 = vector.load %arg2[%c4, %c0_16, %c0_17] : memref<9x256x256xbf16, #tpu.memory_space<vmem>>, vector<1x256x256xbf16>
    %21 = vector.shape_cast %20 : vector<1x256x256xbf16> to vector<256x256xbf16>
    %cst_18 = arith.constant dense<0.000000e+00> : vector<16x256xf32>
    %22 = tpu.matmul %3, %21, %cst_18 {dimension_numbers = #tpu.dot_dimension_numbers<[1], [0], [0], [1], [0, 0, 1, 1], [], []>} : vector<16x256xbf16>, vector<256x256xbf16>, vector<16x256xf32> -> vector<16x256xf32>
    %23 = arith.truncf %22 : vector<16x256xf32> to vector<16x256xbf16>
    %c5 = arith.constant 5 : index
    %c0_19 = arith.constant 0 : index
    %c0_20 = arith.constant 0 : index
    %24 = vector.load %arg2[%c5, %c0_19, %c0_20] : memref<9x256x256xbf16, #tpu.memory_space<vmem>>, vector<1x256x256xbf16>
    %25 = vector.shape_cast %24 : vector<1x256x256xbf16> to vector<256x256xbf16>
    %cst_21 = arith.constant dense<0.000000e+00> : vector<16x256xf32>
    %26 = tpu.matmul %3, %25, %cst_21 {dimension_numbers = #tpu.dot_dimension_numbers<[1], [0], [0], [1], [0, 0, 1, 1], [], []>} : vector<16x256xbf16>, vector<256x256xbf16>, vector<16x256xf32> -> vector<16x256xf32>
    %27 = arith.truncf %26 : vector<16x256xf32> to vector<16x256xbf16>
    %c6 = arith.constant 6 : index
    %c0_22 = arith.constant 0 : index
    %c0_23 = arith.constant 0 : index
    %28 = vector.load %arg2[%c6, %c0_22, %c0_23] : memref<9x256x256xbf16, #tpu.memory_space<vmem>>, vector<1x256x256xbf16>
    %29 = vector.shape_cast %28 : vector<1x256x256xbf16> to vector<256x256xbf16>
    %cst_24 = arith.constant dense<0.000000e+00> : vector<16x256xf32>
    %30 = tpu.matmul %3, %29, %cst_24 {dimension_numbers = #tpu.dot_dimension_numbers<[1], [0], [0], [1], [0, 0, 1, 1], [], []>} : vector<16x256xbf16>, vector<256x256xbf16>, vector<16x256xf32> -> vector<16x256xf32>
    %31 = arith.truncf %30 : vector<16x256xf32> to vector<16x256xbf16>
    %c7 = arith.constant 7 : index
    %c0_25 = arith.constant 0 : index
    %c0_26 = arith.constant 0 : index
    %32 = vector.load %arg2[%c7, %c0_25, %c0_26] : memref<9x256x256xbf16, #tpu.memory_space<vmem>>, vector<1x256x256xbf16>
    %33 = vector.shape_cast %32 : vector<1x256x256xbf16> to vector<256x256xbf16>
    %cst_27 = arith.constant dense<0.000000e+00> : vector<16x256xf32>
    %34 = tpu.matmul %3, %33, %cst_27 {dimension_numbers = #tpu.dot_dimension_numbers<[1], [0], [0], [1], [0, 0, 1, 1], [], []>} : vector<16x256xbf16>, vector<256x256xbf16>, vector<16x256xf32> -> vector<16x256xf32>
    %35 = arith.truncf %34 : vector<16x256xf32> to vector<16x256xbf16>
    %c8 = arith.constant 8 : index
    %c0_28 = arith.constant 0 : index
    %c0_29 = arith.constant 0 : index
    %36 = vector.load %arg2[%c8, %c0_28, %c0_29] : memref<9x256x256xbf16, #tpu.memory_space<vmem>>, vector<1x256x256xbf16>
    %37 = vector.shape_cast %36 : vector<1x256x256xbf16> to vector<256x256xbf16>
    %cst_30 = arith.constant dense<0.000000e+00> : vector<16x256xf32>
    %38 = tpu.matmul %3, %37, %cst_30 {dimension_numbers = #tpu.dot_dimension_numbers<[1], [0], [0], [1], [0, 0, 1, 1], [], []>} : vector<16x256xbf16>, vector<256x256xbf16>, vector<16x256xf32> -> vector<16x256xf32>
    %39 = arith.truncf %38 : vector<16x256xf32> to vector<16x256xbf16>
    %40 = tpu.concatenate %7, %11, %15, %19, %23, %27, %31, %35, %39 in 0 : vector<16x256xbf16>, vector<16x256xbf16>, vector<16x256xbf16>, vector<16x256xbf16>, vector<16x256xbf16>, vector<16x256xbf16>, vector<16x256xbf16>, vector<16x256xbf16>, vector<16x256xbf16> -> vector<144x256xbf16>
    %cst_31 = arith.constant dense<0.000000e+00> : vector<16x256xf32>
    %41 = tpu.matmul %2, %40, %cst_31 {dimension_numbers = #tpu.dot_dimension_numbers<[1], [0], [0], [1], [0, 0, 1, 1], [], []>} : vector<16x144xbf16>, vector<144x256xbf16>, vector<16x256xf32> -> vector<16x256xf32>
    %c0_32 = arith.constant 0 : index
    %c0_33 = arith.constant 0 : index
    %42 = vector.load %arg4[%c0_32, %c0_33] : memref<16x1xf32, #tpu.memory_space<vmem>>, vector<16x1xf32>
    %43 = vector.broadcast %42 : vector<16x1xf32> to vector<16x256xf32>
    %44 = arith.addf %41, %43 : vector<16x256xf32>
    %c0_34 = arith.constant 0 : index
    %c0_35 = arith.constant 0 : index
    %c0_36 = arith.constant 0 : index
    %45 = vector.load %arg5[%c0_34, %c0_35, %c0_36] : memref<1x16x1xf32, #tpu.memory_space<vmem>>, vector<1x16x1xf32>
    %46 = vector.shape_cast %45 : vector<1x16x1xf32> to vector<16x1xf32>
    %47 = vector.broadcast %46 : vector<16x1xf32> to vector<16x256xf32>
    %48 = arith.addf %44, %47 : vector<16x256xf32>
    %49 = arith.negf %48 : vector<16x256xf32>
    %50 = math.exp %49 : vector<16x256xf32>
    %cst_37 = arith.constant 1.000000e+00 : f32
    %51 = vector.broadcast %cst_37 : f32 to vector<16x256xf32>
    %52 = arith.addf %51, %50 : vector<16x256xf32>
    %53 = arith.divf %51, %52 : vector<16x256xf32>
    %54 = arith.mulf %48, %53 : vector<16x256xf32>
    %c0_38 = arith.constant 0 : index
    %c0_39 = arith.constant 0 : index
    %55 = vector.load %arg6[%c0_38, %c0_39] : memref<16x144xbf16, #tpu.memory_space<vmem>>, vector<16x144xbf16>
    %56 = arith.truncf %54 : vector<16x256xf32> to vector<16x256xbf16>
    %c0_40 = arith.constant 0 : index
    %c0_41 = arith.constant 0 : index
    %c0_42 = arith.constant 0 : index
    %57 = vector.load %arg2[%c0_40, %c0_41, %c0_42] : memref<9x256x256xbf16, #tpu.memory_space<vmem>>, vector<1x256x256xbf16>
    %58 = vector.shape_cast %57 : vector<1x256x256xbf16> to vector<256x256xbf16>
    %cst_43 = arith.constant dense<0.000000e+00> : vector<16x256xf32>
    %59 = tpu.matmul %56, %58, %cst_43 {dimension_numbers = #tpu.dot_dimension_numbers<[1], [0], [0], [1], [0, 0, 1, 1], [], []>} : vector<16x256xbf16>, vector<256x256xbf16>, vector<16x256xf32> -> vector<16x256xf32>
    %60 = arith.truncf %59 : vector<16x256xf32> to vector<16x256xbf16>
    %c1_44 = arith.constant 1 : index
    %c0_45 = arith.constant 0 : index
    %c0_46 = arith.constant 0 : index
    %61 = vector.load %arg2[%c1_44, %c0_45, %c0_46] : memref<9x256x256xbf16, #tpu.memory_space<vmem>>, vector<1x256x256xbf16>
    %62 = vector.shape_cast %61 : vector<1x256x256xbf16> to vector<256x256xbf16>
    %cst_47 = arith.constant dense<0.000000e+00> : vector<16x256xf32>
    %63 = tpu.matmul %56, %62, %cst_47 {dimension_numbers = #tpu.dot_dimension_numbers<[1], [0], [0], [1], [0, 0, 1, 1], [], []>} : vector<16x256xbf16>, vector<256x256xbf16>, vector<16x256xf32> -> vector<16x256xf32>
    %64 = arith.truncf %63 : vector<16x256xf32> to vector<16x256xbf16>
    %c2_48 = arith.constant 2 : index
    %c0_49 = arith.constant 0 : index
    %c0_50 = arith.constant 0 : index
    %65 = vector.load %arg2[%c2_48, %c0_49, %c0_50] : memref<9x256x256xbf16, #tpu.memory_space<vmem>>, vector<1x256x256xbf16>
    %66 = vector.shape_cast %65 : vector<1x256x256xbf16> to vector<256x256xbf16>
    %cst_51 = arith.constant dense<0.000000e+00> : vector<16x256xf32>
    %67 = tpu.matmul %56, %66, %cst_51 {dimension_numbers = #tpu.dot_dimension_numbers<[1], [0], [0], [1], [0, 0, 1, 1], [], []>} : vector<16x256xbf16>, vector<256x256xbf16>, vector<16x256xf32> -> vector<16x256xf32>
    %68 = arith.truncf %67 : vector<16x256xf32> to vector<16x256xbf16>
    %c3_52 = arith.constant 3 : index
    %c0_53 = arith.constant 0 : index
    %c0_54 = arith.constant 0 : index
    %69 = vector.load %arg2[%c3_52, %c0_53, %c0_54] : memref<9x256x256xbf16, #tpu.memory_space<vmem>>, vector<1x256x256xbf16>
    %70 = vector.shape_cast %69 : vector<1x256x256xbf16> to vector<256x256xbf16>
    %cst_55 = arith.constant dense<0.000000e+00> : vector<16x256xf32>
    %71 = tpu.matmul %56, %70, %cst_55 {dimension_numbers = #tpu.dot_dimension_numbers<[1], [0], [0], [1], [0, 0, 1, 1], [], []>} : vector<16x256xbf16>, vector<256x256xbf16>, vector<16x256xf32> -> vector<16x256xf32>
    %72 = arith.truncf %71 : vector<16x256xf32> to vector<16x256xbf16>
    %c4_56 = arith.constant 4 : index
    %c0_57 = arith.constant 0 : index
    %c0_58 = arith.constant 0 : index
    %73 = vector.load %arg2[%c4_56, %c0_57, %c0_58] : memref<9x256x256xbf16, #tpu.memory_space<vmem>>, vector<1x256x256xbf16>
    %74 = vector.shape_cast %73 : vector<1x256x256xbf16> to vector<256x256xbf16>
    %cst_59 = arith.constant dense<0.000000e+00> : vector<16x256xf32>
    %75 = tpu.matmul %56, %74, %cst_59 {dimension_numbers = #tpu.dot_dimension_numbers<[1], [0], [0], [1], [0, 0, 1, 1], [], []>} : vector<16x256xbf16>, vector<256x256xbf16>, vector<16x256xf32> -> vector<16x256xf32>
    %76 = arith.truncf %75 : vector<16x256xf32> to vector<16x256xbf16>
    %c5_60 = arith.constant 5 : index
    %c0_61 = arith.constant 0 : index
    %c0_62 = arith.constant 0 : index
    %77 = vector.load %arg2[%c5_60, %c0_61, %c0_62] : memref<9x256x256xbf16, #tpu.memory_space<vmem>>, vector<1x256x256xbf16>
    %78 = vector.shape_cast %77 : vector<1x256x256xbf16> to vector<256x256xbf16>
    %cst_63 = arith.constant dense<0.000000e+00> : vector<16x256xf32>
    %79 = tpu.matmul %56, %78, %cst_63 {dimension_numbers = #tpu.dot_dimension_numbers<[1], [0], [0], [1], [0, 0, 1, 1], [], []>} : vector<16x256xbf16>, vector<256x256xbf16>, vector<16x256xf32> -> vector<16x256xf32>
    %80 = arith.truncf %79 : vector<16x256xf32> to vector<16x256xbf16>
    %c6_64 = arith.constant 6 : index
    %c0_65 = arith.constant 0 : index
    %c0_66 = arith.constant 0 : index
    %81 = vector.load %arg2[%c6_64, %c0_65, %c0_66] : memref<9x256x256xbf16, #tpu.memory_space<vmem>>, vector<1x256x256xbf16>
    %82 = vector.shape_cast %81 : vector<1x256x256xbf16> to vector<256x256xbf16>
    %cst_67 = arith.constant dense<0.000000e+00> : vector<16x256xf32>
    %83 = tpu.matmul %56, %82, %cst_67 {dimension_numbers = #tpu.dot_dimension_numbers<[1], [0], [0], [1], [0, 0, 1, 1], [], []>} : vector<16x256xbf16>, vector<256x256xbf16>, vector<16x256xf32> -> vector<16x256xf32>
    %84 = arith.truncf %83 : vector<16x256xf32> to vector<16x256xbf16>
    %c7_68 = arith.constant 7 : index
    %c0_69 = arith.constant 0 : index
    %c0_70 = arith.constant 0 : index
    %85 = vector.load %arg2[%c7_68, %c0_69, %c0_70] : memref<9x256x256xbf16, #tpu.memory_space<vmem>>, vector<1x256x256xbf16>
    %86 = vector.shape_cast %85 : vector<1x256x256xbf16> to vector<256x256xbf16>
    %cst_71 = arith.constant dense<0.000000e+00> : vector<16x256xf32>
    %87 = tpu.matmul %56, %86, %cst_71 {dimension_numbers = #tpu.dot_dimension_numbers<[1], [0], [0], [1], [0, 0, 1, 1], [], []>} : vector<16x256xbf16>, vector<256x256xbf16>, vector<16x256xf32> -> vector<16x256xf32>
    %88 = arith.truncf %87 : vector<16x256xf32> to vector<16x256xbf16>
    %c8_72 = arith.constant 8 : index
    %c0_73 = arith.constant 0 : index
    %c0_74 = arith.constant 0 : index
    %89 = vector.load %arg2[%c8_72, %c0_73, %c0_74] : memref<9x256x256xbf16, #tpu.memory_space<vmem>>, vector<1x256x256xbf16>
    %90 = vector.shape_cast %89 : vector<1x256x256xbf16> to vector<256x256xbf16>
    %cst_75 = arith.constant dense<0.000000e+00> : vector<16x256xf32>
    %91 = tpu.matmul %56, %90, %cst_75 {dimension_numbers = #tpu.dot_dimension_numbers<[1], [0], [0], [1], [0, 0, 1, 1], [], []>} : vector<16x256xbf16>, vector<256x256xbf16>, vector<16x256xf32> -> vector<16x256xf32>
    %92 = arith.truncf %91 : vector<16x256xf32> to vector<16x256xbf16>
    %93 = tpu.concatenate %60, %64, %68, %72, %76, %80, %84, %88, %92 in 0 : vector<16x256xbf16>, vector<16x256xbf16>, vector<16x256xbf16>, vector<16x256xbf16>, vector<16x256xbf16>, vector<16x256xbf16>, vector<16x256xbf16>, vector<16x256xbf16>, vector<16x256xbf16> -> vector<144x256xbf16>
    %cst_76 = arith.constant dense<0.000000e+00> : vector<16x256xf32>
    %94 = tpu.matmul %55, %93, %cst_76 {dimension_numbers = #tpu.dot_dimension_numbers<[1], [0], [0], [1], [0, 0, 1, 1], [], []>} : vector<16x144xbf16>, vector<144x256xbf16>, vector<16x256xf32> -> vector<16x256xf32>
    %95 = arith.addf %1, %94 : vector<16x256xf32>
    %c0_77 = arith.constant 0 : index
    %c0_78 = arith.constant 0 : index
    %96 = vector.load %arg7[%c0_77, %c0_78] : memref<16x1xf32, #tpu.memory_space<vmem>>, vector<16x1xf32>
    %97 = vector.broadcast %96 : vector<16x1xf32> to vector<16x256xf32>
    %98 = arith.addf %95, %97 : vector<16x256xf32>
    %c0_79 = arith.constant 0 : index
    %c0_80 = arith.constant 0 : index
    %99 = vector.load %arg8[%c0_79, %c0_80] : memref<48x16xbf16, #tpu.memory_space<vmem>>, vector<48x16xbf16>
    %100 = arith.truncf %98 : vector<16x256xf32> to vector<16x256xbf16>
    %cst_81 = arith.constant dense<0.000000e+00> : vector<48x256xf32>
    %101 = tpu.matmul %99, %100, %cst_81 {dimension_numbers = #tpu.dot_dimension_numbers<[1], [0], [0], [1], [0, 0, 1, 1], [], []>} : vector<48x16xbf16>, vector<16x256xbf16>, vector<48x256xf32> -> vector<48x256xf32>
    %c0_82 = arith.constant 0 : index
    %c0_83 = arith.constant 0 : index
    %102 = vector.load %arg9[%c0_82, %c0_83] : memref<48x1xf32, #tpu.memory_space<vmem>>, vector<48x1xf32>
    %103 = vector.broadcast %102 : vector<48x1xf32> to vector<48x256xf32>
    %104 = arith.addf %101, %103 : vector<48x256xf32>
    %105 = vector.extract_strided_slice %104 {offsets = [0, 0], sizes = [8, 256], strides = [1, 1]} : vector<48x256xf32> to vector<8x256xf32>
    %106 = arith.truncf %105 : vector<8x256xf32> to vector<8x256xbf16>
    %107 = vector.extract_strided_slice %104 {offsets = [16, 0], sizes = [8, 256], strides = [1, 1]} : vector<48x256xf32> to vector<8x256xf32>
    %108 = arith.truncf %107 : vector<8x256xf32> to vector<8x256xbf16>
    %109 = vector.extract_strided_slice %104 {offsets = [32, 0], sizes = [8, 256], strides = [1, 1]} : vector<48x256xf32> to vector<8x256xf32>
    %110 = arith.truncf %109 : vector<8x256xf32> to vector<8x256xbf16>
    %cst_84 = arith.constant dense<0.000000e+00> : vector<256x256xf32>
    %111 = tpu.matmul %106, %108, %cst_84 {dimension_numbers = #tpu.dot_dimension_numbers<[0], [0], [1], [1], [0, 1, 1, 1], [], []>} : vector<8x256xbf16>, vector<8x256xbf16>, vector<256x256xf32> -> vector<256x256xf32>
    %cst_85 = arith.constant 0.353553385 : f32
    %112 = vector.broadcast %cst_85 : f32 to vector<256x256xf32>
    %113 = arith.mulf %111, %112 : vector<256x256xf32>
    %cst_86 = arith.constant dense<0xFF800000> : vector<256xf32>
    %114 = vector.multi_reduction <maximumf>, %113, %cst_86 [1] : vector<256x256xf32> to vector<256xf32>
    %115 = vector.shape_cast %114 : vector<256xf32> to vector<256x1xf32>
    %116 = vector.broadcast %115 : vector<256x1xf32> to vector<256x256xf32>
    %117 = arith.subf %113, %116 : vector<256x256xf32>
    %118 = math.exp %117 : vector<256x256xf32>
    %cst_87 = arith.constant dense<0.000000e+00> : vector<256xf32>
    %119 = vector.multi_reduction <add>, %118, %cst_87 [1] : vector<256x256xf32> to vector<256xf32>
    %120 = vector.shape_cast %119 : vector<256xf32> to vector<256x1xf32>
    %121 = tpu.reciprocal %120 {approx = true} : vector<256x1xf32> -> vector<256x1xf32>
    %122 = vector.broadcast %121 : vector<256x1xf32> to vector<256x256xf32>
    %123 = arith.mulf %118, %122 : vector<256x256xf32>
    %124 = arith.truncf %123 : vector<256x256xf32> to vector<256x256xbf16>
    %cst_88 = arith.constant dense<0.000000e+00> : vector<8x256xf32>
    %125 = tpu.matmul %110, %124, %cst_88 {dimension_numbers = #tpu.dot_dimension_numbers<[1], [1], [0], [0], [0, 0, 1, 0], [], []>} : vector<8x256xbf16>, vector<256x256xbf16>, vector<8x256xf32> -> vector<8x256xf32>
    %126 = vector.extract_strided_slice %104 {offsets = [8, 0], sizes = [8, 256], strides = [1, 1]} : vector<48x256xf32> to vector<8x256xf32>
    %127 = arith.truncf %126 : vector<8x256xf32> to vector<8x256xbf16>
    %128 = vector.extract_strided_slice %104 {offsets = [24, 0], sizes = [8, 256], strides = [1, 1]} : vector<48x256xf32> to vector<8x256xf32>
    %129 = arith.truncf %128 : vector<8x256xf32> to vector<8x256xbf16>
    %130 = vector.extract_strided_slice %104 {offsets = [40, 0], sizes = [8, 256], strides = [1, 1]} : vector<48x256xf32> to vector<8x256xf32>
    %131 = arith.truncf %130 : vector<8x256xf32> to vector<8x256xbf16>
    %cst_89 = arith.constant dense<0.000000e+00> : vector<256x256xf32>
    %132 = tpu.matmul %127, %129, %cst_89 {dimension_numbers = #tpu.dot_dimension_numbers<[0], [0], [1], [1], [0, 1, 1, 1], [], []>} : vector<8x256xbf16>, vector<8x256xbf16>, vector<256x256xf32> -> vector<256x256xf32>
    %cst_90 = arith.constant 0.353553385 : f32
    %133 = vector.broadcast %cst_90 : f32 to vector<256x256xf32>
    %134 = arith.mulf %132, %133 : vector<256x256xf32>
    %cst_91 = arith.constant dense<0xFF800000> : vector<256xf32>
    %135 = vector.multi_reduction <maximumf>, %134, %cst_91 [1] : vector<256x256xf32> to vector<256xf32>
    %136 = vector.shape_cast %135 : vector<256xf32> to vector<256x1xf32>
    %137 = vector.broadcast %136 : vector<256x1xf32> to vector<256x256xf32>
    %138 = arith.subf %134, %137 : vector<256x256xf32>
    %139 = math.exp %138 : vector<256x256xf32>
    %cst_92 = arith.constant dense<0.000000e+00> : vector<256xf32>
    %140 = vector.multi_reduction <add>, %139, %cst_92 [1] : vector<256x256xf32> to vector<256xf32>
    %141 = vector.shape_cast %140 : vector<256xf32> to vector<256x1xf32>
    %142 = tpu.reciprocal %141 {approx = true} : vector<256x1xf32> -> vector<256x1xf32>
    %143 = vector.broadcast %142 : vector<256x1xf32> to vector<256x256xf32>
    %144 = arith.mulf %139, %143 : vector<256x256xf32>
    %145 = arith.truncf %144 : vector<256x256xf32> to vector<256x256xbf16>
    %cst_93 = arith.constant dense<0.000000e+00> : vector<8x256xf32>
    %146 = tpu.matmul %131, %145, %cst_93 {dimension_numbers = #tpu.dot_dimension_numbers<[1], [1], [0], [0], [0, 0, 1, 0], [], []>} : vector<8x256xbf16>, vector<256x256xbf16>, vector<8x256xf32> -> vector<8x256xf32>
    %147 = tpu.concatenate %125, %146 in 0 : vector<8x256xf32>, vector<8x256xf32> -> vector<16x256xf32>
    %c0_94 = arith.constant 0 : index
    %c0_95 = arith.constant 0 : index
    %148 = vector.load %arg10[%c0_94, %c0_95] : memref<16x16xbf16, #tpu.memory_space<vmem>>, vector<16x16xbf16>
    %149 = arith.truncf %147 : vector<16x256xf32> to vector<16x256xbf16>
    %cst_96 = arith.constant dense<0.000000e+00> : vector<16x256xf32>
    %150 = tpu.matmul %148, %149, %cst_96 {dimension_numbers = #tpu.dot_dimension_numbers<[1], [0], [0], [1], [0, 0, 1, 1], [], []>} : vector<16x16xbf16>, vector<16x256xbf16>, vector<16x256xf32> -> vector<16x256xf32>
    %c0_97 = arith.constant 0 : index
    %c0_98 = arith.constant 0 : index
    %151 = vector.load %arg11[%c0_97, %c0_98] : memref<16x1xf32, #tpu.memory_space<vmem>>, vector<16x1xf32>
    %152 = vector.broadcast %151 : vector<16x1xf32> to vector<16x256xf32>
    %153 = arith.addf %150, %152 : vector<16x256xf32>
    %154 = arith.addf %98, %153 : vector<16x256xf32>
    %c0_99 = arith.constant 0 : index
    %c0_100 = arith.constant 0 : index
    %c0_101 = arith.constant 0 : index
    %155 = vector.load %arg12[%c0_99, %c0_100, %c0_101] : memref<1x16x256xf32, #tpu.memory_space<vmem>>, vector<1x16x256xf32>
    %156 = vector.shape_cast %155 : vector<1x16x256xf32> to vector<16x256xf32>
    %157 = vector.shape_cast %154 : vector<16x256xf32> to vector<1x16x256xf32>
    tpu.vector_store %arg12[%c0_99, %c0_100, %c0_101], %157 {strides = array<i32>} : memref<1x16x256xf32, #tpu.memory_space<vmem>>, vector<1x16x256xf32>,
    return
  }
  func.func @transform_0(%arg0: i32) -> (i32, i32, i32) {
    %c0_i32 = arith.constant 0 : i32
    %c0_i32_0 = arith.constant 0 : i32
    %c0_i32_1 = arith.constant 0 : i32
    return %arg0, %c0_i32, %c0_i32_0 : i32, i32, i32
  }
  func.func @transform_1(%arg0: i32) -> (i32, i32, i32) {
    %c0_i32 = arith.constant 0 : i32
    %c0_i32_0 = arith.constant 0 : i32
    %c0_i32_1 = arith.constant 0 : i32
    %c0_i32_2 = arith.constant 0 : i32
    return %c0_i32, %c0_i32_0, %c0_i32_1 : i32, i32, i32
  }
  func.func @transform_2(%arg0: i32) -> (i32, i32) {
    %c0_i32 = arith.constant 0 : i32
    %c0_i32_0 = arith.constant 0 : i32
    %c0_i32_1 = arith.constant 0 : i32
    return %c0_i32, %c0_i32_0 : i32, i32
  }
  func.func @transform_3(%arg0: i32) -> (i32, i32) {
    %c0_i32 = arith.constant 0 : i32
    %c0_i32_0 = arith.constant 0 : i32
    %c0_i32_1 = arith.constant 0 : i32
    return %c0_i32, %c0_i32_0 : i32, i32
  }
  func.func @transform_4(%arg0: i32) -> (i32, i32, i32) {
    %c0_i32 = arith.constant 0 : i32
    %c0_i32_0 = arith.constant 0 : i32
    %c0_i32_1 = arith.constant 0 : i32
    return %arg0, %c0_i32, %c0_i32_0 : i32, i32, i32
  }
  func.func @transform_5(%arg0: i32) -> (i32, i32) {
    %c0_i32 = arith.constant 0 : i32
    %c0_i32_0 = arith.constant 0 : i32
    %c0_i32_1 = arith.constant 0 : i32
    return %c0_i32, %c0_i32_0 : i32, i32
  }
  func.func @transform_6(%arg0: i32) -> (i32, i32) {
    %c0_i32 = arith.constant 0 : i32
    %c0_i32_0 = arith.constant 0 : i32
    %c0_i32_1 = arith.constant 0 : i32
    return %c0_i32, %c0_i32_0 : i32, i32
  }
  func.func @transform_7(%arg0: i32) -> (i32, i32) {
    %c0_i32 = arith.constant 0 : i32
    %c0_i32_0 = arith.constant 0 : i32
    %c0_i32_1 = arith.constant 0 : i32
    return %c0_i32, %c0_i32_0 : i32, i32
  }
  func.func @transform_8(%arg0: i32) -> (i32, i32) {
    %c0_i32 = arith.constant 0 : i32
    %c0_i32_0 = arith.constant 0 : i32
    %c0_i32_1 = arith.constant 0 : i32
    return %c0_i32, %c0_i32_0 : i32, i32
  }
  func.func @transform_9(%arg0: i32) -> (i32, i32) {
    %c0_i32 = arith.constant 0 : i32
    %c0_i32_0 = arith.constant 0 : i32
    %c0_i32_1 = arith.constant 0 : i32
    return %c0_i32, %c0_i32_0 : i32, i32
  }
  func.func @transform_10(%arg0: i32) -> (i32, i32) {
    %c0_i32 = arith.constant 0 : i32
    %c0_i32_0 = arith.constant 0 : i32
    %c0_i32_1 = arith.constant 0 : i32
    return %c0_i32, %c0_i32_0 : i32, i32
  }
  func.func @transform_11(%arg0: i32) -> (i32, i32, i32) {
    %c0_i32 = arith.constant 0 : i32
    %c0_i32_0 = arith.constant 0 : i32
    %c0_i32_1 = arith.constant 0 : i32
    return %arg0, %c0_i32, %c0_i32_0 : i32, i32, i32
  }
}

</mosaic_0001>

<bundles_post_ra>
// kernel: upscaling_block_forward.3
= control target key start
LH: loop header
LB: loop body
LE: loop exit
PB: predicated region body
PF: predicated region fallthrough
CT: control target
= control target key end

     0   :  { %s1082_s18 = smov 0   ;;  %s1228_s0 = inlined_call_operand.vmem [shape: bf16[2,32,64], index: 0, kind: input, shape index: {}]   ;;  %s1229_s1 = inlined_call_operand.vmem [shape: f32[2,16,256], index: 1, kind: input, shape index: {}]   ;;  %s1230_s2 = inlined_call_operand.vmem [shape: bf16[64,32], index: 2, kind: input, shape index: {}]   ;;  %s1231_s3 = inlined_call_operand.vmem [shape: bf16[4,64,256], index: 3, kind: input, shape index: {}]   ;;  %s1232_s4 = inlined_call_operand.vmem [shape: f32[16,1], index: 4, kind: input, shape index: {}]   ;;  %s1233_s5 = inlined_call_operand.vmem [shape: f32[2,16,256], index: 5, kind: output, shape index: {}]  }
   0x1 LB: > { %s859_s19 = sadd.s32 4294967295, %s1049_s18   ;;  %p863_p0 = scmp.ge.s32.totalorder %s1049_s18, 1  ;;  %s1049_s18 = sphi %s1082_s18, %s15_s18  }
   0x2   : > { %p197_p1 = scmp.lt.s32.totalorder %s1049_s18, 3 }
   0x4   : > { %p198_p2 = pnand %p863_p0, %p197_p1 }
   0x5   : > { %p230_p3 = scmp.lt.s32.totalorder (!%p198_p2), %s859_s19, 1  ;;  %v991_v0 = vld [vmem:[%s1230_s2] sm:$0xff] (!%p198_p2)   ;;  %vm290_vm0 = vcmask (!%p198_p2), 261120   ;;  %v992_v4 = vld [vmem:[%s1230_s2 + $0x8] sm:$0xff] (!%p198_p2)   ;;  %v993_v6 = vld [vmem:[%s1230_s2 + $0x10] sm:$0xff] (!%p198_p2)   ;;  %v1051_v20 = vmov (!%p198_p2), 0  }
   0x6   : > { %201 = sbr.rel (%p198_p2) target bundleno = 484 (0x1e4), region = 40  ;;  %955 = vmatprep.mubr.msk.bf16.mxu0 (!%p198_p2), %vm290_vm0, %v991_v0  ;;  %v997_v3 = vld [vmem:[%s1231_s3 + $0x4] ss:$8 sps:$4 sm:$0xff] (!%p198_p2)   ;;  %v995_v7 = vld [vmem:[%s1231_s3] ss:$8 sps:$4 sm:$0xff] (!%p198_p2)   ;;  %v994_v12 = vld [vmem:[%s1230_s2 + $0x18] sm:$0xff] (!%p198_p2)   ;;  %673 = vmatprep.mubr.bf16.mxu1 (!%p198_p2), %v1051_v20 }
   0x7   : > { %v1004_v5 = vld [vmem:[%s1231_s3 + $0x84] ss:$8 sps:$4 sm:$0xff] (!%p198_p2)   ;;  %v1006_v8 = vld [vmem:[%s1231_s3 + $0x80] ss:$8 sps:$4 sm:$0xff] (!%p198_p2)   ;;  %v1000_v9 = vld [vmem:[%s1231_s3 + $0x14] ss:$8 sps:$4 sm:$0xff] (!%p198_p2)   ;;  %988 = vset.pattern.permute.xlu0 (!%p198_p2), %v1051_v20 }
   0x8   : > { %641 = vmatprep.subr.bf16.mxu1 (!%p198_p2), %v1004_v5  ;;  %v998_v10 = vld [vmem:[%s1231_s3 + $0x10] ss:$8 sps:$4 sm:$0xff] (!%p198_p2)   ;;  %v1003_v11 = vld [vmem:[%s1231_s3 + $0x24] ss:$8 sps:$4 sm:$0xff] (!%p198_p2)   ;;  %v1001_v13 = vld [vmem:[%s1231_s3 + $0x20] ss:$8 sps:$4 sm:$0xff] (!%p198_p2)  }
   0x9   : > { %642 = vmatpush1.bf16.msra.mxu1 (!%p198_p2), %v1006_v8  ;;  %v1009_v14 = vld [vmem:[%s1231_s3 + $0x34] ss:$8 sps:$4 sm:$0xff] (!%p198_p2)   ;;  %v1007_v16 = vld [vmem:[%s1231_s3 + $0x30] ss:$8 sps:$4 sm:$0xff] (!%p198_p2)   ;;  %v1015_v18 = vld [vmem:[%s1231_s3 + $0x44] ss:$8 sps:$4 sm:$0xff] (!%p198_p2)  }
   0xa   : > { %v1010_v15 = vld [vmem:[%s1231_s3 + $0x94] ss:$8 sps:$4 sm:$0xff] (!%p198_p2)   ;;  %v1012_v17 = vld [vmem:[%s1231_s3 + $0x90] ss:$8 sps:$4 sm:$0xff] (!%p198_p2)   ;;  %v1016_v19 = vld [vmem:[%s1231_s3 + $0xa4] ss:$8 sps:$4 sm:$0xff] (!%p198_p2)  }
   0xb   : > { %643 = vmatprep.subr.bf16.mxu1 (!%p198_p2), %v1010_v15  ;;  %v1018_v21 = vld [vmem:[%s1231_s3 + $0xa0] ss:$8 sps:$4 sm:$0xff] (!%p198_p2)   ;;  %v1022_v22 = vld [vmem:[%s1231_s3 + $0xb4] ss:$8 sps:$4 sm:$0xff] (!%p198_p2)   ;;  %v1024_v23 = vld [vmem:[%s1231_s3 + $0xb0] ss:$8 sps:$4 sm:$0xff] (!%p198_p2)  }
   0xc   : > { %v1030_v24 = vld [vmem:[%s1231_s3 + $0xc4] ss:$8 sps:$4 sm:$0xff] (!%p198_p2)   ;;  %v1013_v32 = vld [vmem:[%s1231_s3 + $0x40] ss:$8 sps:$4 sm:$0xff] (!%p198_p2)   ;;  %vm437_vm1 = vcmask (!%p198_p2), 523264  }
   0xd   : > { %s1235_s19 = smov (!%p230_p3, %s859_s19), 1  ;;  %644 = vmatpush1.bf16.msra.mxu1 %v1012_v17  ;;  %v368_v25 = vld [vmem:[%s1232_s4] sm:$0xff]  ;;  %v369_v26 = vld [vmem:[%s1232_s4 + $0x8] sm:$0xff]  ;;  %v1021_v34 = vld [vmem:[%s1231_s3 + $0x54] ss:$8 sps:$4 sm:$0xff]  }
   0xe   : > { %s942_s22 = sshll.u32 %s1235_s19, 4  ;;  %645 = vmatprep.subr.bf16.mxu1 %v1016_v19  ;;  %376 = vperm.xlu0 %988, %v368_v25   ;;  %v1019_v35 = vld [vmem:[%s1231_s3 + $0x50] ss:$8 sps:$4 sm:$0xff]   ;;  %v1027_v37 = vld [vmem:[%s1231_s3 + $0x64] ss:$8 sps:$4 sm:$0xff]   ;;  %s943_s6 = sshll.u32 %s1235_s19, 5 }
   0xf   : > { %s234_s25 = scalar_lea.vmem %s1228_s0, %s942_s22  ;;  %v1025_v42 = vld [vmem:[%s1231_s3 + $0x60] ss:$8 sps:$4 sm:$0xff]   ;;  %v1033_v45 = vld [vmem:[%s1231_s3 + $0x74] ss:$8 sps:$4 sm:$0xff]   ;;  %v1031_v47 = vld [vmem:[%s1231_s3 + $0x70] ss:$8 sps:$4 sm:$0xff]   ;;  %s239_s9 = scalar_lea.vmem %s1229_s1, %s943_s6 }
  0x10   : > { %v989_v1 = vld [vmem:[%s234_s25] sm:$0xff]   ;;  %v990_v2 = vld [vmem:[%s234_s25 + $0x8] sm:$0xff]   ;;  %v1036_v46 = vld [vmem:[%s1231_s3 + $0xd4] ss:$8 sps:$4 sm:$0xff]   ;;  %s244_s11 = scalar_lea.vmem %s1233_s5, %s943_s6 }
  0x11   : > { %951 = vmatprep.subr.bf16.mxu0 %v989_v1  ;;  %646 = vmatpush1.bf16.msra.mxu1 %v1018_v21  ;;  %v1028_v43 = vld [vmem:[%s1231_s3 + $0xc0] ss:$8 sps:$4 sm:$0xff]   ;;  %v1034_v48 = vld [vmem:[%s1231_s3 + $0xd0] ss:$8 sps:$4 sm:$0xff]   ;;  %v1039_v49 = vld [vmem:[%s1231_s3 + $0xe4] ss:$8 sps:$4 sm:$0xff]  }
  0x12   : > { %952 = vmatpush3.bf16.msra.mxu0 %v989_v1  ;;  %647 = vmatprep.subr.bf16.mxu1 %v1022_v22  ;;  %v1037_v50 = vld [vmem:[%s1231_s3 + $0xe0] ss:$8 sps:$4 sm:$0xff]   ;;  %v1042_v51 = vld [vmem:[%s1231_s3 + $0xf4] ss:$8 sps:$4 sm:$0xff]   ;;  %v1040_v52 = vld [vmem:[%s1231_s3 + $0xf0] ss:$8 sps:$4 sm:$0xff]  }
  0x13   : > { %953 = vmatprep.subr.bf16.mxu0 %v990_v2  ;;  %381 = vperm.xlu0 %988, %v369_v26   ;;  %v370_v54 = vld [vmem:[%s239_s9] sm:$0xff]  ;;  %v371_v56 = vld [vmem:[%s239_s9 + $0x8] sm:$0xff]  ;;  %v372_v59 = vld [vmem:[%s239_s9 + $0x10] sm:$0xff] }
  0x14   : > { %v373_v62 = vld [vmem:[%s239_s9 + $0x18] sm:$0xff] }
  0x15   : > { %648 = vmatpush1.bf16.msra.mxu1 %v1024_v23 }
  0x16   : > { %954 = vmatpush3.bf16.msra.mxu0 %v990_v2  ;;  %741 = vmatprep.subr.bf16.mxu1 %v1030_v24 }
  0x17   : > { %441 = vmatprep.subr.bf16.mxu0 %v997_v3 }
  0x19   : > { %956 = vmatmul.mubr.msk.bf16.vlgmr.msra.gmra.mrb[0].mxu0 %vm290_vm0, %v992_v4 }
  0x1a   : > { %959 = vmatprep.mubr.msk.bf16.mxu0 %vm290_vm0, %v993_v6  ;;  %442 = vmatpush1.bf16.msra.mxu0 %v995_v7 }
  0x1b   : > { %443 = vmatprep.subr.bf16.mxu0 %v1000_v9 }
  0x1e   : > { %444 = vmatpush1.bf16.msra.mxu0 %v998_v10 }
  0x1f   : > { %445 = vmatprep.subr.bf16.mxu0 %v1003_v11 }
  0x21   : > { %960 = vmatmul.mubr.msk.bf16.gmra.mrb[4].mxu0 %vm290_vm0, %v994_v12 }
  0x22   : > { %446 = vmatpush1.bf16.msra.mxu0 %v1001_v13  ;;  %473 = vmatprep.mubr.bf16.mxu0 %v1051_v20 }
  0x23   : > { %447 = vmatprep.subr.bf16.mxu0 %v1009_v14 }
  0x26   : > { %448 = vmatpush1.bf16.msra.mxu0 %v1007_v16 }
  0x27   : > { %541 = vmatprep.subr.bf16.mxu0 %v1015_v18 }
  0x8d   : > { %v377_v53 = vpop.permute.xlu0 %376 }
  0x8e   : > { %v384_v61 = vadd.f32 %v377_v53, %v370_v54  ;;  %v385_v0 = vadd.f32 %v377_v53, %v371_v56 }
  0x92   : > { %v382_v58 = vpop.permute.xlu0 %381 }
  0x93   : > { %v386_v1 = vadd.f32 %v382_v58, %v372_v59  ;;  %v387_v2 = vadd.f32 %v382_v58, %v373_v62 }
  0xec   : > { %v957_v27 = vpop.f32.mrb[0].mxu0 }
  0xed   : > { %v337_v28 = vpop.f32.mrb[1].mxu0 }
  0xee   : > { %v958_v29 = vpop.f32.mrb[2].mxu0 }
  0xef   : > { %v488_v30 = vpack.c.bf16 %v958_v29, %v957_v27  ;;  %v340_v31 = vpop.f32.mrb[3].mxu0 }
  0xf0   : > { %v388_v33 = vpack.c.bf16 %v340_v31, %v337_v28 }
  0xf2   : > { %888 = vmatmul.mubr.msk.bf16.vlgmr.msra.gmra.mrb[8].mxu0 %vm437_vm1, %v388_v33 }
  0xf3   : > { %542 = vmatpush1.bf16.msra.mxu0 %v1013_v32  ;;  %573 = vmatprep.mubr.bf16.mxu0 %v1051_v20 }
  0xf4   : > { %v961_v36 = vpop.f32.mrb[4].mxu0  ;;  %543 = vmatprep.subr.bf16.mxu0 %v1021_v34 }
  0xf5   : > { %v353_v38 = vpop.f32.mrb[5].mxu0 }
  0xf6   : > { %v962_v39 = vpop.f32.mrb[6].mxu0 }
  0xf7   : > { %v688_v40 = vpack.c.bf16 %v962_v39, %v961_v36  ;;  %544 = vmatpush1.bf16.msra.mxu0 %v1019_v35  ;;  %v356_v41 = vpop.f32.mrb[7].mxu0 }
  0xf8   : > { %v588_v44 = vpack.c.bf16 %v356_v41, %v353_v38  ;;  %545 = vmatprep.subr.bf16.mxu0 %v1027_v37 }
  0xfa   : > { %922 = vmatmul.mubr.msk.bf16.vlgmr.msra.gmra.mrb[0].mxu1 %vm437_vm1, %v588_v44 }
  0xfb   : > { %546 = vmatpush1.bf16.msra.mxu0 %v1025_v42  ;;  %742 = vmatpush1.bf16.msra.mxu1 %v1028_v43 }
  0xfc   : > { %547 = vmatprep.subr.bf16.mxu0 %v1033_v45  ;;  %743 = vmatprep.subr.bf16.mxu1 %v1036_v46 }
  0xfd   : > { %773 = vmatprep.mubr.bf16.mxu1 %v1051_v20 }
  0xff   : > { %548 = vmatpush1.bf16.msra.mxu0 %v1031_v47  ;;  %744 = vmatpush1.bf16.msra.mxu1 %v1034_v48 }
 0x100   : > { %745 = vmatprep.subr.bf16.mxu1 %v1039_v49 }
 0x102   : > { %905 = vmatmul.mubr.msk.bf16.vlgmr.msra.gmra.mrb[8].mxu0 %vm437_vm1, %v488_v30 }
 0x103   : > { %746 = vmatpush1.bf16.msra.mxu1 %v1037_v50 }
 0x104   : > { %747 = vmatprep.subr.bf16.mxu1 %v1042_v51 }
 0x107   : > { %748 = vmatpush1.bf16.msra.mxu1 %v1040_v52 }
 0x10a   : > { %939 = vmatmul.mubr.msk.bf16.vlgmr.msra.gmra.mrb[0].mxu1 %vm437_vm1, %v688_v40 }
 0x1d5   : > { %v575_v55 = vpop.f32.mrb[8].mxu0 }
 0x1d6   : > { %v577_v57 = vpop.f32.mrb[9].mxu0  ;;  %v963_v3 = vadd.f32 %v575_v55, %v384_v61 }
 0x1d7   : > { %v579_v60 = vpop.f32.mrb[10].mxu0  ;;  %v965_v4 = vadd.f32 %v577_v57, %v385_v0 }
 0x1d8   : > { %v581_v63 = vpop.f32.mrb[11].mxu0  ;;  %v967_v6 = vadd.f32 %v579_v60, %v386_v1 }
 0x1d9   : > { %v969_v9 = vadd.f32 %v581_v63, %v387_v2 }
 0x1dd   : > { %v775_v5 = vpop.f32.mrb[0].mxu1 }
 0x1de   : > { %v964_v7 = vadd.f32 %v963_v3, %v775_v5  ;;  %v777_v8 = vpop.f32.mrb[1].mxu1 }
 0x1df   : > { %v966_v10 = vadd.f32 %v965_v4, %v777_v8  ;;  %v779_v11 = vpop.f32.mrb[2].mxu1 }
 0x1e0   : > { %788 = vst [vmem:[%s244_s11] sm:$0xff] %v964_v7  ;;  %v968_v12 = vadd.f32 %v967_v6, %v779_v11  ;;  %v781_v13 = vpop.f32.mrb[3].mxu1 }
 0x1e1   : > { %789 = vst [vmem:[%s244_s11 + $0x8] sm:$0xff] %v966_v10  ;;  %v970_v14 = vadd.f32 %v969_v9, %v781_v13 }
 0x1e2   : > { %790 = vst [vmem:[%s244_s11 + $0x10] sm:$0xff] %v968_v12 }
 0x1e3   : > { %791 = vst [vmem:[%s244_s11 + $0x18] sm:$0xff] %v970_v14 }
 0x1e4 PF: > { %s15_s18 = sadd.s32 1, %s1049_s18  }
 0x1e5   : > { %p12_p4 = scmp.ge.s32.totalorder %s15_s18, 4  }
 0x1e7   :  { %14 = sbr.rel (!%p12_p4) target bundleno = 1 (0x1), region = 76 }

// kernel: upscaling_block_forward.4
= control target key start
LH: loop header
LB: loop body
LE: loop exit
PB: predicated region body
PF: predicated region fallthrough
CT: control target
= control target key end

     0   :  { %s7002_s17 = smov 0   ;;  %s10250_s0 = inlined_call_operand.vmem [shape: f32[2,16,256], index: 0, kind: input, shape index: {}]   ;;  %s10251_s1 = inlined_call_operand.vmem [shape: bf16[9,256,256], index: 1, kind: input, shape index: {}]   ;;  %s10252_s2 = inlined_call_operand.vmem [shape: bf16[16,144], index: 2, kind: input, shape index: {}]   ;;  %s10253_s3 = inlined_call_operand.vmem [shape: f32[16,1], index: 3, kind: input, shape index: {}]   ;;  %s10254_s4 = inlined_call_operand.vmem [shape: f32[2,16,1], index: 4, kind: input, shape index: {}]   ;;  %s10255_s5 = inlined_call_operand.vmem [shape: bf16[16,144], index: 5, kind: input, shape index: {}]   ;;  %s10256_s6 = inlined_call_operand.vmem [shape: f32[16,1], index: 6, kind: input, shape index: {}]   ;;  %s10257_s7 = inlined_call_operand.vmem [shape: bf16[48,16], index: 7, kind: input, shape index: {}]   ;;  %s10258_s8 = inlined_call_operand.vmem [shape: f32[48,1], index: 8, kind: input, shape index: {}]   ;;  %s10259_s9 = inlined_call_operand.vmem [shape: bf16[16,16], index: 9, kind: input, shape index: {}]   ;;  %s10260_s10 = inlined_call_operand.vmem [shape: f32[16,1], index: 10, kind: input, shape index: {}]   ;;  %s10261_s11 = inlined_call_operand.vmem [shape: f32[2,16,256], index: 11, kind: output, shape index: {}]  }
   0x1 LB: > { %s5232_s18 = sadd.s32 4294967295, %s6939_s17   ;;  %p5236_p0 = scmp.ge.s32.totalorder %s6939_s17, 1  ;;  %s6939_s17 = sphi %s7002_s17, %s21_s17  }
   0x2   : > { %p347_p1 = scmp.lt.s32.totalorder %s6939_s17, 3 }
   0x4   : > { %p348_p2 = pnand %p5236_p0, %p347_p1 }
   0x6   : > { %351 = sbr.rel (%p348_p2) target bundleno = 3201 (0xc81), region = 64 }
   0xd   : > { %v5855_v0 = vld [vmem:[%s10251_s1 + $0x4] ss:$8 sps:$4 sm:$0xff]   ;;  %v5857_v1 = vld [vmem:[%s10251_s1] ss:$8 sps:$4 sm:$0xff]   ;;  %v5858_v2 = vld [vmem:[%s10251_s1 + $0x14] ss:$8 sps:$4 sm:$0xff]  }
   0xe   : > { %608 = vmatprep.subr.bf16.mxu0 %v5855_v0  ;;  %v5860_v3 = vld [vmem:[%s10251_s1 + $0x10] ss:$8 sps:$4 sm:$0xff]   ;;  %v5861_v4 = vld [vmem:[%s10251_s1 + $0x24] ss:$8 sps:$4 sm:$0xff]   ;;  %v5863_v5 = vld [vmem:[%s10251_s1 + $0x20] ss:$8 sps:$4 sm:$0xff]  }
   0xf   : > { %609 = vmatpush1.bf16.msra.mxu0 %v5857_v1  ;;  %v5864_v6 = vld [vmem:[%s10251_s1 + $0x34] ss:$8 sps:$4 sm:$0xff]   ;;  %v5876_v7 = vld [vmem:[%s10251_s1 + $0x104] ss:$8 sps:$4 sm:$0xff]   ;;  %v5878_v8 = vld [vmem:[%s10251_s1 + $0x100] ss:$8 sps:$4 sm:$0xff]  }
  0x10   : > { %610 = vmatprep.subr.bf16.mxu0 %v5858_v2  ;;  %v5866_v9 = vld [vmem:[%s10251_s1 + $0x30] ss:$8 sps:$4 sm:$0xff]   ;;  %v5867_v10 = vld [vmem:[%s10251_s1 + $0x44] ss:$8 sps:$4 sm:$0xff]   ;;  %846 = vmatprep.subr.bf16.mxu1 %v5876_v7  ;;  %v5882_v11 = vld [vmem:[%s10251_s1 + $0x114] ss:$8 sps:$4 sm:$0xff]  }
  0x11   : > { %847 = vmatpush1.bf16.msra.mxu1 %v5878_v8  ;;  %v5884_v12 = vld [vmem:[%s10251_s1 + $0x110] ss:$8 sps:$4 sm:$0xff]   ;;  %v5869_v13 = vld [vmem:[%s10251_s1 + $0x40] ss:$8 sps:$4 sm:$0xff]   ;;  %v5888_v14 = vld [vmem:[%s10251_s1 + $0x124] ss:$8 sps:$4 sm:$0xff]  }
  0x12   : > { %848 = vmatprep.subr.bf16.mxu1 %v5882_v11  ;;  %v5870_v15 = vld [vmem:[%s10251_s1 + $0x54] ss:$8 sps:$4 sm:$0xff]   ;;  %v5890_v16 = vld [vmem:[%s10251_s1 + $0x120] ss:$8 sps:$4 sm:$0xff]   ;;  %v5872_v18 = vld [vmem:[%s10251_s1 + $0x50] ss:$8 sps:$4 sm:$0xff]  }
  0x13   : > { %611 = vmatpush1.bf16.msra.mxu0 %v5860_v3  ;;  %v5894_v17 = vld [vmem:[%s10251_s1 + $0x134] ss:$8 sps:$4 sm:$0xff]   ;;  %v5873_v19 = vld [vmem:[%s10251_s1 + $0x64] ss:$8 sps:$4 sm:$0xff]   ;;  %p392_p3 = scmp.lt.s32.totalorder %s5232_s18, 1  ;;  %vm2578_vm0 = vcmask 130048  }
  0x14   : > { %612 = vmatprep.subr.bf16.mxu0 %v5861_v4  ;;  %v5896_v20 = vld [vmem:[%s10251_s1 + $0x130] ss:$8 sps:$4 sm:$0xff]   ;;  %v5900_v21 = vld [vmem:[%s10251_s1 + $0x144] ss:$8 sps:$4 sm:$0xff]   ;;  %v5875_v22 = vld [vmem:[%s10251_s1 + $0x60] ss:$8 sps:$4 sm:$0xff]  }
  0x15   : > { %849 = vmatpush1.bf16.msra.mxu1 %v5884_v12  ;;  %v5879_v23 = vld [vmem:[%s10251_s1 + $0x74] ss:$8 sps:$4 sm:$0xff]   ;;  %s10705_s18 = smov (!%p392_p3, %s5232_s18), 1  ;;  %v5902_v24 = vld [vmem:[%s10251_s1 + $0x140] ss:$8 sps:$4 sm:$0xff]   ;;  %vm3371_vm1 = vcmask 1043456  }
  0x16   : > { %850 = vmatprep.subr.bf16.mxu1 %v5888_v14  ;;  %v5906_v25 = vld [vmem:[%s10251_s1 + $0x154] ss:$8 sps:$4 sm:$0xff]   ;;  %v5881_v26 = vld [vmem:[%s10251_s1 + $0x70] ss:$8 sps:$4 sm:$0xff]   ;;  %v5885_v27 = vld [vmem:[%s10251_s1 + $0x84] ss:$8 sps:$4 sm:$0xff]  }
  0x17   : > { %613 = vmatpush1.bf16.msra.mxu0 %v5863_v5  ;;  %s5841_s24 = sshll.u32 %s10705_s18, 5  ;;  %v5908_v28 = vld [vmem:[%s10251_s1 + $0x150] ss:$8 sps:$4 sm:$0xff]   ;;  %v5912_v29 = vld [vmem:[%s10251_s1 + $0x164] ss:$8 sps:$4 sm:$0xff]   ;;  %s5842_s30 = sshll.u32 %s10705_s18, 4 }
  0x18   : > { %614 = vmatprep.subr.bf16.mxu0 %v5864_v6  ;;  %v5887_v30 = vld [vmem:[%s10251_s1 + $0x80] ss:$8 sps:$4 sm:$0xff]   ;;  %s7115_s14 = scalar_lea.vmem %s10250_s0, %s5841_s24  ;;  %v5891_v31 = vld [vmem:[%s10251_s1 + $0x94] ss:$8 sps:$4 sm:$0xff]   ;;  %v5893_v35 = vld [vmem:[%s10251_s1 + $0x90] ss:$8 sps:$4 sm:$0xff]   ;;  %s401_s19 = scalar_lea.vmem %s10254_s4, %s5842_s30 }
  0x19   : > { %851 = vmatpush1.bf16.msra.mxu1 %v5890_v16  ;;  %v5914_v32 = vld [vmem:[%s10251_s1 + $0x160] ss:$8 sps:$4 sm:$0xff]   ;;  %v5918_v33 = vld [vmem:[%s10251_s1 + $0x174] ss:$8 sps:$4 sm:$0xff]   ;;  %v5897_v37 = vld [vmem:[%s10251_s1 + $0xa4] ss:$8 sps:$4 sm:$0xff]  }
  0x1a   : > { %852 = vmatprep.subr.bf16.mxu1 %v5894_v17  ;;  %v409_v34 = vld [vmem:[%s7115_s14 + $0x8] sm:$0xff]  ;;  %v411_v36 = vld [vmem:[%s7115_s14 + $0x18] sm:$0xff]  ;;  %v408_v62 = vld [vmem:[%s7115_s14] sm:$0xff]  ;;  %vm3322_vm2 = vcmask 64512  }
  0x1b   : > { %615 = vmatpush1.bf16.msra.mxu0 %v5866_v9  ;;  %v7134_v38 = vpack.c.bf16 %v411_v36, %v409_v34  ;;  %v5920_v39 = vld [vmem:[%s10251_s1 + $0x170] ss:$8 sps:$4 sm:$0xff]   ;;  %v5924_v40 = vld [vmem:[%s10251_s1 + $0x184] ss:$8 sps:$4 sm:$0xff]   ;;  %v5899_v41 = vld [vmem:[%s10251_s1 + $0xa0] ss:$8 sps:$4 sm:$0xff]  }
  0x1c   : > { %616 = vmatprep.subr.bf16.mxu0 %v5867_v10  ;;  %v5903_v42 = vld [vmem:[%s10251_s1 + $0xb4] ss:$8 sps:$4 sm:$0xff]   ;;  %v5926_v43 = vld [vmem:[%s10251_s1 + $0x180] ss:$8 sps:$4 sm:$0xff]   ;;  %v5905_v45 = vld [vmem:[%s10251_s1 + $0xb0] ss:$8 sps:$4 sm:$0xff]  }
  0x1d   : > { %853 = vmatpush1.bf16.msra.mxu1 %v5896_v20  ;;  %640 = vmatprep.mubr.bf16.mxu0 %v7134_v38  ;;  %v5930_v44 = vld [vmem:[%s10251_s1 + $0x194] ss:$8 sps:$4 sm:$0xff]   ;;  %v5909_v46 = vld [vmem:[%s10251_s1 + $0xc4] ss:$8 sps:$4 sm:$0xff]   ;;  %v5932_v47 = vld [vmem:[%s10251_s1 + $0x190] ss:$8 sps:$4 sm:$0xff]  }
  0x1e   : > { %854 = vmatprep.subr.bf16.mxu1 %v5900_v21  ;;  %878 = vmatprep.mubr.bf16.mxu1 %v7134_v38  ;;  %v5936_v48 = vld [vmem:[%s10251_s1 + $0x1a4] ss:$8 sps:$4 sm:$0xff]   ;;  %v5911_v49 = vld [vmem:[%s10251_s1 + $0xc0] ss:$8 sps:$4 sm:$0xff]   ;;  %v5915_v50 = vld [vmem:[%s10251_s1 + $0xd4] ss:$8 sps:$4 sm:$0xff]  }
  0x1f   : > { %617 = vmatpush1.bf16.msra.mxu0 %v5869_v13  ;;  %v5938_v51 = vld [vmem:[%s10251_s1 + $0x1a0] ss:$8 sps:$4 sm:$0xff]   ;;  %v5942_v52 = vld [vmem:[%s10251_s1 + $0x1b4] ss:$8 sps:$4 sm:$0xff]   ;;  %v5917_v53 = vld [vmem:[%s10251_s1 + $0xd0] ss:$8 sps:$4 sm:$0xff]  }
  0x20   : > { %618 = vmatprep.subr.bf16.mxu0 %v5870_v15  ;;  %v5921_v54 = vld [vmem:[%s10251_s1 + $0xe4] ss:$8 sps:$4 sm:$0xff]   ;;  %v5944_v55 = vld [vmem:[%s10251_s1 + $0x1b0] ss:$8 sps:$4 sm:$0xff]   ;;  %v5923_v57 = vld [vmem:[%s10251_s1 + $0xe0] ss:$8 sps:$4 sm:$0xff]  }
  0x21   : > { %855 = vmatpush1.bf16.msra.mxu1 %v5902_v24  ;;  %v5948_v56 = vld [vmem:[%s10251_s1 + $0x1c4] ss:$8 sps:$4 sm:$0xff]   ;;  %v5927_v58 = vld [vmem:[%s10251_s1 + $0xf4] ss:$8 sps:$4 sm:$0xff]   ;;  %v5950_v59 = vld [vmem:[%s10251_s1 + $0x1c0] ss:$8 sps:$4 sm:$0xff]  }
  0x22   : > { %856 = vmatprep.subr.bf16.mxu1 %v5906_v25  ;;  %v5929_v60 = vld [vmem:[%s10251_s1 + $0xf0] ss:$8 sps:$4 sm:$0xff]   ;;  %v5954_v61 = vld [vmem:[%s10251_s1 + $0x1d4] ss:$8 sps:$4 sm:$0xff]   ;;  %v5935_v0 = vld [vmem:[%s10251_s1 + $0x204] ss:$8 sps:$4 sm:$0xff]  }
  0x23   : > { %619 = vmatpush1.bf16.msra.mxu0 %v5872_v18  ;;  %v410_v63 = vld [vmem:[%s7115_s14 + $0x10] sm:$0xff]  ;;  %v5960_v3 = vld [vmem:[%s10251_s1 + $0x1e4] ss:$8 sps:$4 sm:$0xff]   ;;  %v5933_v4 = vld [vmem:[%s10251_s1 + $0x200] ss:$8 sps:$4 sm:$0xff]  }
  0x24   : > { %620 = vmatprep.subr.bf16.mxu0 %v5873_v19  ;;  %v5956_v1 = vld [vmem:[%s10251_s1 + $0x1d0] ss:$8 sps:$4 sm:$0xff]   ;;  %v7215_v2 = vpack.c.bf16 %v410_v63, %v408_v62  ;;  %v5941_v5 = vld [vmem:[%s10251_s1 + $0x214] ss:$8 sps:$4 sm:$0xff]   ;;  %v5962_v6 = vld [vmem:[%s10251_s1 + $0x1e0] ss:$8 sps:$4 sm:$0xff]  }
  0x25   : > { %857 = vmatpush1.bf16.msra.mxu1 %v5908_v28  ;;  %v5966_v7 = vld [vmem:[%s10251_s1 + $0x1f4] ss:$8 sps:$4 sm:$0xff]   ;;  %v5939_v8 = vld [vmem:[%s10251_s1 + $0x210] ss:$8 sps:$4 sm:$0xff]   ;;  %v5947_v9 = vld [vmem:[%s10251_s1 + $0x224] ss:$8 sps:$4 sm:$0xff]  }
  0x26   : > { %858 = vmatprep.subr.bf16.mxu1 %v5912_v29  ;;  %v5968_v10 = vld [vmem:[%s10251_s1 + $0x1f0] ss:$8 sps:$4 sm:$0xff]   ;;  %v5974_v11 = vld [vmem:[%s10251_s1 + $0x304] ss:$8 sps:$4 sm:$0xff]   ;;  %v5945_v12 = vld [vmem:[%s10251_s1 + $0x220] ss:$8 sps:$4 sm:$0xff]  }
  0x27   : > { %621 = vmatpush1.bf16.msra.mxu0 %v5875_v22  ;;  %v5953_v13 = vld [vmem:[%s10251_s1 + $0x234] ss:$8 sps:$4 sm:$0xff]   ;;  %v5972_v14 = vld [vmem:[%s10251_s1 + $0x300] ss:$8 sps:$4 sm:$0xff]   ;;  %v5951_v16 = vld [vmem:[%s10251_s1 + $0x230] ss:$8 sps:$4 sm:$0xff]  }
  0x28   : > { %622 = vmatprep.subr.bf16.mxu0 %v5879_v23  ;;  %v5980_v15 = vld [vmem:[%s10251_s1 + $0x314] ss:$8 sps:$4 sm:$0xff]   ;;  %v5959_v17 = vld [vmem:[%s10251_s1 + $0x244] ss:$8 sps:$4 sm:$0xff]   ;;  %v5978_v18 = vld [vmem:[%s10251_s1 + $0x310] ss:$8 sps:$4 sm:$0xff]  }
  0x29   : > { %859 = vmatpush1.bf16.msra.mxu1 %v5914_v32  ;;  %v5986_v19 = vld [vmem:[%s10251_s1 + $0x324] ss:$8 sps:$4 sm:$0xff]   ;;  %v5957_v20 = vld [vmem:[%s10251_s1 + $0x240] ss:$8 sps:$4 sm:$0xff]   ;;  %v5965_v21 = vld [vmem:[%s10251_s1 + $0x254] ss:$8 sps:$4 sm:$0xff]  }
  0x2a   : > { %860 = vmatprep.subr.bf16.mxu1 %v5918_v33  ;;  %v5984_v22 = vld [vmem:[%s10251_s1 + $0x320] ss:$8 sps:$4 sm:$0xff]   ;;  %v5992_v23 = vld [vmem:[%s10251_s1 + $0x334] ss:$8 sps:$4 sm:$0xff]   ;;  %v5963_v24 = vld [vmem:[%s10251_s1 + $0x250] ss:$8 sps:$4 sm:$0xff]  }
  0x2b   : > { %623 = vmatpush1.bf16.msra.mxu0 %v5881_v26  ;;  %v5971_v25 = vld [vmem:[%s10251_s1 + $0x264] ss:$8 sps:$4 sm:$0xff]   ;;  %v5990_v26 = vld [vmem:[%s10251_s1 + $0x330] ss:$8 sps:$4 sm:$0xff]   ;;  %v5969_v28 = vld [vmem:[%s10251_s1 + $0x260] ss:$8 sps:$4 sm:$0xff]  }
  0x2c   : > { %624 = vmatprep.subr.bf16.mxu0 %v5885_v27  ;;  %v5998_v27 = vld [vmem:[%s10251_s1 + $0x344] ss:$8 sps:$4 sm:$0xff]   ;;  %v5977_v29 = vld [vmem:[%s10251_s1 + $0x274] ss:$8 sps:$4 sm:$0xff]   ;;  %v5975_v32 = vld [vmem:[%s10251_s1 + $0x270] ss:$8 sps:$4 sm:$0xff]  }
  0x2d   : > { %861 = vmatpush1.bf16.msra.mxu1 %v5920_v39  ;;  %v5983_v33 = vld [vmem:[%s10251_s1 + $0x284] ss:$8 sps:$4 sm:$0xff]   ;;  %v6002_v34 = vld [vmem:[%s10251_s1 + $0x350] ss:$8 sps:$4 sm:$0xff]   ;;  %v5981_v36 = vld [vmem:[%s10251_s1 + $0x280] ss:$8 sps:$4 sm:$0xff]  }
  0x2e   : > { %862 = vmatprep.subr.bf16.mxu1 %v5924_v40  ;;  %v6008_v39 = vld [vmem:[%s10251_s1 + $0x360] ss:$8 sps:$4 sm:$0xff]   ;;  %v6016_v40 = vld [vmem:[%s10251_s1 + $0x374] ss:$8 sps:$4 sm:$0xff]  }
  0x2f   : > { %625 = vmatpush1.bf16.msra.mxu0 %v5887_v30  ;;  %v5996_v30 = vld [vmem:[%s10251_s1 + $0x340] ss:$8 sps:$4 sm:$0xff]   ;;  %v6025_v62 = vld [vmem:[%s10251_s1 + $0x2f4] ss:$8 sps:$4 sm:$0xff]  }
  0x30   : > { %626 = vmatprep.subr.bf16.mxu0 %v5891_v31  ;;  %v6004_v31 = vld [vmem:[%s10251_s1 + $0x354] ss:$8 sps:$4 sm:$0xff]   ;;  %v6044_v63 = vld [vmem:[%s10251_s1 + $0x3c0] ss:$8 sps:$4 sm:$0xff]  }
  0x31   : > { %863 = vmatpush1.bf16.msra.mxu1 %v5926_v43  ;;  %v6014_v43 = vld [vmem:[%s10251_s1 + $0x370] ss:$8 sps:$4 sm:$0xff]  }
  0x32   : > { %864 = vmatprep.subr.bf16.mxu1 %v5930_v44  ;;  %v6022_v44 = vld [vmem:[%s10251_s1 + $0x384] ss:$8 sps:$4 sm:$0xff]  }
  0x33   : > { %627 = vmatpush1.bf16.msra.mxu0 %v5893_v35  ;;  %v6010_v35 = vld [vmem:[%s10251_s1 + $0x364] ss:$8 sps:$4 sm:$0xff]  }
  0x34   : > { %628 = vmatprep.subr.bf16.mxu0 %v5897_v37  ;;  %v5989_v37 = vld [vmem:[%s10251_s1 + $0x294] ss:$8 sps:$4 sm:$0xff]  }
  0x35   : > { %865 = vmatpush1.bf16.msra.mxu1 %v5932_v47  ;;  %v6020_v47 = vld [vmem:[%s10251_s1 + $0x380] ss:$8 sps:$4 sm:$0xff]  }
  0x36   : > { %866 = vmatprep.subr.bf16.mxu1 %v5936_v48  ;;  %v6028_v48 = vld [vmem:[%s10251_s1 + $0x394] ss:$8 sps:$4 sm:$0xff]  }
  0x37   : > { %629 = vmatpush1.bf16.msra.mxu0 %v5899_v41  ;;  %v5987_v41 = vld [vmem:[%s10251_s1 + $0x290] ss:$8 sps:$4 sm:$0xff]  }
  0x38   : > { %630 = vmatprep.subr.bf16.mxu0 %v5903_v42  ;;  %v5995_v42 = vld [vmem:[%s10251_s1 + $0x2a4] ss:$8 sps:$4 sm:$0xff]  }
  0x39   : > { %867 = vmatpush1.bf16.msra.mxu1 %v5938_v51  ;;  %v6026_v51 = vld [vmem:[%s10251_s1 + $0x390] ss:$8 sps:$4 sm:$0xff]  }
  0x3a   : > { %868 = vmatprep.subr.bf16.mxu1 %v5942_v52  ;;  %v6034_v52 = vld [vmem:[%s10251_s1 + $0x3a4] ss:$8 sps:$4 sm:$0xff]  }
  0x3b   : > { %631 = vmatpush1.bf16.msra.mxu0 %v5905_v45  ;;  %v5993_v45 = vld [vmem:[%s10251_s1 + $0x2a0] ss:$8 sps:$4 sm:$0xff]  }
  0x3c   : > { %632 = vmatprep.subr.bf16.mxu0 %v5909_v46  ;;  %v6001_v46 = vld [vmem:[%s10251_s1 + $0x2b4] ss:$8 sps:$4 sm:$0xff]  }
  0x3d   : > { %869 = vmatpush1.bf16.msra.mxu1 %v5944_v55  ;;  %v6032_v55 = vld [vmem:[%s10251_s1 + $0x3a0] ss:$8 sps:$4 sm:$0xff]  }
  0x3e   : > { %870 = vmatprep.subr.bf16.mxu1 %v5948_v56  ;;  %v6040_v56 = vld [vmem:[%s10251_s1 + $0x3b4] ss:$8 sps:$4 sm:$0xff]  }
  0x3f   : > { %633 = vmatpush1.bf16.msra.mxu0 %v5911_v49  ;;  %v5999_v49 = vld [vmem:[%s10251_s1 + $0x2b0] ss:$8 sps:$4 sm:$0xff]  }
  0x40   : > { %634 = vmatprep.subr.bf16.mxu0 %v5915_v50  ;;  %v6007_v50 = vld [vmem:[%s10251_s1 + $0x2c4] ss:$8 sps:$4 sm:$0xff]  }
  0x41   : > { %871 = vmatpush1.bf16.msra.mxu1 %v5950_v59  ;;  %v6038_v59 = vld [vmem:[%s10251_s1 + $0x3b0] ss:$8 sps:$4 sm:$0xff]  }
  0x42   : > { %872 = vmatprep.subr.bf16.mxu1 %v5954_v61  ;;  %v6017_v61 = vld [vmem:[%s10251_s1 + $0x2e0] ss:$8 sps:$4 sm:$0xff]  }
  0x43   : > { %635 = vmatpush1.bf16.msra.mxu0 %v5917_v53  ;;  %v6005_v53 = vld [vmem:[%s10251_s1 + $0x2c0] ss:$8 sps:$4 sm:$0xff]  }
  0x44   : > { %636 = vmatprep.subr.bf16.mxu0 %v5921_v54  ;;  %v6013_v54 = vld [vmem:[%s10251_s1 + $0x2d4] ss:$8 sps:$4 sm:$0xff]  }
  0x45   : > { %873 = vmatpush1.bf16.msra.mxu1 %v5956_v1  ;;  %v6023_v1 = vld [vmem:[%s10251_s1 + $0x2f0] ss:$8 sps:$4 sm:$0xff]  }
  0x46   : > { %874 = vmatprep.subr.bf16.mxu1 %v5960_v3  ;;  %v6031_v3 = vld [vmem:[%s10251_s1 + $0x404] ss:$8 sps:$4 sm:$0xff]  }
  0x47   : > { %637 = vmatpush1.bf16.msra.mxu0 %v5923_v57  ;;  %v6011_v57 = vld [vmem:[%s10251_s1 + $0x2d0] ss:$8 sps:$4 sm:$0xff]  }
  0x48   : > { %638 = vmatprep.subr.bf16.mxu0 %v5927_v58  ;;  %v6019_v58 = vld [vmem:[%s10251_s1 + $0x2e4] ss:$8 sps:$4 sm:$0xff]  }
  0x49   : > { %875 = vmatpush1.bf16.msra.mxu1 %v5962_v6  ;;  %v6029_v6 = vld [vmem:[%s10251_s1 + $0x400] ss:$8 sps:$4 sm:$0xff]  }
  0x4a   : > { %876 = vmatprep.subr.bf16.mxu1 %v5966_v7  ;;  %v6037_v7 = vld [vmem:[%s10251_s1 + $0x414] ss:$8 sps:$4 sm:$0xff]  }
  0x4b   : > { %639 = vmatpush1.bf16.msra.mxu0 %v5929_v60  ;;  %v6046_v60 = vld [vmem:[%s10251_s1 + $0x3c4] ss:$8 sps:$4 sm:$0xff]  }
  0x4c   : > { %1084 = vmatprep.subr.bf16.mxu0 %v5935_v0  ;;  %v6052_v0 = vld [vmem:[%s10251_s1 + $0x3d4] ss:$8 sps:$4 sm:$0xff]  }
  0x4d   : > { %877 = vmatpush1.bf16.msra.mxu1 %v5968_v10  ;;  %v6035_v10 = vld [vmem:[%s10251_s1 + $0x410] ss:$8 sps:$4 sm:$0xff]  }
  0x4e   : > { %641 = vmatmul.mubr.bf16.vlgmr.msra.gmra.mrb[0].mxu0 %v7215_v2  ;;  %1322 = vmatprep.subr.bf16.mxu1 %v5974_v11  ;;  %v6043_v11 = vld [vmem:[%s10251_s1 + $0x424] ss:$8 sps:$4 sm:$0xff]  }
  0x4f   : > { %1085 = vmatpush1.bf16.msra.mxu0 %v5933_v4  ;;  %1116 = vmatprep.mubr.bf16.mxu0 %v7134_v38  ;;  %v6050_v4 = vld [vmem:[%s10251_s1 + $0x3d0] ss:$8 sps:$4 sm:$0xff]  }
  0x50   : > { %1086 = vmatprep.subr.bf16.mxu0 %v5941_v5  ;;  %879 = vmatmul.mubr.bf16.vlgmr.msra.gmra.mrb[0].mxu1 %v7215_v2  ;;  %v6058_v5 = vld [vmem:[%s10251_s1 + $0x3e4] ss:$8 sps:$4 sm:$0xff]  }
  0x51   : > { %1323 = vmatpush1.bf16.msra.mxu1 %v5972_v14  ;;  %1354 = vmatprep.mubr.bf16.mxu1 %v7134_v38  ;;  %v6041_v14 = vld [vmem:[%s10251_s1 + $0x420] ss:$8 sps:$4 sm:$0xff]  }
  0x52   : > { %1324 = vmatprep.subr.bf16.mxu1 %v5980_v15  ;;  %v6049_v15 = vld [vmem:[%s10251_s1 + $0x434] ss:$8 sps:$4 sm:$0xff]  }
  0x53   : > { %1087 = vmatpush1.bf16.msra.mxu0 %v5939_v8  ;;  %v6056_v8 = vld [vmem:[%s10251_s1 + $0x3e0] ss:$8 sps:$4 sm:$0xff]  }
  0x54   : > { %1088 = vmatprep.subr.bf16.mxu0 %v5947_v9  ;;  %v6064_v9 = vld [vmem:[%s10251_s1 + $0x3f4] ss:$8 sps:$4 sm:$0xff]  }
  0x55   : > { %1325 = vmatpush1.bf16.msra.mxu1 %v5978_v18  ;;  %v6047_v18 = vld [vmem:[%s10251_s1 + $0x430] ss:$8 sps:$4 sm:$0xff]  }
  0x56   : > { %1326 = vmatprep.subr.bf16.mxu1 %v5986_v19  ;;  %v6055_v19 = vld [vmem:[%s10251_s1 + $0x444] ss:$8 sps:$4 sm:$0xff]  }
  0x57   : > { %1089 = vmatpush1.bf16.msra.mxu0 %v5945_v12  ;;  %v6062_v12 = vld [vmem:[%s10251_s1 + $0x3f0] ss:$8 sps:$4 sm:$0xff]  }
  0x58   : > { %1090 = vmatprep.subr.bf16.mxu0 %v5953_v13  ;;  %v6070_v13 = vld [vmem:[%s10251_s1 + $0x504] ss:$8 sps:$4 sm:$0xff]  }
  0x59   : > { %1327 = vmatpush1.bf16.msra.mxu1 %v5984_v22  ;;  %v6053_v22 = vld [vmem:[%s10251_s1 + $0x440] ss:$8 sps:$4 sm:$0xff]  }
  0x5a   : > { %1328 = vmatprep.subr.bf16.mxu1 %v5992_v23  ;;  %v6061_v23 = vld [vmem:[%s10251_s1 + $0x454] ss:$8 sps:$4 sm:$0xff]  }
  0x5b   : > { %1091 = vmatpush1.bf16.msra.mxu0 %v5951_v16  ;;  %v6068_v16 = vld [vmem:[%s10251_s1 + $0x500] ss:$8 sps:$4 sm:$0xff]  }
  0x5c   : > { %1092 = vmatprep.subr.bf16.mxu0 %v5959_v17  ;;  %v6076_v17 = vld [vmem:[%s10251_s1 + $0x514] ss:$8 sps:$4 sm:$0xff]  }
  0x5d   : > { %1329 = vmatpush1.bf16.msra.mxu1 %v5990_v26  ;;  %v6059_v26 = vld [vmem:[%s10251_s1 + $0x450] ss:$8 sps:$4 sm:$0xff]  }
  0x5e   : > { %1330 = vmatprep.subr.bf16.mxu1 %v5998_v27  ;;  %v6067_v27 = vld [vmem:[%s10251_s1 + $0x464] ss:$8 sps:$4 sm:$0xff]  }
  0x5f   : > { %1093 = vmatpush1.bf16.msra.mxu0 %v5957_v20  ;;  %v6074_v20 = vld [vmem:[%s10251_s1 + $0x510] ss:$8 sps:$4 sm:$0xff]  }
  0x60   : > { %1094 = vmatprep.subr.bf16.mxu0 %v5965_v21  ;;  %v6082_v21 = vld [vmem:[%s10251_s1 + $0x524] ss:$8 sps:$4 sm:$0xff]  }
  0x61   : > { %1331 = vmatpush1.bf16.msra.mxu1 %v5996_v30  ;;  %v6065_v30 = vld [vmem:[%s10251_s1 + $0x460] ss:$8 sps:$4 sm:$0xff]  }
  0x62   : > { %1332 = vmatprep.subr.bf16.mxu1 %v6004_v31  ;;  %v6073_v31 = vld [vmem:[%s10251_s1 + $0x474] ss:$8 sps:$4 sm:$0xff]  }
  0x63   : > { %1095 = vmatpush1.bf16.msra.mxu0 %v5963_v24  ;;  %v6080_v24 = vld [vmem:[%s10251_s1 + $0x520] ss:$8 sps:$4 sm:$0xff]  }
  0x64   : > { %1096 = vmatprep.subr.bf16.mxu0 %v5971_v25  ;;  %v6088_v25 = vld [vmem:[%s10251_s1 + $0x534] ss:$8 sps:$4 sm:$0xff]  }
  0x65   : > { %1333 = vmatpush1.bf16.msra.mxu1 %v6002_v34  ;;  %v6071_v34 = vld [vmem:[%s10251_s1 + $0x470] ss:$8 sps:$4 sm:$0xff]  }
  0x66   : > { %1334 = vmatprep.subr.bf16.mxu1 %v6010_v35  ;;  %v6079_v35 = vld [vmem:[%s10251_s1 + $0x484] ss:$8 sps:$4 sm:$0xff]  }
  0x67   : > { %1097 = vmatpush1.bf16.msra.mxu0 %v5969_v28  ;;  %v6086_v28 = vld [vmem:[%s10251_s1 + $0x530] ss:$8 sps:$4 sm:$0xff]  }
  0x68   : > { %1098 = vmatprep.subr.bf16.mxu0 %v5977_v29  ;;  %v6094_v29 = vld [vmem:[%s10251_s1 + $0x544] ss:$8 sps:$4 sm:$0xff]  }
  0x69   : > { %1335 = vmatpush1.bf16.msra.mxu1 %v6008_v39  ;;  %v6077_v39 = vld [vmem:[%s10251_s1 + $0x480] ss:$8 sps:$4 sm:$0xff]  }
  0x6a   : > { %1336 = vmatprep.subr.bf16.mxu1 %v6016_v40  ;;  %v6085_v40 = vld [vmem:[%s10251_s1 + $0x494] ss:$8 sps:$4 sm:$0xff]  }
  0x6b   : > { %1099 = vmatpush1.bf16.msra.mxu0 %v5975_v32  ;;  %v6092_v32 = vld [vmem:[%s10251_s1 + $0x540] ss:$8 sps:$4 sm:$0xff]  }
  0x6c   : > { %1100 = vmatprep.subr.bf16.mxu0 %v5983_v33  ;;  %v6100_v33 = vld [vmem:[%s10251_s1 + $0x554] ss:$8 sps:$4 sm:$0xff]  }
  0x6d   : > { %1337 = vmatpush1.bf16.msra.mxu1 %v6014_v43  ;;  %v6083_v43 = vld [vmem:[%s10251_s1 + $0x490] ss:$8 sps:$4 sm:$0xff]  }
  0x6e   : > { %1338 = vmatprep.subr.bf16.mxu1 %v6022_v44  ;;  %v6091_v44 = vld [vmem:[%s10251_s1 + $0x4a4] ss:$8 sps:$4 sm:$0xff]  }
  0x6f   : > { %1101 = vmatpush1.bf16.msra.mxu0 %v5981_v36  ;;  %v6098_v36 = vld [vmem:[%s10251_s1 + $0x550] ss:$8 sps:$4 sm:$0xff]  }
  0x70   : > { %1102 = vmatprep.subr.bf16.mxu0 %v5989_v37  ;;  %v6106_v37 = vld [vmem:[%s10251_s1 + $0x564] ss:$8 sps:$4 sm:$0xff]  }
  0x71   : > { %1339 = vmatpush1.bf16.msra.mxu1 %v6020_v47  ;;  %v6089_v47 = vld [vmem:[%s10251_s1 + $0x4a0] ss:$8 sps:$4 sm:$0xff]  }
  0x72   : > { %1340 = vmatprep.subr.bf16.mxu1 %v6028_v48  ;;  %v6097_v48 = vld [vmem:[%s10251_s1 + $0x4b4] ss:$8 sps:$4 sm:$0xff]  }
  0x73   : > { %1103 = vmatpush1.bf16.msra.mxu0 %v5987_v41  ;;  %v6104_v41 = vld [vmem:[%s10251_s1 + $0x560] ss:$8 sps:$4 sm:$0xff]  }
  0x74   : > { %1104 = vmatprep.subr.bf16.mxu0 %v5995_v42  ;;  %v6112_v42 = vld [vmem:[%s10251_s1 + $0x574] ss:$8 sps:$4 sm:$0xff]  }
  0x75   : > { %1341 = vmatpush1.bf16.msra.mxu1 %v6026_v51  ;;  %v6095_v51 = vld [vmem:[%s10251_s1 + $0x4b0] ss:$8 sps:$4 sm:$0xff]  }
  0x76   : > { %1342 = vmatprep.subr.bf16.mxu1 %v6034_v52  ;;  %v6103_v52 = vld [vmem:[%s10251_s1 + $0x4c4] ss:$8 sps:$4 sm:$0xff]  }
  0x77   : > { %1105 = vmatpush1.bf16.msra.mxu0 %v5993_v45  ;;  %v6110_v45 = vld [vmem:[%s10251_s1 + $0x570] ss:$8 sps:$4 sm:$0xff]  }
  0x78   : > { %1106 = vmatprep.subr.bf16.mxu0 %v6001_v46  ;;  %v6118_v46 = vld [vmem:[%s10251_s1 + $0x584] ss:$8 sps:$4 sm:$0xff]  }
  0x79   : > { %1343 = vmatpush1.bf16.msra.mxu1 %v6032_v55  ;;  %v6101_v55 = vld [vmem:[%s10251_s1 + $0x4c0] ss:$8 sps:$4 sm:$0xff]  }
  0x7a   : > { %1344 = vmatprep.subr.bf16.mxu1 %v6040_v56  ;;  %v6109_v56 = vld [vmem:[%s10251_s1 + $0x4d4] ss:$8 sps:$4 sm:$0xff]  }
  0x7b   : > { %1107 = vmatpush1.bf16.msra.mxu0 %v5999_v49  ;;  %v6116_v49 = vld [vmem:[%s10251_s1 + $0x580] ss:$8 sps:$4 sm:$0xff]  }
  0x7c   : > { %1108 = vmatprep.subr.bf16.mxu0 %v6007_v50  ;;  %v6124_v50 = vld [vmem:[%s10251_s1 + $0x594] ss:$8 sps:$4 sm:$0xff]  }
  0x7d   : > { %1345 = vmatpush1.bf16.msra.mxu1 %v6038_v59  ;;  %v6107_v59 = vld [vmem:[%s10251_s1 + $0x4d0] ss:$8 sps:$4 sm:$0xff]  }
  0x7e   : > { %1346 = vmatprep.subr.bf16.mxu1 %v6046_v60  ;;  %v6115_v60 = vld [vmem:[%s10251_s1 + $0x4e4] ss:$8 sps:$4 sm:$0xff]  }
  0x7f   : > { %1109 = vmatpush1.bf16.msra.mxu0 %v6005_v53  ;;  %v6122_v53 = vld [vmem:[%s10251_s1 + $0x590] ss:$8 sps:$4 sm:$0xff]  }
  0x80   : > { %1110 = vmatprep.subr.bf16.mxu0 %v6013_v54  ;;  %v6130_v54 = vld [vmem:[%s10251_s1 + $0x5a4] ss:$8 sps:$4 sm:$0xff]  }
  0x81   : > { %1347 = vmatpush1.bf16.msra.mxu1 %v6044_v63  ;;  %v6113_v63 = vld [vmem:[%s10251_s1 + $0x4e0] ss:$8 sps:$4 sm:$0xff]  }
  0x82   : > { %1348 = vmatprep.subr.bf16.mxu1 %v6052_v0  ;;  %v6121_v0 = vld [vmem:[%s10251_s1 + $0x4f4] ss:$8 sps:$4 sm:$0xff]  }
  0x83   : > { %1111 = vmatpush1.bf16.msra.mxu0 %v6011_v57  ;;  %v6128_v57 = vld [vmem:[%s10251_s1 + $0x5a0] ss:$8 sps:$4 sm:$0xff]  }
  0x84   : > { %1112 = vmatprep.subr.bf16.mxu0 %v6019_v58  ;;  %v6136_v58 = vld [vmem:[%s10251_s1 + $0x5b4] ss:$8 sps:$4 sm:$0xff]  }
  0x85   : > { %1349 = vmatpush1.bf16.msra.mxu1 %v6050_v4  ;;  %v6119_v4 = vld [vmem:[%s10251_s1 + $0x4f0] ss:$8 sps:$4 sm:$0xff]  }
  0x86   : > { %1350 = vmatprep.subr.bf16.mxu1 %v6058_v5  ;;  %v6127_v5 = vld [vmem:[%s10251_s1 + $0x604] ss:$8 sps:$4 sm:$0xff]  }
  0x87   : > { %1113 = vmatpush1.bf16.msra.mxu0 %v6017_v61  ;;  %v6134_v61 = vld [vmem:[%s10251_s1 + $0x5b0] ss:$8 sps:$4 sm:$0xff]  }
  0x88   : > { %1114 = vmatprep.subr.bf16.mxu0 %v6025_v62  ;;  %v6142_v62 = vld [vmem:[%s10251_s1 + $0x5c4] ss:$8 sps:$4 sm:$0xff]  }
  0x89   : > { %1351 = vmatpush1.bf16.msra.mxu1 %v6056_v8  ;;  %v6125_v8 = vld [vmem:[%s10251_s1 + $0x600] ss:$8 sps:$4 sm:$0xff]  }
  0x8a   : > { %1352 = vmatprep.subr.bf16.mxu1 %v6064_v9  ;;  %v6133_v9 = vld [vmem:[%s10251_s1 + $0x614] ss:$8 sps:$4 sm:$0xff]  }
  0x8b   : > { %1115 = vmatpush1.bf16.msra.mxu0 %v6023_v1  ;;  %v6140_v1 = vld [vmem:[%s10251_s1 + $0x5c0] ss:$8 sps:$4 sm:$0xff]  }
  0x8c   : > { %1560 = vmatprep.subr.bf16.mxu0 %v6031_v3  ;;  %v6148_v3 = vld [vmem:[%s10251_s1 + $0x5d4] ss:$8 sps:$4 sm:$0xff]  }
  0x8d   : > { %1353 = vmatpush1.bf16.msra.mxu1 %v6062_v12  ;;  %v6160_v12 = vld [vmem:[%s10251_s1 + $0x5f4] ss:$8 sps:$4 sm:$0xff]  }
  0x8e   : > { %1117 = vmatmul.mubr.bf16.vlgmr.msra.gmra.mrb[4].mxu0 %v7215_v2  ;;  %1798 = vmatprep.subr.bf16.mxu1 %v6070_v13  ;;  %v6139_v13 = vld [vmem:[%s10251_s1 + $0x624] ss:$8 sps:$4 sm:$0xff]  }
  0x8f   : > { %1561 = vmatpush1.bf16.msra.mxu0 %v6029_v6  ;;  %1592 = vmatprep.mubr.bf16.mxu0 %v7134_v38  ;;  %v6146_v6 = vld [vmem:[%s10251_s1 + $0x5d0] ss:$8 sps:$4 sm:$0xff]  }
  0x90   : > { %1562 = vmatprep.subr.bf16.mxu0 %v6037_v7  ;;  %1355 = vmatmul.mubr.bf16.vlgmr.msra.gmra.mrb[4].mxu1 %v7215_v2  ;;  %v6154_v7 = vld [vmem:[%s10251_s1 + $0x5e4] ss:$8 sps:$4 sm:$0xff]  }
  0x91   : > { %1799 = vmatpush1.bf16.msra.mxu1 %v6068_v16  ;;  %1830 = vmatprep.mubr.bf16.mxu1 %v7134_v38  ;;  %v6137_v16 = vld [vmem:[%s10251_s1 + $0x620] ss:$8 sps:$4 sm:$0xff]  }
  0x92   : > { %1800 = vmatprep.subr.bf16.mxu1 %v6076_v17  ;;  %v6145_v17 = vld [vmem:[%s10251_s1 + $0x634] ss:$8 sps:$4 sm:$0xff]  }
  0x93   : > { %1563 = vmatpush1.bf16.msra.mxu0 %v6035_v10  ;;  %v6152_v10 = vld [vmem:[%s10251_s1 + $0x5e0] ss:$8 sps:$4 sm:$0xff]  }
  0x94   : > { %1564 = vmatprep.subr.bf16.mxu0 %v6043_v11  ;;  %v6131_v11 = vld [vmem:[%s10251_s1 + $0x610] ss:$8 sps:$4 sm:$0xff]  }
  0x95   : > { %1801 = vmatpush1.bf16.msra.mxu1 %v6074_v20  ;;  %v6143_v20 = vld [vmem:[%s10251_s1 + $0x630] ss:$8 sps:$4 sm:$0xff]  }
  0x96   : > { %1802 = vmatprep.subr.bf16.mxu1 %v6082_v21  ;;  %v6151_v21 = vld [vmem:[%s10251_s1 + $0x644] ss:$8 sps:$4 sm:$0xff]  }
  0x97   : > { %1565 = vmatpush1.bf16.msra.mxu0 %v6041_v14  ;;  %v6158_v14 = vld [vmem:[%s10251_s1 + $0x5f0] ss:$8 sps:$4 sm:$0xff]  }
  0x98   : > { %1566 = vmatprep.subr.bf16.mxu0 %v6049_v15  ;;  %v6166_v15 = vld [vmem:[%s10251_s1 + $0x704] ss:$8 sps:$4 sm:$0xff]  }
  0x99   : > { %1803 = vmatpush1.bf16.msra.mxu1 %v6080_v24  ;;  %v6149_v24 = vld [vmem:[%s10251_s1 + $0x640] ss:$8 sps:$4 sm:$0xff]  }
  0x9a   : > { %1804 = vmatprep.subr.bf16.mxu1 %v6088_v25  ;;  %v6157_v25 = vld [vmem:[%s10251_s1 + $0x654] ss:$8 sps:$4 sm:$0xff]  }
  0x9b   : > { %1567 = vmatpush1.bf16.msra.mxu0 %v6047_v18  ;;  %v6164_v18 = vld [vmem:[%s10251_s1 + $0x700] ss:$8 sps:$4 sm:$0xff]  }
  0x9c   : > { %1568 = vmatprep.subr.bf16.mxu0 %v6055_v19  ;;  %v6172_v19 = vld [vmem:[%s10251_s1 + $0x714] ss:$8 sps:$4 sm:$0xff]  }
  0x9d   : > { %1805 = vmatpush1.bf16.msra.mxu1 %v6086_v28  ;;  %v6155_v28 = vld [vmem:[%s10251_s1 + $0x650] ss:$8 sps:$4 sm:$0xff]  }
  0x9e   : > { %1806 = vmatprep.subr.bf16.mxu1 %v6094_v29  ;;  %v6163_v29 = vld [vmem:[%s10251_s1 + $0x664] ss:$8 sps:$4 sm:$0xff]  }
  0x9f   : > { %1569 = vmatpush1.bf16.msra.mxu0 %v6053_v22  ;;  %v6170_v22 = vld [vmem:[%s10251_s1 + $0x710] ss:$8 sps:$4 sm:$0xff]  }
  0xa0   : > { %1570 = vmatprep.subr.bf16.mxu0 %v6061_v23  ;;  %v6178_v23 = vld [vmem:[%s10251_s1 + $0x724] ss:$8 sps:$4 sm:$0xff]  }
  0xa1   : > { %1807 = vmatpush1.bf16.msra.mxu1 %v6092_v32  ;;  %v6161_v32 = vld [vmem:[%s10251_s1 + $0x660] ss:$8 sps:$4 sm:$0xff]  }
  0xa2   : > { %1808 = vmatprep.subr.bf16.mxu1 %v6100_v33  ;;  %v6169_v33 = vld [vmem:[%s10251_s1 + $0x674] ss:$8 sps:$4 sm:$0xff]  }
  0xa3   : > { %1571 = vmatpush1.bf16.msra.mxu0 %v6059_v26  ;;  %v6176_v26 = vld [vmem:[%s10251_s1 + $0x720] ss:$8 sps:$4 sm:$0xff]  }
  0xa4   : > { %1572 = vmatprep.subr.bf16.mxu0 %v6067_v27  ;;  %v6184_v27 = vld [vmem:[%s10251_s1 + $0x734] ss:$8 sps:$4 sm:$0xff]  }
  0xa5   : > { %1809 = vmatpush1.bf16.msra.mxu1 %v6098_v36  ;;  %v6167_v36 = vld [vmem:[%s10251_s1 + $0x670] ss:$8 sps:$4 sm:$0xff]  }
  0xa6   : > { %1810 = vmatprep.subr.bf16.mxu1 %v6106_v37  ;;  %v6175_v37 = vld [vmem:[%s10251_s1 + $0x684] ss:$8 sps:$4 sm:$0xff]  }
  0xa7   : > { %1573 = vmatpush1.bf16.msra.mxu0 %v6065_v30  ;;  %v6182_v30 = vld [vmem:[%s10251_s1 + $0x730] ss:$8 sps:$4 sm:$0xff]  }
  0xa8   : > { %1574 = vmatprep.subr.bf16.mxu0 %v6073_v31  ;;  %v6190_v31 = vld [vmem:[%s10251_s1 + $0x744] ss:$8 sps:$4 sm:$0xff]  }
  0xa9   : > { %1811 = vmatpush1.bf16.msra.mxu1 %v6104_v41  ;;  %v6173_v41 = vld [vmem:[%s10251_s1 + $0x680] ss:$8 sps:$4 sm:$0xff]  }
  0xaa   : > { %1812 = vmatprep.subr.bf16.mxu1 %v6112_v42  ;;  %v6181_v42 = vld [vmem:[%s10251_s1 + $0x694] ss:$8 sps:$4 sm:$0xff]  }
  0xab   : > { %1575 = vmatpush1.bf16.msra.mxu0 %v6071_v34  ;;  %v6188_v34 = vld [vmem:[%s10251_s1 + $0x740] ss:$8 sps:$4 sm:$0xff]  }
  0xac   : > { %1576 = vmatprep.subr.bf16.mxu0 %v6079_v35  ;;  %v6196_v35 = vld [vmem:[%s10251_s1 + $0x754] ss:$8 sps:$4 sm:$0xff]  }
  0xad   : > { %1813 = vmatpush1.bf16.msra.mxu1 %v6110_v45  ;;  %v6179_v45 = vld [vmem:[%s10251_s1 + $0x690] ss:$8 sps:$4 sm:$0xff]  }
  0xae   : > { %1814 = vmatprep.subr.bf16.mxu1 %v6118_v46  ;;  %v6187_v46 = vld [vmem:[%s10251_s1 + $0x6a4] ss:$8 sps:$4 sm:$0xff]  }
  0xaf   : > { %1577 = vmatpush1.bf16.msra.mxu0 %v6077_v39  ;;  %v6194_v39 = vld [vmem:[%s10251_s1 + $0x750] ss:$8 sps:$4 sm:$0xff]  }
  0xb0   : > { %1578 = vmatprep.subr.bf16.mxu0 %v6085_v40  ;;  %v6202_v40 = vld [vmem:[%s10251_s1 + $0x764] ss:$8 sps:$4 sm:$0xff]  }
  0xb1   : > { %1815 = vmatpush1.bf16.msra.mxu1 %v6116_v49  ;;  %v6185_v49 = vld [vmem:[%s10251_s1 + $0x6a0] ss:$8 sps:$4 sm:$0xff]  }
  0xb2   : > { %1816 = vmatprep.subr.bf16.mxu1 %v6124_v50  ;;  %v6193_v50 = vld [vmem:[%s10251_s1 + $0x6b4] ss:$8 sps:$4 sm:$0xff]  }
  0xb3   : > { %1579 = vmatpush1.bf16.msra.mxu0 %v6083_v43  ;;  %v6200_v43 = vld [vmem:[%s10251_s1 + $0x760] ss:$8 sps:$4 sm:$0xff]  }
  0xb4   : > { %1580 = vmatprep.subr.bf16.mxu0 %v6091_v44  ;;  %v6208_v44 = vld [vmem:[%s10251_s1 + $0x774] ss:$8 sps:$4 sm:$0xff]  }
  0xb5   : > { %1817 = vmatpush1.bf16.msra.mxu1 %v6122_v53  ;;  %v6191_v53 = vld [vmem:[%s10251_s1 + $0x6b0] ss:$8 sps:$4 sm:$0xff]  }
  0xb6   : > { %1818 = vmatprep.subr.bf16.mxu1 %v6130_v54  ;;  %v6199_v54 = vld [vmem:[%s10251_s1 + $0x6c4] ss:$8 sps:$4 sm:$0xff]  }
  0xb7   : > { %1581 = vmatpush1.bf16.msra.mxu0 %v6089_v47  ;;  %v7733_v47 = vld [vmem:[%s10251_s1 + $0x770] ss:$8 sps:$4 sm:$0xff]  }
  0xb8   : > { %1582 = vmatprep.subr.bf16.mxu0 %v6097_v48  ;;  %v7738_v48 = vld [vmem:[%s10251_s1 + $0x784] ss:$8 sps:$4 sm:$0xff]  }
  0xb9   : > { %1819 = vmatpush1.bf16.msra.mxu1 %v6128_v57  ;;  %v7779_v57 = vld [vmem:[%s10251_s1 + $0x6c0] ss:$8 sps:$4 sm:$0xff]  }
  0xba   : > { %1820 = vmatprep.subr.bf16.mxu1 %v6136_v58  ;;  %v7784_v58 = vld [vmem:[%s10251_s1 + $0x6d4] ss:$8 sps:$4 sm:$0xff]  }
  0xbb   : > { %1583 = vmatpush1.bf16.msra.mxu0 %v6095_v51  ;;  %v7750_v51 = vld [vmem:[%s10251_s1 + $0x780] ss:$8 sps:$4 sm:$0xff]  }
  0xbc   : > { %1584 = vmatprep.subr.bf16.mxu0 %v6103_v52  ;;  %v7756_v52 = vld [vmem:[%s10251_s1 + $0x794] ss:$8 sps:$4 sm:$0xff]  }
  0xbd   : > { %1821 = vmatpush1.bf16.msra.mxu1 %v6134_v61  ;;  %v7802_v61 = vld [vmem:[%s10251_s1 + $0x6d0] ss:$8 sps:$4 sm:$0xff]  }
  0xbe   : > { %1822 = vmatprep.subr.bf16.mxu1 %v6142_v62  ;;  %v7808_v62 = vld [vmem:[%s10251_s1 + $0x6e4] ss:$8 sps:$4 sm:$0xff]  }
  0xbf   : > { %1585 = vmatpush1.bf16.msra.mxu0 %v6101_v55  ;;  %v7768_v55 = vld [vmem:[%s10251_s1 + $0x790] ss:$8 sps:$4 sm:$0xff]  }
  0xc0   : > { %1586 = vmatprep.subr.bf16.mxu0 %v6109_v56  ;;  %v7774_v56 = vld [vmem:[%s10251_s1 + $0x7a4] ss:$8 sps:$4 sm:$0xff]  }
  0xc1   : > { %1823 = vmatpush1.bf16.msra.mxu1 %v6140_v1  ;;  %v7826_v1 = vld [vmem:[%s10251_s1 + $0x6e0] ss:$8 sps:$4 sm:$0xff]  }
  0xc2   : > { %1824 = vmatprep.subr.bf16.mxu1 %v6148_v3  ;;  %v7832_v3 = vld [vmem:[%s10251_s1 + $0x6f4] ss:$8 sps:$4 sm:$0xff]  }
  0xc3   : > { %1587 = vmatpush1.bf16.msra.mxu0 %v6107_v59  ;;  %v7790_v59 = vld [vmem:[%s10251_s1 + $0x7a0] ss:$8 sps:$4 sm:$0xff]  }
  0xc4   : > { %1588 = vmatprep.subr.bf16.mxu0 %v6115_v60  ;;  %v7796_v60 = vld [vmem:[%s10251_s1 + $0x7b4] ss:$8 sps:$4 sm:$0xff]  }
  0xc5   : > { %1825 = vmatpush1.bf16.msra.mxu1 %v6146_v6  ;;  %v7850_v6 = vld [vmem:[%s10251_s1 + $0x6f0] ss:$8 sps:$4 sm:$0xff]  }
  0xc6   : > { %1826 = vmatprep.subr.bf16.mxu1 %v6154_v7  ;;  %v7856_v7 = vld [vmem:[%s10251_s1 + $0x804] ss:$8 sps:$4 sm:$0xff]  }
  0xc7   : > { %1589 = vmatpush1.bf16.msra.mxu0 %v6113_v63  ;;  %v7814_v63 = vld [vmem:[%s10251_s1 + $0x7b0] ss:$8 sps:$4 sm:$0xff]  }
  0xc8   : > { %1590 = vmatprep.subr.bf16.mxu0 %v6121_v0  ;;  %v7820_v0 = vld [vmem:[%s10251_s1 + $0x7c4] ss:$8 sps:$4 sm:$0xff]  }
  0xc9   : > { %1827 = vmatpush1.bf16.msra.mxu1 %v6152_v10  ;;  %v7874_v10 = vld [vmem:[%s10251_s1 + $0x800] ss:$8 sps:$4 sm:$0xff]  }
  0xca   : > { %1828 = vmatprep.subr.bf16.mxu1 %v6160_v12  ;;  %v7886_v12 = vld [vmem:[%s10251_s1 + $0x7e0] ss:$8 sps:$4 sm:$0xff]  }
  0xcb   : > { %1591 = vmatpush1.bf16.msra.mxu0 %v6119_v4  ;;  %v7838_v4 = vld [vmem:[%s10251_s1 + $0x7c0] ss:$8 sps:$4 sm:$0xff]  }
  0xcc   : > { %2036 = vmatprep.subr.bf16.mxu0 %v6127_v5  ;;  %v7844_v5 = vld [vmem:[%s10251_s1 + $0x7d4] ss:$8 sps:$4 sm:$0xff]  }
  0xcd   : > { %1829 = vmatpush1.bf16.msra.mxu1 %v6158_v14  ;;  %v7899_v14 = vld [vmem:[%s10251_s1 + $0x810] ss:$8 sps:$4 sm:$0xff]  }
  0xce   : > { %1593 = vmatmul.mubr.bf16.vlgmr.msra.gmra.mrb[8].mxu0 %v7215_v2  ;;  %2274 = vmatprep.subr.bf16.mxu1 %v6166_v15  ;;  %v7906_v15 = vld [vmem:[%s10251_s1 + $0x824] ss:$8 sps:$4 sm:$0xff]  }
  0xcf   : > { %2037 = vmatpush1.bf16.msra.mxu0 %v6125_v8  ;;  %2068 = vmatprep.mubr.bf16.mxu0 %v7134_v38  ;;  %v7862_v8 = vld [vmem:[%s10251_s1 + $0x7d0] ss:$8 sps:$4 sm:$0xff]  }
  0xd0   : > { %2038 = vmatprep.subr.bf16.mxu0 %v6133_v9  ;;  %1831 = vmatmul.mubr.bf16.vlgmr.msra.gmra.mrb[8].mxu1 %v7215_v2  ;;  %v7868_v9 = vld [vmem:[%s10251_s1 + $0x7e4] ss:$8 sps:$4 sm:$0xff]  }
  0xd1   : > { %2275 = vmatpush1.bf16.msra.mxu1 %v6164_v18  ;;  %2306 = vmatprep.mubr.bf16.mxu1 %v7134_v38  ;;  %v7932_v18 = vld [vmem:[%s10251_s1 + $0x830] ss:$8 sps:$4 sm:$0xff]  }
  0xd2   : > { %2276 = vmatprep.subr.bf16.mxu1 %v6172_v19  ;;  %v7938_v19 = vld [vmem:[%s10251_s1 + $0x844] ss:$8 sps:$4 sm:$0xff]  }
  0xd3   : > { %2039 = vmatpush1.bf16.msra.mxu0 %v6131_v11  ;;  %v7880_v11 = vld [vmem:[%s10251_s1 + $0x814] ss:$8 sps:$4 sm:$0xff]  }
  0xd4   : > { %2040 = vmatprep.subr.bf16.mxu0 %v6139_v13  ;;  %v7893_v13 = vld [vmem:[%s10251_s1 + $0x7f4] ss:$8 sps:$4 sm:$0xff]  }
  0xd5   : > { %2277 = vmatpush1.bf16.msra.mxu1 %v6170_v22  ;;  %v7957_v22 = vld [vmem:[%s10251_s1 + $0x850] ss:$8 sps:$4 sm:$0xff]  }
  0xd6   : > { %2278 = vmatprep.subr.bf16.mxu1 %v6178_v23  ;;  %v7963_v23 = vld [vmem:[%s10251_s1 + $0x864] ss:$8 sps:$4 sm:$0xff]  }
  0xd7   : > { %2041 = vmatpush1.bf16.msra.mxu0 %v6137_v16  ;;  %v7912_v16 = vld [vmem:[%s10251_s1 + $0x7f0] ss:$8 sps:$4 sm:$0xff]  }
  0xd8   : > { %2042 = vmatprep.subr.bf16.mxu0 %v6145_v17  ;;  %v7925_v17 = vld [vmem:[%s10251_s1 + $0x834] ss:$8 sps:$4 sm:$0xff]  }
  0xd9   : > { %2279 = vmatpush1.bf16.msra.mxu1 %v6176_v26 }
  0xda   : > { %2280 = vmatprep.subr.bf16.mxu1 %v6184_v27  ;;  %v7969_v27 = vld [vmem:[%s10251_s1 + $0x860] ss:$8 sps:$4 sm:$0xff]  }
  0xdb   : > { %2043 = vmatpush1.bf16.msra.mxu0 %v6143_v20  ;;  %v7945_v20 = vld [vmem:[%s10251_s1 + $0x840] ss:$8 sps:$4 sm:$0xff]  }
  0xdc   : > { %2044 = vmatprep.subr.bf16.mxu0 %v6151_v21  ;;  %v7951_v21 = vld [vmem:[%s10251_s1 + $0x854] ss:$8 sps:$4 sm:$0xff]  }
  0xdd   : > { %2281 = vmatpush1.bf16.msra.mxu1 %v6182_v30  ;;  %v7975_v30 = vld [vmem:[%s10251_s1 + $0x874] ss:$8 sps:$4 sm:$0xff]  }
  0xde   : > { %2282 = vmatprep.subr.bf16.mxu1 %v6190_v31 }
  0xdf   : > { %2045 = vmatpush1.bf16.msra.mxu0 %v6149_v24 }
  0xe0   : > { %2046 = vmatprep.subr.bf16.mxu0 %v6157_v25 }
  0xe1   : > { %2283 = vmatpush1.bf16.msra.mxu1 %v6188_v34  ;;  %v7993_v34 = vld [vmem:[%s10251_s1 + $0x880] ss:$8 sps:$4 sm:$0xff]  }
  0xe2   : > { %2284 = vmatprep.subr.bf16.mxu1 %v6196_v35 }
  0xe3   : > { %2047 = vmatpush1.bf16.msra.mxu0 %v6155_v28 }
  0xe4   : > { %2048 = vmatprep.subr.bf16.mxu0 %v6163_v29 }
  0xe5   : > { %2285 = vmatpush1.bf16.msra.mxu1 %v6194_v39 }
  0xe6   : > { %2286 = vmatprep.subr.bf16.mxu1 %v6202_v40 }
  0xe7   : > { %2049 = vmatpush1.bf16.msra.mxu0 %v6161_v32  ;;  %v7981_v32 = vld [vmem:[%s10251_s1 + $0x870] ss:$8 sps:$4 sm:$0xff]  }
  0xe8   : > { %2050 = vmatprep.subr.bf16.mxu0 %v6169_v33  ;;  %v7987_v33 = vld [vmem:[%s10251_s1 + $0x884] ss:$8 sps:$4 sm:$0xff]  }
  0xe9   : > { %2287 = vmatpush1.bf16.msra.mxu1 %v6200_v43 }
  0xea   : > { %2288 = vmatprep.subr.bf16.mxu1 %v6208_v44  ;;  %v8011_v44 = vld [vmem:[%s10251_s1 + $0x8a4] ss:$8 sps:$4 sm:$0xff]  }
  0xeb   : > { %2051 = vmatpush1.bf16.msra.mxu0 %v6167_v36  ;;  %v7999_v36 = vld [vmem:[%s10251_s1 + $0x894] ss:$8 sps:$4 sm:$0xff]   ;;  %10411 = vst [vmem:[#allocation4_spill] sm:$0xff] %v8011_v44 }
  0xec   : > { %2052 = vmatprep.subr.bf16.mxu0 %v6175_v37  ;;  %10409 = vst [vmem:[#allocation2_spill] sm:$0xff] %v7999_v36 }
  0xed   : > { %2289 = vmatpush1.bf16.msra.mxu1 %v7733_v47 }
  0xee   : > { %2290 = vmatprep.subr.bf16.mxu1 %v7738_v48 }
  0xef   : > { %2053 = vmatpush1.bf16.msra.mxu0 %v6173_v41 }
  0xf0   : > { %2054 = vmatprep.subr.bf16.mxu0 %v6181_v42  ;;  %v8005_v42 = vld [vmem:[%s10251_s1 + $0x890] ss:$8 sps:$4 sm:$0xff]  }
  0xf1   : > { %2291 = vmatpush1.bf16.msra.mxu1 %v7750_v51  ;;  %10410 = vst [vmem:[#allocation3_spill] sm:$0xff] %v8005_v42 }
  0xf2   : > { %2292 = vmatprep.subr.bf16.mxu1 %v7756_v52 }
  0xf3   : > { %2055 = vmatpush1.bf16.msra.mxu0 %v6179_v45  ;;  %v8017_v45 = vld [vmem:[%s10251_s1 + $0x8a0] ss:$8 sps:$4 sm:$0xff]  }
  0xf4   : > { %2056 = vmatprep.subr.bf16.mxu0 %v6187_v46  ;;  %10412 = vst [vmem:[#allocation5_spill] sm:$0xff] %v8017_v45  ;;  %v8023_v46 = vld [vmem:[%s10251_s1 + $0x8b4] ss:$8 sps:$4 sm:$0xff]  }
  0xf5   : > { %2293 = vmatpush1.bf16.msra.mxu1 %v7768_v55  ;;  %10413 = vst [vmem:[#allocation6_spill] sm:$0xff] %v8023_v46 }
  0xf6   : > { %2294 = vmatprep.subr.bf16.mxu1 %v7774_v56 }
  0xf7   : > { %2057 = vmatpush1.bf16.msra.mxu0 %v6185_v49  ;;  %v8029_v49 = vld [vmem:[%s10251_s1 + $0x8b0] ss:$8 sps:$4 sm:$0xff]  }
  0xf8   : > { %2058 = vmatprep.subr.bf16.mxu0 %v6193_v50  ;;  %10414 = vst [vmem:[#allocation7_spill] sm:$0xff] %v8029_v49  ;;  %v8035_v50 = vld [vmem:[%s10251_s1 + $0x8c4] ss:$8 sps:$4 sm:$0xff]  }
  0xf9   : > { %2295 = vmatpush1.bf16.msra.mxu1 %v7790_v59  ;;  %10415 = vst [vmem:[#allocation8_spill] sm:$0xff] %v8035_v50 }
  0xfa   : > { %2296 = vmatprep.subr.bf16.mxu1 %v7796_v60 }
  0xfb   : > { %2059 = vmatpush1.bf16.msra.mxu0 %v6191_v53  ;;  %v8041_v53 = vld [vmem:[%s10251_s1 + $0x8c0] ss:$8 sps:$4 sm:$0xff]  }
  0xfc   : > { %2060 = vmatprep.subr.bf16.mxu0 %v6199_v54  ;;  %10416 = vst [vmem:[#allocation9_spill] sm:$0xff] %v8041_v53  ;;  %v8047_v54 = vld [vmem:[%s10251_s1 + $0x8d4] ss:$8 sps:$4 sm:$0xff]  }
  0xfd   : > { %2297 = vmatpush1.bf16.msra.mxu1 %v7814_v63  ;;  %10417 = vst [vmem:[#allocation10_spill] sm:$0xff] %v8047_v54 }
  0xfe   : > { %2298 = vmatprep.subr.bf16.mxu1 %v7820_v0 }
  0xff   : > { %2061 = vmatpush1.bf16.msra.mxu0 %v7779_v57 }
 0x100   : > { %2062 = vmatprep.subr.bf16.mxu0 %v7784_v58 }
 0x101   : > { %2299 = vmatpush1.bf16.msra.mxu1 %v7838_v4 }
 0x102   : > { %2300 = vmatprep.subr.bf16.mxu1 %v7844_v5 }
 0x103   : > { %2063 = vmatpush1.bf16.msra.mxu0 %v7802_v61 }
 0x104   : > { %2064 = vmatprep.subr.bf16.mxu0 %v7808_v62 }
 0x105   : > { %2301 = vmatpush1.bf16.msra.mxu1 %v7862_v8 }
 0x106   : > { %2302 = vmatprep.subr.bf16.mxu1 %v7868_v9 }
 0x107   : > { %2065 = vmatpush1.bf16.msra.mxu0 %v7826_v1 }
 0x108   : > { %2066 = vmatprep.subr.bf16.mxu0 %v7832_v3 }
 0x109   : > { %2303 = vmatpush1.bf16.msra.mxu1 %v7886_v12 }
 0x10a   : > { %2304 = vmatprep.subr.bf16.mxu1 %v7893_v13 }
 0x10b   : > { %2067 = vmatpush1.bf16.msra.mxu0 %v7850_v6 }
 0x10c   : > { %2512 = vmatprep.subr.bf16.mxu0 %v7856_v7 }
 0x10d   : > { %2305 = vmatpush1.bf16.msra.mxu1 %v7912_v16 }
 0x10e   : > { %2069 = vmatmul.mubr.bf16.vlgmr.msra.gmra.mrb[12].mxu0 %v7215_v2 }
 0x10f   : > { %2513 = vmatpush1.bf16.msra.mxu0 %v7874_v10  ;;  %2544 = vmatprep.mubr.bf16.mxu0 %v7134_v38  ;;  %v7919_v38 = vld [vmem:[%s10251_s1 + $0x820] ss:$8 sps:$4 sm:$0xff]  }
 0x110   : > { %2514 = vmatprep.subr.bf16.mxu0 %v7880_v11  ;;  %2307 = vmatmul.mubr.bf16.vlgmr.msra.gmra.mrb[12].mxu1 %v7215_v2 }
 0x113   : > { %2515 = vmatpush1.bf16.msra.mxu0 %v7899_v14 }
 0x114   : > { %2516 = vmatprep.subr.bf16.mxu0 %v7906_v15 }
 0x117   : > { %2517 = vmatpush1.bf16.msra.mxu0 %v7919_v38 }
 0x118   : > { %2518 = vmatprep.subr.bf16.mxu0 %v7925_v17 }
 0x11b   : > { %2519 = vmatpush1.bf16.msra.mxu0 %v7932_v18 }
 0x11c   : > { %2520 = vmatprep.subr.bf16.mxu0 %v7938_v19 }
 0x11f   : > { %2521 = vmatpush1.bf16.msra.mxu0 %v7945_v20 }
 0x120   : > { %2522 = vmatprep.subr.bf16.mxu0 %v7951_v21 }
 0x121   : > { %v642_v24 = vpop.f32.mrb[0].mxu0 }
 0x122   : > { %v644_v25 = vpop.f32.mrb[1].mxu0 }
 0x123   : > { %v646_v26 = vpop.f32.mrb[2].mxu0  ;;  %2523 = vmatpush1.bf16.msra.mxu0 %v7957_v22  ;;  %v880_v35 = vpop.f32.mrb[0].mxu1 }
 0x124   : > { %v651_v28 = vpack.c.bf16 %v646_v26, %v642_v24  ;;  %v648_v29 = vpop.f32.mrb[3].mxu0  ;;  %2524 = vmatprep.subr.bf16.mxu0 %v7963_v23  ;;  %v882_v37 = vpop.f32.mrb[1].mxu1  ;;  %v8053_v24 = vld [vmem:[%s10251_s1 + $0x8d0] ss:$8 sps:$4 sm:$0xff]   ;;  %v8065_v26 = vld [vmem:[%s10251_s1 + $0x8e0] ss:$8 sps:$4 sm:$0xff]  }
 0x125   : > { %v652_v31 = vpack.c.bf16 %v648_v29, %v644_v25  ;;  %v884_v39 = vpop.f32.mrb[2].mxu1  ;;  %10418 = vst [vmem:[#allocation11_spill] sm:$0xff] %v8053_v24  ;;  %v8059_v25 = vld [vmem:[%s10251_s1 + $0x8e4] ss:$8 sps:$4 sm:$0xff]   ;;  %10420 = vst [vmem:[#allocation13_spill] sm:$0xff] %v8065_v26 }
 0x126   : > { %v889_v40 = vpack.c.bf16 %v884_v39, %v880_v35  ;;  %v886_v41 = vpop.f32.mrb[3].mxu1  ;;  %10419 = vst [vmem:[#allocation12_spill] sm:$0xff] %v8059_v25  ;;  %v8077_v29 = vld [vmem:[%s10251_s1 + $0x8f0] ss:$8 sps:$4 sm:$0xff]   ;;  %v6698_v35 = vld [vmem:[%s10251_s1 + $0x100] ss:$8 sps:$4 sm:$0xff]  }
 0x127   : > { %2525 = vmatpush1.bf16.msra.mxu0 %v7969_v27  ;;  %2582 = vmatprep.subr.bf16.mxu1 %v652_v31  ;;  %v890_v43 = vpack.c.bf16 %v886_v41, %v882_v37  ;;  %10422 = vst [vmem:[#allocation15_spill] sm:$0xff] %v8077_v29  ;;  %v6697_v31 = vld [vmem:[%s10251_s1 + $0x104] ss:$8 sps:$4 sm:$0xff]   ;;  %v6699_v37 = vld [vmem:[%s10251_s1 + $0x114] ss:$8 sps:$4 sm:$0xff]  }
 0x128   : > { %2583 = vmatpush1.bf16.msra.mxu1 %v651_v28  ;;  %2526 = vmatprep.subr.bf16.mxu0 %v7975_v30  ;;  %v8071_v28 = vld [vmem:[%s10251_s1 + $0x8f4] ss:$8 sps:$4 sm:$0xff]   ;;  %v6700_v39 = vld [vmem:[%s10251_s1 + $0x110] ss:$8 sps:$4 sm:$0xff]  }
 0x129   : > { %2584 = vmatprep.subr.bf16.mxu1 %v890_v43  ;;  %10421 = vst [vmem:[#allocation14_spill] sm:$0xff] %v8071_v28  ;;  %v6703_v41 = vld [vmem:[%s10251_s1 + $0x134] ss:$8 sps:$4 sm:$0xff]   ;;  %v6704_v43 = vld [vmem:[%s10251_s1 + $0x130] ss:$8 sps:$4 sm:$0xff]  }
 0x12b   : > { %2527 = vmatpush1.bf16.msra.mxu0 %v7981_v32 }
 0x12c   : > { %2528 = vmatprep.subr.bf16.mxu0 %v7987_v33  ;;  %2585 = vmatpush1.bf16.msra.mxu1 %v889_v40  ;;  %v6701_v40 = vld [vmem:[%s10251_s1 + $0x124] ss:$8 sps:$4 sm:$0xff]  }
 0x12f   : > { %2529 = vmatpush1.bf16.msra.mxu0 %v7993_v34 }
 0x130   : > { %2530 = vmatprep.subr.bf16.mxu0 %v7999_v36 }
 0x133   : > { %2531 = vmatpush1.bf16.msra.mxu0 %v8005_v42 }
 0x134   : > { %2532 = vmatprep.subr.bf16.mxu0 %v8011_v44 }
 0x137   : > { %2533 = vmatpush1.bf16.msra.mxu0 %v8017_v45 }
 0x138   : > { %2534 = vmatprep.subr.bf16.mxu0 %v8023_v46 }
 0x13b   : > { %2535 = vmatpush1.bf16.msra.mxu0 %v8029_v49 }
 0x13c   : > { %2536 = vmatprep.subr.bf16.mxu0 %v8035_v50 }
 0x13f   : > { %2537 = vmatpush1.bf16.msra.mxu0 %v8041_v53 }
 0x140   : > { %2538 = vmatprep.subr.bf16.mxu0 %v8047_v54 }
 0x143   : > { %2539 = vmatpush1.bf16.msra.mxu0 %v8053_v24 }
 0x144   : > { %2540 = vmatprep.subr.bf16.mxu0 %v8059_v25 }
 0x147   : > { %2541 = vmatpush1.bf16.msra.mxu0 %v8065_v26  ;;  %v10265_v26 = vmov 0  }
 0x148   : > { %2542 = vmatprep.subr.bf16.mxu0 %v8071_v28  ;;  %v6711_v28 = vld [vmem:[%s10251_s1 + $0x174] ss:$8 sps:$4 sm:$0xff]   ;;  %5854 = vset.pattern.permute.xlu1 %v10265_v26 }
 0x149   : > { %5853 = vset.pattern.permute.xlu0 %v10265_v26  ;;  %v3137_v26 = vld [vmem:[%s10256_s6] sm:$0xff] }
 0x14b   : > { %2543 = vmatpush1.bf16.msra.mxu0 %v8077_v29  ;;  %v6709_v29 = vld [vmem:[%s10251_s1 + $0x164] ss:$8 sps:$4 sm:$0xff]  }
 0x14c   : > { %2718 = vmatprep.subr.bf16.mxu0 %v6697_v31  ;;  %v6705_v31 = vld [vmem:[%s10251_s1 + $0x144] ss:$8 sps:$4 sm:$0xff]  }
 0x14e   : > { %2545 = vmatmul.mubr.bf16.vlgmr.msra.gmra.mrb[16].mxu0 %v7215_v2  ;;  %v6702_v2 = vld [vmem:[%s10251_s1 + $0x120] ss:$8 sps:$4 sm:$0xff]  }
 0x14f   : > { %2719 = vmatpush1.bf16.msra.mxu0 %v6698_v35  ;;  %v6706_v35 = vld [vmem:[%s10251_s1 + $0x140] ss:$8 sps:$4 sm:$0xff]  }
 0x150   : > { %2720 = vmatprep.subr.bf16.mxu0 %v6699_v37  ;;  %v6707_v37 = vld [vmem:[%s10251_s1 + $0x154] ss:$8 sps:$4 sm:$0xff]  }
 0x153   : > { %2721 = vmatpush1.bf16.msra.mxu0 %v6700_v39 }
 0x154   : > { %2722 = vmatprep.subr.bf16.mxu0 %v6701_v40 }
 0x157   : > { %2723 = vmatpush1.bf16.msra.mxu0 %v6702_v2 }
 0x158   : > { %2724 = vmatprep.subr.bf16.mxu0 %v6703_v41  ;;  %v6708_v41 = vld [vmem:[%s10251_s1 + $0x150] ss:$8 sps:$4 sm:$0xff]  }
 0x15b   : > { %2725 = vmatpush1.bf16.msra.mxu0 %v6704_v43 }
 0x15c   : > { %2726 = vmatprep.subr.bf16.mxu0 %v6705_v31 }
 0x15f   : > { %2727 = vmatpush1.bf16.msra.mxu0 %v6706_v35 }
 0x160   : > { %2728 = vmatprep.subr.bf16.mxu0 %v6707_v37  ;;  %v6710_v37 = vld [vmem:[%s10251_s1 + $0x160] ss:$8 sps:$4 sm:$0xff]  }
 0x161   : > { %v1118_v39 = vpop.f32.mrb[4].mxu0 }
 0x162   : > { %v1120_v40 = vpop.f32.mrb[5].mxu0 }
 0x163   : > { %v1122_v2 = vpop.f32.mrb[6].mxu0  ;;  %2729 = vmatpush1.bf16.msra.mxu0 %v6708_v41 }
 0x164   : > { %v1127_v43 = vpack.c.bf16 %v1122_v2, %v1118_v39  ;;  %v1124_v31 = vpop.f32.mrb[7].mxu0  ;;  %2730 = vmatprep.subr.bf16.mxu0 %v6709_v29  ;;  %v1356_v39 = vpop.f32.mrb[4].mxu1  ;;  %v6712_v2 = vld [vmem:[%s10251_s1 + $0x170] ss:$8 sps:$4 sm:$0xff]  }
 0x165   : > { %v1128_v35 = vpack.c.bf16 %v1124_v31, %v1120_v40  ;;  %v1358_v29 = vpop.f32.mrb[5].mxu1  ;;  %v6713_v40 = vld [vmem:[%s10251_s1 + $0x184] ss:$8 sps:$4 sm:$0xff]  }
 0x166   : > { %v1360_v41 = vpop.f32.mrb[6].mxu1 }
 0x167   : > { %2586 = vmatprep.subr.bf16.mxu1 %v1128_v35  ;;  %2731 = vmatpush1.bf16.msra.mxu0 %v6710_v37  ;;  %v1365_v31 = vpack.c.bf16 %v1360_v41, %v1356_v39  ;;  %v6715_v37 = vld [vmem:[%s10251_s1 + $0x194] ss:$8 sps:$4 sm:$0xff]   ;;  %v6717_v39 = vld [vmem:[%s10251_s1 + $0x1a4] ss:$8 sps:$4 sm:$0xff]   ;;  %v6720_v41 = vld [vmem:[%s10251_s1 + $0x1b0] ss:$8 sps:$4 sm:$0xff]  }
 0x168   : > { %2587 = vmatpush1.bf16.msra.mxu1 %v1127_v43  ;;  %2732 = vmatprep.subr.bf16.mxu0 %v6711_v28  ;;  %v1362_v43 = vpop.f32.mrb[7].mxu1  ;;  %v6714_v28 = vld [vmem:[%s10251_s1 + $0x180] ss:$8 sps:$4 sm:$0xff]  }
 0x169   : > { %v1366_v35 = vpack.c.bf16 %v1362_v43, %v1358_v29  ;;  %v6718_v29 = vld [vmem:[%s10251_s1 + $0x1a0] ss:$8 sps:$4 sm:$0xff]  }
 0x16a   : > { %v6722_v43 = vld [vmem:[%s10251_s1 + $0x1c0] ss:$8 sps:$4 sm:$0xff]  }
 0x16b   : > { %2733 = vmatpush1.bf16.msra.mxu0 %v6712_v2  ;;  %2588 = vmatprep.subr.bf16.mxu1 %v1366_v35  ;;  %v6716_v2 = vld [vmem:[%s10251_s1 + $0x190] ss:$8 sps:$4 sm:$0xff]   ;;  %v6723_v35 = vld [vmem:[%s10251_s1 + $0x1d4] ss:$8 sps:$4 sm:$0xff]  }
 0x16c   : > { %2734 = vmatprep.subr.bf16.mxu0 %v6713_v40  ;;  %2589 = vmatpush1.bf16.msra.mxu1 %v1365_v31  ;;  %v6719_v40 = vld [vmem:[%s10251_s1 + $0x1b4] ss:$8 sps:$4 sm:$0xff]   ;;  %v6721_v31 = vld [vmem:[%s10251_s1 + $0x1c4] ss:$8 sps:$4 sm:$0xff]  }
 0x16f   : > { %2735 = vmatpush1.bf16.msra.mxu0 %v6714_v28  ;;  %v6724_v28 = vld [vmem:[%s10251_s1 + $0x1d0] ss:$8 sps:$4 sm:$0xff]  }
 0x170   : > { %2736 = vmatprep.subr.bf16.mxu0 %v6715_v37  ;;  %v6725_v37 = vld [vmem:[%s10251_s1 + $0x1e4] ss:$8 sps:$4 sm:$0xff]  }
 0x173   : > { %2737 = vmatpush1.bf16.msra.mxu0 %v6716_v2  ;;  %v6726_v2 = vld [vmem:[%s10251_s1 + $0x1e0] ss:$8 sps:$4 sm:$0xff]  }
 0x174   : > { %2738 = vmatprep.subr.bf16.mxu0 %v6717_v39  ;;  %v6727_v39 = vld [vmem:[%s10251_s1 + $0x1f4] ss:$8 sps:$4 sm:$0xff]  }
 0x177   : > { %2739 = vmatpush1.bf16.msra.mxu0 %v6718_v29  ;;  %v6728_v29 = vld [vmem:[%s10251_s1 + $0x1f0] ss:$8 sps:$4 sm:$0xff]  }
 0x178   : > { %2740 = vmatprep.subr.bf16.mxu0 %v6719_v40  ;;  %v6729_v40 = vld [vmem:[%s10251_s1 + $0x304] ss:$8 sps:$4 sm:$0xff]  }
 0x17b   : > { %2741 = vmatpush1.bf16.msra.mxu0 %v6720_v41 }
 0x17c   : > { %2742 = vmatprep.subr.bf16.mxu0 %v6721_v31 }
 0x17f   : > { %2743 = vmatpush1.bf16.msra.mxu0 %v6722_v43 }
 0x180   : > { %2744 = vmatprep.subr.bf16.mxu0 %v6723_v35 }
 0x183   : > { %2745 = vmatpush1.bf16.msra.mxu0 %v6724_v28 }
 0x184   : > { %2746 = vmatprep.subr.bf16.mxu0 %v6725_v37 }
 0x187   : > { %2747 = vmatpush1.bf16.msra.mxu0 %v6726_v2  ;;  %v6287_v2 = vld [vmem:[%s10252_s2 + $0x4] ss:$8 sps:$4 sm:$0xff]  }
 0x188   : > { %2748 = vmatprep.subr.bf16.mxu0 %v6727_v39  ;;  %5789 = vmatprep.mubr.msk.bf16.mxu1 %vm2578_vm0, %v6287_v2  ;;  %v2626_v2 = vld [vmem:[%s401_s19 + $0x8] sm:$0xff] }
 0x18b   : > { %2749 = vmatpush1.bf16.msra.mxu0 %v6728_v29  ;;  %v2557_v29 = vld [vmem:[%s10253_s3] sm:$0xff] }
 0x18c   : > { %2808 = vmatprep.subr.bf16.mxu0 %v6729_v40  ;;  %2561 = vperm.xlu0 %5853, %v2557_v29   ;;  %v3161_v29 = vld [vmem:[%s10258_s8] sm:$0xff] }
 0x1a1   : > { %v1594_v41 = vpop.f32.mrb[8].mxu0 }
 0x1a2   : > { %v1596_v31 = vpop.f32.mrb[9].mxu0 }
 0x1a3   : > { %v1598_v43 = vpop.f32.mrb[10].mxu0  ;;  %v1832_v39 = vpop.f32.mrb[8].mxu1 }
 0x1a4   : > { %v1603_v35 = vpack.c.bf16 %v1598_v43, %v1594_v41  ;;  %v1600_v28 = vpop.f32.mrb[11].mxu0  ;;  %v1834_v40 = vpop.f32.mrb[9].mxu1 }
 0x1a5   : > { %v1604_v37 = vpack.c.bf16 %v1600_v28, %v1596_v31  ;;  %v1836_v41 = vpop.f32.mrb[10].mxu1  ;;  %v2625_v31 = vld [vmem:[%s401_s19] sm:$0xff]  ;;  %v2558_v28 = vld [vmem:[%s10253_s3 + $0x8] sm:$0xff]  ;;  %s406_s19 = scalar_lea.vmem %s10261_s11, %s5841_s24 }
 0x1a6   : > { %v1841_v43 = vpack.c.bf16 %v1836_v41, %v1832_v39  ;;  %2629 = vperm.xlu1 %5854, %v2625_v31   ;;  %2566 = vperm.xlu0 %5853, %v2558_v28   ;;  %v3138_v39 = vld [vmem:[%s10256_s6 + $0x8] sm:$0xff] }
 0x1a7   : > { %2590 = vmatprep.subr.bf16.mxu1 %v1604_v37  ;;  %v3162_v41 = vld [vmem:[%s10258_s8 + $0x8] sm:$0xff] }
 0x1a8   : > { %2591 = vmatpush1.bf16.msra.mxu1 %v1603_v35  ;;  %v1838_v35 = vpop.f32.mrb[11].mxu1 }
 0x1a9   : > { %v1842_v37 = vpack.c.bf16 %v1838_v35, %v1834_v40  ;;  %v3163_v40 = vld [vmem:[%s10258_s8 + $0x10] sm:$0xff] }
 0x1aa   : > { %2634 = vperm.xlu1 %5854, %v2626_v2   ;;  %3141 = vperm.xlu0 %5853, %v3137_v26  }
 0x1ab   : > { %2592 = vmatprep.subr.bf16.mxu1 %v1842_v37 }
 0x1ac   : > { %2593 = vmatpush1.bf16.msra.mxu1 %v1841_v43 }
 0x1ae   : > { %3146 = vperm.xlu1 %5854, %v3138_v39   ;;  %3169 = vperm.xlu0 %5853, %v3161_v29  }
 0x1b2   : > { %3179 = vperm.xlu1 %5854, %v3163_v40  }
 0x1b6   : > { %3174 = vperm.xlu1 %5854, %v3162_v41  }
 0x1e1   : > { %v2070_v31 = vpop.f32.mrb[12].mxu0 }
 0x1e2   : > { %v2072_v43 = vpop.f32.mrb[13].mxu0 }
 0x1e3   : > { %v2074_v35 = vpop.f32.mrb[14].mxu0  ;;  %v2308_v2 = vpop.f32.mrb[12].mxu1 }
 0x1e4   : > { %v2079_v26 = vpack.c.bf16 %v2074_v35, %v2070_v31  ;;  %v2076_v28 = vpop.f32.mrb[15].mxu0  ;;  %v2310_v39 = vpop.f32.mrb[13].mxu1  ;;  %v6289_v31 = vld [vmem:[%s10252_s2] ss:$8 sps:$4 sm:$0xff]   ;;  %v6738_v35 = vld [vmem:[%s10251_s1 + $0x44] ss:$8 sps:$4 sm:$0xff]  }
 0x1e5   : > { %v2080_v37 = vpack.c.bf16 %v2076_v28, %v2072_v43  ;;  %v2312_v25 = vpop.f32.mrb[14].mxu1  ;;  %v6737_v43 = vld [vmem:[%s10251_s1 + $0x30] ss:$8 sps:$4 sm:$0xff]   ;;  %v6740_v28 = vld [vmem:[%s10251_s1 + $0x54] ss:$8 sps:$4 sm:$0xff]  }
 0x1e6   : > { %v2317_v24 = vpack.c.bf16 %v2312_v25, %v2308_v2  ;;  %v2314_v54 = vpop.f32.mrb[15].mxu1  ;;  %v6730_v25 = vld [vmem:[%s10251_s1 + $0x4] ss:$8 sps:$4 sm:$0xff]  }
 0x1e7   : > { %2594 = vmatprep.subr.bf16.mxu1 %v2080_v37  ;;  %v2318_v29 = vpack.c.bf16 %v2314_v54, %v2310_v39  ;;  %v6731_v54 = vld [vmem:[%s10251_s1] ss:$8 sps:$4 sm:$0xff]   ;;  %v6741_v37 = vld [vmem:[%s10251_s1 + $0x50] ss:$8 sps:$4 sm:$0xff]   ;;  %v6742_v2 = vld [vmem:[%s10251_s1 + $0x64] ss:$8 sps:$4 sm:$0xff]  }
 0x1e8   : > { %2595 = vmatpush1.bf16.msra.mxu1 %v2079_v26  ;;  %v6739_v26 = vld [vmem:[%s10251_s1 + $0x40] ss:$8 sps:$4 sm:$0xff]  }
 0x1e9   : > { %2596 = vmatprep.subr.bf16.mxu1 %v2318_v29  ;;  %v6743_v39 = vld [vmem:[%s10251_s1 + $0x60] ss:$8 sps:$4 sm:$0xff]   ;;  %v6744_v29 = vld [vmem:[%s10251_s1 + $0x74] ss:$8 sps:$4 sm:$0xff]  }
 0x1ec   : > { %2597 = vmatpush1.bf16.msra.mxu1 %v2317_v24  ;;  %v6736_v24 = vld [vmem:[%s10251_s1 + $0x34] ss:$8 sps:$4 sm:$0xff]  }
 0x221   : > { %v2546_v40 = vpop.f32.mrb[16].mxu0 }
 0x222   : > { %v2548_v53 = vpop.f32.mrb[17].mxu0 }
 0x223   : > { %v2550_v50 = vpop.f32.mrb[18].mxu0 }
 0x224   : > { %v2555_v41 = vpack.c.bf16 %v2550_v50, %v2546_v40  ;;  %v2552_v49 = vpop.f32.mrb[19].mxu0  ;;  %v6734_v50 = vld [vmem:[%s10251_s1 + $0x24] ss:$8 sps:$4 sm:$0xff]   ;;  %v6745_v40 = vld [vmem:[%s10251_s1 + $0x70] ss:$8 sps:$4 sm:$0xff]  }
 0x225   : > { %v2556_v46 = vpack.c.bf16 %v2552_v49, %v2548_v53  ;;  %v6733_v49 = vld [vmem:[%s10251_s1 + $0x10] ss:$8 sps:$4 sm:$0xff]   ;;  %v6735_v53 = vld [vmem:[%s10251_s1 + $0x20] ss:$8 sps:$4 sm:$0xff]  }
 0x227   : > { %2598 = vmatprep.subr.bf16.mxu1 %v2556_v46  ;;  %v6732_v46 = vld [vmem:[%s10251_s1 + $0x14] ss:$8 sps:$4 sm:$0xff]  }
 0x228   : > { %2599 = vmatpush1.bf16.msra.mxu1 %v2555_v41  ;;  %v6746_v41 = vld [vmem:[%s10251_s1 + $0x84] ss:$8 sps:$4 sm:$0xff]  }
 0x229   : > { %2673 = vmatprep.subr.bf16.mxu1 %v6730_v25  ;;  %v6748_v25 = vld [vmem:[%s10251_s1 + $0x94] ss:$8 sps:$4 sm:$0xff]  }
 0x22b   : > { %2615 = vmatmul.mubr.bf16.vlgmr.msra.gmra.mrb[16].mxu1 %v6289_v31  ;;  %v6747_v31 = vld [vmem:[%s10251_s1 + $0x80] ss:$8 sps:$4 sm:$0xff]  }
 0x22c   : > { %2674 = vmatpush1.bf16.msra.mxu1 %v6731_v54  ;;  %v6749_v54 = vld [vmem:[%s10251_s1 + $0x90] ss:$8 sps:$4 sm:$0xff]  }
 0x22d   : > { %2675 = vmatprep.subr.bf16.mxu1 %v6732_v46  ;;  %v6750_v46 = vld [vmem:[%s10251_s1 + $0xa4] ss:$8 sps:$4 sm:$0xff]  }
 0x230   : > { %2676 = vmatpush1.bf16.msra.mxu1 %v6733_v49  ;;  %v6751_v49 = vld [vmem:[%s10251_s1 + $0xa0] ss:$8 sps:$4 sm:$0xff]  }
 0x231   : > { %2677 = vmatprep.subr.bf16.mxu1 %v6734_v50  ;;  %v6752_v50 = vld [vmem:[%s10251_s1 + $0xb4] ss:$8 sps:$4 sm:$0xff]  }
 0x234   : > { %2678 = vmatpush1.bf16.msra.mxu1 %v6735_v53  ;;  %v6753_v53 = vld [vmem:[%s10251_s1 + $0xb0] ss:$8 sps:$4 sm:$0xff]  }
 0x235   : > { %2679 = vmatprep.subr.bf16.mxu1 %v6736_v24  ;;  %v6754_v24 = vld [vmem:[%s10251_s1 + $0xc4] ss:$8 sps:$4 sm:$0xff]  }
 0x238   : > { %2680 = vmatpush1.bf16.msra.mxu1 %v6737_v43  ;;  %v6755_v43 = vld [vmem:[%s10251_s1 + $0xc0] ss:$8 sps:$4 sm:$0xff]  }
 0x239   : > { %2681 = vmatprep.subr.bf16.mxu1 %v6738_v35  ;;  %v6756_v35 = vld [vmem:[%s10251_s1 + $0xd4] ss:$8 sps:$4 sm:$0xff]  }
 0x23c   : > { %2682 = vmatpush1.bf16.msra.mxu1 %v6739_v26  ;;  %v6757_v26 = vld [vmem:[%s10251_s1 + $0xd0] ss:$8 sps:$4 sm:$0xff]  }
 0x23d   : > { %2683 = vmatprep.subr.bf16.mxu1 %v6740_v28  ;;  %v6758_v28 = vld [vmem:[%s10251_s1 + $0xe4] ss:$8 sps:$4 sm:$0xff]  }
 0x240   : > { %2684 = vmatpush1.bf16.msra.mxu1 %v6741_v37  ;;  %v6759_v37 = vld [vmem:[%s10251_s1 + $0xe0] ss:$8 sps:$4 sm:$0xff]  }
 0x241   : > { %2685 = vmatprep.subr.bf16.mxu1 %v6742_v2  ;;  %v6760_v2 = vld [vmem:[%s10251_s1 + $0xf4] ss:$8 sps:$4 sm:$0xff]  }
 0x244   : > { %2686 = vmatpush1.bf16.msra.mxu1 %v6743_v39  ;;  %v6761_v39 = vld [vmem:[%s10251_s1 + $0xf0] ss:$8 sps:$4 sm:$0xff]  }
 0x245   : > { %2687 = vmatprep.subr.bf16.mxu1 %v6744_v29  ;;  %v6762_v29 = vld [vmem:[%s10251_s1 + $0x204] ss:$8 sps:$4 sm:$0xff]  }
 0x248   : > { %2688 = vmatpush1.bf16.msra.mxu1 %v6745_v40  ;;  %v2562_v40 = vpop.permute.xlu0 %2561 }
 0x249   : > { %2689 = vmatprep.subr.bf16.mxu1 %v6746_v41  ;;  %v2630_v41 = vpop.permute.xlu1 %2629 }
 0x24c   : > { %2690 = vmatpush1.bf16.msra.mxu1 %v6747_v31 }
 0x24d   : > { %2691 = vmatprep.subr.bf16.mxu1 %v6748_v25 }
 0x250   : > { %2692 = vmatpush1.bf16.msra.mxu1 %v6749_v54 }
 0x251   : > { %2693 = vmatprep.subr.bf16.mxu1 %v6750_v46  ;;  %v2567_v46 = vpop.permute.xlu0 %2566 }
 0x254   : > { %2694 = vmatpush1.bf16.msra.mxu1 %v6751_v49 }
 0x255   : > { %2695 = vmatprep.subr.bf16.mxu1 %v6752_v50 }
 0x258   : > { %2696 = vmatpush1.bf16.msra.mxu1 %v6753_v53 }
 0x259   : > { %2697 = vmatprep.subr.bf16.mxu1 %v6754_v24 }
 0x25c   : > { %2698 = vmatpush1.bf16.msra.mxu1 %v6755_v43 }
 0x25d   : > { %2699 = vmatprep.subr.bf16.mxu1 %v6756_v35  ;;  %v2635_v35 = vpop.permute.xlu1 %2634 }
 0x260   : > { %2700 = vmatpush1.bf16.msra.mxu1 %v6757_v26 }
 0x261   : > { %2701 = vmatprep.subr.bf16.mxu1 %v6758_v28 }
 0x264   : > { %2702 = vmatpush1.bf16.msra.mxu1 %v6759_v37 }
 0x265   : > { %2703 = vmatprep.subr.bf16.mxu1 %v6760_v2 }
 0x268   : > { %2704 = vmatpush1.bf16.msra.mxu1 %v6761_v39 }
 0x269   : > { %2763 = vmatprep.subr.bf16.mxu1 %v6762_v29 }
 0x2fe   : > { %v2616_v31 = vpop.f32.mrb[16].mxu1 }
 0x2ff   : > { %v2617_v25 = vadd.f32 %v2616_v31, %v2562_v40  ;;  %v2618_v54 = vpop.f32.mrb[17].mxu1 }
 0x300   : > { %v2619_v49 = vadd.f32 %v2618_v54, %v2562_v40  ;;  %v2620_v50 = vpop.f32.mrb[18].mxu1 }
 0x301   : > { %v2637_v53 = vadd.f32 %v2630_v41, %v2617_v25  ;;  %v2621_v24 = vadd.f32 %v2620_v50, %v2567_v46  ;;  %v2622_v43 = vpop.f32.mrb[19].mxu1 }
 0x302   : > { %v2638_v26 = vadd.f32 %v2630_v41, %v2619_v49  ;;  %v2623_v28 = vadd.f32 %v2622_v43, %v2567_v46 }
 0x303   : > { %v5790_v37 = vmul.f32 -1.442695, %v2637_v53  ;;  %v2639_v2 = vadd.f32 %v2635_v35, %v2621_v24 }
 0x304   : > { %v5791_v39 = vmul.f32 -1.442695, %v2638_v26  ;;  %v2640_v45 = vadd.f32 %v2635_v35, %v2623_v28 }
 0x305   : > { %6297 = vpow2.f32 %v5790_v37  ;;  %v5792_v29 = vmul.f32 -1.442695, %v2639_v2 }
 0x306   : > { %6299 = vpow2.f32 %v5791_v39  ;;  %v5793_v44 = vmul.f32 -1.442695, %v2640_v45 }
 0x307   : > { %6301 = vpow2.f32 %v5792_v29 }
 0x308   : > { %6303 = vpow2.f32 %v5793_v44 }
 0x30f   : > { %v6298_v31 = vpop.eup %6297 }
 0x310   : > { %v6300_v42 = vpop.eup %6299  ;;  %v2653_v40 = vadd.f32 1.0, %v6298_v31  ;;  %v6769_v31 = vld [vmem:[%s10251_s1 + $0x224] ss:$8 sps:$4 sm:$0xff]  }
 0x311   : > { %v6302_v54 = vpop.eup %6301  ;;  %v2654_v25 = vadd.f32 1.0, %v6300_v42  ;;  %v6764_v42 = vld [vmem:[%s10251_s1 + $0x300] ss:$8 sps:$4 sm:$0xff]  }
 0x312   : > { %v6304_v50 = vpop.eup %6303  ;;  %6305 = vrcp.f32 %v2653_v40  ;;  %v2655_v36 = vadd.f32 1.0, %v6302_v54  ;;  %v6770_v40 = vld [vmem:[%s10251_s1 + $0x324] ss:$8 sps:$4 sm:$0xff]   ;;  %v6771_v54 = vld [vmem:[%s10251_s1 + $0x220] ss:$8 sps:$4 sm:$0xff]  }
 0x313   : > { %6307 = vrcp.f32 %v2654_v25  ;;  %v2656_v41 = vadd.f32 1.0, %v6304_v50  ;;  %v6772_v25 = vld [vmem:[%s10251_s1 + $0x320] ss:$8 sps:$4 sm:$0xff]   ;;  %v6773_v50 = vld [vmem:[%s10251_s1 + $0x234] ss:$8 sps:$4 sm:$0xff]  }
 0x314   : > { %6309 = vrcp.f32 %v2655_v36  ;;  %v6763_v36 = vld [vmem:[%s10251_s1 + $0x200] ss:$8 sps:$4 sm:$0xff]  }
 0x315   : > { %6311 = vrcp.f32 %v2656_v41  ;;  %v6774_v41 = vld [vmem:[%s10251_s1 + $0x334] ss:$8 sps:$4 sm:$0xff]  }
 0x31c   : > { %v6306_v46 = vpop.eup %6305 }
 0x31d   : > { %v6308_v49 = vpop.eup %6307  ;;  %v2665_v35 = vmul.f32 %v6306_v46, %v2637_v53  ;;  %v6766_v53 = vld [vmem:[%s10251_s1 + $0x314] ss:$8 sps:$4 sm:$0xff]   ;;  %v6775_v46 = vld [vmem:[%s10251_s1 + $0x230] ss:$8 sps:$4 sm:$0xff]  }
 0x31e   : > { %v6310_v24 = vpop.eup %6309  ;;  %v2666_v37 = vmul.f32 %v6308_v49, %v2638_v26  ;;  %v6767_v26 = vld [vmem:[%s10251_s1 + $0x210] ss:$8 sps:$4 sm:$0xff]  }
 0x31f   : > { %v6312_v43 = vpop.eup %6311  ;;  %v2667_v28 = vmul.f32 %v6310_v24, %v2639_v2  ;;  %v6768_v2 = vld [vmem:[%s10251_s1 + $0x310] ss:$8 sps:$4 sm:$0xff]   ;;  %v6777_v24 = vld [vmem:[%s10251_s1 + $0x244] ss:$8 sps:$4 sm:$0xff]  }
 0x320   : > { %v2668_v44 = vmul.f32 %v6312_v43, %v2640_v45  ;;  %v6765_v45 = vld [vmem:[%s10251_s1 + $0x214] ss:$8 sps:$4 sm:$0xff]   ;;  %v6776_v49 = vld [vmem:[%s10251_s1 + $0x330] ss:$8 sps:$4 sm:$0xff]   ;;  %v6778_v43 = vld [vmem:[%s10251_s1 + $0x344] ss:$8 sps:$4 sm:$0xff]  }
 0x321   : > { %v8314_v39 = vpack.c.bf16 %v2667_v28, %v2665_v35  ;;  %v6779_v35 = vld [vmem:[%s10251_s1 + $0x240] ss:$8 sps:$4 sm:$0xff]  }
 0x322   : > { %v8316_v29 = vpack.c.bf16 %v2668_v44, %v2666_v37  ;;  %v6780_v28 = vld [vmem:[%s10251_s1 + $0x340] ss:$8 sps:$4 sm:$0xff]   ;;  %v6781_v37 = vld [vmem:[%s10251_s1 + $0x254] ss:$8 sps:$4 sm:$0xff]  }
 0x323   : > { %v6782_v44 = vld [vmem:[%s10251_s1 + $0x354] ss:$8 sps:$4 sm:$0xff]  }
 0x324   : > { %2705 = vmatprep.mubr.bf16.mxu1 %v8316_v29  ;;  %2750 = vmatprep.mubr.bf16.mxu0 %v8316_v29 }
 0x325   : > { %2706 = vmatmul.mubr.bf16.vlgmr.msra.gmra.mrb[20].mxu1 %v8314_v39  ;;  %2751 = vmatmul.mubr.bf16.vlgmr.msra.gmra.mrb[20].mxu0 %v8314_v39 }
 0x326   : > { %2764 = vmatpush1.bf16.msra.mxu1 %v6763_v36  ;;  %2809 = vmatpush1.bf16.msra.mxu0 %v6764_v42  ;;  %v6783_v36 = vld [vmem:[%s10251_s1 + $0x250] ss:$8 sps:$4 sm:$0xff]  }
 0x327   : > { %2795 = vmatprep.mubr.bf16.mxu1 %v8316_v29  ;;  %2840 = vmatprep.mubr.bf16.mxu0 %v8316_v29  ;;  %v6784_v42 = vld [vmem:[%s10251_s1 + $0x350] ss:$8 sps:$4 sm:$0xff]  }
 0x328   : > { %2765 = vmatprep.subr.bf16.mxu1 %v6765_v45  ;;  %2810 = vmatprep.subr.bf16.mxu0 %v6766_v53  ;;  %v6785_v45 = vld [vmem:[%s10251_s1 + $0x264] ss:$8 sps:$4 sm:$0xff]  }
 0x329   : > { %v6786_v53 = vld [vmem:[%s10251_s1 + $0x364] ss:$8 sps:$4 sm:$0xff]  }
 0x32a   : > { %2766 = vmatpush1.bf16.msra.mxu1 %v6767_v26  ;;  %2811 = vmatpush1.bf16.msra.mxu0 %v6768_v2  ;;  %v6787_v26 = vld [vmem:[%s10251_s1 + $0x260] ss:$8 sps:$4 sm:$0xff]  }
 0x32b   : > { %2767 = vmatprep.subr.bf16.mxu1 %v6769_v31  ;;  %2812 = vmatprep.subr.bf16.mxu0 %v6770_v40  ;;  %v6788_v2 = vld [vmem:[%s10251_s1 + $0x360] ss:$8 sps:$4 sm:$0xff]   ;;  %v6789_v31 = vld [vmem:[%s10251_s1 + $0x274] ss:$8 sps:$4 sm:$0xff]  }
 0x32c   : > { %v6790_v40 = vld [vmem:[%s10251_s1 + $0x374] ss:$8 sps:$4 sm:$0xff]  }
 0x32e   : > { %2768 = vmatpush1.bf16.msra.mxu1 %v6771_v54  ;;  %2813 = vmatpush1.bf16.msra.mxu0 %v6772_v25  ;;  %v6791_v54 = vld [vmem:[%s10251_s1 + $0x270] ss:$8 sps:$4 sm:$0xff]  }
 0x32f   : > { %2769 = vmatprep.subr.bf16.mxu1 %v6773_v50  ;;  %2814 = vmatprep.subr.bf16.mxu0 %v6774_v41  ;;  %v6792_v25 = vld [vmem:[%s10251_s1 + $0x370] ss:$8 sps:$4 sm:$0xff]   ;;  %v6793_v50 = vld [vmem:[%s10251_s1 + $0x284] ss:$8 sps:$4 sm:$0xff]  }
 0x330   : > { %v6794_v41 = vld [vmem:[%s10251_s1 + $0x384] ss:$8 sps:$4 sm:$0xff]  }
 0x332   : > { %2770 = vmatpush1.bf16.msra.mxu1 %v6775_v46  ;;  %2815 = vmatpush1.bf16.msra.mxu0 %v6776_v49  ;;  %v6795_v46 = vld [vmem:[%s10251_s1 + $0x280] ss:$8 sps:$4 sm:$0xff]  }
 0x333   : > { %2771 = vmatprep.subr.bf16.mxu1 %v6777_v24  ;;  %2816 = vmatprep.subr.bf16.mxu0 %v6778_v43  ;;  %v6796_v49 = vld [vmem:[%s10251_s1 + $0x380] ss:$8 sps:$4 sm:$0xff]   ;;  %v6797_v24 = vld [vmem:[%s10251_s1 + $0x294] ss:$8 sps:$4 sm:$0xff]  }
 0x334   : > { %v6798_v43 = vld [vmem:[%s10251_s1 + $0x394] ss:$8 sps:$4 sm:$0xff]  }
 0x336   : > { %2772 = vmatpush1.bf16.msra.mxu1 %v6779_v35  ;;  %2817 = vmatpush1.bf16.msra.mxu0 %v6780_v28  ;;  %v6799_v35 = vld [vmem:[%s10251_s1 + $0x290] ss:$8 sps:$4 sm:$0xff]  }
 0x337   : > { %2773 = vmatprep.subr.bf16.mxu1 %v6781_v37  ;;  %2818 = vmatprep.subr.bf16.mxu0 %v6782_v44  ;;  %v6800_v28 = vld [vmem:[%s10251_s1 + $0x390] ss:$8 sps:$4 sm:$0xff]   ;;  %v6801_v37 = vld [vmem:[%s10251_s1 + $0x2a4] ss:$8 sps:$4 sm:$0xff]  }
 0x338   : > { %v6802_v44 = vld [vmem:[%s10251_s1 + $0x3a4] ss:$8 sps:$4 sm:$0xff]  }
 0x33a   : > { %2774 = vmatpush1.bf16.msra.mxu1 %v6783_v36  ;;  %2819 = vmatpush1.bf16.msra.mxu0 %v6784_v42  ;;  %v6803_v36 = vld [vmem:[%s10251_s1 + $0x2a0] ss:$8 sps:$4 sm:$0xff]  }
 0x33b   : > { %2775 = vmatprep.subr.bf16.mxu1 %v6785_v45  ;;  %2820 = vmatprep.subr.bf16.mxu0 %v6786_v53  ;;  %v6804_v42 = vld [vmem:[%s10251_s1 + $0x3a0] ss:$8 sps:$4 sm:$0xff]   ;;  %v6805_v45 = vld [vmem:[%s10251_s1 + $0x2b4] ss:$8 sps:$4 sm:$0xff]  }
 0x33c   : > { %v6806_v53 = vld [vmem:[%s10251_s1 + $0x3b4] ss:$8 sps:$4 sm:$0xff]  }
 0x33e   : > { %2776 = vmatpush1.bf16.msra.mxu1 %v6787_v26  ;;  %2821 = vmatpush1.bf16.msra.mxu0 %v6788_v2  ;;  %v6807_v26 = vld [vmem:[%s10251_s1 + $0x2b0] ss:$8 sps:$4 sm:$0xff]  }
 0x33f   : > { %2777 = vmatprep.subr.bf16.mxu1 %v6789_v31  ;;  %2822 = vmatprep.subr.bf16.mxu0 %v6790_v40  ;;  %v6808_v2 = vld [vmem:[%s10251_s1 + $0x3b0] ss:$8 sps:$4 sm:$0xff]   ;;  %v6809_v31 = vld [vmem:[%s10251_s1 + $0x2c4] ss:$8 sps:$4 sm:$0xff]  }
 0x340   : > { %v6810_v40 = vld [vmem:[%s10251_s1 + $0x3c4] ss:$8 sps:$4 sm:$0xff]  }
 0x342   : > { %2778 = vmatpush1.bf16.msra.mxu1 %v6791_v54  ;;  %2823 = vmatpush1.bf16.msra.mxu0 %v6792_v25  ;;  %v6811_v54 = vld [vmem:[%s10251_s1 + $0x2c0] ss:$8 sps:$4 sm:$0xff]  }
 0x343   : > { %2779 = vmatprep.subr.bf16.mxu1 %v6793_v50  ;;  %2824 = vmatprep.subr.bf16.mxu0 %v6794_v41  ;;  %v6812_v25 = vld [vmem:[%s10251_s1 + $0x3c0] ss:$8 sps:$4 sm:$0xff]   ;;  %v6813_v50 = vld [vmem:[%s10251_s1 + $0x2d4] ss:$8 sps:$4 sm:$0xff]  }
 0x344   : > { %v6814_v41 = vld [vmem:[%s10251_s1 + $0x3d4] ss:$8 sps:$4 sm:$0xff]  }
 0x346   : > { %2780 = vmatpush1.bf16.msra.mxu1 %v6795_v46  ;;  %2825 = vmatpush1.bf16.msra.mxu0 %v6796_v49  ;;  %v6815_v46 = vld [vmem:[%s10251_s1 + $0x2d0] ss:$8 sps:$4 sm:$0xff]  }
 0x347   : > { %2781 = vmatprep.subr.bf16.mxu1 %v6797_v24  ;;  %2826 = vmatprep.subr.bf16.mxu0 %v6798_v43  ;;  %v6816_v49 = vld [vmem:[%s10251_s1 + $0x3d0] ss:$8 sps:$4 sm:$0xff]   ;;  %v6817_v24 = vld [vmem:[%s10251_s1 + $0x2e4] ss:$8 sps:$4 sm:$0xff]  }
 0x348   : > { %v6818_v43 = vld [vmem:[%s10251_s1 + $0x3e4] ss:$8 sps:$4 sm:$0xff]  }
 0x34a   : > { %2782 = vmatpush1.bf16.msra.mxu1 %v6799_v35  ;;  %2827 = vmatpush1.bf16.msra.mxu0 %v6800_v28  ;;  %v6819_v35 = vld [vmem:[%s10251_s1 + $0x2e0] ss:$8 sps:$4 sm:$0xff]  }
 0x34b   : > { %2783 = vmatprep.subr.bf16.mxu1 %v6801_v37  ;;  %2828 = vmatprep.subr.bf16.mxu0 %v6802_v44  ;;  %v6820_v28 = vld [vmem:[%s10251_s1 + $0x3e0] ss:$8 sps:$4 sm:$0xff]   ;;  %v6821_v37 = vld [vmem:[%s10251_s1 + $0x2f4] ss:$8 sps:$4 sm:$0xff]  }
 0x34c   : > { %v6822_v44 = vld [vmem:[%s10251_s1 + $0x3f4] ss:$8 sps:$4 sm:$0xff]  }
 0x34e   : > { %2784 = vmatpush1.bf16.msra.mxu1 %v6803_v36  ;;  %2829 = vmatpush1.bf16.msra.mxu0 %v6804_v42  ;;  %v6823_v36 = vld [vmem:[%s10251_s1 + $0x2f0] ss:$8 sps:$4 sm:$0xff]  }
 0x34f   : > { %2785 = vmatprep.subr.bf16.mxu1 %v6805_v45  ;;  %2830 = vmatprep.subr.bf16.mxu0 %v6806_v53  ;;  %v6824_v42 = vld [vmem:[%s10251_s1 + $0x3f0] ss:$8 sps:$4 sm:$0xff]   ;;  %v6825_v45 = vld [vmem:[%s10251_s1 + $0x404] ss:$8 sps:$4 sm:$0xff]  }
 0x350   : > { %v6826_v53 = vld [vmem:[%s10251_s1 + $0x504] ss:$8 sps:$4 sm:$0xff]  }
 0x352   : > { %2786 = vmatpush1.bf16.msra.mxu1 %v6807_v26  ;;  %2831 = vmatpush1.bf16.msra.mxu0 %v6808_v2  ;;  %v6827_v26 = vld [vmem:[%s10251_s1 + $0x400] ss:$8 sps:$4 sm:$0xff]  }
 0x353   : > { %2787 = vmatprep.subr.bf16.mxu1 %v6809_v31  ;;  %2832 = vmatprep.subr.bf16.mxu0 %v6810_v40  ;;  %v6828_v2 = vld [vmem:[%s10251_s1 + $0x500] ss:$8 sps:$4 sm:$0xff]   ;;  %v6829_v31 = vld [vmem:[%s10251_s1 + $0x414] ss:$8 sps:$4 sm:$0xff]  }
 0x354   : > { %v6830_v40 = vld [vmem:[%s10251_s1 + $0x514] ss:$8 sps:$4 sm:$0xff]  }
 0x356   : > { %2788 = vmatpush1.bf16.msra.mxu1 %v6811_v54  ;;  %2833 = vmatpush1.bf16.msra.mxu0 %v6812_v25  ;;  %v6831_v54 = vld [vmem:[%s10251_s1 + $0x410] ss:$8 sps:$4 sm:$0xff]  }
 0x357   : > { %2789 = vmatprep.subr.bf16.mxu1 %v6813_v50  ;;  %2834 = vmatprep.subr.bf16.mxu0 %v6814_v41  ;;  %v6832_v25 = vld [vmem:[%s10251_s1 + $0x510] ss:$8 sps:$4 sm:$0xff]   ;;  %v6833_v50 = vld [vmem:[%s10251_s1 + $0x424] ss:$8 sps:$4 sm:$0xff]  }
 0x358   : > { %v6834_v41 = vld [vmem:[%s10251_s1 + $0x524] ss:$8 sps:$4 sm:$0xff]  }
 0x35a   : > { %2790 = vmatpush1.bf16.msra.mxu1 %v6815_v46  ;;  %2835 = vmatpush1.bf16.msra.mxu0 %v6816_v49  ;;  %v6835_v46 = vld [vmem:[%s10251_s1 + $0x420] ss:$8 sps:$4 sm:$0xff]  }
 0x35b   : > { %2791 = vmatprep.subr.bf16.mxu1 %v6817_v24  ;;  %2836 = vmatprep.subr.bf16.mxu0 %v6818_v43  ;;  %v6836_v49 = vld [vmem:[%s10251_s1 + $0x520] ss:$8 sps:$4 sm:$0xff]   ;;  %v6837_v24 = vld [vmem:[%s10251_s1 + $0x434] ss:$8 sps:$4 sm:$0xff]  }
 0x35c   : > { %v6838_v43 = vld [vmem:[%s10251_s1 + $0x534] ss:$8 sps:$4 sm:$0xff]  }
 0x35e   : > { %2792 = vmatpush1.bf16.msra.mxu1 %v6819_v35  ;;  %2837 = vmatpush1.bf16.msra.mxu0 %v6820_v28  ;;  %v6839_v35 = vld [vmem:[%s10251_s1 + $0x430] ss:$8 sps:$4 sm:$0xff]  }
 0x35f   : > { %2793 = vmatprep.subr.bf16.mxu1 %v6821_v37  ;;  %2838 = vmatprep.subr.bf16.mxu0 %v6822_v44  ;;  %v6840_v28 = vld [vmem:[%s10251_s1 + $0x530] ss:$8 sps:$4 sm:$0xff]   ;;  %v6841_v37 = vld [vmem:[%s10251_s1 + $0x444] ss:$8 sps:$4 sm:$0xff]  }
 0x360   : > { %v6842_v44 = vld [vmem:[%s10251_s1 + $0x544] ss:$8 sps:$4 sm:$0xff]  }
 0x362   : > { %2794 = vmatpush1.bf16.msra.mxu1 %v6823_v36  ;;  %2839 = vmatpush1.bf16.msra.mxu0 %v6824_v42  ;;  %v6843_v36 = vld [vmem:[%s10251_s1 + $0x440] ss:$8 sps:$4 sm:$0xff]  }
 0x363   : > { %2853 = vmatprep.subr.bf16.mxu1 %v6825_v45  ;;  %2898 = vmatprep.subr.bf16.mxu0 %v6826_v53  ;;  %v6844_v42 = vld [vmem:[%s10251_s1 + $0x540] ss:$8 sps:$4 sm:$0xff]   ;;  %v6845_v45 = vld [vmem:[%s10251_s1 + $0x454] ss:$8 sps:$4 sm:$0xff]  }
 0x364   : > { %v6846_v53 = vld [vmem:[%s10251_s1 + $0x554] ss:$8 sps:$4 sm:$0xff]  }
 0x365   : > { %2796 = vmatmul.mubr.bf16.vlgmr.msra.gmra.mrb[24].mxu1 %v8314_v39  ;;  %2841 = vmatmul.mubr.bf16.vlgmr.msra.gmra.mrb[24].mxu0 %v8314_v39 }
 0x366   : > { %2854 = vmatpush1.bf16.msra.mxu1 %v6827_v26  ;;  %2885 = vmatprep.mubr.bf16.mxu1 %v8316_v29  ;;  %v6847_v26 = vld [vmem:[%s10251_s1 + $0x450] ss:$8 sps:$4 sm:$0xff]  }
 0x367   : > { %2899 = vmatpush1.bf16.msra.mxu0 %v6828_v2  ;;  %2930 = vmatprep.mubr.bf16.mxu0 %v8316_v29  ;;  %v6848_v2 = vld [vmem:[%s10251_s1 + $0x550] ss:$8 sps:$4 sm:$0xff]  }
 0x368   : > { %2855 = vmatprep.subr.bf16.mxu1 %v6829_v31  ;;  %2900 = vmatprep.subr.bf16.mxu0 %v6830_v40  ;;  %v6849_v31 = vld [vmem:[%s10251_s1 + $0x464] ss:$8 sps:$4 sm:$0xff]  }
 0x369   : > { %v6850_v40 = vld [vmem:[%s10251_s1 + $0x564] ss:$8 sps:$4 sm:$0xff]  }
 0x36a   : > { %2856 = vmatpush1.bf16.msra.mxu1 %v6831_v54  ;;  %v6851_v54 = vld [vmem:[%s10251_s1 + $0x460] ss:$8 sps:$4 sm:$0xff]  }
 0x36b   : > { %2901 = vmatpush1.bf16.msra.mxu0 %v6832_v25  ;;  %2857 = vmatprep.subr.bf16.mxu1 %v6833_v50  ;;  %v6852_v25 = vld [vmem:[%s10251_s1 + $0x560] ss:$8 sps:$4 sm:$0xff]   ;;  %v6853_v50 = vld [vmem:[%s10251_s1 + $0x474] ss:$8 sps:$4 sm:$0xff]  }
 0x36c   : > { %2902 = vmatprep.subr.bf16.mxu0 %v6834_v41  ;;  %v6854_v41 = vld [vmem:[%s10251_s1 + $0x574] ss:$8 sps:$4 sm:$0xff]  }
 0x36e   : > { %2858 = vmatpush1.bf16.msra.mxu1 %v6835_v46  ;;  %v6855_v46 = vld [vmem:[%s10251_s1 + $0x470] ss:$8 sps:$4 sm:$0xff]  }
 0x36f   : > { %2903 = vmatpush1.bf16.msra.mxu0 %v6836_v49  ;;  %2859 = vmatprep.subr.bf16.mxu1 %v6837_v24  ;;  %v6856_v49 = vld [vmem:[%s10251_s1 + $0x570] ss:$8 sps:$4 sm:$0xff]   ;;  %v6857_v24 = vld [vmem:[%s10251_s1 + $0x484] ss:$8 sps:$4 sm:$0xff]  }
 0x370   : > { %2904 = vmatprep.subr.bf16.mxu0 %v6838_v43  ;;  %v6858_v43 = vld [vmem:[%s10251_s1 + $0x584] ss:$8 sps:$4 sm:$0xff]  }
 0x372   : > { %2860 = vmatpush1.bf16.msra.mxu1 %v6839_v35  ;;  %v6859_v35 = vld [vmem:[%s10251_s1 + $0x480] ss:$8 sps:$4 sm:$0xff]  }
 0x373   : > { %2905 = vmatpush1.bf16.msra.mxu0 %v6840_v28  ;;  %2861 = vmatprep.subr.bf16.mxu1 %v6841_v37  ;;  %v6860_v28 = vld [vmem:[%s10251_s1 + $0x580] ss:$8 sps:$4 sm:$0xff]   ;;  %v6861_v37 = vld [vmem:[%s10251_s1 + $0x494] ss:$8 sps:$4 sm:$0xff]  }
 0x374   : > { %2906 = vmatprep.subr.bf16.mxu0 %v6842_v44  ;;  %v6862_v44 = vld [vmem:[%s10251_s1 + $0x594] ss:$8 sps:$4 sm:$0xff]  }
 0x376   : > { %2862 = vmatpush1.bf16.msra.mxu1 %v6843_v36  ;;  %v6863_v36 = vld [vmem:[%s10251_s1 + $0x490] ss:$8 sps:$4 sm:$0xff]  }
 0x377   : > { %2907 = vmatpush1.bf16.msra.mxu0 %v6844_v42  ;;  %2863 = vmatprep.subr.bf16.mxu1 %v6845_v45  ;;  %v6864_v42 = vld [vmem:[%s10251_s1 + $0x590] ss:$8 sps:$4 sm:$0xff]   ;;  %v6865_v45 = vld [vmem:[%s10251_s1 + $0x4a4] ss:$8 sps:$4 sm:$0xff]  }
 0x378   : > { %2908 = vmatprep.subr.bf16.mxu0 %v6846_v53  ;;  %v6866_v53 = vld [vmem:[%s10251_s1 + $0x5a4] ss:$8 sps:$4 sm:$0xff]  }
 0x37a   : > { %2864 = vmatpush1.bf16.msra.mxu1 %v6847_v26  ;;  %v6867_v26 = vld [vmem:[%s10251_s1 + $0x4a0] ss:$8 sps:$4 sm:$0xff]  }
 0x37b   : > { %2909 = vmatpush1.bf16.msra.mxu0 %v6848_v2  ;;  %2865 = vmatprep.subr.bf16.mxu1 %v6849_v31  ;;  %v6868_v2 = vld [vmem:[%s10251_s1 + $0x5a0] ss:$8 sps:$4 sm:$0xff]   ;;  %v6869_v31 = vld [vmem:[%s10251_s1 + $0x4b4] ss:$8 sps:$4 sm:$0xff]  }
 0x37c   : > { %2910 = vmatprep.subr.bf16.mxu0 %v6850_v40  ;;  %v6870_v40 = vld [vmem:[%s10251_s1 + $0x5b4] ss:$8 sps:$4 sm:$0xff]  }
 0x37e   : > { %2866 = vmatpush1.bf16.msra.mxu1 %v6851_v54  ;;  %v6871_v54 = vld [vmem:[%s10251_s1 + $0x4b0] ss:$8 sps:$4 sm:$0xff]  }
 0x37f   : > { %2911 = vmatpush1.bf16.msra.mxu0 %v6852_v25  ;;  %2867 = vmatprep.subr.bf16.mxu1 %v6853_v50  ;;  %v6872_v25 = vld [vmem:[%s10251_s1 + $0x5b0] ss:$8 sps:$4 sm:$0xff]   ;;  %v6873_v50 = vld [vmem:[%s10251_s1 + $0x4c4] ss:$8 sps:$4 sm:$0xff]  }
 0x380   : > { %2912 = vmatprep.subr.bf16.mxu0 %v6854_v41  ;;  %v6874_v41 = vld [vmem:[%s10251_s1 + $0x5c4] ss:$8 sps:$4 sm:$0xff]  }
 0x382   : > { %2868 = vmatpush1.bf16.msra.mxu1 %v6855_v46  ;;  %v6875_v46 = vld [vmem:[%s10251_s1 + $0x4c0] ss:$8 sps:$4 sm:$0xff]  }
 0x383   : > { %2913 = vmatpush1.bf16.msra.mxu0 %v6856_v49  ;;  %2869 = vmatprep.subr.bf16.mxu1 %v6857_v24  ;;  %v6876_v49 = vld [vmem:[%s10251_s1 + $0x5c0] ss:$8 sps:$4 sm:$0xff]   ;;  %v6877_v24 = vld [vmem:[%s10251_s1 + $0x4d4] ss:$8 sps:$4 sm:$0xff]  }
 0x384   : > { %2914 = vmatprep.subr.bf16.mxu0 %v6858_v43  ;;  %v6878_v43 = vld [vmem:[%s10251_s1 + $0x5d4] ss:$8 sps:$4 sm:$0xff]  }
 0x386   : > { %2870 = vmatpush1.bf16.msra.mxu1 %v6859_v35  ;;  %v6879_v35 = vld [vmem:[%s10251_s1 + $0x4d0] ss:$8 sps:$4 sm:$0xff]  }
 0x387   : > { %2915 = vmatpush1.bf16.msra.mxu0 %v6860_v28  ;;  %2871 = vmatprep.subr.bf16.mxu1 %v6861_v37  ;;  %v6880_v28 = vld [vmem:[%s10251_s1 + $0x5d0] ss:$8 sps:$4 sm:$0xff]   ;;  %v6881_v37 = vld [vmem:[%s10251_s1 + $0x4e4] ss:$8 sps:$4 sm:$0xff]  }
 0x388   : > { %2916 = vmatprep.subr.bf16.mxu0 %v6862_v44  ;;  %v6882_v44 = vld [vmem:[%s10251_s1 + $0x5e4] ss:$8 sps:$4 sm:$0xff]  }
 0x38a   : > { %2872 = vmatpush1.bf16.msra.mxu1 %v6863_v36  ;;  %v6883_v36 = vld [vmem:[%s10251_s1 + $0x4e0] ss:$8 sps:$4 sm:$0xff]  }
 0x38b   : > { %2917 = vmatpush1.bf16.msra.mxu0 %v6864_v42  ;;  %2873 = vmatprep.subr.bf16.mxu1 %v6865_v45  ;;  %v6884_v42 = vld [vmem:[%s10251_s1 + $0x5e0] ss:$8 sps:$4 sm:$0xff]   ;;  %v6885_v45 = vld [vmem:[%s10251_s1 + $0x4f4] ss:$8 sps:$4 sm:$0xff]  }
 0x38c   : > { %2918 = vmatprep.subr.bf16.mxu0 %v6866_v53  ;;  %v6886_v53 = vld [vmem:[%s10251_s1 + $0x5f4] ss:$8 sps:$4 sm:$0xff]  }
 0x38e   : > { %2874 = vmatpush1.bf16.msra.mxu1 %v6867_v26  ;;  %v6887_v26 = vld [vmem:[%s10251_s1 + $0x4f0] ss:$8 sps:$4 sm:$0xff]  }
 0x38f   : > { %2919 = vmatpush1.bf16.msra.mxu0 %v6868_v2  ;;  %2875 = vmatprep.subr.bf16.mxu1 %v6869_v31  ;;  %v6888_v2 = vld [vmem:[%s10251_s1 + $0x5f0] ss:$8 sps:$4 sm:$0xff]   ;;  %v6889_v31 = vld [vmem:[%s10251_s1 + $0x604] ss:$8 sps:$4 sm:$0xff]  }
 0x390   : > { %2920 = vmatprep.subr.bf16.mxu0 %v6870_v40  ;;  %v6890_v40 = vld [vmem:[%s10251_s1 + $0x704] ss:$8 sps:$4 sm:$0xff]  }
 0x392   : > { %2876 = vmatpush1.bf16.msra.mxu1 %v6871_v54  ;;  %v6891_v54 = vld [vmem:[%s10251_s1 + $0x600] ss:$8 sps:$4 sm:$0xff]  }
 0x393   : > { %2921 = vmatpush1.bf16.msra.mxu0 %v6872_v25  ;;  %2877 = vmatprep.subr.bf16.mxu1 %v6873_v50  ;;  %v6892_v25 = vld [vmem:[%s10251_s1 + $0x700] ss:$8 sps:$4 sm:$0xff]   ;;  %v6893_v50 = vld [vmem:[%s10251_s1 + $0x614] ss:$8 sps:$4 sm:$0xff]  }
 0x394   : > { %2922 = vmatprep.subr.bf16.mxu0 %v6874_v41  ;;  %v6894_v41 = vld [vmem:[%s10251_s1 + $0x714] ss:$8 sps:$4 sm:$0xff]  }
 0x396   : > { %2878 = vmatpush1.bf16.msra.mxu1 %v6875_v46  ;;  %v6895_v46 = vld [vmem:[%s10251_s1 + $0x610] ss:$8 sps:$4 sm:$0xff]  }
 0x397   : > { %2923 = vmatpush1.bf16.msra.mxu0 %v6876_v49  ;;  %2879 = vmatprep.subr.bf16.mxu1 %v6877_v24  ;;  %v6896_v49 = vld [vmem:[%s10251_s1 + $0x710] ss:$8 sps:$4 sm:$0xff]   ;;  %v6897_v24 = vld [vmem:[%s10251_s1 + $0x624] ss:$8 sps:$4 sm:$0xff]  }
 0x398   : > { %2924 = vmatprep.subr.bf16.mxu0 %v6878_v43  ;;  %v6898_v43 = vld [vmem:[%s10251_s1 + $0x724] ss:$8 sps:$4 sm:$0xff]  }
 0x39a   : > { %2880 = vmatpush1.bf16.msra.mxu1 %v6879_v35  ;;  %v6899_v35 = vld [vmem:[%s10251_s1 + $0x620] ss:$8 sps:$4 sm:$0xff]  }
 0x39b   : > { %2925 = vmatpush1.bf16.msra.mxu0 %v6880_v28  ;;  %2881 = vmatprep.subr.bf16.mxu1 %v6881_v37  ;;  %v6900_v28 = vld [vmem:[%s10251_s1 + $0x720] ss:$8 sps:$4 sm:$0xff]   ;;  %v6901_v37 = vld [vmem:[%s10251_s1 + $0x634] ss:$8 sps:$4 sm:$0xff]  }
 0x39c   : > { %2926 = vmatprep.subr.bf16.mxu0 %v6882_v44  ;;  %v6902_v44 = vld [vmem:[%s10251_s1 + $0x734] ss:$8 sps:$4 sm:$0xff]  }
 0x39e   : > { %2882 = vmatpush1.bf16.msra.mxu1 %v6883_v36  ;;  %v6903_v36 = vld [vmem:[%s10251_s1 + $0x630] ss:$8 sps:$4 sm:$0xff]  }
 0x39f   : > { %2927 = vmatpush1.bf16.msra.mxu0 %v6884_v42  ;;  %2883 = vmatprep.subr.bf16.mxu1 %v6885_v45  ;;  %v6904_v42 = vld [vmem:[%s10251_s1 + $0x730] ss:$8 sps:$4 sm:$0xff]   ;;  %v6905_v45 = vld [vmem:[%s10251_s1 + $0x644] ss:$8 sps:$4 sm:$0xff]  }
 0x3a0   : > { %2928 = vmatprep.subr.bf16.mxu0 %v6886_v53  ;;  %v6906_v53 = vld [vmem:[%s10251_s1 + $0x744] ss:$8 sps:$4 sm:$0xff]  }
 0x3a2   : > { %2884 = vmatpush1.bf16.msra.mxu1 %v6887_v26  ;;  %v6907_v26 = vld [vmem:[%s10251_s1 + $0x640] ss:$8 sps:$4 sm:$0xff]  }
 0x3a3   : > { %2929 = vmatpush1.bf16.msra.mxu0 %v6888_v2  ;;  %2943 = vmatprep.subr.bf16.mxu1 %v6889_v31  ;;  %v6908_v2 = vld [vmem:[%s10251_s1 + $0x740] ss:$8 sps:$4 sm:$0xff]   ;;  %v6909_v31 = vld [vmem:[%s10251_s1 + $0x654] ss:$8 sps:$4 sm:$0xff]  }
 0x3a4   : > { %2988 = vmatprep.subr.bf16.mxu0 %v6890_v40  ;;  %v6910_v40 = vld [vmem:[%s10251_s1 + $0x754] ss:$8 sps:$4 sm:$0xff]  }
 0x3a5   : > { %2886 = vmatmul.mubr.bf16.vlgmr.msra.gmra.mrb[28].mxu1 %v8314_v39 }
 0x3a6   : > { %2931 = vmatmul.mubr.bf16.vlgmr.msra.gmra.mrb[28].mxu0 %v8314_v39  ;;  %2944 = vmatpush1.bf16.msra.mxu1 %v6891_v54  ;;  %v6911_v54 = vld [vmem:[%s10251_s1 + $0x650] ss:$8 sps:$4 sm:$0xff]  }
 0x3a7   : > { %2975 = vmatprep.mubr.bf16.mxu1 %v8316_v29  ;;  %2989 = vmatpush1.bf16.msra.mxu0 %v6892_v25  ;;  %v6912_v25 = vld [vmem:[%s10251_s1 + $0x750] ss:$8 sps:$4 sm:$0xff]  }
 0x3a8   : > { %3020 = vmatprep.mubr.bf16.mxu0 %v8316_v29  ;;  %2945 = vmatprep.subr.bf16.mxu1 %v6893_v50  ;;  %v6913_v50 = vld [vmem:[%s10251_s1 + $0x664] ss:$8 sps:$4 sm:$0xff]  }
 0x3a9   : > { %2990 = vmatprep.subr.bf16.mxu0 %v6894_v41  ;;  %v6914_v41 = vld [vmem:[%s10251_s1 + $0x764] ss:$8 sps:$4 sm:$0xff]  }
 0x3aa   : > { %2946 = vmatpush1.bf16.msra.mxu1 %v6895_v46  ;;  %v6915_v46 = vld [vmem:[%s10251_s1 + $0x660] ss:$8 sps:$4 sm:$0xff]  }
 0x3ab   : > { %2991 = vmatpush1.bf16.msra.mxu0 %v6896_v49  ;;  %2947 = vmatprep.subr.bf16.mxu1 %v6897_v24  ;;  %v6916_v49 = vld [vmem:[%s10251_s1 + $0x760] ss:$8 sps:$4 sm:$0xff]   ;;  %v6917_v24 = vld [vmem:[%s10251_s1 + $0x674] ss:$8 sps:$4 sm:$0xff]  }
 0x3ac   : > { %2992 = vmatprep.subr.bf16.mxu0 %v6898_v43  ;;  %v6918_v43 = vld [vmem:[%s10251_s1 + $0x774] ss:$8 sps:$4 sm:$0xff]  }
 0x3ae   : > { %2948 = vmatpush1.bf16.msra.mxu1 %v6899_v35  ;;  %v6919_v35 = vld [vmem:[%s10251_s1 + $0x670] ss:$8 sps:$4 sm:$0xff]  }
 0x3af   : > { %2993 = vmatpush1.bf16.msra.mxu0 %v6900_v28  ;;  %2949 = vmatprep.subr.bf16.mxu1 %v6901_v37  ;;  %v6920_v28 = vld [vmem:[%s10251_s1 + $0x684] ss:$8 sps:$4 sm:$0xff]   ;;  %v6921_v37 = vld [vmem:[%s10251_s1 + $0x680] ss:$8 sps:$4 sm:$0xff]  }
 0x3b0   : > { %2994 = vmatprep.subr.bf16.mxu0 %v6902_v44  ;;  %v6922_v44 = vld [vmem:[%s10251_s1 + $0x694] ss:$8 sps:$4 sm:$0xff]  }
 0x3b2   : > { %2950 = vmatpush1.bf16.msra.mxu1 %v6903_v36 }
 0x3b3   : > { %2995 = vmatpush1.bf16.msra.mxu0 %v6904_v42  ;;  %2951 = vmatprep.subr.bf16.mxu1 %v6905_v45 }
 0x3b4   : > { %2996 = vmatprep.subr.bf16.mxu0 %v6906_v53 }
 0x3b6   : > { %2952 = vmatpush1.bf16.msra.mxu1 %v6907_v26 }
 0x3b7   : > { %2997 = vmatpush1.bf16.msra.mxu0 %v6908_v2  ;;  %2953 = vmatprep.subr.bf16.mxu1 %v6909_v31 }
 0x3b8   : > { %2998 = vmatprep.subr.bf16.mxu0 %v6910_v40 }
 0x3ba   : > { %2954 = vmatpush1.bf16.msra.mxu1 %v6911_v54 }
 0x3bb   : > { %2999 = vmatpush1.bf16.msra.mxu0 %v6912_v25  ;;  %2955 = vmatprep.subr.bf16.mxu1 %v6913_v50 }
 0x3bc   : > { %3000 = vmatprep.subr.bf16.mxu0 %v6914_v41 }
 0x3be   : > { %2956 = vmatpush1.bf16.msra.mxu1 %v6915_v46 }
 0x3bf   : > { %3001 = vmatpush1.bf16.msra.mxu0 %v6916_v49  ;;  %2957 = vmatprep.subr.bf16.mxu1 %v6917_v24  ;;  %v6290_v49 = vld [vmem:[%s10255_s5 + $0x4] ss:$8 sps:$4 sm:$0xff]  }
 0x3c0   : > { %3002 = vmatprep.subr.bf16.mxu0 %v6918_v43 }
 0x3c2   : > { %2958 = vmatpush1.bf16.msra.mxu1 %v6919_v35 }
 0x3c3   : > { %3003 = vmatpush1.bf16.msra.mxu0 %v7733_v47  ;;  %2959 = vmatprep.subr.bf16.mxu1 %v6920_v28  ;;  %v6923_v47 = vld [vmem:[%s10251_s1 + $0x690] ss:$8 sps:$4 sm:$0xff]  }
 0x3c4   : > { %3004 = vmatprep.subr.bf16.mxu0 %v7738_v48  ;;  %v6924_v48 = vld [vmem:[%s10251_s1 + $0x6a4] ss:$8 sps:$4 sm:$0xff]  }
 0x3c6   : > { %2960 = vmatpush1.bf16.msra.mxu1 %v6921_v37 }
 0x3c7   : > { %3005 = vmatpush1.bf16.msra.mxu0 %v7750_v51  ;;  %2961 = vmatprep.subr.bf16.mxu1 %v6922_v44  ;;  %v6925_v51 = vld [vmem:[%s10251_s1 + $0x6a0] ss:$8 sps:$4 sm:$0xff]  }
 0x3c8   : > { %3006 = vmatprep.subr.bf16.mxu0 %v7756_v52  ;;  %v6926_v52 = vld [vmem:[%s10251_s1 + $0x6b4] ss:$8 sps:$4 sm:$0xff]  }
 0x3ca   : > { %2962 = vmatpush1.bf16.msra.mxu1 %v6923_v47 }
 0x3cb   : > { %3007 = vmatpush1.bf16.msra.mxu0 %v7768_v55  ;;  %2963 = vmatprep.subr.bf16.mxu1 %v6924_v48  ;;  %v6927_v55 = vld [vmem:[%s10251_s1 + $0x6b0] ss:$8 sps:$4 sm:$0xff]  }
 0x3cc   : > { %3008 = vmatprep.subr.bf16.mxu0 %v7774_v56  ;;  %v6928_v56 = vld [vmem:[%s10251_s1 + $0x6c4] ss:$8 sps:$4 sm:$0xff]  }
 0x3ce   : > { %2964 = vmatpush1.bf16.msra.mxu1 %v6925_v51 }
 0x3cf   : > { %3009 = vmatpush1.bf16.msra.mxu0 %v7790_v59  ;;  %2965 = vmatprep.subr.bf16.mxu1 %v6926_v52 }
 0x3d0   : > { %3010 = vmatprep.subr.bf16.mxu0 %v7796_v60 }
 0x3d2   : > { %2966 = vmatpush1.bf16.msra.mxu1 %v6927_v55 }
 0x3d3   : > { %3011 = vmatpush1.bf16.msra.mxu0 %v7814_v63  ;;  %2967 = vmatprep.subr.bf16.mxu1 %v6928_v56 }
 0x3d4   : > { %3012 = vmatprep.subr.bf16.mxu0 %v7820_v0 }
 0x3d6   : > { %2968 = vmatpush1.bf16.msra.mxu1 %v7779_v57 }
 0x3d7   : > { %3013 = vmatpush1.bf16.msra.mxu0 %v7838_v4  ;;  %2969 = vmatprep.subr.bf16.mxu1 %v7784_v58 }
 0x3d8   : > { %3014 = vmatprep.subr.bf16.mxu0 %v7844_v5 }
 0x3da   : > { %2970 = vmatpush1.bf16.msra.mxu1 %v7802_v61 }
 0x3db   : > { %3015 = vmatpush1.bf16.msra.mxu0 %v7862_v8  ;;  %2971 = vmatprep.subr.bf16.mxu1 %v7808_v62  ;;  %v10425_v8 = vld [vmem:[#allocation4_spill] sm:$0xff] }
 0x3dc   : > { %3016 = vmatprep.subr.bf16.mxu0 %v7868_v9  ;;  %v10426_v9 = vld [vmem:[#allocation5_spill] sm:$0xff] }
 0x3de   : > { %2972 = vmatpush1.bf16.msra.mxu1 %v7826_v1 }
 0x3df   : > { %3017 = vmatpush1.bf16.msra.mxu0 %v7886_v12  ;;  %2973 = vmatprep.subr.bf16.mxu1 %v7832_v3  ;;  %v10429_v12 = vld [vmem:[#allocation8_spill] sm:$0xff] }
 0x3e0   : > { %3018 = vmatprep.subr.bf16.mxu0 %v7893_v13  ;;  %v10430_v13 = vld [vmem:[#allocation9_spill] sm:$0xff] }
 0x3e2   : > { %2974 = vmatpush1.bf16.msra.mxu1 %v7850_v6  ;;  %v10423_v6 = vld [vmem:[#allocation2_spill] sm:$0xff] }
 0x3e3   : > { %3019 = vmatpush1.bf16.msra.mxu0 %v7912_v16  ;;  %3033 = vmatprep.subr.bf16.mxu1 %v7856_v7  ;;  %v10424_v7 = vld [vmem:[#allocation3_spill] sm:$0xff]  ;;  %v10433_v16 = vld [vmem:[#allocation12_spill] sm:$0xff] }
 0x3e5   : > { %2976 = vmatmul.mubr.bf16.vlgmr.msra.gmra.mrb[32].mxu1 %v8314_v39 }
 0x3e6   : > { %3021 = vmatmul.mubr.bf16.vlgmr.msra.gmra.mrb[32].mxu0 %v8314_v39  ;;  %3034 = vmatpush1.bf16.msra.mxu1 %v7874_v10  ;;  %v10427_v10 = vld [vmem:[#allocation6_spill] sm:$0xff] }
 0x3e7   : > { %3065 = vmatprep.mubr.bf16.mxu1 %v8316_v29  ;;  %3035 = vmatprep.subr.bf16.mxu1 %v7880_v11  ;;  %v10428_v11 = vld [vmem:[#allocation7_spill] sm:$0xff] }
 0x3e8   : > { %5796 = vmatprep.mubr.msk.bf16.mxu0 %vm2578_vm0, %v6290_v49 }
 0x3ea   : > { %3036 = vmatpush1.bf16.msra.mxu1 %v7899_v14  ;;  %v10431_v14 = vld [vmem:[#allocation10_spill] sm:$0xff] }
 0x3eb   : > { %3037 = vmatprep.subr.bf16.mxu1 %v7906_v15  ;;  %v10432_v15 = vld [vmem:[#allocation11_spill] sm:$0xff] }
 0x3ee   : > { %3038 = vmatpush1.bf16.msra.mxu1 %v7919_v38  ;;  %v10434_v38 = vld [vmem:[#allocation13_spill] sm:$0xff] }
 0x3ef   : > { %3039 = vmatprep.subr.bf16.mxu1 %v7925_v17  ;;  %v10435_v17 = vld [vmem:[#allocation14_spill] sm:$0xff] }
 0x3f2   : > { %3040 = vmatpush1.bf16.msra.mxu1 %v7932_v18  ;;  %v10436_v18 = vld [vmem:[#allocation15_spill] sm:$0xff] }
 0x3f3   : > { %3041 = vmatprep.subr.bf16.mxu1 %v7938_v19  ;;  %v10437_v19 = vmov 0  }
 0x3f6   : > { %3042 = vmatpush1.bf16.msra.mxu1 %v7945_v20 }
 0x3f7   : > { %3043 = vmatprep.subr.bf16.mxu1 %v7951_v21 }
 0x3f8   : > { %v2707_v57 = vpop.f32.mrb[20].mxu1  ;;  %v2752_v58 = vpop.f32.mrb[20].mxu0 }
 0x3f9   : > { %v2709_v59 = vpop.f32.mrb[21].mxu1  ;;  %v2754_v60 = vpop.f32.mrb[21].mxu0 }
 0x3fa   : > { %3044 = vmatpush1.bf16.msra.mxu1 %v7957_v22  ;;  %v2711_v61 = vpop.f32.mrb[22].mxu1  ;;  %v2756_v62 = vpop.f32.mrb[22].mxu0 }
 0x3fb   : > { %v2716_v63 = vpack.c.bf16 %v2711_v61, %v2707_v57  ;;  %v2761_v0 = vpack.c.bf16 %v2756_v62, %v2752_v58  ;;  %v2713_v1 = vpop.f32.mrb[23].mxu1  ;;  %v2758_v3 = vpop.f32.mrb[23].mxu0  ;;  %3045 = vmatprep.subr.bf16.mxu1 %v7963_v23 }
 0x3fc   : > { %v2717_v4 = vpack.c.bf16 %v2713_v1, %v2709_v59  ;;  %v2762_v5 = vpack.c.bf16 %v2758_v3, %v2754_v60  ;;  %v6929_v3 = vld [vmem:[%s7115_s14 + $0x8] sm:$0xff] }
 0x3fe   : > { %3046 = vmatpush1.bf16.msra.mxu1 %v7969_v27  ;;  %3090 = vmatprep.subr.bf16.mxu0 %v2717_v4 }
 0x3ff   : > { %3091 = vmatpush1.bf16.msra.mxu0 %v2716_v63  ;;  %3047 = vmatprep.subr.bf16.mxu1 %v7975_v30  ;;  %v6292_v63 = vld [vmem:[%s10255_s5] ss:$8 sps:$4 sm:$0xff]  }
 0x400   : > { %3092 = vmatprep.subr.bf16.mxu0 %v2762_v5 }
 0x402   : > { %3048 = vmatpush1.bf16.msra.mxu1 %v7981_v32 }
 0x403   : > { %3093 = vmatpush1.bf16.msra.mxu0 %v2761_v0  ;;  %3049 = vmatprep.subr.bf16.mxu1 %v7987_v33 }
 0x406   : > { %3050 = vmatpush1.bf16.msra.mxu1 %v7993_v34 }
 0x407   : > { %3051 = vmatprep.subr.bf16.mxu1 %v10423_v6  ;;  %v6930_v6 = vld [vmem:[%s7115_s14] sm:$0xff] }
 0x40a   : > { %3052 = vmatpush1.bf16.msra.mxu1 %v10424_v7 }
 0x40b   : > { %3053 = vmatprep.subr.bf16.mxu1 %v10425_v8  ;;  %v6931_v8 = vld [vmem:[%s7115_s14 + $0x10] sm:$0xff] }
 0x40e   : > { %3054 = vmatpush1.bf16.msra.mxu1 %v10426_v9 }
 0x40f   : > { %3055 = vmatprep.subr.bf16.mxu1 %v10427_v10 }
 0x412   : > { %3056 = vmatpush1.bf16.msra.mxu1 %v10428_v11  ;;  %v3147_v11 = vpop.permute.xlu1 %3146 }
 0x413   : > { %3057 = vmatprep.subr.bf16.mxu1 %v10429_v12  ;;  %v6932_v12 = vld [vmem:[%s7115_s14 + $0x18] sm:$0xff] }
 0x416   : > { %3058 = vmatpush1.bf16.msra.mxu1 %v10430_v13 }
 0x417   : > { %3059 = vmatprep.subr.bf16.mxu1 %v10431_v14  ;;  %v3142_v14 = vpop.permute.xlu0 %3141 }
 0x41a   : > { %3060 = vmatpush1.bf16.msra.mxu1 %v10432_v15 }
 0x41b   : > { %3061 = vmatprep.subr.bf16.mxu1 %v10433_v16 }
 0x41e   : > { %3062 = vmatpush1.bf16.msra.mxu1 %v10434_v38 }
 0x41f   : > { %3063 = vmatprep.subr.bf16.mxu1 %v10435_v17 }
 0x422   : > { %3064 = vmatpush1.bf16.msra.mxu1 %v10436_v18 }
 0x425   : > { %3066 = vmatmul.mubr.bf16.vlgmr.msra.gmra.mrb[36].mxu1 %v8314_v39 }
 0x426   : > { %3410 = vmatprep.mubr.bf16.mxu1 %v10437_v19 }
 0x438   : > { %v2797_v20 = vpop.f32.mrb[24].mxu1  ;;  %v2842_v21 = vpop.f32.mrb[24].mxu0 }
 0x439   : > { %v2799_v22 = vpop.f32.mrb[25].mxu1  ;;  %v2844_v23 = vpop.f32.mrb[25].mxu0 }
 0x43a   : > { %v2801_v27 = vpop.f32.mrb[26].mxu1  ;;  %v2846_v30 = vpop.f32.mrb[26].mxu0 }
 0x43b   : > { %v2806_v32 = vpack.c.bf16 %v2801_v27, %v2797_v20  ;;  %v2851_v33 = vpack.c.bf16 %v2846_v30, %v2842_v21  ;;  %v2803_v34 = vpop.f32.mrb[27].mxu1  ;;  %v2848_v29 = vpop.f32.mrb[27].mxu0  ;;  %v6293_v21 = vld [vmem:[%s10257_s7] sm:$0xff]  }
 0x43c   : > { %v2807_v36 = vpack.c.bf16 %v2803_v34, %v2799_v22  ;;  %v2852_v42 = vpack.c.bf16 %v2848_v29, %v2844_v23  ;;  %v6294_v22 = vld [vmem:[%s10257_s7 + $0x8] sm:$0xff]   ;;  %v3170_v23 = vpop.permute.xlu0 %3169 }
 0x43e   : > { %3094 = vmatprep.subr.bf16.mxu0 %v2807_v36 }
 0x43f   : > { %3095 = vmatpush1.bf16.msra.mxu0 %v2806_v32 }
 0x440   : > { %3096 = vmatprep.subr.bf16.mxu0 %v2852_v42 }
 0x443   : > { %3097 = vmatpush1.bf16.msra.mxu0 %v2851_v33 }
 0x478   : > { %v2887_v45 = vpop.f32.mrb[28].mxu1 }
 0x479   : > { %v2932_v39 = vpop.f32.mrb[28].mxu0  ;;  %v2889_v53 = vpop.f32.mrb[29].mxu1 }
 0x47a   : > { %v2934_v26 = vpop.f32.mrb[29].mxu0  ;;  %v2891_v2 = vpop.f32.mrb[30].mxu1 }
 0x47b   : > { %v2896_v31 = vpack.c.bf16 %v2891_v2, %v2887_v45  ;;  %v2936_v40 = vpop.f32.mrb[30].mxu0  ;;  %v2893_v54 = vpop.f32.mrb[31].mxu1 }
 0x47c   : > { %v2941_v25 = vpack.c.bf16 %v2936_v40, %v2932_v39  ;;  %v2897_v50 = vpack.c.bf16 %v2893_v54, %v2889_v53  ;;  %v2938_v41 = vpop.f32.mrb[31].mxu0  ;;  %v3180_v45 = vpop.permute.xlu1 %3179 }
 0x47d   : > { %v2942_v46 = vpack.c.bf16 %v2938_v41, %v2934_v26 }
 0x47e   : > { %3098 = vmatprep.subr.bf16.mxu0 %v2897_v50 }
 0x47f   : > { %3099 = vmatpush1.bf16.msra.mxu0 %v2896_v31 }
 0x480   : > { %3100 = vmatprep.subr.bf16.mxu0 %v2942_v46  ;;  %v3175_v41 = vpop.permute.xlu1 %3174 }
 0x483   : > { %3101 = vmatpush1.bf16.msra.mxu0 %v2941_v25 }
 0x4b8   : > { %v2977_v24 = vpop.f32.mrb[32].mxu1 }
 0x4b9   : > { %v3022_v43 = vpop.f32.mrb[32].mxu0  ;;  %v2979_v35 = vpop.f32.mrb[33].mxu1 }
 0x4ba   : > { %v3024_v28 = vpop.f32.mrb[33].mxu0  ;;  %v2981_v37 = vpop.f32.mrb[34].mxu1 }
 0x4bb   : > { %v2986_v44 = vpack.c.bf16 %v2981_v37, %v2977_v24  ;;  %v3026_v47 = vpop.f32.mrb[34].mxu0  ;;  %v2983_v48 = vpop.f32.mrb[35].mxu1  ;;  %v3164_v24 = vld [vmem:[%s10258_s8 + $0x18] sm:$0xff] }
 0x4bc   : > { %v3031_v51 = vpack.c.bf16 %v3026_v47, %v3022_v43  ;;  %v2987_v52 = vpack.c.bf16 %v2983_v48, %v2979_v35  ;;  %v3028_v55 = vpop.f32.mrb[35].mxu0 }
 0x4bd   : > { %v3032_v56 = vpack.c.bf16 %v3028_v55, %v3024_v28 }
 0x4be   : > { %3102 = vmatprep.subr.bf16.mxu0 %v2987_v52 }
 0x4bf   : > { %3103 = vmatpush1.bf16.msra.mxu0 %v2986_v44 }
 0x4c0   : > { %3104 = vmatprep.subr.bf16.mxu0 %v3032_v56 }
 0x4c3   : > { %3105 = vmatpush1.bf16.msra.mxu0 %v3031_v51 }
 0x4f8   : > { %v3067_v57 = vpop.f32.mrb[36].mxu1 }
 0x4f9   : > { %v3069_v58 = vpop.f32.mrb[37].mxu1 }
 0x4fa   : > { %v3071_v59 = vpop.f32.mrb[38].mxu1 }
 0x4fb   : > { %v3076_v60 = vpack.c.bf16 %v3071_v59, %v3067_v57  ;;  %v3073_v61 = vpop.f32.mrb[39].mxu1 }
 0x4fc   : > { %v3077_v62 = vpack.c.bf16 %v3073_v61, %v3069_v58 }
 0x4fe   : > { %3106 = vmatprep.subr.bf16.mxu0 %v3077_v62 }
 0x4ff   : > { %3107 = vmatpush1.bf16.msra.mxu0 %v3076_v60 }
 0x502   : > { %3123 = vmatmul.mubr.bf16.vlgmr.msra.gmra.mrb[36].mxu0 %v6292_v63 }
 0x503   : > { %3253 = vmatprep.mubr.bf16.mxu0 %v10437_v19 }
 0x5d5   : > { %v3124_v0 = vpop.f32.mrb[36].mxu0 }
 0x5d6   : > { %v3126_v1 = vpop.f32.mrb[37].mxu0  ;;  %v3133_v7 = vadd.f32 %v6930_v6, %v3124_v0 }
 0x5d7   : > { %v3134_v4 = vadd.f32 %v6929_v3, %v3126_v1  ;;  %v3128_v5 = vpop.f32.mrb[38].mxu0 }
 0x5d8   : > { %v3135_v9 = vadd.f32 %v6931_v8, %v3128_v5  ;;  %v3130_v10 = vpop.f32.mrb[39].mxu0  ;;  %v8909_v17 = vadd.f32 %v3142_v14, %v3133_v7 }
 0x5d9   : > { %v3136_v13 = vadd.f32 %v6932_v12, %v3130_v10  ;;  %v8905_v16 = vadd.f32 %v3142_v14, %v3134_v4 }
 0x5da   : > { %v8903_v15 = vadd.f32 %v3147_v11, %v3135_v9  ;;  %10441 = vst [vmem:[#allocation5_spill] sm:$0xff] %v8909_v17 }
 0x5db   : > { %10439 = vst [vmem:[#allocation3_spill] sm:$0xff] %v8905_v16  ;;  %v8907_v38 = vadd.f32 %v3147_v11, %v3136_v13 }
 0x5dc   : > { %10438 = vst [vmem:[#allocation2_spill] sm:$0xff] %v8903_v15  ;;  %v3159_v20 = vpack.c.bf16 %v8903_v15, %v8909_v17 }
 0x5dd   : > { %10440 = vst [vmem:[#allocation4_spill] sm:$0xff] %v8907_v38  ;;  %v3160_v18 = vpack.c.bf16 %v8907_v38, %v8905_v16 }
 0x5df   : > { %3221 = vmatprep.subr.bf16.mxu0 %v3160_v18 }
 0x5e0   : > { %3222 = vmatpush1.bf16.msra.mxu0 %v3159_v20 }
 0x5e3   : > { %5800 = vmatmul.mubr.msk.bf16.vlgmr.msra.gmra.mrb[40].mxu0 %vm2578_vm0, %v6293_v21 }
 0x5e4   : > { %3263 = vmatprep.mubr.bf16.mxu0 %v10437_v19 }
 0x5eb   : > { %5801 = vmatmul.mubr.msk.bf16.gmra.mrb[44].mxu0 %vm2578_vm0, %v6294_v22 }
 0x5ec   : > { %3273 = vmatprep.mubr.bf16.mxu0 %v10437_v19 }
 0x6b6   : > { %v3255_v27 = vpop.f32.mrb[40].mxu0 }
 0x6b7   : > { %v3256_v30 = vadd.f32 %v3255_v27, %v3170_v23  ;;  %v3257_v32 = vpop.f32.mrb[41].mxu0 }
 0x6b8   : > { %v3258_v33 = vadd.f32 %v3257_v32, %v3170_v23  ;;  %v3259_v34 = vpop.f32.mrb[42].mxu0 }
 0x6b9   : > { %v3284_v29 = vpack.c.bf16 %v3256_v30, %v3256_v30  ;;  %v3261_v36 = vpop.f32.mrb[43].mxu0  ;;  %v3260_v46 = vadd.f32 %v3259_v34, %v3175_v41 }
 0x6ba   : > { %v3285_v42 = vpack.c.bf16 %v3258_v33, %v3258_v33  ;;  %v3262_v43 = vadd.f32 %v3261_v36, %v3175_v41 }
 0x6bb   : > { %3290 = vxpose.xlu0.c.b16.start.end [1/1] (short) %v3284_v29, 128  ;;  %v4188_v49 = vpack.c.bf16 %v3260_v46, %v3260_v46 }
 0x6bc   : > { %3306 = vxpose.xlu1.c.b16.start.end [1/1] (short) %v3285_v42, 128  ;;  %v4189_v35 = vpack.c.bf16 %v3262_v43, %v3262_v43 }
 0x6be   : > { %v3265_v39 = vpop.f32.mrb[44].mxu0 }
 0x6bf   : > { %v3266_v53 = vadd.f32 %v3265_v39, %v3180_v45  ;;  %v3267_v26 = vpop.f32.mrb[45].mxu0 }
 0x6c0   : > { %v3268_v2 = vadd.f32 %v3267_v26, %v3180_v45  ;;  %v3269_v31 = vpop.f32.mrb[46].mxu0 }
 0x6c1   : > { %v3286_v40 = vpack.c.bf16 %v3266_v53, %v3266_v53  ;;  %v3271_v54 = vpop.f32.mrb[47].mxu0 }
 0x6c2   : > { %v3287_v25 = vpack.c.bf16 %v3268_v2, %v3268_v2 }
 0x6c3   : > { %v3373_v50 = vsel %vm3371_vm1, %v3286_v40, 0 }
 0x6c4   : > { %5803 = vmatprep.subr.msk.bf16.mxu1 %vm3371_vm1, %v3287_v25 }
 0x6c5   : > { %3379 = vmatpush1.bf16.msra.mxu1 %v3373_v50 }
 0x6d9   : > { %4194 = vxpose.xlu1.c.b16.start.end [1/1] (short) %v4188_v49, 128 }
 0x6e0   : > { %3184 = vperm.xlu0 %5853, %v3164_v24  }
 0x6fe   : > { %4210 = vxpose.xlu0.c.b16.start.end [1/1] (short) %v4189_v35, 128 }
 0x721   : > { %v3298_v28 = vpop.trf.xlu0 }
 0x722   : > { %5804 = vmatmul.mubr.msk.bf16.vlgmr.msra.gmra.mrb[40].mxu1 %vm3322_vm2, %v3298_v28  ;;  %v3314_v57 = vpop.trf.xlu1 }
 0x723   : > { %3420 = vmatprep.mubr.bf16.mxu1 %v10437_v19 }
 0x725   : > { %v3299_v37 = vpop.trf.xlu0 }
 0x726   : > { %v3315_v63 = vpop.trf.xlu1 }
 0x729   : > { %v3300_v44 = vpop.trf.xlu0 }
 0x72a   : > { %5805 = vmatmul.mubr.msk.bf16.gmra.mrb[44].mxu1 %vm3322_vm2, %v3299_v37  ;;  %v3316_v0 = vpop.trf.xlu1 }
 0x72b   : > { %3430 = vmatprep.mubr.bf16.mxu1 %v10437_v19 }
 0x72d   : > { %v3301_v47 = vpop.trf.xlu0 }
 0x72e   : > { %v3317_v1 = vpop.trf.xlu1 }
 0x731   : > { %v3302_v48 = vpop.trf.xlu0 }
 0x732   : > { %5806 = vmatmul.mubr.msk.bf16.gmra.mrb[48].mxu1 %vm3322_vm2, %v3300_v44  ;;  %v3318_v3 = vpop.trf.xlu1 }
 0x733   : > { %3440 = vmatprep.mubr.bf16.mxu1 %v10437_v19 }
 0x735   : > { %v3303_v51 = vpop.trf.xlu0 }
 0x736   : > { %v3319_v4 = vpop.trf.xlu1 }
 0x739   : > { %v3304_v52 = vpop.trf.xlu0 }
 0x73a   : > { %5807 = vmatmul.mubr.msk.bf16.gmra.mrb[52].mxu1 %vm3322_vm2, %v3301_v47  ;;  %v3320_v5 = vpop.trf.xlu1 }
 0x73b   : > { %3450 = vmatprep.mubr.bf16.mxu1 %v10437_v19 }
 0x73d   : > { %v3305_v55 = vpop.trf.xlu0 }
 0x73e   : > { %v3321_v6 = vpop.trf.xlu1 }
 0x742   : > { %5808 = vmatmul.mubr.msk.bf16.gmra.mrb[56].mxu1 %vm3322_vm2, %v3302_v48  ;;  %v4202_v7 = vpop.trf.xlu1 }
 0x743   : > { %3460 = vmatprep.mubr.bf16.mxu1 %v10437_v19 }
 0x746   : > { %v4203_v8 = vpop.trf.xlu1 }
 0x74a   : > { %5809 = vmatmul.mubr.msk.bf16.gmra.mrb[60].mxu1 %vm3322_vm2, %v3303_v51  ;;  %v4204_v9 = vpop.trf.xlu1 }
 0x74b   : > { %3470 = vmatprep.mubr.bf16.mxu1 %v10437_v19 }
 0x74e   : > { %v4205_v10 = vpop.trf.xlu1 }
 0x752   : > { %5810 = vmatmul.mubr.msk.bf16.gmra.mrb[64].mxu1 %vm3322_vm2, %v3304_v52  ;;  %v4206_v11 = vpop.trf.xlu1 }
 0x753   : > { %3480 = vmatprep.mubr.bf16.mxu1 %v10437_v19 }
 0x756   : > { %v4207_v12 = vpop.trf.xlu1 }
 0x75a   : > { %5811 = vmatmul.mubr.msk.bf16.gmra.mrb[68].mxu1 %vm3322_vm2, %v3305_v55  ;;  %v4208_v13 = vpop.trf.xlu1 }
 0x75b   : > { %3490 = vmatprep.mubr.bf16.mxu1 %v10437_v19 }
 0x75e   : > { %v4209_v14 = vpop.trf.xlu1 }
 0x75f   : > { %v3185_v56 = vpop.permute.xlu0 %3184 }
 0x760   : > { %v3270_v58 = vadd.f32 %v3269_v31, %v3185_v56  ;;  %v3272_v59 = vadd.f32 %v3271_v54, %v3185_v56 }
 0x762   : > { %v4190_v60 = vpack.c.bf16 %v3270_v58, %v3270_v58  ;;  %v4191_v61 = vpack.c.bf16 %v3272_v59, %v3272_v59  ;;  %5812 = vmatmul.mubr.msk.bf16.gmra.mrb[72].mxu1 %vm3322_vm2, %v3314_v57 }
 0x763   : > { %3500 = vmatprep.mubr.bf16.mxu1 %v10437_v19 }
 0x764   : > { %5820 = vmatprep.subr.msk.bf16.mxu1 %vm3371_vm1, %v4191_v61  ;;  %v4275_v62 = vsel %vm3371_vm1, %v4190_v60, 0  ;;  %v4218_v18 = vpop.trf.xlu0 }
 0x765   : > { %4281 = vmatpush1.bf16.msra.mxu1 %v4275_v62 }
 0x768   : > { %v4219_v20 = vpop.trf.xlu0 }
 0x76a   : > { %5813 = vmatmul.mubr.msk.bf16.gmra.mrb[76].mxu1 %vm3322_vm2, %v3315_v63 }
 0x76b   : > { %3510 = vmatprep.mubr.bf16.mxu1 %v10437_v19 }
 0x76c   : > { %v4220_v21 = vpop.trf.xlu0 }
 0x770   : > { %v4221_v33 = vpop.trf.xlu0 }
 0x772   : > { %5814 = vmatmul.mubr.msk.bf16.gmra.mrb[80].mxu1 %vm3322_vm2, %v3316_v0 }
 0x773   : > { %3520 = vmatprep.mubr.bf16.mxu1 %v10437_v19 }
 0x774   : > { %v4222_v40 = vpop.trf.xlu0 }
 0x778   : > { %v4223_v37 = vpop.trf.xlu0 }
 0x77a   : > { %5815 = vmatmul.mubr.msk.bf16.gmra.mrb[84].mxu1 %vm3322_vm2, %v3317_v1 }
 0x77b   : > { %3530 = vmatprep.mubr.bf16.mxu1 %v10437_v19 }
 0x77c   : > { %v4224_v60 = vpop.trf.xlu0 }
 0x782   : > { %5816 = vmatmul.mubr.msk.bf16.gmra.mrb[88].mxu1 %vm3322_vm2, %v3318_v3 }
 0x783   : > { %3540 = vmatprep.mubr.bf16.mxu1 %v10437_v19 }
 0x78a   : > { %5817 = vmatmul.mubr.msk.bf16.gmra.mrb[92].mxu1 %vm3322_vm2, %v3319_v4 }
 0x78b   : > { %3550 = vmatprep.mubr.bf16.mxu1 %v10437_v19 }
 0x792   : > { %5818 = vmatmul.mubr.msk.bf16.gmra.mrb[96].mxu1 %vm3322_vm2, %v3320_v5 }
 0x793   : > { %3560 = vmatprep.mubr.bf16.mxu1 %v10437_v19 }
 0x79a   : > { %5819 = vmatmul.mubr.msk.bf16.gmra.mrb[100].mxu1 %vm3322_vm2, %v3321_v6 }
 0x79b   : > { %4312 = vmatprep.mubr.bf16.mxu1 %v10437_v19 }
 0x7a2   : > { %5821 = vmatmul.mubr.msk.bf16.vlgmr.msra.gmra.mrb[104].mxu1 %vm3322_vm2, %v4202_v7 }
 0x7a3   : > { %4322 = vmatprep.mubr.bf16.mxu1 %v10437_v19 }
 0x7aa   : > { %5822 = vmatmul.mubr.msk.bf16.gmra.mrb[108].mxu1 %vm3322_vm2, %v4203_v8  ;;  %v4225_v8 = vpop.trf.xlu0 }
 0x7ab   : > { %4332 = vmatprep.mubr.bf16.mxu1 %v10437_v19 }
 0x7b2   : > { %5823 = vmatmul.mubr.msk.bf16.gmra.mrb[112].mxu1 %vm3322_vm2, %v4204_v9 }
 0x7b3   : > { %4342 = vmatprep.mubr.bf16.mxu1 %v10437_v19 }
 0x7ba   : > { %5824 = vmatmul.mubr.msk.bf16.gmra.mrb[116].mxu1 %vm3322_vm2, %v4205_v10 }
 0x7bb   : > { %4352 = vmatprep.mubr.bf16.mxu1 %v10437_v19 }
 0x7c2   : > { %5825 = vmatmul.mubr.msk.bf16.gmra.mrb[120].mxu1 %vm3322_vm2, %v4206_v11 }
 0x7c3   : > { %4362 = vmatprep.mubr.bf16.mxu1 %v10437_v19 }
 0x7ca   : > { %5826 = vmatmul.mubr.msk.bf16.gmra.mrb[124].mxu1 %vm3322_vm2, %v4207_v12 }
 0x7cb   : > { %4372 = vmatprep.mubr.bf16.mxu1 %v10437_v19 }
 0x7d2   : > { %5827 = vmatmul.mubr.msk.bf16.gmra.mrb[128].mxu1 %vm3322_vm2, %v4208_v13 }
 0x7d3   : > { %4382 = vmatprep.mubr.bf16.mxu1 %v10437_v19 }
 0x7da   : > { %5828 = vmatmul.mubr.msk.bf16.gmra.mrb[132].mxu1 %vm3322_vm2, %v4209_v14 }
 0x7db   : > { %4392 = vmatprep.mubr.bf16.mxu1 %v10437_v19 }
 0x7e2   : > { %5829 = vmatmul.mubr.msk.bf16.gmra.mrb[136].mxu1 %vm3322_vm2, %v4218_v18 }
 0x7e3   : > { %4402 = vmatprep.mubr.bf16.mxu1 %v10437_v19 }
 0x7ea   : > { %5830 = vmatmul.mubr.msk.bf16.gmra.mrb[140].mxu1 %vm3322_vm2, %v4219_v20 }
 0x7eb   : > { %4412 = vmatprep.mubr.bf16.mxu1 %v10437_v19 }
 0x7f2   : > { %5831 = vmatmul.mubr.msk.bf16.gmra.mrb[144].mxu1 %vm3322_vm2, %v4220_v21 }
 0x7f3   : > { %4422 = vmatprep.mubr.bf16.mxu1 %v10437_v19 }
 0x7f5   : > { %v3412_v22 = vpop.f32.mrb[40].mxu1 }
 0x7f6   : > { %v8986_v23 = vmul.f32 0.35355338, %v3412_v22  ;;  %v3414_v27 = vpop.f32.mrb[41].mxu1 }
 0x7f7   : > { %v8988_v30 = vmul.f32 0.35355338, %v3414_v27  ;;  %v3416_v32 = vpop.f32.mrb[42].mxu1 }
 0x7f8   : > { %v8990_v34 = vmul.f32 0.35355338, %v3416_v32  ;;  %v3418_v29 = vpop.f32.mrb[43].mxu1 }
 0x7f9   : > { %v8992_v36 = vmul.f32 0.35355338, %v3418_v29  ;;  %v3635_v42 = vmax.f32 %v8986_v23, %v8988_v30 }
 0x7fa   : > { %5832 = vmatmul.mubr.msk.bf16.gmra.mrb[148].mxu1 %vm3322_vm2, %v4221_v33 }
 0x7fb   : > { %3636 = vmax.xlane.f32.xlu1 %v3635_v42  ;;  %v3638_v45 = vmax.f32 %v8990_v34, %v8992_v36  ;;  %4432 = vmatprep.mubr.bf16.mxu1 %v10437_v19 }
 0x7fd   : > { %3639 = vmax.xlane.f32.xlu0 %v3638_v45  ;;  %v3422_v39 = vpop.f32.mrb[44].mxu1 }
 0x7fe   : > { %v9000_v53 = vmul.f32 0.35355338, %v3422_v39  ;;  %v3424_v26 = vpop.f32.mrb[45].mxu1 }
 0x7ff   : > { %v9002_v2 = vmul.f32 0.35355338, %v3424_v26  ;;  %v3426_v31 = vpop.f32.mrb[46].mxu1 }
 0x800   : > { %v3428_v54 = vpop.f32.mrb[47].mxu1  ;;  %v9004_v25 = vmul.f32 0.35355338, %v3426_v31 }
 0x801   : > { %v9006_v50 = vmul.f32 0.35355338, %v3428_v54  ;;  %v3641_v41 = vmax.f32 %v9000_v53, %v9002_v2 }
 0x802   : > { %5833 = vmatmul.mubr.msk.bf16.gmra.mrb[152].mxu1 %vm3322_vm2, %v4222_v40 }
 0x803   : > { %3642 = vmax.xlane.f32.xlu1 %v3641_v41  ;;  %4442 = vmatprep.mubr.bf16.mxu1 %v10437_v19  ;;  %v3644_v49 = vmax.f32 %v9004_v25, %v9006_v50 }
 0x805   : > { %v3432_v46 = vpop.f32.mrb[48].mxu1 }
 0x806   : > { %v9014_v24 = vmul.f32 0.35355338, %v3432_v46  ;;  %v3434_v43 = vpop.f32.mrb[49].mxu1 }
 0x807   : > { %v9016_v35 = vmul.f32 0.35355338, %v3434_v43  ;;  %3645 = vmax.xlane.f32.xlu1 %v3644_v49  ;;  %v3436_v28 = vpop.f32.mrb[50].mxu1 }
 0x808   : > { %v3438_v44 = vpop.f32.mrb[51].mxu1  ;;  %v9018_v47 = vmul.f32 0.35355338, %v3436_v28 }
 0x809   : > { %v9020_v48 = vmul.f32 0.35355338, %v3438_v44  ;;  %v3647_v51 = vmax.f32 %v9014_v24, %v9016_v35 }
 0x80a   : > { %5834 = vmatmul.mubr.msk.bf16.gmra.mrb[156].mxu1 %vm3322_vm2, %v4223_v37 }
 0x80b   : > { %3648 = vmax.xlane.f32.xlu1 %v3647_v51  ;;  %4452 = vmatprep.mubr.bf16.mxu1 %v10437_v19  ;;  %v3650_v55 = vmax.f32 %v9018_v47, %v9020_v48 }
 0x80d   : > { %v3442_v52 = vpop.f32.mrb[52].mxu1 }
 0x80e   : > { %v9028_v56 = vmul.f32 0.35355338, %v3442_v52  ;;  %v3444_v57 = vpop.f32.mrb[53].mxu1 }
 0x80f   : > { %v9030_v58 = vmul.f32 0.35355338, %v3444_v57  ;;  %3651 = vmax.xlane.f32.xlu1 %v3650_v55  ;;  %v3446_v59 = vpop.f32.mrb[54].mxu1 }
 0x810   : > { %v9032_v61 = vmul.f32 0.35355338, %v3446_v59  ;;  %v3448_v62 = vpop.f32.mrb[55].mxu1 }
 0x811   : > { %v9034_v63 = vmul.f32 0.35355338, %v3448_v62  ;;  %v3653_v0 = vmax.f32 %v9028_v56, %v9030_v58 }
 0x812   : > { %5835 = vmatmul.mubr.msk.bf16.gmra.mrb[160].mxu1 %vm3322_vm2, %v4224_v60 }
 0x813   : > { %3654 = vmax.xlane.f32.xlu1 %v3653_v0  ;;  %v3656_v1 = vmax.f32 %v9032_v61, %v9034_v63  ;;  %4462 = vmatprep.mubr.bf16.mxu1 %v10437_v19 }
 0x815   : > { %v3452_v3 = vpop.f32.mrb[56].mxu1 }
 0x816   : > { %v9042_v4 = vmul.f32 0.35355338, %v3452_v3  ;;  %v3454_v5 = vpop.f32.mrb[57].mxu1 }
 0x817   : > { %v9044_v6 = vmul.f32 0.35355338, %v3454_v5  ;;  %3657 = vmax.xlane.f32.xlu1 %v3656_v1  ;;  %v3456_v7 = vpop.f32.mrb[58].mxu1 }
 0x818   : > { %v9046_v9 = vmul.f32 0.35355338, %v3456_v7  ;;  %v3458_v10 = vpop.f32.mrb[59].mxu1 }
 0x819   : > { %v9048_v11 = vmul.f32 0.35355338, %v3458_v10  ;;  %v3659_v12 = vmax.f32 %v9042_v4, %v9044_v6 }
 0x81a   : > { %5836 = vmatmul.mubr.msk.bf16.gmra.mrb[164].mxu1 %vm3322_vm2, %v4225_v8 }
 0x81b   : > { %3660 = vmax.xlane.f32.xlu1 %v3659_v12  ;;  %v3662_v13 = vmax.f32 %v9046_v9, %v9048_v11  ;;  %5146 = vmatprep.mubr.bf16.mxu1 %v10437_v19 }
 0x81d   : > { %v3462_v14 = vpop.f32.mrb[60].mxu1 }
 0x81e   : > { %v9056_v18 = vmul.f32 0.35355338, %v3462_v14  ;;  %v3464_v20 = vpop.f32.mrb[61].mxu1 }
 0x81f   : > { %v9058_v21 = vmul.f32 0.35355338, %v3464_v20  ;;  %3663 = vmax.xlane.f32.xlu1 %v3662_v13  ;;  %v3466_v22 = vpop.f32.mrb[62].mxu1 }
 0x820   : > { %v9060_v27 = vmul.f32 0.35355338, %v3466_v22  ;;  %v3468_v32 = vpop.f32.mrb[63].mxu1 }
 0x821   : > { %v9062_v33 = vmul.f32 0.35355338, %v3468_v32  ;;  %v3665_v29 = vmax.f32 %v9056_v18, %v9058_v21 }
 0x823   : > { %3666 = vmax.xlane.f32.xlu0 %v3665_v29  ;;  %v3668_v19 = vmax.f32 %v9060_v27, %v9062_v33 }
 0x825   : > { %3669 = vmax.xlane.f32.xlu1 %v3668_v19  ;;  %v3472_v42 = vpop.f32.mrb[64].mxu1 }
 0x826   : > { %v9068_v45 = vmul.f32 0.35355338, %v3472_v42  ;;  %v3474_v39 = vpop.f32.mrb[65].mxu1 }
 0x827   : > { %v9070_v26 = vmul.f32 0.35355338, %v3474_v39  ;;  %v3476_v31 = vpop.f32.mrb[66].mxu1 }
 0x828   : > { %v9072_v40 = vmul.f32 0.35355338, %v3476_v31  ;;  %v3478_v54 = vpop.f32.mrb[67].mxu1 }
 0x829   : > { %v9074_v41 = vmul.f32 0.35355338, %v3478_v54  ;;  %v3671_v46 = vmax.f32 %v9068_v45, %v9070_v26 }
 0x82b   : > { %3672 = vmax.xlane.f32.xlu0 %v3671_v46  ;;  %v3674_v49 = vmax.f32 %v9072_v40, %v9074_v41 }
 0x82d   : > { %3675 = vmax.xlane.f32.xlu1 %v3674_v49  ;;  %v3482_v43 = vpop.f32.mrb[68].mxu1 }
 0x82e   : > { %v9080_v28 = vmul.f32 0.35355338, %v3482_v43  ;;  %v3484_v37 = vpop.f32.mrb[69].mxu1 }
 0x82f   : > { %v9082_v44 = vmul.f32 0.35355338, %v3484_v37  ;;  %v3486_v51 = vpop.f32.mrb[70].mxu1 }
 0x830   : > { %v9084_v52 = vmul.f32 0.35355338, %v3486_v51  ;;  %v3488_v55 = vpop.f32.mrb[71].mxu1 }
 0x831   : > { %v9086_v57 = vmul.f32 0.35355338, %v3488_v55  ;;  %v3677_v59 = vmax.f32 %v9080_v28, %v9082_v44 }
 0x833   : > { %3678 = vmax.xlane.f32.xlu0 %v3677_v59  ;;  %v3680_v60 = vmax.f32 %v9084_v52, %v9086_v57 }
 0x835   : > { %3681 = vmax.xlane.f32.xlu1 %v3680_v60  ;;  %v3492_v62 = vpop.f32.mrb[72].mxu1 }
 0x836   : > { %v9092_v0 = vmul.f32 0.35355338, %v3492_v62  ;;  %v3494_v1 = vpop.f32.mrb[73].mxu1 }
 0x837   : > { %v9094_v3 = vmul.f32 0.35355338, %v3494_v1  ;;  %v3496_v5 = vpop.f32.mrb[74].mxu1 }
 0x838   : > { %v9096_v7 = vmul.f32 0.35355338, %v3496_v5  ;;  %v3498_v8 = vpop.f32.mrb[75].mxu1 }
 0x839   : > { %v9098_v10 = vmul.f32 0.35355338, %v3498_v8  ;;  %v3683_v12 = vmax.f32 %v9092_v0, %v9094_v3 }
 0x83b   : > { %3684 = vmax.xlane.f32.xlu0 %v3683_v12  ;;  %v3686_v13 = vmax.f32 %v9096_v7, %v9098_v10 }
 0x83d   : > { %3687 = vmax.xlane.f32.xlu1 %v3686_v13  ;;  %v3502_v14 = vpop.f32.mrb[76].mxu1 }
 0x83e   : > { %v9104_v20 = vmul.f32 0.35355338, %v3502_v14  ;;  %v3504_v22 = vpop.f32.mrb[77].mxu1 }
 0x83f   : > { %v9106_v32 = vmul.f32 0.35355338, %v3504_v22  ;;  %v3506_v29 = vpop.f32.mrb[78].mxu1 }
 0x840   : > { %10442 = vst [vmem:[#allocation6_spill] sm:$0xff] %v9104_v20  ;;  %v9108_v19 = vmul.f32 0.35355338, %v3506_v29  ;;  %v3508_v42 = vpop.f32.mrb[79].mxu1 }
 0x841   : > { %10443 = vst [vmem:[#allocation7_spill] sm:$0xff] %v9106_v32  ;;  %v9110_v39 = vmul.f32 0.35355338, %v3508_v42  ;;  %v3689_v31 = vmax.f32 %v9104_v20, %v9106_v32 }
 0x842   : > { %10444 = vst [vmem:[#allocation8_spill] sm:$0xff] %v9108_v19 }
 0x843   : > { %10445 = vst [vmem:[#allocation9_spill] sm:$0xff] %v9110_v39  ;;  %3690 = vmax.xlane.f32.xlu0 %v3689_v31  ;;  %v3692_v54 = vmax.f32 %v9108_v19, %v9110_v39 }
 0x845   : > { %3693 = vmax.xlane.f32.xlu1 %v3692_v54  ;;  %v3512_v46 = vpop.f32.mrb[80].mxu1 }
 0x846   : > { %v9116_v49 = vmul.f32 0.35355338, %v3512_v46  ;;  %v3514_v43 = vpop.f32.mrb[81].mxu1 }
 0x847   : > { %v9118_v37 = vmul.f32 0.35355338, %v3514_v43  ;;  %v3516_v51 = vpop.f32.mrb[82].mxu1 }
 0x848   : > { %10446 = vst [vmem:[#allocation10_spill] sm:$0xff] %v9116_v49  ;;  %v9120_v55 = vmul.f32 0.35355338, %v3516_v51  ;;  %v3518_v59 = vpop.f32.mrb[83].mxu1 }
 0x849   : > { %10447 = vst [vmem:[#allocation11_spill] sm:$0xff] %v9118_v37  ;;  %v9122_v60 = vmul.f32 0.35355338, %v3518_v59  ;;  %v3695_v62 = vmax.f32 %v9116_v49, %v9118_v37  ;;  %v6295_v37 = vld [vmem:[%s10257_s7 + $0x10] sm:$0xff]  }
 0x84a   : > { %10448 = vst [vmem:[#allocation12_spill] sm:$0xff] %v9120_v55  ;;  %5802 = vmatmul.mubr.msk.bf16.gmra.mrb[48].mxu0 %vm2578_vm0, %v6295_v37 }
 0x84b   : > { %10449 = vst [vmem:[#allocation13_spill] sm:$0xff] %v9122_v60  ;;  %3696 = vmax.xlane.f32.xlu0 %v3695_v62  ;;  %v3698_v1 = vmax.f32 %v9120_v55, %v9122_v60 }
 0x84d   : > { %3699 = vmax.xlane.f32.xlu1 %v3698_v1  ;;  %v3522_v5 = vpop.f32.mrb[84].mxu1 }
 0x84e   : > { %v9128_v8 = vmul.f32 0.35355338, %v3522_v5  ;;  %v3524_v12 = vpop.f32.mrb[85].mxu1 }
 0x84f   : > { %v9130_v13 = vmul.f32 0.35355338, %v3524_v12  ;;  %v3526_v14 = vpop.f32.mrb[86].mxu1 }
 0x850   : > { %10450 = vst [vmem:[#allocation14_spill] sm:$0xff] %v9128_v8  ;;  %v9132_v22 = vmul.f32 0.35355338, %v3526_v14  ;;  %v3528_v29 = vpop.f32.mrb[87].mxu1 }
 0x851   : > { %10451 = vst [vmem:[#allocation15_spill] sm:$0xff] %v9130_v13  ;;  %v9134_v42 = vmul.f32 0.35355338, %v3528_v29  ;;  %v3701_v31 = vmax.f32 %v9128_v8, %v9130_v13 }
 0x852   : > { %10452 = vst [vmem:[#allocation16_spill] sm:$0xff] %v9132_v22 }
 0x853   : > { %10453 = vst [vmem:[#allocation17_spill] sm:$0xff] %v9134_v42  ;;  %3702 = vmax.xlane.f32.xlu0 %v3701_v31  ;;  %v3704_v54 = vmax.f32 %v9132_v22, %v9134_v42 }
 0x855   : > { %3705 = vmax.xlane.f32.xlu1 %v3704_v54  ;;  %v3532_v46 = vpop.f32.mrb[88].mxu1 }
 0x856   : > { %v9140_v43 = vmul.f32 0.35355338, %v3532_v46  ;;  %v3534_v51 = vpop.f32.mrb[89].mxu1 }
 0x857   : > { %v9142_v59 = vmul.f32 0.35355338, %v3534_v51  ;;  %v3536_v62 = vpop.f32.mrb[90].mxu1 }
 0x858   : > { %10454 = vst [vmem:[#allocation18_spill] sm:$0xff] %v9140_v43  ;;  %v9144_v1 = vmul.f32 0.35355338, %v3536_v62  ;;  %v3538_v5 = vpop.f32.mrb[91].mxu1 }
 0x859   : > { %10455 = vst [vmem:[#allocation19_spill] sm:$0xff] %v9142_v59  ;;  %v9146_v12 = vmul.f32 0.35355338, %v3538_v5  ;;  %v3707_v14 = vmax.f32 %v9140_v43, %v9142_v59 }
 0x85a   : > { %10456 = vst [vmem:[#allocation20_spill] sm:$0xff] %v9144_v1 }
 0x85b   : > { %10457 = vst [vmem:[#allocation21_spill] sm:$0xff] %v9146_v12  ;;  %3708 = vmax.xlane.f32.xlu0 %v3707_v14  ;;  %v3710_v29 = vmax.f32 %v9144_v1, %v9146_v12 }
 0x85d   : > { %3711 = vmax.xlane.f32.xlu1 %v3710_v29  ;;  %v3542_v31 = vpop.f32.mrb[92].mxu1 }
 0x85e   : > { %v9152_v54 = vmul.f32 0.35355338, %v3542_v31  ;;  %v3544_v46 = vpop.f32.mrb[93].mxu1 }
 0x85f   : > { %v9154_v51 = vmul.f32 0.35355338, %v3544_v46  ;;  %v3546_v38 = vpop.f32.mrb[94].mxu1 }
 0x860   : > { %10458 = vst [vmem:[#allocation22_spill] sm:$0xff] %v9152_v54  ;;  %v9156_v62 = vmul.f32 0.35355338, %v3546_v38  ;;  %v3548_v15 = vpop.f32.mrb[95].mxu1 }
 0x861   : > { %10459 = vst [vmem:[#allocation23_spill] sm:$0xff] %v9154_v51  ;;  %v9158_v5 = vmul.f32 0.35355338, %v3548_v15  ;;  %v3713_v16 = vmax.f32 %v9152_v54, %v9154_v51 }
 0x862   : > { %10460 = vst [vmem:[#allocation24_spill] sm:$0xff] %v9156_v62 }
 0x863   : > { %10461 = vst [vmem:[#allocation25_spill] sm:$0xff] %v9158_v5  ;;  %3714 = vmax.xlane.f32.xlu0 %v3713_v16  ;;  %v3716_v14 = vmax.f32 %v9156_v62, %v9158_v5 }
 0x865   : > { %3717 = vmax.xlane.f32.xlu1 %v3716_v14  ;;  %v3552_v29 = vpop.f32.mrb[96].mxu1 }
 0x866   : > { %v9164_v31 = vmul.f32 0.35355338, %v3552_v29  ;;  %v3554_v17 = vpop.f32.mrb[97].mxu1 }
 0x867   : > { %v9166_v46 = vmul.f32 0.35355338, %v3554_v17  ;;  %v3556_v12 = vpop.f32.mrb[98].mxu1 }
 0x868   : > { %10462 = vst [vmem:[#allocation26_spill] sm:$0xff] %v9164_v31  ;;  %v9168_v38 = vmul.f32 0.35355338, %v3556_v12  ;;  %v3558_v1 = vpop.f32.mrb[99].mxu1 }
 0x869   : > { %10463 = vst [vmem:[#allocation27_spill] sm:$0xff] %v9166_v46  ;;  %v9170_v15 = vmul.f32 0.35355338, %v3558_v1  ;;  %v3719_v51 = vmax.f32 %v9164_v31, %v9166_v46 }
 0x86a   : > { %10464 = vst [vmem:[#allocation28_spill] sm:$0xff] %v9168_v38 }
 0x86b   : > { %10465 = vst [vmem:[#allocation29_spill] sm:$0xff] %v9170_v15  ;;  %3720 = vmax.xlane.f32.xlu0 %v3719_v51  ;;  %v3722_v16 = vmax.f32 %v9168_v38, %v9170_v15 }
 0x86d   : > { %3723 = vmax.xlane.f32.xlu1 %v3722_v16  ;;  %v3562_v14 = vpop.f32.mrb[100].mxu1 }
 0x86e   : > { %v9176_v29 = vmul.f32 0.35355338, %v3562_v14  ;;  %v3564_v5 = vpop.f32.mrb[101].mxu1 }
 0x86f   : > { %v9178_v17 = vmul.f32 0.35355338, %v3564_v5  ;;  %v3566_v62 = vpop.f32.mrb[102].mxu1 }
 0x870   : > { %10466 = vst [vmem:[#allocation30_spill] sm:$0xff] %v9176_v29  ;;  %v3568_v12 = vpop.f32.mrb[103].mxu1 }
 0x871   : > { %10467 = vst [vmem:[#allocation31_spill] sm:$0xff] %v9178_v17  ;;  %v3725_v1 = vmax.f32 %v9176_v29, %v9178_v17 }
 0x873   : > { %3726 = vmax.xlane.f32.xlu0 %v3725_v1 }
 0x875   : > { %v4314_v54 = vpop.f32.mrb[104].mxu1 }
 0x876   : > { %v4316_v59 = vpop.f32.mrb[105].mxu1 }
 0x877   : > { %v9182_v46 = vpop.f32.mrb[106].mxu1 }
 0x878   : > { %v9184_v51 = vpop.f32.mrb[107].mxu1 }
 0x87d   : > { %v9186_v15 = vpop.f32.mrb[108].mxu1 }
 0x87e   : > { %v9188_v16 = vpop.f32.mrb[109].mxu1 }
 0x87f   : > { %v9190_v14 = vpop.f32.mrb[110].mxu1 }
 0x880   : > { %v9192_v5 = vpop.f32.mrb[111].mxu1 }
 0x885   : > { %v9194_v38 = vpop.f32.mrb[112].mxu1 }
 0x886   : > { %v9196_v31 = vpop.f32.mrb[113].mxu1 }
 0x887   : > { %v9198_v17 = vpop.f32.mrb[114].mxu1 }
 0x888   : > { %v3637_v1 = vpop.xlane.xlu1 %3636  ;;  %v9200_v29 = vpop.f32.mrb[115].mxu1 }
 0x889   : > { %v3731_v43 = vsub.f32 %v8986_v23, %v3637_v1  ;;  %v3732_v42 = vsub.f32 %v8988_v30, %v3637_v1 }
 0x88a   : > { %v3640_v22 = vpop.xlane.xlu0 %3639 }
 0x88b   : > { %v3795_v13 = vmul.f32 1.442695, %v3731_v43  ;;  %v3797_v8 = vmul.f32 1.442695, %v3732_v42  ;;  %v3733_v60 = vsub.f32 %v8990_v34, %v3640_v22  ;;  %v3734_v55 = vsub.f32 %v8992_v36, %v3640_v22 }
 0x88d   : > { %6313 = vpow2.f32 %v3795_v13  ;;  %v3799_v49 = vmul.f32 1.442695, %v3733_v60  ;;  %v3801_v39 = vmul.f32 1.442695, %v3734_v55  ;;  %v9209_v19 = vpop.f32.mrb[116].mxu1 }
 0x88e   : > { %6315 = vpow2.f32 %v3797_v8  ;;  %v9212_v23 = vpop.f32.mrb[117].mxu1 }
 0x88f   : > { %6317 = vpow2.f32 %v3799_v49  ;;  %v9214_v30 = vpop.f32.mrb[118].mxu1  ;;  %v9224_v49 = vmul.f32 0.35355338, %v4314_v54 }
 0x890   : > { %6319 = vpow2.f32 %v3801_v39  ;;  %v3643_v34 = vpop.xlane.xlu1 %3642  ;;  %v9216_v36 = vpop.f32.mrb[119].mxu1 }
 0x891   : > { %v3735_v22 = vsub.f32 %v9000_v53, %v3643_v34  ;;  %v3736_v13 = vsub.f32 %v9002_v2, %v3643_v34  ;;  %v9230_v2 = vmul.f32 0.35355338, %v4316_v59  ;;  %v9246_v59 = vmul.f32 0.35355338, %v3566_v62 }
 0x893   : > { %v3803_v60 = vmul.f32 1.442695, %v3735_v22  ;;  %v3805_v55 = vmul.f32 1.442695, %v3736_v13 }
 0x894   : > { %v3646_v42 = vpop.xlane.xlu1 %3645 }
 0x895   : > { %6321 = vpow2.f32 %v3803_v60  ;;  %v3737_v37 = vsub.f32 %v9004_v25, %v3646_v42  ;;  %v3738_v8 = vsub.f32 %v9006_v50, %v3646_v42  ;;  %v9222_v43 = vpop.f32.mrb[120].mxu1 }
 0x896   : > { %6323 = vpow2.f32 %v3805_v55  ;;  %v9226_v39 = vpop.f32.mrb[121].mxu1 }
 0x897   : > { %v9228_v1 = vpop.eup %6313  ;;  %v3807_v53 = vmul.f32 1.442695, %v3737_v37  ;;  %v3809_v32 = vmul.f32 1.442695, %v3738_v8  ;;  %v9234_v13 = vpop.f32.mrb[122].mxu1 }
 0x898   : > { %10468 = vst [vmem:[#allocation32_spill] sm:$0xff] %v9228_v1  ;;  %v9232_v34 = vpop.eup %6315  ;;  %v3649_v22 = vpop.xlane.xlu1 %3648  ;;  %v9248_v37 = vmul.f32 0.35355338, %v3568_v12 }
 0x899   : > { %v9236_v25 = vpop.eup %6317  ;;  %6325 = vpow2.f32 %v3807_v53  ;;  %v3739_v50 = vsub.f32 %v9014_v24, %v3649_v22  ;;  %v3740_v54 = vsub.f32 %v9016_v35, %v3649_v22  ;;  %v3923_v60 = vadd.f32 %v9232_v34, %v9228_v1  ;;  %v9242_v55 = vpop.f32.mrb[123].mxu1 }
 0x89a   : > { %10469 = vst [vmem:[#allocation33_spill] sm:$0xff] %v9236_v25  ;;  %v9244_v42 = vpop.eup %6319  ;;  %6327 = vpow2.f32 %v3809_v32  ;;  %v4537_v35 = vmax.f32 %v9224_v49, %v9230_v2  ;;  %v9259_v32 = vmul.f32 0.35355338, %v9186_v15 }
 0x89b   : > { %10470 = vst [vmem:[#allocation34_spill] sm:$0xff] %v9244_v42  ;;  %v3811_v8 = vmul.f32 1.442695, %v3739_v50  ;;  %v3813_v20 = vmul.f32 1.442695, %v3740_v54  ;;  %3924 = vadd.xlane.f32.xlu0 %v3923_v60  ;;  %v3926_v24 = vadd.f32 %v9244_v42, %v9236_v25 }
 0x89c   : > { %v3652_v53 = vpop.xlane.xlu1 %3651 }
 0x89d   : > { %6329 = vpow2.f32 %v3811_v8  ;;  %v3741_v22 = vsub.f32 %v9018_v47, %v3652_v53  ;;  %v3742_v1 = vsub.f32 %v9020_v48, %v3652_v53  ;;  %3927 = vadd.xlane.f32.xlu1 %v3926_v24  ;;  %v9256_v62 = vpop.f32.mrb[124].mxu1  ;;  %v9266_v8 = vmul.f32 0.35355338, %v9188_v16 }
 0x89e   : > { %6331 = vpow2.f32 %v3813_v20  ;;  %v9261_v12 = vpop.f32.mrb[125].mxu1  ;;  %v3728_v47 = vmax.f32 %v9246_v59, %v9248_v37 }
 0x89f   : > { %v9263_v50 = vpop.eup %6321  ;;  %v3815_v54 = vmul.f32 1.442695, %v3741_v22  ;;  %v3817_v60 = vmul.f32 1.442695, %v3742_v1  ;;  %4538 = vmax.xlane.f32.xlu0 %v4537_v35  ;;  %v9272_v20 = vpop.f32.mrb[126].mxu1  ;;  %v4543_v42 = vmax.f32 %v9259_v32, %v9266_v8 }
 0x8a0   : > { %10471 = vst [vmem:[#allocation35_spill] sm:$0xff] %v9263_v50  ;;  %v9270_v48 = vpop.eup %6323  ;;  %v3655_v24 = vpop.xlane.xlu1 %3654 }
 0x8a1   : > { %10472 = vst [vmem:[#allocation36_spill] sm:$0xff] %v9270_v48  ;;  %6333 = vpow2.f32 %v3815_v54  ;;  %v3743_v15 = vsub.f32 %v9028_v56, %v3655_v24  ;;  %v3744_v53 = vsub.f32 %v9030_v58, %v3655_v24  ;;  %3729 = vmax.xlane.f32.xlu1 %v3728_v47  ;;  %v3929_v1 = vadd.f32 %v9270_v48, %v9263_v50  ;;  %v9278_v35 = vpop.f32.mrb[127].mxu1 }
 0x8a2   : > { %6335 = vpow2.f32 %v3817_v60  ;;  %v9287_v56 = vmul.f32 0.35355338, %v9182_v46  ;;  %v9290_v58 = vmul.f32 0.35355338, %v9184_v51 }
 0x8a3   : > { %v9280_v16 = vpop.eup %6325  ;;  %v3819_v22 = vmul.f32 1.442695, %v3743_v15  ;;  %v3821_v25 = vmul.f32 1.442695, %v3744_v53  ;;  %3930 = vadd.xlane.f32.xlu0 %v3929_v1  ;;  %v9299_v1 = vmul.f32 0.35355338, %v9194_v38 }
 0x8a4   : > { %10473 = vst [vmem:[#allocation37_spill] sm:$0xff] %v9280_v16  ;;  %v9284_v54 = vpop.eup %6327  ;;  %v3658_v47 = vpop.xlane.xlu1 %3657 }
 0x8a5   : > { %10474 = vst [vmem:[#allocation38_spill] sm:$0xff] %v9284_v54  ;;  %6337 = vpow2.f32 %v3819_v22  ;;  %v3745_v60 = vsub.f32 %v9032_v61, %v3658_v47  ;;  %v3746_v24 = vsub.f32 %v9034_v63, %v3658_v47  ;;  %v3932_v15 = vadd.f32 %v9284_v54, %v9280_v16  ;;  %v9296_v53 = vpop.f32.mrb[128].mxu1 }
 0x8a6   : > { %6339 = vpow2.f32 %v3821_v25  ;;  %v9301_v46 = vpop.f32.mrb[129].mxu1  ;;  %v9306_v61 = vmul.f32 0.35355338, %v9196_v31  ;;  %v4540_v25 = vmax.f32 %v9287_v56, %v9290_v58 }
 0x8a7   : > { %v9303_v50 = vpop.eup %6329  ;;  %v3823_v51 = vmul.f32 1.442695, %v3745_v60  ;;  %v3825_v48 = vmul.f32 1.442695, %v3746_v24  ;;  %4544 = vmax.xlane.f32.xlu0 %v4543_v42  ;;  %3933 = vadd.xlane.f32.xlu1 %v3932_v15  ;;  %v9312_v47 = vpop.f32.mrb[130].mxu1 }
 0x8a8   : > { %10475 = vst [vmem:[#allocation39_spill] sm:$0xff] %v9303_v50  ;;  %v9308_v63 = vpop.eup %6331  ;;  %v3661_v22 = vpop.xlane.xlu1 %3660  ;;  %v4549_v54 = vmax.f32 %v9299_v1, %v9306_v61 }
 0x8a9   : > { %10476 = vst [vmem:[#allocation40_spill] sm:$0xff] %v9308_v63  ;;  %6341 = vpow2.f32 %v3823_v51  ;;  %v3747_v38 = vsub.f32 %v9042_v4, %v3661_v22  ;;  %v3748_v16 = vsub.f32 %v9044_v6, %v3661_v22  ;;  %v3935_v42 = vadd.f32 %v9308_v63, %v9303_v50  ;;  %v9318_v60 = vpop.f32.mrb[131].mxu1 }
 0x8aa   : > { %6343 = vpow2.f32 %v3825_v48  ;;  %v9327_v4 = vmul.f32 0.35355338, %v9190_v14  ;;  %v9330_v6 = vmul.f32 0.35355338, %v9192_v5  ;;  %v9342_v14 = vmul.f32 0.35355338, %v9212_v23 }
 0x8ab   : > { %v9320_v31 = vpop.eup %6333  ;;  %v3827_v24 = vmul.f32 1.442695, %v3747_v38  ;;  %v3829_v15 = vmul.f32 1.442695, %v3748_v16  ;;  %3936 = vadd.xlane.f32.xlu0 %v3935_v42  ;;  %4541 = vmax.xlane.f32.xlu1 %v4540_v25  ;;  %v9339_v42 = vmul.f32 0.35355338, %v9209_v19 }
 0x8ac   : > { %10477 = vst [vmem:[#allocation41_spill] sm:$0xff] %v9320_v31  ;;  %v9324_v51 = vpop.eup %6335  ;;  %10479 = vst [vmem:[#allocation43_spill] sm:$0xff] %v9330_v6  ;;  %v3664_v22 = vpop.xlane.xlu1 %3663 }
 0x8ad   : > { %10478 = vst [vmem:[#allocation42_spill] sm:$0xff] %v9324_v51  ;;  %6345 = vpow2.f32 %v3827_v24  ;;  %v3749_v48 = vsub.f32 %v9046_v9, %v3664_v22  ;;  %v3750_v38 = vsub.f32 %v9048_v11, %v3664_v22  ;;  %v3938_v16 = vadd.f32 %v9324_v51, %v9320_v31  ;;  %v9336_v25 = vpop.f32.mrb[132].mxu1 }
 0x8ae   : > { %6347 = vpow2.f32 %v3829_v15  ;;  %v9344_v5 = vpop.f32.mrb[133].mxu1  ;;  %v4546_v15 = vmax.f32 %v9327_v4, %v9330_v6 }
 0x8af   : > { %v9346_v50 = vpop.eup %6337  ;;  %v3831_v24 = vmul.f32 1.442695, %v3749_v48  ;;  %v3833_v9 = vmul.f32 1.442695, %v3750_v38  ;;  %4550 = vmax.xlane.f32.xlu0 %v4549_v54  ;;  %3939 = vadd.xlane.f32.xlu1 %v3938_v16  ;;  %v9352_v31 = vpop.f32.mrb[134].mxu1  ;;  %v4555_v38 = vmax.f32 %v9339_v42, %v9342_v14 }
 0x8b0   : > { %10480 = vst [vmem:[#allocation44_spill] sm:$0xff] %v9346_v50  ;;  %v9348_v11 = vpop.eup %6339  ;;  %v3667_v22 = vpop.xlane.xlu0 %3666 }
 0x8b1   : > { %10481 = vst [vmem:[#allocation45_spill] sm:$0xff] %v9348_v11  ;;  %6349 = vpow2.f32 %v3831_v24  ;;  %v3751_v19 = vsub.f32 %v9056_v18, %v3667_v22  ;;  %v3752_v23 = vsub.f32 %v9058_v21, %v3667_v22  ;;  %v3941_v51 = vadd.f32 %v9348_v11, %v9346_v50  ;;  %v9358_v48 = vpop.f32.mrb[135].mxu1 }
 0x8b2   : > { %6351 = vpow2.f32 %v3833_v9  ;;  %v3670_v54 = vpop.xlane.xlu1 %3669  ;;  %v9369_v22 = vmul.f32 0.35355338, %v9198_v17  ;;  %v9372_v9 = vmul.f32 0.35355338, %v9200_v29 }
 0x8b3   : > { %v9362_v16 = vpop.eup %6341  ;;  %v3835_v63 = vmul.f32 1.442695, %v3751_v19  ;;  %v3837_v6 = vmul.f32 1.442695, %v3752_v23  ;;  %v3753_v24 = vsub.f32 %v9060_v27, %v3670_v54  ;;  %v3754_v18 = vsub.f32 %v9062_v33, %v3670_v54  ;;  %3942 = vadd.xlane.f32.xlu0 %v3941_v51  ;;  %4547 = vmax.xlane.f32.xlu1 %v4546_v15 }
 0x8b4   : > { %10482 = vst [vmem:[#allocation46_spill] sm:$0xff] %v9362_v16  ;;  %v9366_v21 = vpop.eup %6343  ;;  %v9379_v27 = vmul.f32 0.35355338, %v9222_v43  ;;  %v9382_v33 = vmul.f32 0.35355338, %v9226_v39 }
 0x8b5   : > { %10483 = vst [vmem:[#allocation47_spill] sm:$0xff] %v9366_v21  ;;  %6353 = vpow2.f32 %v3835_v63  ;;  %v3839_v50 = vmul.f32 1.442695, %v3753_v24  ;;  %v3841_v11 = vmul.f32 1.442695, %v3754_v18  ;;  %v3944_v19 = vadd.f32 %v9366_v21, %v9362_v16  ;;  %v9376_v23 = vpop.f32.mrb[136].mxu1 }
 0x8b6   : > { %6355 = vpow2.f32 %v3837_v6  ;;  %10484 = vst [vmem:[#allocation48_spill] sm:$0xff] %v9382_v33  ;;  %v9384_v17 = vpop.f32.mrb[137].mxu1  ;;  %v9404_v24 = vmul.f32 0.35355338, %v9216_v36  ;;  %v4561_v18 = vmax.f32 %v9379_v27, %v9382_v33 }
 0x8b7   : > { %v9386_v51 = vpop.eup %6345  ;;  %6357 = vpow2.f32 %v3839_v50  ;;  %4556 = vmax.xlane.f32.xlu0 %v4555_v38  ;;  %3945 = vadd.xlane.f32.xlu1 %v3944_v19  ;;  %v9388_v29 = vpop.f32.mrb[138].mxu1  ;;  %v4552_v50 = vmax.f32 %v9369_v22, %v9372_v9  ;;  %v9401_v38 = vmul.f32 0.35355338, %v9214_v30 }
 0x8b8   : > { %10485 = vst [vmem:[#allocation49_spill] sm:$0xff] %v9386_v51  ;;  %v9390_v63 = vpop.eup %6347  ;;  %6359 = vpow2.f32 %v3841_v11  ;;  %v3673_v15 = vpop.xlane.xlu0 %3672 }
 0x8b9   : > { %10486 = vst [vmem:[#allocation50_spill] sm:$0xff] %v9390_v63  ;;  %v9392_v6 = vpop.f32.mrb[139].mxu1  ;;  %v3755_v43 = vsub.f32 %v9068_v45, %v3673_v15  ;;  %v3756_v39 = vsub.f32 %v9070_v26, %v3673_v15  ;;  %v3947_v54 = vadd.f32 %v9390_v63, %v9386_v51 }
 0x8ba   : > { %v3676_v11 = vpop.xlane.xlu1 %3675 }
 0x8bb   : > { %v9408_v19 = vpop.eup %6349  ;;  %v3843_v45 = vmul.f32 1.442695, %v3755_v43  ;;  %v3845_v26 = vmul.f32 1.442695, %v3756_v39  ;;  %v3757_v15 = vsub.f32 %v9072_v40, %v3676_v11  ;;  %v3758_v51 = vsub.f32 %v9074_v41, %v3676_v11  ;;  %3948 = vadd.xlane.f32.xlu0 %v3947_v54  ;;  %4553 = vmax.xlane.f32.xlu1 %v4552_v50 }
 0x8bc   : > { %10487 = vst [vmem:[#allocation51_spill] sm:$0xff] %v9408_v19  ;;  %v9412_v63 = vpop.eup %6351  ;;  %v9419_v43 = vmul.f32 0.35355338, %v9256_v62  ;;  %v9422_v40 = vmul.f32 0.35355338, %v9261_v12  ;;  %v4558_v54 = vmax.f32 %v9401_v38, %v9404_v24 }
 0x8bd   : > { %10488 = vst [vmem:[#allocation52_spill] sm:$0xff] %v9412_v63  ;;  %6361 = vpow2.f32 %v3843_v45  ;;  %v3847_v30 = vmul.f32 1.442695, %v3757_v15  ;;  %v3849_v36 = vmul.f32 1.442695, %v3758_v51  ;;  %v3950_v16 = vadd.f32 %v9412_v63, %v9408_v19  ;;  %v9416_v21 = vpop.f32.mrb[140].mxu1 }
 0x8be   : > { %6363 = vpow2.f32 %v3845_v26  ;;  %v9424_v41 = vpop.f32.mrb[141].mxu1  ;;  %v4567_v19 = vmax.f32 %v9419_v43, %v9422_v40 }
 0x8bf   : > { %v9426_v39 = vpop.eup %6353  ;;  %6365 = vpow2.f32 %v3847_v30  ;;  %4562 = vmax.xlane.f32.xlu0 %v4561_v18  ;;  %3951 = vadd.xlane.f32.xlu1 %v3950_v16  ;;  %v9430_v51 = vpop.f32.mrb[142].mxu1  ;;  %v9445_v16 = vmul.f32 0.35355338, %v9234_v13  ;;  %v9448_v18 = vmul.f32 0.35355338, %v9242_v55 }
 0x8c0   : > { %10489 = vst [vmem:[#allocation53_spill] sm:$0xff] %v9426_v39  ;;  %v9432_v50 = vpop.eup %6355  ;;  %6367 = vpow2.f32 %v3849_v36  ;;  %v3679_v62 = vpop.xlane.xlu0 %3678 }
 0x8c1   : > { %10490 = vst [vmem:[#allocation54_spill] sm:$0xff] %v9432_v50  ;;  %v9434_v11 = vpop.f32.mrb[143].mxu1  ;;  %v9436_v12 = vpop.eup %6357  ;;  %v3759_v45 = vsub.f32 %v9080_v28, %v3679_v62  ;;  %v3760_v26 = vsub.f32 %v9082_v44, %v3679_v62  ;;  %v3953_v15 = vadd.f32 %v9432_v50, %v9426_v39  ;;  %v9459_v50 = vmul.f32 0.35355338, %v9296_v53 }
 0x8c2   : > { %10491 = vst [vmem:[#allocation55_spill] sm:$0xff] %v9436_v12  ;;  %v9442_v30 = vpop.eup %6359  ;;  %v3682_v36 = vpop.xlane.xlu1 %3681 }
 0x8c3   : > { %10492 = vst [vmem:[#allocation56_spill] sm:$0xff] %v9442_v30  ;;  %v3851_v63 = vmul.f32 1.442695, %v3759_v45  ;;  %v3853_v33 = vmul.f32 1.442695, %v3760_v26  ;;  %v3761_v28 = vsub.f32 %v9084_v52, %v3682_v36  ;;  %v3762_v44 = vsub.f32 %v9086_v57, %v3682_v36  ;;  %4559 = vmax.xlane.f32.xlu1 %v4558_v54  ;;  %3954 = vadd.xlane.f32.xlu0 %v3953_v15 }
 0x8c4   : > { %v3956_v13 = vadd.f32 %v9442_v30, %v9436_v12  ;;  %10493 = vst [vmem:[#allocation57_spill] sm:$0xff] %v9459_v50  ;;  %v9462_v45 = vmul.f32 0.35355338, %v9301_v46 }
 0x8c5   : > { %6369 = vpow2.f32 %v3851_v63  ;;  %v3855_v62 = vmul.f32 1.442695, %v3761_v28  ;;  %v3857_v39 = vmul.f32 1.442695, %v3762_v44  ;;  %v9456_v55 = vpop.f32.mrb[144].mxu1  ;;  %v4564_v63 = vmax.f32 %v9445_v16, %v9448_v18 }
 0x8c6   : > { %6371 = vpow2.f32 %v3853_v33  ;;  %10494 = vst [vmem:[#allocation58_spill] sm:$0xff] %v9462_v45  ;;  %v9464_v52 = vpop.f32.mrb[145].mxu1 }
 0x8c7   : > { %v9466_v57 = vpop.eup %6361  ;;  %6373 = vpow2.f32 %v3855_v62  ;;  %3957 = vadd.xlane.f32.xlu1 %v3956_v13  ;;  %4568 = vmax.xlane.f32.xlu0 %v4567_v19  ;;  %v9470_v54 = vpop.f32.mrb[146].mxu1  ;;  %v9485_v19 = vmul.f32 0.35355338, %v9272_v20  ;;  %v9488_v62 = vmul.f32 0.35355338, %v9278_v35  ;;  %v4573_v13 = vmax.f32 %v9459_v50, %v9462_v45 }
 0x8c8   : > { %10495 = vst [vmem:[#allocation59_spill] sm:$0xff] %v9466_v57  ;;  %v9472_v26 = vpop.eup %6363  ;;  %6375 = vpow2.f32 %v3857_v39  ;;  %v3685_v53 = vpop.xlane.xlu0 %3684  ;;  %v9539_v50 = vmul.f32 0.35355338, %v9376_v23 }
 0x8c9   : > { %10496 = vst [vmem:[#allocation60_spill] sm:$0xff] %v9472_v26  ;;  %v9474_v33 = vpop.f32.mrb[147].mxu1  ;;  %v9476_v46 = vpop.eup %6365  ;;  %v3763_v15 = vsub.f32 %v9092_v0, %v3685_v53  ;;  %v3764_v36 = vsub.f32 %v9094_v3, %v3685_v53  ;;  %v3959_v28 = vadd.f32 %v9472_v26, %v9466_v57  ;;  %10499 = vst [vmem:[#allocation63_spill] sm:$0xff] %v9485_v19  ;;  %v9499_v26 = vmul.f32 0.35355338, %v9336_v25 }
 0x8ca   : > { %10497 = vst [vmem:[#allocation61_spill] sm:$0xff] %v9476_v46  ;;  %v9482_v44 = vpop.eup %6367  ;;  %10500 = vst [vmem:[#allocation64_spill] sm:$0xff] %v9488_v62  ;;  %v3688_v39 = vpop.xlane.xlu1 %3687 }
 0x8cb   : > { %10498 = vst [vmem:[#allocation62_spill] sm:$0xff] %v9482_v44  ;;  %v3859_v12 = vmul.f32 1.442695, %v3763_v15  ;;  %v3861_v30 = vmul.f32 1.442695, %v3764_v36  ;;  %v3765_v0 = vsub.f32 %v9096_v7, %v3688_v39  ;;  %v3766_v3 = vsub.f32 %v9098_v10, %v3688_v39  ;;  %4565 = vmax.xlane.f32.xlu1 %v4564_v63  ;;  %3960 = vadd.xlane.f32.xlu0 %v3959_v28  ;;  %v10505_v28 = vld [vmem:[#allocation6_spill] sm:$0xff] }
 0x8cc   : > { %v3962_v20 = vadd.f32 %v9482_v44, %v9476_v46  ;;  %v9502_v15 = vmul.f32 0.35355338, %v9344_v5 }
 0x8cd   : > { %6377 = vpow2.f32 %v3859_v12  ;;  %v3863_v53 = vmul.f32 1.442695, %v3765_v0  ;;  %v3865_v57 = vmul.f32 1.442695, %v3766_v3  ;;  %v9496_v35 = vpop.f32.mrb[148].mxu1  ;;  %v4570_v12 = vmax.f32 %v9485_v19, %v9488_v62  ;;  %v10506_v0 = vld [vmem:[#allocation7_spill] sm:$0xff] }
 0x8ce   : > { %6379 = vpow2.f32 %v3861_v30  ;;  %10501 = vst [vmem:[#allocation65_spill] sm:$0xff] %v9502_v15  ;;  %v9504_v7 = vpop.f32.mrb[149].mxu1  ;;  %v4579_v44 = vmax.f32 %v9499_v26, %v9502_v15 }
 0x8cf   : > { %v9506_v10 = vpop.eup %6369  ;;  %6381 = vpow2.f32 %v3863_v53  ;;  %3963 = vadd.xlane.f32.xlu1 %v3962_v20  ;;  %4574 = vmax.xlane.f32.xlu0 %v4573_v13  ;;  %v9510_v63 = vpop.f32.mrb[150].mxu1  ;;  %v9525_v13 = vmul.f32 0.35355338, %v9312_v47  ;;  %v9528_v20 = vmul.f32 0.35355338, %v9318_v60 }
 0x8d0   : > { %10502 = vst [vmem:[#allocation66_spill] sm:$0xff] %v9506_v10  ;;  %v9512_v36 = vpop.eup %6371  ;;  %6383 = vpow2.f32 %v3865_v57  ;;  %v3691_v25 = vpop.xlane.xlu0 %3690 }
 0x8d1   : > { %10503 = vst [vmem:[#allocation67_spill] sm:$0xff] %v9512_v36  ;;  %v9514_v30 = vpop.f32.mrb[151].mxu1  ;;  %v9516_v5 = vpop.eup %6373  ;;  %v3767_v39 = vsub.f32 %v10505_v28, %v3691_v25  ;;  %v3768_v3 = vsub.f32 %v10506_v0, %v3691_v25  ;;  %v3965_v46 = vadd.f32 %v9512_v36, %v9506_v10  ;;  %10508 = vst [vmem:[#allocation7_spill] sm:$0xff] %v9525_v13  ;;  %v10510_v28 = vld [vmem:[#allocation8_spill] sm:$0xff]  ;;  %v10511_v25 = vld [vmem:[#allocation9_spill] sm:$0xff] }
 0x8d2   : > { %10504 = vst [vmem:[#allocation68_spill] sm:$0xff] %v9516_v5  ;;  %v9522_v53 = vpop.eup %6375  ;;  %10509 = vst [vmem:[#allocation69_spill] sm:$0xff] %v9528_v20  ;;  %v3694_v57 = vpop.xlane.xlu1 %3693 }
 0x8d3   : > { %10507 = vst [vmem:[#allocation6_spill] sm:$0xff] %v9522_v53  ;;  %v3867_v62 = vmul.f32 1.442695, %v3767_v39  ;;  %v3869_v19 = vmul.f32 1.442695, %v3768_v3  ;;  %v3769_v45 = vsub.f32 %v10510_v28, %v3694_v57  ;;  %v3770_v0 = vsub.f32 %v10511_v25, %v3694_v57  ;;  %4571 = vmax.xlane.f32.xlu1 %v4570_v12  ;;  %3966 = vadd.xlane.f32.xlu0 %v3965_v46  ;;  %v10517_v12 = vld [vmem:[#allocation10_spill] sm:$0xff] }
 0x8d4   : > { %v3968_v47 = vadd.f32 %v9522_v53, %v9516_v5  ;;  %10512 = vst [vmem:[#allocation8_spill] sm:$0xff] %v9539_v50  ;;  %v9542_v39 = vmul.f32 0.35355338, %v9384_v17  ;;  %v10518_v25 = vld [vmem:[#allocation11_spill] sm:$0xff] }
 0x8d5   : > { %6385 = vpow2.f32 %v3867_v62  ;;  %v3871_v10 = vmul.f32 1.442695, %v3769_v45  ;;  %v3873_v36 = vmul.f32 1.442695, %v3770_v0  ;;  %v9536_v60 = vpop.f32.mrb[152].mxu1  ;;  %v4576_v45 = vmax.f32 %v9525_v13, %v9528_v20 }
 0x8d6   : > { %6387 = vpow2.f32 %v3869_v19  ;;  %10513 = vst [vmem:[#allocation9_spill] sm:$0xff] %v9542_v39  ;;  %v9544_v3 = vpop.f32.mrb[153].mxu1 }
 0x8d7   : > { %v9546_v57 = vpop.eup %6377  ;;  %6389 = vpow2.f32 %v3871_v10  ;;  %3969 = vadd.xlane.f32.xlu1 %v3968_v47  ;;  %4580 = vmax.xlane.f32.xlu0 %v4579_v44  ;;  %v9550_v46 = vpop.f32.mrb[154].mxu1  ;;  %v9565_v44 = vmul.f32 0.35355338, %v9352_v31  ;;  %v9568_v47 = vmul.f32 0.35355338, %v9358_v48 }
 0x8d8   : > { %10514 = vst [vmem:[#allocation70_spill] sm:$0xff] %v9546_v57  ;;  %v9552_v62 = vpop.eup %6379  ;;  %6391 = vpow2.f32 %v3873_v36  ;;  %v3697_v23 = vpop.xlane.xlu0 %3696  ;;  %v4585_v36 = vmax.f32 %v9539_v50, %v9542_v39  ;;  %v9579_v39 = vmul.f32 0.35355338, %v9416_v21 }
 0x8d9   : > { %10515 = vst [vmem:[#allocation71_spill] sm:$0xff] %v9552_v62  ;;  %v9554_v19 = vpop.f32.mrb[155].mxu1  ;;  %v9556_v17 = vpop.eup %6381  ;;  %v3771_v28 = vsub.f32 %v10517_v12, %v3697_v23  ;;  %v3772_v0 = vsub.f32 %v10518_v25, %v3697_v23  ;;  %v3971_v5 = vadd.f32 %v9552_v62, %v9546_v57  ;;  %10520 = vst [vmem:[#allocation11_spill] sm:$0xff] %v9565_v44  ;;  %v10522_v12 = vld [vmem:[#allocation12_spill] sm:$0xff]  ;;  %v10523_v23 = vld [vmem:[#allocation13_spill] sm:$0xff] }
 0x8da   : > { %10516 = vst [vmem:[#allocation72_spill] sm:$0xff] %v9556_v17  ;;  %v9562_v10 = vpop.eup %6383  ;;  %10521 = vst [vmem:[#allocation73_spill] sm:$0xff] %v9568_v47  ;;  %v3700_v53 = vpop.xlane.xlu1 %3699 }
 0x8db   : > { %10519 = vst [vmem:[#allocation10_spill] sm:$0xff] %v9562_v10  ;;  %v3875_v20 = vmul.f32 1.442695, %v3771_v28  ;;  %v3877_v13 = vmul.f32 1.442695, %v3772_v0  ;;  %v3773_v15 = vsub.f32 %v10522_v12, %v3700_v53  ;;  %v3774_v25 = vsub.f32 %v10523_v23, %v3700_v53  ;;  %4577 = vmax.xlane.f32.xlu1 %v4576_v45  ;;  %3972 = vadd.xlane.f32.xlu0 %v3971_v5  ;;  %v10529_v45 = vld [vmem:[#allocation14_spill] sm:$0xff] }
 0x8dc   : > { %v3974_v31 = vadd.f32 %v9562_v10, %v9556_v17  ;;  %10524 = vst [vmem:[#allocation12_spill] sm:$0xff] %v9579_v39  ;;  %v9582_v28 = vmul.f32 0.35355338, %v9424_v41  ;;  %v10530_v23 = vld [vmem:[#allocation15_spill] sm:$0xff] }
 0x8dd   : > { %6393 = vpow2.f32 %v3875_v20  ;;  %v3879_v57 = vmul.f32 1.442695, %v3773_v15  ;;  %v3881_v62 = vmul.f32 1.442695, %v3774_v25  ;;  %v9576_v48 = vpop.f32.mrb[156].mxu1  ;;  %v4582_v15 = vmax.f32 %v9565_v44, %v9568_v47 }
 0x8de   : > { %6395 = vpow2.f32 %v3877_v13  ;;  %10525 = vst [vmem:[#allocation13_spill] sm:$0xff] %v9582_v28  ;;  %v9584_v0 = vpop.f32.mrb[157].mxu1 }
 0x8df   : > { %v9586_v53 = vpop.eup %6385  ;;  %6397 = vpow2.f32 %v3879_v57  ;;  %3975 = vadd.xlane.f32.xlu1 %v3974_v31  ;;  %4586 = vmax.xlane.f32.xlu0 %v4585_v36  ;;  %v9590_v5 = vpop.f32.mrb[158].mxu1  ;;  %v9605_v36 = vmul.f32 0.35355338, %v9388_v29  ;;  %v9608_v31 = vmul.f32 0.35355338, %v9392_v6 }
 0x8e0   : > { %10526 = vst [vmem:[#allocation74_spill] sm:$0xff] %v9586_v53  ;;  %v9592_v20 = vpop.eup %6387  ;;  %6399 = vpow2.f32 %v3881_v62  ;;  %v3703_v21 = vpop.xlane.xlu0 %3702  ;;  %v4591_v62 = vmax.f32 %v9579_v39, %v9582_v28  ;;  %v9619_v28 = vmul.f32 0.35355338, %v9456_v55 }
 0x8e1   : > { %10527 = vst [vmem:[#allocation75_spill] sm:$0xff] %v9592_v20  ;;  %v9594_v13 = vpop.f32.mrb[159].mxu1  ;;  %v9596_v41 = vpop.eup %6389  ;;  %v3775_v12 = vsub.f32 %v10529_v45, %v3703_v21  ;;  %v3776_v25 = vsub.f32 %v10530_v23, %v3703_v21  ;;  %v3977_v17 = vadd.f32 %v9592_v20, %v9586_v53  ;;  %10532 = vst [vmem:[#allocation15_spill] sm:$0xff] %v9605_v36  ;;  %v10534_v45 = vld [vmem:[#allocation16_spill] sm:$0xff]  ;;  %v10535_v21 = vld [vmem:[#allocation17_spill] sm:$0xff] }
 0x8e2   : > { %10528 = vst [vmem:[#allocation76_spill] sm:$0xff] %v9596_v41  ;;  %v9602_v57 = vpop.eup %6391  ;;  %10533 = vst [vmem:[#allocation77_spill] sm:$0xff] %v9608_v31  ;;  %v3706_v10 = vpop.xlane.xlu1 %3705 }
 0x8e3   : > { %10531 = vst [vmem:[#allocation14_spill] sm:$0xff] %v9602_v57  ;;  %v3883_v47 = vmul.f32 1.442695, %v3775_v12  ;;  %v3885_v44 = vmul.f32 1.442695, %v3776_v25  ;;  %v3777_v50 = vsub.f32 %v10534_v45, %v3706_v10  ;;  %v3778_v23 = vsub.f32 %v10535_v21, %v3706_v10  ;;  %4583 = vmax.xlane.f32.xlu1 %v4582_v15  ;;  %3978 = vadd.xlane.f32.xlu0 %v3977_v17  ;;  %v10540_v15 = vld [vmem:[#allocation18_spill] sm:$0xff] }
 0x8e4   : > { %v3980_v29 = vadd.f32 %v9602_v57, %v9596_v41  ;;  %v9622_v12 = vmul.f32 0.35355338, %v9464_v52  ;;  %v10541_v21 = vld [vmem:[#allocation19_spill] sm:$0xff] }
 0x8e5   : > { %6401 = vpow2.f32 %v3883_v47  ;;  %v3887_v53 = vmul.f32 1.442695, %v3777_v50  ;;  %v3889_v20 = vmul.f32 1.442695, %v3778_v23  ;;  %v9616_v6 = vpop.f32.mrb[160].mxu1  ;;  %v4588_v50 = vmax.f32 %v9605_v36, %v9608_v31 }
 0x8e6   : > { %6403 = vpow2.f32 %v3885_v44  ;;  %10536 = vst [vmem:[#allocation16_spill] sm:$0xff] %v9622_v12  ;;  %v9624_v25 = vpop.f32.mrb[161].mxu1 }
 0x8e7   : > { %v9626_v10 = vpop.eup %6393  ;;  %6405 = vpow2.f32 %v3887_v53  ;;  %3981 = vadd.xlane.f32.xlu1 %v3980_v29  ;;  %4592 = vmax.xlane.f32.xlu0 %v4591_v62  ;;  %v9630_v17 = vpop.f32.mrb[162].mxu1  ;;  %v9645_v62 = vmul.f32 0.35355338, %v9430_v51  ;;  %v9648_v29 = vmul.f32 0.35355338, %v9434_v11 }
 0x8e8   : > { %10537 = vst [vmem:[#allocation17_spill] sm:$0xff] %v9626_v10  ;;  %v9632_v47 = vpop.eup %6395  ;;  %6407 = vpow2.f32 %v3889_v20  ;;  %v3709_v55 = vpop.xlane.xlu0 %3708  ;;  %v4597_v20 = vmax.f32 %v9619_v28, %v9622_v12  ;;  %v9659_v12 = vmul.f32 0.35355338, %v9496_v35  ;;  %v10550_v35 = vld [vmem:[#allocation22_spill] sm:$0xff] }
 0x8e9   : > { %10538 = vst [vmem:[#allocation78_spill] sm:$0xff] %v9632_v47  ;;  %v9634_v44 = vpop.f32.mrb[163].mxu1  ;;  %v9636_v52 = vpop.eup %6397  ;;  %v3779_v45 = vsub.f32 %v10540_v15, %v3709_v55  ;;  %v3780_v23 = vsub.f32 %v10541_v21, %v3709_v55  ;;  %v3983_v41 = vadd.f32 %v9632_v47, %v9626_v10  ;;  %10543 = vst [vmem:[#allocation19_spill] sm:$0xff] %v9648_v29  ;;  %v10544_v15 = vld [vmem:[#allocation20_spill] sm:$0xff]  ;;  %v10545_v55 = vld [vmem:[#allocation21_spill] sm:$0xff] }
 0x8ea   : > { %10539 = vst [vmem:[#allocation79_spill] sm:$0xff] %v9636_v52  ;;  %v9642_v53 = vpop.eup %6399  ;;  %v3712_v57 = vpop.xlane.xlu1 %3711 }
 0x8eb   : > { %10542 = vst [vmem:[#allocation18_spill] sm:$0xff] %v9642_v53  ;;  %v3891_v31 = vmul.f32 1.442695, %v3779_v45  ;;  %v3893_v36 = vmul.f32 1.442695, %v3780_v23  ;;  %v3781_v39 = vsub.f32 %v10544_v15, %v3712_v57  ;;  %v3782_v21 = vsub.f32 %v10545_v55, %v3712_v57  ;;  %4589 = vmax.xlane.f32.xlu1 %v4588_v50  ;;  %3984 = vadd.xlane.f32.xlu0 %v3983_v41 }
 0x8ec   : > { %v3986_v51 = vadd.f32 %v9642_v53, %v9636_v52  ;;  %v9662_v45 = vmul.f32 0.35355338, %v9504_v7  ;;  %v10551_v7 = vld [vmem:[#allocation23_spill] sm:$0xff]  ;;  %v9681_v52 = vmul.f32 0.35355338, %v9470_v54 }
 0x8ed   : > { %6409 = vpow2.f32 %v3891_v31  ;;  %v3895_v10 = vmul.f32 1.442695, %v3781_v39  ;;  %v3897_v47 = vmul.f32 1.442695, %v3782_v21  ;;  %v9656_v11 = vpop.f32.mrb[164].mxu1  ;;  %v4594_v39 = vmax.f32 %v9645_v62, %v9648_v29 }
 0x8ee   : > { %6411 = vpow2.f32 %v3893_v36  ;;  %10546 = vst [vmem:[#allocation20_spill] sm:$0xff] %v9662_v45  ;;  %v9664_v23 = vpop.f32.mrb[165].mxu1 }
 0x8ef   : > { %v9666_v57 = vpop.eup %6401  ;;  %6413 = vpow2.f32 %v3895_v10  ;;  %3987 = vadd.xlane.f32.xlu1 %v3986_v51  ;;  %4598 = vmax.xlane.f32.xlu0 %v4597_v20  ;;  %v9684_v10 = vmul.f32 0.35355338, %v9474_v33  ;;  %v9693_v33 = vmul.f32 0.35355338, %v9536_v60 }
 0x8f0   : > { %10547 = vst [vmem:[#allocation21_spill] sm:$0xff] %v9666_v57  ;;  %v9670_v41 = vpop.eup %6403  ;;  %6415 = vpow2.f32 %v3897_v47  ;;  %v3715_v36 = vpop.xlane.xlu0 %3714  ;;  %v4603_v47 = vmax.f32 %v9659_v12, %v9662_v45  ;;  %v9696_v45 = vmul.f32 0.35355338, %v9544_v3 }
 0x8f1   : > { %10548 = vst [vmem:[#allocation80_spill] sm:$0xff] %v9670_v41  ;;  %v9672_v31 = vpop.eup %6405  ;;  %v3783_v50 = vsub.f32 %v10550_v35, %v3715_v36  ;;  %v3784_v15 = vsub.f32 %v10551_v7, %v3715_v36  ;;  %v3989_v55 = vadd.f32 %v9670_v41, %v9666_v57  ;;  %v10553_v35 = vld [vmem:[#allocation24_spill] sm:$0xff]  ;;  %v10554_v36 = vld [vmem:[#allocation25_spill] sm:$0xff] }
 0x8f2   : > { %10549 = vst [vmem:[#allocation81_spill] sm:$0xff] %v9672_v31  ;;  %v9678_v21 = vpop.eup %6407  ;;  %v3718_v20 = vpop.xlane.xlu1 %3717 }
 0x8f3   : > { %10552 = vst [vmem:[#allocation22_spill] sm:$0xff] %v9678_v21  ;;  %v3899_v51 = vmul.f32 1.442695, %v3783_v50  ;;  %v3901_v53 = vmul.f32 1.442695, %v3784_v15  ;;  %v3785_v29 = vsub.f32 %v10553_v35, %v3718_v20  ;;  %v3786_v7 = vsub.f32 %v10554_v36, %v3718_v20  ;;  %4595 = vmax.xlane.f32.xlu1 %v4594_v39  ;;  %3990 = vadd.xlane.f32.xlu0 %v3989_v55  ;;  %v10559_v20 = vld [vmem:[#allocation27_spill] sm:$0xff] }
 0x8f4   : > { %v3992_v54 = vadd.f32 %v9678_v21, %v9672_v31  ;;  %v4600_v15 = vmax.f32 %v9681_v52, %v9684_v10  ;;  %v9713_v36 = vmul.f32 0.35355338, %v9510_v63 }
 0x8f5   : > { %6417 = vpow2.f32 %v3899_v51  ;;  %v3903_v57 = vmul.f32 1.442695, %v3785_v29  ;;  %v3905_v41 = vmul.f32 1.442695, %v3786_v7 }
 0x8f6   : > { %6419 = vpow2.f32 %v3901_v53  ;;  %v10558_v53 = vld [vmem:[#allocation26_spill] sm:$0xff] }
 0x8f7   : > { %v9698_v50 = vpop.eup %6409  ;;  %6421 = vpow2.f32 %v3903_v57  ;;  %3993 = vadd.xlane.f32.xlu1 %v3992_v54  ;;  %4604 = vmax.xlane.f32.xlu0 %v4603_v47  ;;  %v9716_v57 = vmul.f32 0.35355338, %v9514_v30  ;;  %v9724_v30 = vpop.f32.mrb[166].mxu1 }
 0x8f8   : > { %10555 = vst [vmem:[#allocation23_spill] sm:$0xff] %v9698_v50  ;;  %v9702_v29 = vpop.eup %6411  ;;  %6423 = vpow2.f32 %v3905_v41  ;;  %v3721_v39 = vpop.xlane.xlu0 %3720  ;;  %v4609_v41 = vmax.f32 %v9693_v33, %v9696_v45 }
 0x8f9   : > { %10556 = vst [vmem:[#allocation24_spill] sm:$0xff] %v9702_v29  ;;  %v9704_v55 = vpop.eup %6413  ;;  %v3787_v60 = vsub.f32 %v10558_v53, %v3721_v39  ;;  %v3788_v51 = vsub.f32 %v10559_v20, %v3721_v39  ;;  %v3995_v3 = vadd.f32 %v9702_v29, %v9698_v50  ;;  %v10560_v53 = vld [vmem:[#allocation28_spill] sm:$0xff]  ;;  %v10561_v39 = vld [vmem:[#allocation29_spill] sm:$0xff] }
 0x8fa   : > { %10557 = vst [vmem:[#allocation25_spill] sm:$0xff] %v9704_v55  ;;  %v9710_v35 = vpop.eup %6415  ;;  %v3724_v47 = vpop.xlane.xlu1 %3723 }
 0x8fb   : > { %v3907_v7 = vmul.f32 1.442695, %v3787_v60  ;;  %v3909_v54 = vmul.f32 1.442695, %v3788_v51  ;;  %v3789_v31 = vsub.f32 %v10560_v53, %v3724_v47  ;;  %v3790_v20 = vsub.f32 %v10561_v39, %v3724_v47  ;;  %4601 = vmax.xlane.f32.xlu1 %v4600_v15  ;;  %3996 = vadd.xlane.f32.xlu0 %v3995_v3  ;;  %v9736_v51 = vpop.f32.mrb[167].mxu1  ;;  %v10566_v39 = vld [vmem:[#allocation31_spill] sm:$0xff] }
 0x8fc   : > { %v3998_v63 = vadd.f32 %v9710_v35, %v9704_v55  ;;  %v4606_v60 = vmax.f32 %v9713_v36, %v9716_v57  ;;  %v9731_v15 = vmul.f32 0.35355338, %v9576_v48 }
 0x8fd   : > { %6425 = vpow2.f32 %v3907_v7  ;;  %v3911_v50 = vmul.f32 1.442695, %v3789_v31  ;;  %v3913_v29 = vmul.f32 1.442695, %v3790_v20  ;;  %v9734_v31 = vmul.f32 0.35355338, %v9584_v0 }
 0x8fe   : > { %6427 = vpow2.f32 %v3909_v54  ;;  %v10565_v54 = vld [vmem:[#allocation30_spill] sm:$0xff]  ;;  %v9749_v0 = vmul.f32 0.35355338, %v9550_v46  ;;  %v9752_v20 = vmul.f32 0.35355338, %v9554_v19 }
 0x8ff   : > { %v9726_v21 = vpop.eup %6417  ;;  %6429 = vpow2.f32 %v3911_v50  ;;  %3999 = vadd.xlane.f32.xlu1 %v3998_v63  ;;  %4610 = vmax.xlane.f32.xlu0 %v4609_v41  ;;  %v4615_v55 = vmax.f32 %v9731_v15, %v9734_v31 }
 0x900   : > { %10562 = vst [vmem:[#allocation26_spill] sm:$0xff] %v9726_v21  ;;  %v9738_v3 = vpop.eup %6419  ;;  %6431 = vpow2.f32 %v3913_v29  ;;  %v3727_v47 = vpop.xlane.xlu0 %3726  ;;  %v4612_v46 = vmax.f32 %v9749_v0, %v9752_v20 }
 0x901   : > { %10563 = vst [vmem:[#allocation27_spill] sm:$0xff] %v9738_v3  ;;  %v9740_v7 = vpop.eup %6421  ;;  %v3791_v53 = vsub.f32 %v10565_v54, %v3727_v47  ;;  %v3792_v50 = vsub.f32 %v10566_v39, %v3727_v47  ;;  %v4001_v41 = vadd.f32 %v9738_v3, %v9726_v21 }
 0x902   : > { %10564 = vst [vmem:[#allocation28_spill] sm:$0xff] %v9740_v7  ;;  %v9746_v48 = vpop.eup %6423 }
 0x903   : > { %10567 = vst [vmem:[#allocation29_spill] sm:$0xff] %v9746_v48  ;;  %v3915_v63 = vmul.f32 1.442695, %v3791_v53  ;;  %v3917_v29 = vmul.f32 1.442695, %v3792_v50  ;;  %4607 = vmax.xlane.f32.xlu1 %v4606_v60  ;;  %4002 = vadd.xlane.f32.xlu0 %v4001_v41  ;;  %v4004_v47 = vadd.f32 %v9746_v48, %v9740_v7 }
 0x904   : > { %v9771_v50 = vmul.f32 0.35355338, %v9590_v5  ;;  %v9774_v41 = vmul.f32 0.35355338, %v9594_v13 }
 0x905   : > { %6433 = vpow2.f32 %v3915_v63 }
 0x906   : > { %6435 = vpow2.f32 %v3917_v29  ;;  %v4618_v29 = vmax.f32 %v9771_v50, %v9774_v41 }
 0x907   : > { %v9758_v54 = vpop.eup %6425  ;;  %4005 = vadd.xlane.f32.xlu1 %v4004_v47  ;;  %4616 = vmax.xlane.f32.xlu0 %v4615_v55 }
 0x908   : > { %10568 = vst [vmem:[#allocation30_spill] sm:$0xff] %v9758_v54  ;;  %v9762_v19 = vpop.eup %6427 }
 0x909   : > { %10569 = vst [vmem:[#allocation31_spill] sm:$0xff] %v9762_v19  ;;  %v9764_v53 = vpop.eup %6429  ;;  %v4007_v60 = vadd.f32 %v9762_v19, %v9758_v54 }
 0x90a   : > { %10570 = vst [vmem:[#allocation82_spill] sm:$0xff] %v9764_v53  ;;  %v9768_v39 = vpop.eup %6431 }
 0x90b   : > { %10571 = vst [vmem:[#allocation83_spill] sm:$0xff] %v9768_v39  ;;  %4613 = vmax.xlane.f32.xlu1 %v4612_v46  ;;  %4008 = vadd.xlane.f32.xlu0 %v4007_v60  ;;  %v4010_v55 = vadd.f32 %v9768_v39, %v9764_v53 }
 0x90f   : > { %v9778_v63 = vpop.eup %6433  ;;  %4011 = vadd.xlane.f32.xlu1 %v4010_v55 }
 0x910   : > { %10572 = vst [vmem:[#allocation84_spill] sm:$0xff] %v9778_v63  ;;  %v9782_v47 = vpop.eup %6435 }
 0x911   : > { %10573 = vst [vmem:[#allocation85_spill] sm:$0xff] %v9782_v47  ;;  %v4013_v46 = vadd.f32 %v9782_v47, %v9778_v63 }
 0x913   : > { %4619 = vmax.xlane.f32.xlu1 %v4618_v29  ;;  %4014 = vadd.xlane.f32.xlu0 %v4013_v46 }
 0x928   : > { %v3925_v5 = vpop.xlane.xlu0 %3924 }
 0x929   : > { %6437 = vrcp.f32 %v3925_v5 }
 0x92a   : > { %v3928_v13 = vpop.xlane.xlu1 %3927 }
 0x92b   : > { %6439 = vrcp.f32 %v3928_v13 }
 0x92c   : > { %v4539_v60 = vpop.xlane.xlu0 %4538 }
 0x92d   : > { %v4633_v53 = vsub.f32 %v9224_v49, %v4539_v60  ;;  %v4634_v54 = vsub.f32 %v9230_v2, %v4539_v60 }
 0x92e   : > { %v3730_v39 = vpop.xlane.xlu1 %3729 }
 0x92f   : > { %v4697_v19 = vmul.f32 1.442695, %v4633_v53  ;;  %v4699_v7 = vmul.f32 1.442695, %v4634_v54  ;;  %v3793_v55 = vsub.f32 %v9246_v59, %v3730_v39  ;;  %v3794_v21 = vsub.f32 %v9248_v37, %v3730_v39  ;;  %v10574_v37 = vld [vmem:[#allocation34_spill] sm:$0xff] }
 0x930   : > { %v3931_v48 = vpop.xlane.xlu0 %3930 }
 0x931   : > { %6441 = vpow2.f32 %v4697_v19  ;;  %v3919_v29 = vmul.f32 1.442695, %v3793_v55  ;;  %v3921_v46 = vmul.f32 1.442695, %v3794_v21  ;;  %v10575_v19 = vld [vmem:[#allocation32_spill] sm:$0xff]  ;;  %v10576_v21 = vld [vmem:[#allocation33_spill] sm:$0xff] }
 0x932   : > { %6443 = vpow2.f32 %v4699_v7 }
 0x933   : > { %v6438_v5 = vpop.eup %6437  ;;  %6445 = vpow2.f32 %v3919_v29 }
 0x934   : > { %6447 = vpow2.f32 %v3921_v46  ;;  %v3934_v13 = vpop.xlane.xlu1 %3933  ;;  %v4545_v63 = vpop.xlane.xlu0 %4544  ;;  %v4052_v59 = vmul.f32 %v6438_v5, %v9232_v34  ;;  %v4051_v39 = vmul.f32 %v6438_v5, %v10575_v19 }
 0x935   : > { %v6440_v49 = vpop.eup %6439  ;;  %6449 = vrcp.f32 %v3931_v48  ;;  %v4637_v2 = vsub.f32 %v9259_v32, %v4545_v63  ;;  %v4638_v54 = vsub.f32 %v9266_v8, %v4545_v63 }
 0x936   : > { %6451 = vrcp.f32 %v3934_v13  ;;  %v4054_v53 = vmul.f32 %v6440_v49, %v10574_v37  ;;  %v4053_v7 = vmul.f32 %v6440_v49, %v10576_v21 }
 0x937   : > { %v4705_v60 = vmul.f32 1.442695, %v4637_v2  ;;  %v4707_v55 = vmul.f32 1.442695, %v4638_v54 }
 0x938   : > { %v4542_v29 = vpop.xlane.xlu1 %4541  ;;  %v3937_v46 = vpop.xlane.xlu0 %3936  ;;  %v4116_v47 = vpack.c.bf16 %v4054_v53, %v4052_v59  ;;  %v4115_v3 = vpack.c.bf16 %v4053_v7, %v4051_v39 }
 0x939   : > { %6453 = vpow2.f32 %v4705_v60  ;;  %v4635_v32 = vsub.f32 %v9287_v56, %v4542_v29  ;;  %v4636_v8 = vsub.f32 %v9290_v58, %v4542_v29  ;;  %v10578_v60 = vld [vmem:[#allocation43_spill] sm:$0xff]  ;;  %v10579_v29 = vld [vmem:[#allocation38_spill] sm:$0xff] }
 0x93a   : > { %6455 = vpow2.f32 %v4707_v55  ;;  %4147 = vmatprep.subr.bf16.mxu0 %v4116_v47 }
 0x93b   : > { %v9798_v34 = vpop.eup %6441  ;;  %v4701_v48 = vmul.f32 1.442695, %v4635_v32  ;;  %v4703_v63 = vmul.f32 1.442695, %v4636_v8  ;;  %4148 = vmatpush1.bf16.xpose.msra.mxu0 %v4115_v3  ;;  %6457 = vrcp.f32 %v3937_v46  ;;  %v10580_v32 = vld [vmem:[#allocation35_spill] sm:$0xff] }
 0x93c   : > { %v9800_v5 = vpop.eup %6443  ;;  %v3940_v13 = vpop.xlane.xlu1 %3939 }
 0x93d   : > { %v4551_v49 = vpop.xlane.xlu0 %4550  ;;  %v9802_v2 = vpop.eup %6445  ;;  %6459 = vpow2.f32 %v4701_v48  ;;  %v4825_v58 = vadd.f32 %v9800_v5, %v9798_v34  ;;  %v10581_v48 = vld [vmem:[#allocation37_spill] sm:$0xff] }
 0x93e   : > { %v4641_v54 = vsub.f32 %v9299_v1, %v4551_v49  ;;  %v4642_v56 = vsub.f32 %v9306_v61, %v4551_v49  ;;  %v9808_v47 = vpop.eup %6447  ;;  %6461 = vpow2.f32 %v4703_v63  ;;  %v10577_v1 = vld [vmem:[#allocation36_spill] sm:$0xff] }
 0x93f   : > { %v6450_v59 = vpop.eup %6449  ;;  %6463 = vrcp.f32 %v3940_v13  ;;  %4826 = vadd.xlane.f32.xlu0 %v4825_v58  ;;  %v4016_v53 = vadd.f32 %v9808_v47, %v9802_v2 }
 0x940   : > { %v4713_v3 = vmul.f32 1.442695, %v4641_v54  ;;  %v4715_v37 = vmul.f32 1.442695, %v4642_v56  ;;  %v6452_v19 = vpop.eup %6451  ;;  %v4548_v39 = vpop.xlane.xlu1 %4547  ;;  %v4056_v7 = vmul.f32 %v6450_v59, %v10577_v1  ;;  %v4055_v8 = vmul.f32 %v6450_v59, %v10580_v32 }
 0x941   : > { %v3943_v21 = vpop.xlane.xlu0 %3942  ;;  %4017 = vadd.xlane.f32.xlu1 %v4016_v53  ;;  %v4639_v61 = vsub.f32 %v9327_v4, %v4548_v39  ;;  %v4640_v55 = vsub.f32 %v10578_v60, %v4548_v39  ;;  %v4058_v46 = vmul.f32 %v6452_v19, %v10579_v29  ;;  %v4057_v63 = vmul.f32 %v6452_v19, %v10581_v48 }
 0x942   : > { %6465 = vpow2.f32 %v4713_v3 }
 0x943   : > { %6467 = vpow2.f32 %v4715_v37  ;;  %v9818_v13 = vpop.eup %6453  ;;  %v4709_v49 = vmul.f32 1.442695, %v4639_v61  ;;  %v4711_v54 = vmul.f32 1.442695, %v4640_v55  ;;  %v4118_v56 = vpack.c.bf16 %v4058_v46, %v4056_v7  ;;  %v10584_v55 = vld [vmem:[#allocation40_spill] sm:$0xff]  ;;  %v10585_v46 = vld [vmem:[#allocation42_spill] sm:$0xff] }
 0x944   : > { %10582 = vst [vmem:[#allocation34_spill] sm:$0xff] %v9818_v13  ;;  %v9820_v58 = vpop.eup %6455  ;;  %6469 = vrcp.f32 %v3943_v21  ;;  %v3946_v3 = vpop.xlane.xlu1 %3945  ;;  %v4117_v4 = vpack.c.bf16 %v4057_v63, %v4055_v8  ;;  %v10586_v8 = vld [vmem:[#allocation39_spill] sm:$0xff]  ;;  %v10587_v63 = vld [vmem:[#allocation41_spill] sm:$0xff] }
 0x945   : > { %10583 = vst [vmem:[#allocation32_spill] sm:$0xff] %v9820_v58  ;;  %v4557_v53 = vpop.xlane.xlu0 %4556  ;;  %6471 = vpow2.f32 %v4709_v49  ;;  %4149 = vmatprep.subr.bf16.mxu0 %v4118_v56  ;;  %v4831_v37 = vadd.f32 %v9820_v58, %v9818_v13  ;;  %v6458_v39 = vpop.eup %6457 }
 0x946   : > { %6473 = vpow2.f32 %v4711_v54  ;;  %4150 = vmatpush1.bf16.xpose.msra.mxu0 %v4117_v4  ;;  %v4060_v29 = vmul.f32 %v6458_v39, %v10584_v55  ;;  %v4059_v48 = vmul.f32 %v6458_v39, %v10586_v8  ;;  %v4645_v58 = vsub.f32 %v9339_v42, %v4557_v53 }
 0x947   : > { %v9824_v59 = vpop.eup %6459  ;;  %6475 = vrcp.f32 %v3946_v3  ;;  %4832 = vadd.xlane.f32.xlu0 %v4831_v37 }
 0x948   : > { %v9826_v19 = vpop.eup %6461  ;;  %v4554_v1 = vpop.xlane.xlu1 %4553 }
 0x949   : > { %v3949_v7 = vpop.xlane.xlu0 %3948  ;;  %v6464_v21 = vpop.eup %6463  ;;  %v4643_v61 = vsub.f32 %v9369_v22, %v4554_v1  ;;  %v4828_v60 = vadd.f32 %v9826_v19, %v9824_v59  ;;  %v4644_v56 = vsub.f32 %v9372_v9, %v4554_v1  ;;  %v9846_v9 = vmul.f32 0.35355338, %v9616_v6 }
 0x94a   : > { %v4062_v32 = vmul.f32 %v6464_v21, %v10585_v46  ;;  %v4061_v49 = vmul.f32 %v6464_v21, %v10587_v63  ;;  %6477 = vrcp.f32 %v3949_v7  ;;  %v9849_v1 = vmul.f32 0.35355338, %v9624_v25  ;;  %v10591_v63 = vld [vmem:[#allocation45_spill] sm:$0xff] }
 0x94b   : > { %4829 = vadd.xlane.f32.xlu1 %v4828_v60  ;;  %v4717_v55 = vmul.f32 1.442695, %v4643_v61  ;;  %v4719_v8 = vmul.f32 1.442695, %v4644_v56  ;;  %v4646_v7 = vsub.f32 %v9342_v14, %v4557_v53  ;;  %v10592_v56 = vld [vmem:[#allocation47_spill] sm:$0xff]  ;;  %v10593_v53 = vld [vmem:[#allocation44_spill] sm:$0xff] }
 0x94c   : > { %v9835_v54 = vpop.eup %6465  ;;  %v3952_v4 = vpop.xlane.xlu1 %3951  ;;  %v4120_v22 = vpack.c.bf16 %v4062_v32, %v4060_v29  ;;  %v4119_v13 = vpack.c.bf16 %v4061_v49, %v4059_v48  ;;  %v9855_v29 = vmul.f32 0.35355338, %v9630_v17  ;;  %v9858_v32 = vmul.f32 0.35355338, %v9634_v44 }
 0x94d   : > { %10588 = vst [vmem:[#allocation33_spill] sm:$0xff] %v9835_v54  ;;  %v9838_v3 = vpop.eup %6467  ;;  %v4563_v37 = vpop.xlane.xlu0 %4562  ;;  %6479 = vrcp.f32 %v3952_v4  ;;  %v4721_v48 = vmul.f32 1.442695, %v4645_v58  ;;  %v4621_v58 = vmax.f32 %v9846_v9, %v9849_v1 }
 0x94e   : > { %10589 = vst [vmem:[#allocation36_spill] sm:$0xff] %v9838_v3  ;;  %v4837_v39 = vadd.f32 %v9838_v3, %v9835_v54  ;;  %v6470_v46 = vpop.eup %6469  ;;  %4151 = vmatprep.subr.bf16.mxu0 %v4120_v22  ;;  %6481 = vpow2.f32 %v4717_v55  ;;  %v10594_v22 = vld [vmem:[#allocation46_spill] sm:$0xff]  ;;  %v4723_v55 = vmul.f32 1.442695, %v4646_v7  ;;  %v9875_v7 = vmul.f32 0.35355338, %v9656_v11 }
 0x94f   : > { %v9843_v21 = vpop.eup %6471  ;;  %4152 = vmatpush1.bf16.xpose.msra.mxu0 %v4119_v13  ;;  %v4064_v49 = vmul.f32 %v6470_v46, %v10591_v63  ;;  %v4063_v4 = vmul.f32 %v6470_v46, %v10593_v53  ;;  %6483 = vpow2.f32 %v4719_v8  ;;  %v4649_v63 = vsub.f32 %v9379_v27, %v4563_v37  ;;  %v10597_v53 = vld [vmem:[#allocation52_spill] sm:$0xff]  ;;  %v10598_v11 = vld [vmem:[#allocation49_spill] sm:$0xff] }
 0x950   : > { %10590 = vst [vmem:[#allocation43_spill] sm:$0xff] %v9843_v21  ;;  %4838 = vadd.xlane.f32.xlu0 %v4837_v39  ;;  %v9851_v42 = vpop.eup %6473  ;;  %v4560_v61 = vpop.xlane.xlu1 %4559 }
 0x951   : > { %v3955_v60 = vpop.xlane.xlu0 %3954  ;;  %v6476_v13 = vpop.eup %6475  ;;  %v4647_v6 = vsub.f32 %v9401_v38, %v4560_v61  ;;  %v4834_v25 = vadd.f32 %v9851_v42, %v9843_v21  ;;  %v4648_v44 = vsub.f32 %v9404_v24, %v4560_v61  ;;  %v4624_v24 = vmax.f32 %v9855_v29, %v9858_v32 }
 0x952   : > { %v4066_v14 = vmul.f32 %v6476_v13, %v10592_v56  ;;  %v4065_v17 = vmul.f32 %v6476_v13, %v10594_v22  ;;  %6485 = vrcp.f32 %v3955_v60  ;;  %v10595_v56 = vld [vmem:[#allocation48_spill] sm:$0xff]  ;;  %v9878_v60 = vmul.f32 0.35355338, %v9664_v23 }
 0x953   : > { %4835 = vadd.xlane.f32.xlu1 %v4834_v25  ;;  %v4650_v21 = vsub.f32 %v10595_v56, %v4563_v37  ;;  %v4725_v46 = vmul.f32 1.442695, %v4647_v6  ;;  %6487 = vpow2.f32 %v4721_v48  ;;  %v4727_v61 = vmul.f32 1.442695, %v4648_v44 }
 0x954   : > { %v3958_v38 = vpop.xlane.xlu1 %3957  ;;  %v4122_v39 = vpack.c.bf16 %v4066_v14, %v4064_v49  ;;  %v4121_v3 = vpack.c.bf16 %v4065_v17, %v4063_v4  ;;  %v6478_v8 = vpop.eup %6477  ;;  %v4729_v6 = vmul.f32 1.442695, %v4649_v63  ;;  %v10596_v14 = vld [vmem:[#allocation50_spill] sm:$0xff]  ;;  %v10599_v17 = vld [vmem:[#allocation51_spill] sm:$0xff] }
 0x955   : > { %v4569_v54 = vpop.xlane.xlu0 %4568  ;;  %6489 = vrcp.f32 %v3958_v38  ;;  %v4731_v25 = vmul.f32 1.442695, %v4650_v21  ;;  %v4067_v22 = vmul.f32 %v6478_v8, %v10598_v11  ;;  %v4627_v21 = vmax.f32 %v9875_v7, %v9878_v60 }
 0x956   : > { %4153 = vmatprep.subr.bf16.mxu0 %v4122_v39  ;;  %6491 = vpow2.f32 %v4723_v55  ;;  %v4653_v27 = vsub.f32 %v9419_v43, %v4569_v54  ;;  %v4654_v43 = vsub.f32 %v9422_v40, %v4569_v54  ;;  %v10601_v40 = vld [vmem:[#allocation57_spill] sm:$0xff] }
 0x957   : > { %4154 = vmatpush1.bf16.xpose.msra.mxu0 %v4121_v3  ;;  %4622 = vmax.xlane.f32.xlu1 %v4621_v58  ;;  %v6480_v48 = vpop.eup %6479  ;;  %6493 = vpow2.f32 %v4725_v46  ;;  %v4068_v3 = vmul.f32 %v6478_v8, %v10596_v14 }
 0x958   : > { %v4566_v37 = vpop.xlane.xlu1 %4565  ;;  %v4070_v4 = vmul.f32 %v6480_v48, %v10597_v53  ;;  %v4069_v23 = vmul.f32 %v6480_v48, %v10599_v17  ;;  %v9886_v44 = vpop.eup %6481  ;;  %6495 = vpow2.f32 %v4727_v61  ;;  %v4739_v61 = vmul.f32 1.442695, %v4654_v43  ;;  %v3165_v17 = vld [vmem:[%s10258_s8 + $0x20] sm:$0xff] }
 0x959   : > { %v3961_v13 = vpop.xlane.xlu0 %3960  ;;  %v4651_v49 = vsub.f32 %v9445_v16, %v4566_v37  ;;  %10600 = vst [vmem:[#allocation38_spill] sm:$0xff] %v9886_v44  ;;  %v4652_v58 = vsub.f32 %v9448_v18, %v4566_v37  ;;  %v4737_v16 = vmul.f32 1.442695, %v4653_v27  ;;  %v9892_v56 = vpop.eup %6483  ;;  %v10603_v27 = vld [vmem:[#allocation58_spill] sm:$0xff] }
 0x95a   : > { %6497 = vrcp.f32 %v3961_v13  ;;  %v4124_v38 = vpack.c.bf16 %v4070_v4, %v4068_v3  ;;  %v4123_v63 = vpack.c.bf16 %v4069_v23, %v4067_v22  ;;  %v10605_v3 = vld [vmem:[#allocation54_spill] sm:$0xff]  ;;  %v9902_v4 = vpop.f32.mrb[48].mxu0  ;;  %v10606_v23 = vld [vmem:[#allocation56_spill] sm:$0xff] }
 0x95b   : > { %4625 = vmax.xlane.f32.xlu1 %v4624_v24  ;;  %6499 = vpow2.f32 %v4729_v6  ;;  %v4733_v46 = vmul.f32 1.442695, %v4651_v49  ;;  %v4735_v18 = vmul.f32 1.442695, %v4652_v58  ;;  %v10604_v6 = vld [vmem:[#allocation63_spill] sm:$0xff]  ;;  %v10607_v58 = vld [vmem:[#allocation53_spill] sm:$0xff] }
 0x95c   : > { %v3964_v55 = vpop.xlane.xlu1 %3963  ;;  %v6486_v8 = vpop.eup %6485  ;;  %6501 = vpow2.f32 %v4731_v25  ;;  %4155 = vmatprep.subr.bf16.mxu0 %v4124_v38  ;;  %v4840_v25 = vadd.f32 %v9892_v56, %v9886_v44 }
 0x95d   : > { %v4575_v39 = vpop.xlane.xlu0 %4574  ;;  %6503 = vrcp.f32 %v3964_v55  ;;  %v9895_v24 = vpop.eup %6487  ;;  %v4072_v53 = vmul.f32 %v6486_v8, %v10605_v3 }
 0x95e   : > { %v4657_v54 = vsub.f32 %v10601_v40, %v4575_v39  ;;  %10602 = vst [vmem:[#allocation35_spill] sm:$0xff] %v9895_v24  ;;  %6505 = vpow2.f32 %v4737_v16  ;;  %v4658_v37 = vsub.f32 %v10603_v27, %v4575_v39  ;;  %v10608_v16 = vld [vmem:[#allocation55_spill] sm:$0xff]  ;;  %v9912_v38 = vpop.f32.mrb[49].mxu0 }
 0x95f   : > { %4156 = vmatpush1.bf16.xpose.msra.mxu0 %v4123_v63  ;;  %4628 = vmax.xlane.f32.xlu1 %v4627_v21  ;;  %v6490_v14 = vpop.eup %6489  ;;  %6507 = vpow2.f32 %v4733_v46  ;;  %v4071_v21 = vmul.f32 %v6486_v8, %v10607_v58  ;;  %v10610_v63 = vld [vmem:[#allocation64_spill] sm:$0xff] }
 0x960   : > { %v4572_v13 = vpop.xlane.xlu1 %4571  ;;  %v9904_v11 = vpop.eup %6491  ;;  %v4745_v22 = vmul.f32 1.442695, %v4657_v54  ;;  %v4074_v43 = vmul.f32 %v6490_v14, %v10606_v23  ;;  %v4073_v55 = vmul.f32 %v6490_v14, %v10608_v16  ;;  %6509 = vpow2.f32 %v4735_v18 }
 0x961   : > { %v3967_v48 = vpop.xlane.xlu0 %3966  ;;  %v4655_v49 = vsub.f32 %v10604_v6, %v4572_v13  ;;  %v9914_v39 = vpop.eup %6493  ;;  %v4656_v46 = vsub.f32 %v10610_v63, %v4572_v13  ;;  %v4747_v40 = vmul.f32 1.442695, %v4658_v37  ;;  %v4843_v23 = vadd.f32 %v9904_v11, %v9895_v24  ;;  %v10612_v13 = vld [vmem:[#allocation65_spill] sm:$0xff] }
 0x962   : > { %10609 = vst [vmem:[#allocation37_spill] sm:$0xff] %v9914_v39  ;;  %6511 = vrcp.f32 %v3967_v48  ;;  %v4126_v27 = vpack.c.bf16 %v4074_v43, %v4072_v53  ;;  %v4125_v3 = vpack.c.bf16 %v4073_v55, %v4071_v21  ;;  %v9917_v44 = vpop.eup %6495  ;;  %v10615_v43 = vld [vmem:[#allocation7_spill] sm:$0xff]  ;;  %v10616_v21 = vld [vmem:[#allocation60_spill] sm:$0xff] }
 0x963   : > { %4841 = vadd.xlane.f32.xlu1 %v4840_v25  ;;  %10611 = vst [vmem:[#allocation40_spill] sm:$0xff] %v9917_v44  ;;  %6513 = vpow2.f32 %v4739_v61  ;;  %v4741_v8 = vmul.f32 1.442695, %v4655_v49  ;;  %v4743_v25 = vmul.f32 1.442695, %v4656_v46  ;;  %v10618_v46 = vld [vmem:[#allocation62_spill] sm:$0xff] }
 0x964   : > { %v3970_v54 = vpop.xlane.xlu1 %3969  ;;  %v6498_v18 = vpop.eup %6497  ;;  %6515 = vpow2.f32 %v4745_v22  ;;  %4157 = vmatprep.subr.bf16.mxu0 %v4126_v27  ;;  %v10619_v27 = vld [vmem:[#allocation59_spill] sm:$0xff] }
 0x965   : > { %v4581_v6 = vpop.xlane.xlu0 %4580  ;;  %v9923_v48 = vpop.eup %6499  ;;  %6517 = vrcp.f32 %v3970_v54  ;;  %v4076_v16 = vmul.f32 %v6498_v18, %v10616_v21 }
 0x966   : > { %3189 = vperm.xlu0 %5853, %v3165_v17   ;;  %v4661_v14 = vsub.f32 %v9499_v26, %v4581_v6  ;;  %v4662_v37 = vsub.f32 %v10612_v13, %v4581_v6  ;;  %10613 = vst [vmem:[#allocation42_spill] sm:$0xff] %v9923_v48  ;;  %v9925_v53 = vpop.eup %6501  ;;  %6519 = vpow2.f32 %v4747_v40  ;;  %v4846_v26 = vadd.f32 %v9917_v44, %v9914_v39  ;;  %v10620_v40 = vld [vmem:[#allocation61_spill] sm:$0xff] }
 0x967   : > { %4158 = vmatpush1.bf16.xpose.msra.mxu0 %v4125_v3  ;;  %4844 = vadd.xlane.f32.xlu1 %v4843_v23  ;;  %10614 = vst [vmem:[#allocation39_spill] sm:$0xff] %v9925_v53  ;;  %v6504_v17 = vpop.eup %6503  ;;  %6521 = vpow2.f32 %v4741_v8  ;;  %v4075_v6 = vmul.f32 %v6498_v18, %v10619_v27  ;;  %v10622_v13 = vld [vmem:[#allocation69_spill] sm:$0xff]  ;;  %v4849_v18 = vadd.f32 %v9925_v53, %v9923_v48 }
 0x968   : > { %v4578_v61 = vpop.xlane.xlu1 %4577  ;;  %v4753_v22 = vmul.f32 1.442695, %v4661_v14  ;;  %v9931_v55 = vpop.eup %6505  ;;  %v4755_v63 = vmul.f32 1.442695, %v4662_v37  ;;  %v4078_v54 = vmul.f32 %v6504_v17, %v10618_v46  ;;  %v4077_v3 = vmul.f32 %v6504_v17, %v10620_v40  ;;  %v10624_v37 = vld [vmem:[#allocation8_spill] sm:$0xff] }
 0x969   : > { %v3973_v49 = vpop.xlane.xlu0 %3972  ;;  %v4659_v58 = vsub.f32 %v10615_v43, %v4578_v61  ;;  %10617 = vst [vmem:[#allocation41_spill] sm:$0xff] %v9931_v55  ;;  %v9936_v23 = vpop.eup %6507  ;;  %6523 = vpow2.f32 %v4743_v25  ;;  %v4660_v24 = vsub.f32 %v10622_v13, %v4578_v61  ;;  %v10625_v25 = vld [vmem:[#allocation9_spill] sm:$0xff] }
 0x96a   : > { %10621 = vst [vmem:[#allocation45_spill] sm:$0xff] %v9936_v23  ;;  %6525 = vrcp.f32 %v3973_v49  ;;  %v4128_v43 = vpack.c.bf16 %v4078_v54, %v4076_v16  ;;  %v4127_v39 = vpack.c.bf16 %v4077_v3, %v4075_v6  ;;  %v9939_v44 = vpop.eup %6509  ;;  %v10628_v3 = vld [vmem:[#allocation73_spill] sm:$0xff] }
 0x96b   : > { %4847 = vadd.xlane.f32.xlu1 %v4846_v26  ;;  %v4749_v8 = vmul.f32 1.442695, %v4659_v58  ;;  %10623 = vst [vmem:[#allocation47_spill] sm:$0xff] %v9939_v44  ;;  %6527 = vpow2.f32 %v4753_v22  ;;  %v4751_v49 = vmul.f32 1.442695, %v4660_v24  ;;  %v4852_v54 = vadd.f32 %v9939_v44, %v9936_v23 }
 0x96c   : > { %v3976_v14 = vpop.xlane.xlu1 %3975  ;;  %v6512_v17 = vpop.eup %6511  ;;  %6529 = vpow2.f32 %v4755_v63  ;;  %4159 = vmatprep.subr.bf16.mxu0 %v4128_v43  ;;  %v10627_v63 = vld [vmem:[#allocation11_spill] sm:$0xff] }
 0x96d   : > { %v4587_v21 = vpop.xlane.xlu0 %4586  ;;  %v9945_v26 = vpop.eup %6513  ;;  %6531 = vrcp.f32 %v3976_v14  ;;  %v10629_v43 = vld [vmem:[#allocation67_spill] sm:$0xff]  ;;  %v10630_v14 = vld [vmem:[#allocation6_spill] sm:$0xff] }
 0x96e   : > { %v4665_v46 = vsub.f32 %v10624_v37, %v4587_v21  ;;  %v4666_v61 = vsub.f32 %v10625_v25, %v4587_v21  ;;  %v9947_v58 = vpop.eup %6515  ;;  %6533 = vpow2.f32 %v4749_v8  ;;  %v4080_v21 = vmul.f32 %v6512_v17, %v10629_v43  ;;  %v10632_v25 = vld [vmem:[#allocation68_spill] sm:$0xff] }
 0x96f   : > { %4160 = vmatpush1.bf16.xpose.msra.mxu0 %v4127_v39  ;;  %4850 = vadd.xlane.f32.xlu1 %v4849_v18  ;;  %10626 = vst [vmem:[#allocation44_spill] sm:$0xff] %v9947_v58  ;;  %v6518_v27 = vpop.eup %6517  ;;  %v10631_v18 = vld [vmem:[#allocation66_spill] sm:$0xff]  ;;  %6535 = vpow2.f32 %v4751_v49 }
 0x970   : > { %v4584_v22 = vpop.xlane.xlu1 %4583  ;;  %v4761_v6 = vmul.f32 1.442695, %v4665_v46  ;;  %v9954_v24 = vpop.eup %6519  ;;  %v4763_v39 = vmul.f32 1.442695, %v4666_v61  ;;  %v4082_v37 = vmul.f32 %v6518_v27, %v10630_v14  ;;  %v4079_v8 = vmul.f32 %v6512_v17, %v10631_v18  ;;  %v10634_v17 = vld [vmem:[#allocation12_spill] sm:$0xff] }
 0x971   : > { %v3979_v16 = vpop.xlane.xlu0 %3978  ;;  %v4663_v40 = vsub.f32 %v10627_v63, %v4584_v22  ;;  %v4664_v13 = vsub.f32 %v10628_v3, %v4584_v22  ;;  %v4081_v48 = vmul.f32 %v6518_v27, %v10632_v25  ;;  %v9959_v53 = vpop.eup %6521  ;;  %v4855_v46 = vadd.f32 %v9945_v26, %v9931_v55  ;;  %v10635_v27 = vld [vmem:[#allocation13_spill] sm:$0xff] }
 0x972   : > { %10633 = vst [vmem:[#allocation46_spill] sm:$0xff] %v9959_v53  ;;  %6537 = vrcp.f32 %v3979_v16  ;;  %v4130_v3 = vpack.c.bf16 %v4082_v37, %v4080_v21  ;;  %v10636_v37 = vld [vmem:[#allocation15_spill] sm:$0xff] }
 0x973   : > { %4853 = vadd.xlane.f32.xlu1 %v4852_v54  ;;  %v4757_v63 = vmul.f32 1.442695, %v4663_v40  ;;  %v4129_v23 = vpack.c.bf16 %v4081_v48, %v4079_v8  ;;  %v9963_v61 = vpop.eup %6523  ;;  %6539 = vpow2.f32 %v4761_v6  ;;  %v4759_v14 = vmul.f32 1.442695, %v4664_v13  ;;  %v10637_v8 = vld [vmem:[#allocation77_spill] sm:$0xff] }
 0x974   : > { %v3982_v22 = vpop.xlane.xlu1 %3981  ;;  %v6526_v44 = vpop.eup %6525  ;;  %6541 = vpow2.f32 %v4763_v39  ;;  %4161 = vmatprep.subr.bf16.mxu0 %v4130_v3  ;;  %v4858_v13 = vadd.f32 %v9963_v61, %v9959_v53 }
 0x975   : > { %v4593_v43 = vpop.xlane.xlu0 %4592  ;;  %v9967_v49 = vpop.eup %6527  ;;  %6543 = vrcp.f32 %v3982_v22 }
 0x976   : > { %v4669_v18 = vsub.f32 %v10634_v17, %v4593_v43  ;;  %v4670_v25 = vsub.f32 %v10635_v27, %v4593_v43  ;;  %v9969_v40 = vpop.eup %6529  ;;  %6545 = vpow2.f32 %v4757_v63  ;;  %v10638_v43 = vld [vmem:[#allocation71_spill] sm:$0xff]  ;;  %v10642_v27 = vld [vmem:[#allocation72_spill] sm:$0xff] }
 0x977   : > { %4162 = vmatpush1.bf16.xpose.msra.mxu0 %v4129_v23  ;;  %4856 = vadd.xlane.f32.xlu1 %v4855_v46  ;;  %v6532_v21 = vpop.eup %6531  ;;  %6547 = vpow2.f32 %v4759_v14  ;;  %v4084_v22 = vmul.f32 %v6526_v44, %v10638_v43  ;;  %v10640_v23 = vld [vmem:[#allocation10_spill] sm:$0xff]  ;;  %v9982_v14 = vmul.f32 0.35355338, %v9724_v30  ;;  %v4861_v30 = vadd.f32 %v9954_v24, %v9947_v58 }
 0x978   : > { %v4769_v54 = vmul.f32 1.442695, %v4669_v18  ;;  %v4771_v16 = vmul.f32 1.442695, %v4670_v25  ;;  %v4590_v48 = vpop.xlane.xlu1 %4589  ;;  %v9976_v17 = vpop.eup %6533  ;;  %v4086_v46 = vmul.f32 %v6532_v21, %v10640_v23  ;;  %v10641_v18 = vld [vmem:[#allocation70_spill] sm:$0xff]  ;;  %v4085_v25 = vmul.f32 %v6532_v21, %v10642_v27 }
 0x979   : > { %v3985_v6 = vpop.xlane.xlu0 %3984  ;;  %v4667_v39 = vsub.f32 %v10636_v37, %v4590_v48  ;;  %v4668_v3 = vsub.f32 %v10637_v8, %v4590_v48  ;;  %10639 = vst [vmem:[#allocation48_spill] sm:$0xff] %v9976_v17  ;;  %v4083_v63 = vmul.f32 %v6526_v44, %v10641_v18  ;;  %v9985_v48 = vmul.f32 0.35355338, %v9736_v51  ;;  %v9987_v23 = vpop.eup %6535 }
 0x97a   : > { %6549 = vpow2.f32 %v4769_v54  ;;  %v4132_v8 = vpack.c.bf16 %v4086_v46, %v4084_v22  ;;  %10643 = vst [vmem:[#allocation50_spill] sm:$0xff] %v9987_v23  ;;  %v4864_v46 = vadd.f32 %v9987_v23, %v9976_v17 }
 0x97b   : > { %6551 = vpow2.f32 %v4771_v16  ;;  %v4765_v55 = vmul.f32 1.442695, %v4667_v39  ;;  %v4767_v53 = vmul.f32 1.442695, %v4668_v3  ;;  %4859 = vadd.xlane.f32.xlu1 %v4858_v13  ;;  %v4131_v43 = vpack.c.bf16 %v4085_v25, %v4083_v63  ;;  %v10644_v16 = vld [vmem:[#allocation16_spill] sm:$0xff]  ;;  %v10647_v63 = vld [vmem:[#allocation19_spill] sm:$0xff] }
 0x97c   : > { %6553 = vrcp.f32 %v3985_v6  ;;  %v3988_v37 = vpop.xlane.xlu1 %3987  ;;  %v6538_v39 = vpop.eup %6537  ;;  %4163 = vmatprep.subr.bf16.mxu0 %v4132_v8  ;;  %v10648_v25 = vld [vmem:[#allocation75_spill] sm:$0xff] }
 0x97d   : > { %v4599_v54 = vpop.xlane.xlu0 %4598  ;;  %6555 = vpow2.f32 %v4765_v55  ;;  %v9993_v6 = vpop.eup %6539 }
 0x97e   : > { %v4673_v44 = vsub.f32 %v9619_v28, %v4599_v54  ;;  %v4674_v21 = vsub.f32 %v10644_v16, %v4599_v54  ;;  %6557 = vpow2.f32 %v4767_v53  ;;  %10645 = vst [vmem:[#allocation52_spill] sm:$0xff] %v9993_v6  ;;  %v9995_v3 = vpop.eup %6541  ;;  %v4630_v28 = vmax.f32 %v9982_v14, %v9985_v48  ;;  %v10649_v54 = vld [vmem:[#allocation14_spill] sm:$0xff] }
 0x97f   : > { %6559 = vrcp.f32 %v3988_v37  ;;  %4164 = vmatpush1.bf16.xpose.msra.mxu0 %v4131_v43  ;;  %4862 = vadd.xlane.f32.xlu1 %v4861_v30  ;;  %10646 = vst [vmem:[#allocation49_spill] sm:$0xff] %v9995_v3  ;;  %v6544_v18 = vpop.eup %6543  ;;  %v4088_v37 = vmul.f32 %v6538_v39, %v10648_v25 }
 0x980   : > { %v4777_v51 = vmul.f32 1.442695, %v4673_v44  ;;  %v4779_v13 = vmul.f32 1.442695, %v4674_v21  ;;  %v4596_v55 = vpop.xlane.xlu1 %4595  ;;  %v10004_v8 = vpop.eup %6545  ;;  %v4090_v43 = vmul.f32 %v6544_v18, %v10649_v54  ;;  %v10650_v44 = vld [vmem:[#allocation74_spill] sm:$0xff]  ;;  %v10651_v21 = vld [vmem:[#allocation76_spill] sm:$0xff] }
 0x981   : > { %v3991_v22 = vpop.xlane.xlu0 %3990  ;;  %v4671_v53 = vsub.f32 %v9645_v62, %v4596_v55  ;;  %v4672_v27 = vsub.f32 %v10647_v63, %v4596_v55  ;;  %v4087_v16 = vmul.f32 %v6538_v39, %v10650_v44  ;;  %v4089_v30 = vmul.f32 %v6544_v18, %v10651_v21  ;;  %v10009_v58 = vpop.eup %6547  ;;  %v10652_v54 = vld [vmem:[#allocation20_spill] sm:$0xff] }
 0x982   : > { %6561 = vpow2.f32 %v4777_v51  ;;  %v4134_v55 = vpack.c.bf16 %v4090_v43, %v4088_v37  ;;  %v4870_v44 = vadd.f32 %v10009_v58, %v10004_v8 }
 0x983   : > { %6563 = vpow2.f32 %v4779_v13  ;;  %v4773_v17 = vmul.f32 1.442695, %v4671_v53  ;;  %v4775_v23 = vmul.f32 1.442695, %v4672_v27  ;;  %4865 = vadd.xlane.f32.xlu1 %v4864_v46  ;;  %v4133_v25 = vpack.c.bf16 %v4089_v30, %v4087_v16 }
 0x984   : > { %6565 = vrcp.f32 %v3991_v22  ;;  %v10011_v62 = vpop.eup %6549  ;;  %v3994_v51 = vpop.xlane.xlu1 %3993  ;;  %v4867_v53 = vadd.f32 %v9969_v40, %v9967_v49  ;;  %4165 = vmatprep.subr.bf16.mxu0 %v4134_v55 }
 0x985   : > { %4631 = vmax.xlane.f32.xlu0 %v4630_v28  ;;  %v4605_v63 = vpop.xlane.xlu0 %4604  ;;  %v10013_v13 = vpop.eup %6551  ;;  %6567 = vpow2.f32 %v4773_v17  ;;  %v4873_v28 = vadd.f32 %v9995_v3, %v9993_v6 }
 0x986   : > { %v4677_v39 = vsub.f32 %v9659_v12, %v4605_v63  ;;  %v4678_v18 = vsub.f32 %v10652_v54, %v4605_v63  ;;  %v6554_v27 = vpop.eup %6553  ;;  %6569 = vpow2.f32 %v4775_v23  ;;  %v4879_v23 = vadd.f32 %v10013_v13, %v10011_v62  ;;  %v10654_v63 = vld [vmem:[#allocation18_spill] sm:$0xff] }
 0x987   : > { %v10021_v22 = vpop.eup %6555  ;;  %6571 = vrcp.f32 %v3994_v51  ;;  %4166 = vmatpush1.bf16.xpose.msra.mxu0 %v4133_v25  ;;  %4868 = vadd.xlane.f32.xlu1 %v4867_v53  ;;  %v10653_v51 = vld [vmem:[#allocation78_spill] sm:$0xff] }
 0x988   : > { %v4785_v46 = vmul.f32 1.442695, %v4677_v39  ;;  %v4787_v37 = vmul.f32 1.442695, %v4678_v18  ;;  %v10023_v17 = vpop.eup %6557  ;;  %v4602_v12 = vpop.xlane.xlu1 %4601  ;;  %v4092_v55 = vmul.f32 %v6554_v27, %v10653_v51  ;;  %v10655_v39 = vld [vmem:[#allocation17_spill] sm:$0xff]  ;;  %v10656_v18 = vld [vmem:[#allocation79_spill] sm:$0xff] }
 0x989   : > { %4874 = vadd.xlane.f32.xlu0 %v4873_v28  ;;  %v3997_v43 = vpop.xlane.xlu0 %3996  ;;  %v6560_v16 = vpop.eup %6559  ;;  %v4675_v21 = vsub.f32 %v9681_v52, %v4602_v12  ;;  %v4676_v30 = vsub.f32 %v9684_v10, %v4602_v12  ;;  %v4091_v54 = vmul.f32 %v6554_v27, %v10655_v39 }
 0x98a   : > { %6573 = vpow2.f32 %v4785_v46  ;;  %v4094_v25 = vmul.f32 %v6560_v16, %v10654_v63  ;;  %v4093_v53 = vmul.f32 %v6560_v16, %v10656_v18  ;;  %v10658_v18 = vld [vmem:[#allocation22_spill] sm:$0xff] }
 0x98b   : > { %6575 = vpow2.f32 %v4787_v37  ;;  %v4781_v6 = vmul.f32 1.442695, %v4675_v21  ;;  %v4783_v3 = vmul.f32 1.442695, %v4676_v30  ;;  %4871 = vadd.xlane.f32.xlu1 %v4870_v44  ;;  %v4876_v37 = vadd.f32 %v10023_v17, %v10021_v22 }
 0x98c   : > { %v10035_v28 = vpop.eup %6561  ;;  %6577 = vrcp.f32 %v3997_v43  ;;  %v4000_v52 = vpop.xlane.xlu1 %3999  ;;  %v4136_v10 = vpack.c.bf16 %v4094_v25, %v4092_v55  ;;  %v4135_v51 = vpack.c.bf16 %v4093_v53, %v4091_v54 }
 0x98d   : > { %v10037_v46 = vpop.eup %6563  ;;  %4880 = vadd.xlane.f32.xlu0 %v4879_v23  ;;  %v4611_v12 = vpop.xlane.xlu0 %4610  ;;  %6579 = vpow2.f32 %v4781_v6 }
 0x98e   : > { %v6566_v63 = vpop.eup %6565  ;;  %v4681_v27 = vsub.f32 %v9693_v33, %v4611_v12  ;;  %v4682_v16 = vsub.f32 %v9696_v45, %v4611_v12  ;;  %v4885_v43 = vadd.f32 %v10037_v46, %v10035_v28  ;;  %6581 = vpow2.f32 %v4783_v3  ;;  %4167 = vmatprep.subr.bf16.mxu0 %v4136_v10  ;;  %v10657_v33 = vld [vmem:[#allocation80_spill] sm:$0xff]  ;;  %v10660_v12 = vld [vmem:[#allocation81_spill] sm:$0xff] }
 0x98f   : > { %v10045_v44 = vpop.eup %6567  ;;  %6583 = vrcp.f32 %v4000_v52  ;;  %4168 = vmatpush1.bf16.xpose.msra.mxu0 %v4135_v51  ;;  %4877 = vadd.xlane.f32.xlu1 %v4876_v37  ;;  %v4096_v25 = vmul.f32 %v6566_v63, %v10657_v33  ;;  %v10659_v52 = vld [vmem:[#allocation21_spill] sm:$0xff] }
 0x990   : > { %v4793_v23 = vmul.f32 1.442695, %v4681_v27  ;;  %v4795_v21 = vmul.f32 1.442695, %v4682_v16  ;;  %v10047_v30 = vpop.eup %6569  ;;  %v4608_v6 = vpop.xlane.xlu1 %4607  ;;  %v4095_v10 = vmul.f32 %v6566_v63, %v10659_v52 }
 0x991   : > { %4886 = vadd.xlane.f32.xlu0 %v4885_v43  ;;  %v4003_v55 = vpop.xlane.xlu0 %4002  ;;  %v6572_v45 = vpop.eup %6571  ;;  %v4679_v39 = vsub.f32 %v9713_v36, %v4608_v6  ;;  %v4680_v3 = vsub.f32 %v9716_v57, %v4608_v6  ;;  %v4882_v54 = vadd.f32 %v10047_v30, %v10045_v44 }
 0x992   : > { %6585 = vpow2.f32 %v4793_v23  ;;  %v4098_v53 = vmul.f32 %v6572_v45, %v10658_v18  ;;  %v4097_v51 = vmul.f32 %v6572_v45, %v10660_v12  ;;  %v10661_v18 = vld [vmem:[#allocation24_spill] sm:$0xff] }
 0x993   : > { %6587 = vpow2.f32 %v4795_v21  ;;  %v4789_v27 = vmul.f32 1.442695, %v4679_v39  ;;  %v4791_v16 = vmul.f32 1.442695, %v4680_v3  ;;  %4883 = vadd.xlane.f32.xlu1 %v4882_v54 }
 0x994   : > { %v10057_v37 = vpop.eup %6573  ;;  %6589 = vrcp.f32 %v4003_v55  ;;  %v4006_v36 = vpop.xlane.xlu1 %4005  ;;  %v4138_v57 = vpack.c.bf16 %v4098_v53, %v4096_v25  ;;  %v4137_v6 = vpack.c.bf16 %v4097_v51, %v4095_v10 }
 0x995   : > { %v10059_v43 = vpop.eup %6575  ;;  %v4617_v23 = vpop.xlane.xlu0 %4616  ;;  %6591 = vpow2.f32 %v4789_v27  ;;  %v10662_v27 = vld [vmem:[#allocation23_spill] sm:$0xff] }
 0x996   : > { %v6578_v33 = vpop.eup %6577  ;;  %v4685_v21 = vsub.f32 %v9731_v15, %v4617_v23  ;;  %v4686_v63 = vsub.f32 %v9734_v31, %v4617_v23  ;;  %v4891_v45 = vadd.f32 %v10059_v43, %v10057_v37  ;;  %6593 = vpow2.f32 %v4791_v16  ;;  %4169 = vmatprep.subr.bf16.mxu0 %v4138_v57 }
 0x997   : > { %v10065_v39 = vpop.eup %6579  ;;  %6595 = vrcp.f32 %v4006_v36  ;;  %4170 = vmatpush1.bf16.xpose.msra.mxu0 %v4137_v6  ;;  %v4100_v53 = vmul.f32 %v6578_v33, %v10661_v18  ;;  %v4099_v16 = vmul.f32 %v6578_v33, %v10662_v27  ;;  %v10663_v36 = vld [vmem:[#allocation25_spill] sm:$0xff]  ;;  %v10666_v27 = vld [vmem:[#allocation26_spill] sm:$0xff] }
 0x998   : > { %v4801_v3 = vmul.f32 1.442695, %v4685_v21  ;;  %v4803_v55 = vmul.f32 1.442695, %v4686_v63  ;;  %4892 = vadd.xlane.f32.xlu0 %v4891_v45  ;;  %v10067_v25 = vpop.eup %6581  ;;  %v4614_v54 = vpop.xlane.xlu1 %4613 }
 0x999   : > { %v6584_v15 = vpop.eup %6583  ;;  %v4683_v31 = vsub.f32 %v9749_v0, %v4614_v54  ;;  %v4684_v52 = vsub.f32 %v9752_v20, %v4614_v54  ;;  %v4009_v10 = vpop.xlane.xlu0 %4008  ;;  %v4888_v12 = vadd.f32 %v10067_v25, %v10065_v39 }
 0x99a   : > { %6597 = vpow2.f32 %v4801_v3  ;;  %v4102_v51 = vmul.f32 %v6584_v15, %v9710_v35  ;;  %v4101_v57 = vmul.f32 %v6584_v15, %v10663_v36  ;;  %v10667_v36 = vld [vmem:[#allocation28_spill] sm:$0xff] }
 0x99b   : > { %6599 = vpow2.f32 %v4803_v55  ;;  %v4797_v6 = vmul.f32 1.442695, %v4683_v31  ;;  %v4799_v21 = vmul.f32 1.442695, %v4684_v52  ;;  %4889 = vadd.xlane.f32.xlu1 %v4888_v12  ;;  %v10664_v52 = vld [vmem:[#allocation27_spill] sm:$0xff]  ;;  %v10665_v12 = vld [vmem:[#allocation29_spill] sm:$0xff] }
 0x99c   : > { %v10077_v23 = vpop.eup %6585  ;;  %6601 = vrcp.f32 %v4009_v10  ;;  %v4012_v0 = vpop.xlane.xlu1 %4011  ;;  %v4140_v20 = vpack.c.bf16 %v4102_v51, %v4100_v53  ;;  %v4139_v45 = vpack.c.bf16 %v4101_v57, %v4099_v16 }
 0x99d   : > { %v10079_v63 = vpop.eup %6587  ;;  %6603 = vpow2.f32 %v4797_v6 }
 0x99e   : > { %v4897_v3 = vadd.f32 %v10079_v63, %v10077_v23  ;;  %v6590_v35 = vpop.eup %6589  ;;  %6605 = vpow2.f32 %v4799_v21  ;;  %4171 = vmatprep.subr.bf16.mxu0 %v4140_v20 }
 0x99f   : > { %v10083_v33 = vpop.eup %6591  ;;  %6607 = vrcp.f32 %v4012_v0  ;;  %4172 = vmatpush1.bf16.xpose.msra.mxu0 %v4139_v45  ;;  %v4104_v10 = vmul.f32 %v6590_v35, %v10664_v52  ;;  %v4103_v16 = vmul.f32 %v6590_v35, %v10666_v27  ;;  %v10670_v52 = vld [vmem:[#allocation83_spill] sm:$0xff]  ;;  %v10672_v27 = vld [vmem:[#allocation82_spill] sm:$0xff] }
 0x9a0   : > { %4898 = vadd.xlane.f32.xlu0 %v4897_v3  ;;  %v10085_v55 = vpop.eup %6593  ;;  %v4620_v54 = vpop.xlane.xlu1 %4619 }
 0x9a1   : > { %v6596_v18 = vpop.eup %6595  ;;  %v4687_v15 = vsub.f32 %v9771_v50, %v4620_v54  ;;  %v4688_v53 = vsub.f32 %v9774_v41, %v4620_v54  ;;  %v4894_v31 = vadd.f32 %v10085_v55, %v10083_v33 }
 0x9a2   : > { %v4106_v51 = vmul.f32 %v6596_v18, %v10665_v12  ;;  %v4105_v57 = vmul.f32 %v6596_v18, %v10667_v36  ;;  %v10671_v12 = vld [vmem:[#allocation30_spill] sm:$0xff] }
 0x9a3   : > { %v4805_v21 = vmul.f32 1.442695, %v4687_v15  ;;  %v4807_v0 = vmul.f32 1.442695, %v4688_v53  ;;  %4895 = vadd.xlane.f32.xlu1 %v4894_v31  ;;  %v10669_v53 = vld [vmem:[#allocation31_spill] sm:$0xff] }
 0x9a4   : > { %v10095_v6 = vpop.eup %6597  ;;  %v4142_v50 = vpack.c.bf16 %v4106_v51, %v4104_v10  ;;  %v4141_v41 = vpack.c.bf16 %v4105_v57, %v4103_v16 }
 0x9a5   : > { %10668 = vst [vmem:[#allocation51_spill] sm:$0xff] %v10095_v6  ;;  %v10097_v20 = vpop.eup %6599  ;;  %6609 = vpow2.f32 %v4805_v21 }
 0x9a6   : > { %v4903_v45 = vadd.f32 %v10097_v20, %v10095_v6  ;;  %v6602_v3 = vpop.eup %6601  ;;  %6611 = vpow2.f32 %v4807_v0  ;;  %4173 = vmatprep.subr.bf16.mxu0 %v4142_v50 }
 0x9a7   : > { %v10101_v54 = vpop.eup %6603  ;;  %4174 = vmatpush1.bf16.xpose.msra.mxu0 %v4141_v41  ;;  %v4108_v31 = vmul.f32 %v6602_v3, %v10669_v53  ;;  %v4107_v51 = vmul.f32 %v6602_v3, %v10671_v12  ;;  %v10117_v41 = vpop.f32.mrb[50].mxu0 }
 0x9a8   : > { %4904 = vadd.xlane.f32.xlu0 %v4903_v45  ;;  %v10103_v35 = vpop.eup %6605  ;;  %10673 = vst [vmem:[#allocation57_spill] sm:$0xff] %v10117_v41  ;;  %v10119_v45 = vpop.f32.mrb[51].mxu0 }
 0x9a9   : > { %v6608_v18 = vpop.eup %6607  ;;  %v4900_v15 = vadd.f32 %v10103_v35, %v10101_v54  ;;  %10674 = vst [vmem:[#allocation58_spill] sm:$0xff] %v10119_v45  ;;  %v4015_v3 = vpop.xlane.xlu0 %4014 }
 0x9aa   : > { %v4110_v10 = vmul.f32 %v6608_v18, %v10670_v52  ;;  %v4109_v16 = vmul.f32 %v6608_v18, %v10672_v27  ;;  %6613 = vrcp.f32 %v4015_v3  ;;  %v10676_v27 = vld [vmem:[#allocation84_spill] sm:$0xff] }
 0x9ab   : > { %4901 = vadd.xlane.f32.xlu1 %v4900_v15 }
 0x9ac   : > { %v4144_v36 = vpack.c.bf16 %v4110_v10, %v4108_v31  ;;  %v4143_v57 = vpack.c.bf16 %v4109_v16, %v4107_v51  ;;  %v10675_v10 = vld [vmem:[#allocation85_spill] sm:$0xff] }
 0x9ae   : > { %4175 = vmatprep.subr.bf16.mxu0 %v4144_v36 }
 0x9af   : > { %v10111_v21 = vpop.eup %6609  ;;  %4176 = vmatpush1.bf16.xpose.msra.mxu0 %v4143_v57 }
 0x9b0   : > { %v10113_v0 = vpop.eup %6611 }
 0x9b1   : > { %v4906_v50 = vadd.f32 %v10113_v0, %v10111_v21 }
 0x9b3   : > { %4907 = vadd.xlane.f32.xlu1 %v4906_v50 }
 0x9b4   : > { %v6614_v53 = vpop.eup %6613 }
 0x9b5   : > { %v4112_v12 = vmul.f32 %v6614_v53, %v10675_v10  ;;  %v4111_v16 = vmul.f32 %v6614_v53, %v10676_v27 }
 0x9cc   : > { %v4827_v15 = vpop.xlane.xlu0 %4826 }
 0x9ce   : > { %v4018_v18 = vpop.xlane.xlu1 %4017 }
 0x9cf   : > { %6615 = vrcp.f32 %v4018_v18 }
 0x9d0   : > { %6617 = vrcp.f32 %v4827_v15 }
 0x9d4   : > { %v4833_v57 = vpop.xlane.xlu0 %4832 }
 0x9d8   : > { %v4830_v31 = vpop.xlane.xlu1 %4829 }
 0x9d9   : > { %v6616_v52 = vpop.eup %6615  ;;  %6619 = vrcp.f32 %v4830_v31 }
 0x9da   : > { %v4114_v51 = vmul.f32 %v6616_v52, %v9808_v47  ;;  %v4113_v36 = vmul.f32 %v6616_v52, %v9802_v2  ;;  %6621 = vrcp.f32 %v4833_v57  ;;  %v6618_v15 = vpop.eup %6617 }
 0x9db   : > { %v4954_v10 = vmul.f32 %v6618_v15, %v9800_v5  ;;  %v4953_v27 = vmul.f32 %v6618_v15, %v9798_v34 }
 0x9dc   : > { %v4146_v50 = vpack.c.bf16 %v4114_v51, %v4112_v12  ;;  %v4145_v41 = vpack.c.bf16 %v4113_v36, %v4111_v16 }
 0x9dd   : > { %v4839_v3 = vpop.xlane.xlu0 %4838 }
 0x9de   : > { %4177 = vmatprep.subr.bf16.mxu0 %v4146_v50 }
 0x9df   : > { %4178 = vmatpush1.bf16.xpose.msra.mxu0 %v4145_v41 }
 0x9e0   : > { %v4836_v18 = vpop.xlane.xlu1 %4835 }
 0x9e1   : > { %6623 = vrcp.f32 %v4836_v18 }
 0x9e3   : > { %v6620_v45 = vpop.eup %6619 }
 0x9e4   : > { %v4623_v31 = vpop.xlane.xlu1 %4622  ;;  %v4956_v47 = vmul.f32 %v6620_v45, %v9826_v19  ;;  %v4955_v53 = vmul.f32 %v6620_v45, %v9824_v59  ;;  %v6622_v19 = vpop.eup %6621  ;;  %v10677_v45 = vld [vmem:[#allocation32_spill] sm:$0xff] }
 0x9e5   : > { %v3190_v6 = vpop.permute.xlu0 %3189  ;;  %v4689_v2 = vsub.f32 %v9846_v9, %v4623_v31  ;;  %v4690_v52 = vsub.f32 %v9849_v1, %v4623_v31  ;;  %v4958_v18 = vmul.f32 %v6622_v19, %v10677_v45 }
 0x9e6   : > { %v3276_v12 = vadd.f32 %v9902_v4, %v3190_v6  ;;  %v3278_v41 = vadd.f32 %v9912_v38, %v3190_v6  ;;  %v5018_v51 = vpack.c.bf16 %v4956_v47, %v4954_v10  ;;  %v5017_v1 = vpack.c.bf16 %v4955_v53, %v4953_v27  ;;  %v10678_v10 = vld [vmem:[#allocation43_spill] sm:$0xff] }
 0x9e7   : > { %v4809_v16 = vmul.f32 1.442695, %v4689_v2  ;;  %v4811_v36 = vmul.f32 1.442695, %v4690_v52  ;;  %v10679_v52 = vld [vmem:[#allocation34_spill] sm:$0xff] }
 0x9e8   : > { %v3288_v57 = vpack.c.bf16 %v3276_v12, %v3276_v12  ;;  %v3289_v50 = vpack.c.bf16 %v3278_v41, %v3278_v41  ;;  %v4626_v5 = vpop.xlane.xlu1 %4625  ;;  %5049 = vmatprep.subr.bf16.mxu0 %v5018_v51  ;;  %v4957_v12 = vmul.f32 %v6622_v19, %v10679_v52  ;;  %v10683_v52 = vld [vmem:[#allocation40_spill] sm:$0xff] }
 0x9e9   : > { %6625 = vpow2.f32 %v4809_v16  ;;  %v4691_v59 = vsub.f32 %v9855_v29, %v4626_v5  ;;  %v4692_v9 = vsub.f32 %v9858_v32, %v4626_v5 }
 0x9ea   : > { %4179 = vmatprep.mubr.bf16.mxu0 %v3289_v50  ;;  %6627 = vpow2.f32 %v4811_v36 }
 0x9eb   : > { %4180 = vmatmul.mubr.bf16.vlgmr.msra.gmra.mrb[52].mxu0 %v3288_v57  ;;  %v6624_v4 = vpop.eup %6623  ;;  %v4813_v38 = vmul.f32 1.442695, %v4691_v59  ;;  %v4815_v6 = vmul.f32 1.442695, %v4692_v9 }
 0x9ec   : > { %5050 = vmatpush1.bf16.xpose.msra.mxu0 %v5017_v1  ;;  %v4629_v34 = vpop.xlane.xlu1 %4628  ;;  %v4960_v15 = vmul.f32 %v6624_v4, %v9851_v42  ;;  %v4959_v32 = vmul.f32 %v6624_v4, %v10678_v10  ;;  %v10680_v4 = vld [vmem:[#allocation36_spill] sm:$0xff] }
 0x9ed   : > { %6629 = vpow2.f32 %v4813_v38  ;;  %v4693_v31 = vsub.f32 %v9875_v7, %v4629_v34  ;;  %v4694_v29 = vsub.f32 %v9878_v60, %v4629_v34  ;;  %v10681_v34 = vld [vmem:[#allocation33_spill] sm:$0xff] }
 0x9ee   : > { %6631 = vpow2.f32 %v4815_v6  ;;  %v5020_v47 = vpack.c.bf16 %v4960_v15, %v4958_v18  ;;  %v5019_v51 = vpack.c.bf16 %v4959_v32, %v4957_v12  ;;  %v10682_v18 = vld [vmem:[#allocation38_spill] sm:$0xff] }
 0x9ef   : > { %v4817_v53 = vmul.f32 1.442695, %v4693_v31  ;;  %v4819_v2 = vmul.f32 1.442695, %v4694_v29  ;;  %6633 = vrcp.f32 %v4839_v3 }
 0x9f0   : > { %v4842_v41 = vpop.xlane.xlu1 %4841  ;;  %5051 = vmatprep.subr.bf16.mxu0 %v5020_v47 }
 0x9f1   : > { %6635 = vpow2.f32 %v4817_v53 }
 0x9f2   : > { %6637 = vpow2.f32 %v4819_v2 }
 0x9f3   : > { %v10141_v42 = vpop.eup %6625  ;;  %6639 = vrcp.f32 %v4842_v41 }
 0x9f4   : > { %5052 = vmatpush1.bf16.xpose.msra.mxu0 %v5019_v51  ;;  %v10143_v7 = vpop.eup %6627  ;;  %v4845_v60 = vpop.xlane.xlu1 %4844  ;;  %v10685_v51 = vld [vmem:[#allocation35_spill] sm:$0xff] }
 0x9f5   : > { %v4909_v27 = vadd.f32 %v10143_v7, %v10141_v42  ;;  %6641 = vrcp.f32 %v4845_v60 }
 0x9f7   : > { %v10147_v16 = vpop.eup %6629  ;;  %4910 = vadd.xlane.f32.xlu0 %v4909_v27 }
 0x9f8   : > { %v10149_v3 = vpop.eup %6631  ;;  %v4848_v36 = vpop.xlane.xlu1 %4847 }
 0x9f9   : > { %6643 = vrcp.f32 %v4848_v36  ;;  %v4912_v57 = vadd.f32 %v10149_v3, %v10147_v16  ;;  %v6634_v50 = vpop.eup %6633 }
 0x9fa   : > { %v4962_v38 = vmul.f32 %v6634_v50, %v10680_v4  ;;  %v4961_v45 = vmul.f32 %v6634_v50, %v10681_v34 }
 0x9fb   : > { %v10153_v5 = vpop.eup %6635  ;;  %4913 = vadd.xlane.f32.xlu1 %v4912_v57 }
 0x9fc   : > { %v10155_v19 = vpop.eup %6637  ;;  %v4851_v59 = vpop.xlane.xlu1 %4850 }
 0x9fd   : > { %v6640_v9 = vpop.eup %6639  ;;  %v4915_v1 = vadd.f32 %v10155_v19, %v10153_v5  ;;  %6645 = vrcp.f32 %v4851_v59 }
 0x9fe   : > { %v4964_v6 = vmul.f32 %v6640_v9, %v9892_v56  ;;  %v4963_v15 = vmul.f32 %v6640_v9, %v10682_v18  ;;  %v10684_v56 = vld [vmem:[#allocation37_spill] sm:$0xff] }
 0x9ff   : > { %4916 = vadd.xlane.f32.xlu0 %v4915_v1  ;;  %v6642_v32 = vpop.eup %6641  ;;  %v10686_v1 = vld [vmem:[#allocation39_spill] sm:$0xff] }
 0xa00   : > { %v4854_v31 = vpop.xlane.xlu1 %4853  ;;  %v5022_v29 = vpack.c.bf16 %v4964_v6, %v4962_v38  ;;  %v5021_v10 = vpack.c.bf16 %v4963_v15, %v4961_v45  ;;  %v4966_v2 = vmul.f32 %v6642_v32, %v9904_v11  ;;  %v4965_v60 = vmul.f32 %v6642_v32, %v10685_v51  ;;  %v10687_v38 = vld [vmem:[#allocation47_spill] sm:$0xff]  ;;  %v10688_v6 = vld [vmem:[#allocation45_spill] sm:$0xff]  ;;  %v10689_v45 = vld [vmem:[#allocation42_spill] sm:$0xff] }
 0xa01   : > { %6647 = vrcp.f32 %v4854_v31 }
 0xa02   : > { %5053 = vmatprep.subr.bf16.mxu0 %v5022_v29 }
 0xa03   : > { %v6644_v47 = vpop.eup %6643  ;;  %5054 = vmatpush1.bf16.xpose.msra.mxu0 %v5021_v10 }
 0xa04   : > { %v4857_v53 = vpop.xlane.xlu1 %4856  ;;  %v4968_v12 = vmul.f32 %v6644_v47, %v10683_v52  ;;  %v4967_v41 = vmul.f32 %v6644_v47, %v10684_v56 }
 0xa05   : > { %6649 = vrcp.f32 %v4857_v53 }
 0xa06   : > { %v5024_v27 = vpack.c.bf16 %v4968_v12, %v4966_v2  ;;  %v5023_v36 = vpack.c.bf16 %v4967_v41, %v4965_v60  ;;  %v3166_v2 = vld [vmem:[%s10258_s8 + $0x28] sm:$0xff] }
 0xa07   : > { %v6646_v50 = vpop.eup %6645 }
 0xa08   : > { %v4860_v57 = vpop.xlane.xlu1 %4859  ;;  %5055 = vmatprep.subr.bf16.mxu0 %v5024_v27  ;;  %v4970_v4 = vmul.f32 %v6646_v50, %v10686_v1  ;;  %v4969_v18 = vmul.f32 %v6646_v50, %v10689_v45  ;;  %v10690_v27 = vld [vmem:[#allocation46_spill] sm:$0xff]  ;;  %v10694_v45 = vld [vmem:[#allocation44_spill] sm:$0xff] }
 0xa09   : > { %6651 = vrcp.f32 %v4860_v57 }
 0xa0b   : > { %v6648_v59 = vpop.eup %6647  ;;  %5056 = vmatpush1.bf16.xpose.msra.mxu0 %v5023_v36 }
 0xa0c   : > { %v4863_v9 = vpop.xlane.xlu1 %4862  ;;  %v4972_v11 = vmul.f32 %v6648_v59, %v10687_v38  ;;  %v4971_v34 = vmul.f32 %v6648_v59, %v10688_v6  ;;  %v10692_v38 = vld [vmem:[#allocation50_spill] sm:$0xff]  ;;  %v10693_v6 = vld [vmem:[#allocation48_spill] sm:$0xff] }
 0xa0d   : > { %6653 = vrcp.f32 %v4863_v9 }
 0xa0e   : > { %v5026_v15 = vpack.c.bf16 %v4972_v11, %v4970_v4  ;;  %v5025_v31 = vpack.c.bf16 %v4971_v34, %v4969_v18 }
 0xa0f   : > { %v6650_v29 = vpop.eup %6649 }
 0xa10   : > { %v4866_v10 = vpop.xlane.xlu1 %4865  ;;  %5057 = vmatprep.subr.bf16.mxu0 %v5026_v15  ;;  %v4974_v12 = vmul.f32 %v6650_v29, %v9945_v26 }
 0xa11   : > { %6655 = vrcp.f32 %v4866_v10 }
 0xa12   : > { %v4632_v32 = vpop.xlane.xlu0 %4631 }
 0xa13   : > { %v4695_v47 = vsub.f32 %v9982_v14, %v4632_v32  ;;  %v4696_v53 = vsub.f32 %v9985_v48, %v4632_v32  ;;  %v6652_v52 = vpop.eup %6651  ;;  %5058 = vmatpush1.bf16.xpose.msra.mxu0 %v5025_v31  ;;  %v10691_v14 = vld [vmem:[#allocation41_spill] sm:$0xff] }
 0xa14   : > { %v4869_v51 = vpop.xlane.xlu1 %4868  ;;  %v4976_v60 = vmul.f32 %v6652_v52, %v9963_v61  ;;  %v4975_v36 = vmul.f32 %v6652_v52, %v10690_v27  ;;  %v4973_v57 = vmul.f32 %v6650_v29, %v10691_v14 }
 0xa15   : > { %v4821_v56 = vmul.f32 1.442695, %v4695_v47  ;;  %v4823_v41 = vmul.f32 1.442695, %v4696_v53  ;;  %6657 = vrcp.f32 %v4869_v51  ;;  %3194 = vperm.xlu0 %5853, %v3166_v2  }
 0xa16   : > { %v5028_v48 = vpack.c.bf16 %v4976_v60, %v4974_v12  ;;  %v5027_v50 = vpack.c.bf16 %v4975_v36, %v4973_v57  ;;  %v4875_v59 = vpop.xlane.xlu0 %4874 }
 0xa17   : > { %6659 = vpow2.f32 %v4821_v56  ;;  %v6654_v1 = vpop.eup %6653 }
 0xa18   : > { %6661 = vpow2.f32 %v4823_v41  ;;  %v4872_v9 = vpop.xlane.xlu1 %4871  ;;  %5059 = vmatprep.subr.bf16.mxu0 %v5028_v48  ;;  %v4978_v61 = vmul.f32 %v6654_v1, %v9954_v24  ;;  %v4977_v18 = vmul.f32 %v6654_v1, %v10694_v45  ;;  %v10695_v48 = vld [vmem:[#allocation49_spill] sm:$0xff]  ;;  %v10696_v1 = vld [vmem:[#allocation52_spill] sm:$0xff]  ;;  %v5095_v45 = vld [vmem:[%s10260_s10 + $0x8] sm:$0xff] }
 0xa19   : > { %6663 = vrcp.f32 %v4872_v9 }
 0xa1a   : > { %6665 = vrcp.f32 %v4875_v59  ;;  %v4881_v32 = vpop.xlane.xlu0 %4880 }
 0xa1b   : > { %v6656_v26 = vpop.eup %6655  ;;  %5060 = vmatpush1.bf16.xpose.msra.mxu0 %v5027_v50 }
 0xa1c   : > { %v4878_v4 = vpop.xlane.xlu1 %4877  ;;  %v4980_v11 = vmul.f32 %v6656_v26, %v10692_v38  ;;  %v4979_v34 = vmul.f32 %v6656_v26, %v10693_v6  ;;  %v5094_v6 = vld [vmem:[%s10260_s10] sm:$0xff] }
 0xa1d   : > { %6667 = vrcp.f32 %v4878_v4 }
 0xa1e   : > { %v5030_v15 = vpack.c.bf16 %v4980_v11, %v4978_v61  ;;  %v5029_v29 = vpack.c.bf16 %v4979_v34, %v4977_v18  ;;  %v4887_v14 = vpop.xlane.xlu0 %4886 }
 0xa1f   : > { %v6658_v31 = vpop.eup %6657 }
 0xa20   : > { %v4884_v47 = vpop.xlane.xlu1 %4883  ;;  %5061 = vmatprep.subr.bf16.mxu0 %v5030_v15  ;;  %v4982_v52 = vmul.f32 %v6658_v31, %v9969_v40  ;;  %v4981_v51 = vmul.f32 %v6658_v31, %v9967_v49 }
 0xa21   : > { %v10184_v10 = vpop.eup %6659  ;;  %6669 = vrcp.f32 %v4884_v47 }
 0xa22   : > { %v10186_v53 = vpop.eup %6661  ;;  %6671 = vrcp.f32 %v4881_v32 }
 0xa23   : > { %v4918_v24 = vadd.f32 %v10186_v53, %v10184_v10  ;;  %v6664_v2 = vpop.eup %6663  ;;  %5062 = vmatpush1.bf16.xpose.msra.mxu0 %v5029_v29 }
 0xa24   : > { %v4984_v12 = vmul.f32 %v6664_v2, %v10009_v58  ;;  %v4983_v56 = vmul.f32 %v6664_v2, %v10004_v8  ;;  %v6666_v41 = vpop.eup %6665 }
 0xa25   : > { %4919 = vadd.xlane.f32.xlu1 %v4918_v24  ;;  %v4986_v50 = vmul.f32 %v6666_v41, %v10695_v48  ;;  %v4985_v26 = vmul.f32 %v6666_v41, %v10696_v1  ;;  %v4893_v4 = vpop.xlane.xlu0 %4892 }
 0xa26   : > { %v5032_v60 = vpack.c.bf16 %v4984_v12, %v4982_v52  ;;  %v5031_v36 = vpack.c.bf16 %v4983_v56, %v4981_v51 }
 0xa27   : > { %v6668_v27 = vpop.eup %6667 }
 0xa28   : > { %v4890_v57 = vpop.xlane.xlu1 %4889  ;;  %5063 = vmatprep.subr.bf16.mxu0 %v5032_v60  ;;  %v4988_v59 = vmul.f32 %v6668_v27, %v10023_v17  ;;  %v4987_v8 = vmul.f32 %v6668_v27, %v10021_v22 }
 0xa29   : > { %6673 = vrcp.f32 %v4890_v57 }
 0xa2a   : > { %v5034_v9 = vpack.c.bf16 %v4988_v59, %v4986_v50  ;;  %6675 = vrcp.f32 %v4887_v14  ;;  %v5033_v11 = vpack.c.bf16 %v4987_v8, %v4985_v26 }
 0xa2b   : > { %v6670_v40 = vpop.eup %6669  ;;  %5064 = vmatpush1.bf16.xpose.msra.mxu0 %v5031_v36 }
 0xa2c   : > { %5065 = vmatprep.subr.bf16.mxu0 %v5034_v9  ;;  %v6672_v58 = vpop.eup %6671  ;;  %v4992_v49 = vmul.f32 %v6670_v40, %v10047_v30  ;;  %v4991_v30 = vmul.f32 %v6670_v40, %v10045_v44 }
 0xa2d   : > { %v4990_v38 = vmul.f32 %v6672_v58, %v10013_v13  ;;  %v4989_v18 = vmul.f32 %v6672_v58, %v10011_v62  ;;  %v4899_v15 = vpop.xlane.xlu0 %4898 }
 0xa2f   : > { %v5036_v17 = vpack.c.bf16 %v4992_v49, %v4990_v38  ;;  %v5035_v32 = vpack.c.bf16 %v4991_v30, %v4989_v18 }
 0xa30   : > { %v4896_v61 = vpop.xlane.xlu1 %4895 }
 0xa31   : > { %6677 = vrcp.f32 %v4896_v61  ;;  %v10698_v61 = vld [vmem:[#allocation58_spill] sm:$0xff] }
 0xa32   : > { %6679 = vrcp.f32 %v4893_v4 }
 0xa33   : > { %v6674_v34 = vpop.eup %6673  ;;  %5066 = vmatpush1.bf16.xpose.msra.mxu0 %v5033_v11 }
 0xa34   : > { %5067 = vmatprep.subr.bf16.mxu0 %v5036_v17  ;;  %v6676_v22 = vpop.eup %6675  ;;  %v4996_v13 = vmul.f32 %v6674_v34, %v10067_v25  ;;  %v4995_v2 = vmul.f32 %v6674_v34, %v10065_v39 }
 0xa35   : > { %v4994_v29 = vmul.f32 %v6676_v22, %v10037_v46  ;;  %v4993_v25 = vmul.f32 %v6676_v22, %v10035_v28  ;;  %v4905_v62 = vpop.xlane.xlu0 %4904 }
 0xa36   : > { %5098 = vperm.xlu1 %5854, %v5094_v6  }
 0xa37   : > { %v5038_v47 = vpack.c.bf16 %v4996_v13, %v4994_v29  ;;  %v5037_v46 = vpack.c.bf16 %v4995_v2, %v4993_v25 }
 0xa38   : > { %v4902_v31 = vpop.xlane.xlu1 %4901 }
 0xa39   : > { %6681 = vrcp.f32 %v4902_v31 }
 0xa3a   : > { %5103 = vperm.xlu1 %5854, %v5095_v45   ;;  %6683 = vrcp.f32 %v4899_v15 }
 0xa3b   : > { %v6678_v24 = vpop.eup %6677  ;;  %5068 = vmatpush1.bf16.xpose.msra.mxu0 %v5035_v32  ;;  %v10699_v32 = vld [vmem:[#allocation57_spill] sm:$0xff] }
 0xa3c   : > { %5069 = vmatprep.subr.bf16.mxu0 %v5038_v47  ;;  %v6680_v44 = vpop.eup %6679  ;;  %v5000_v52 = vmul.f32 %v6678_v24, %v10085_v55  ;;  %v4999_v27 = vmul.f32 %v6678_v24, %v10083_v33 }
 0xa3d   : > { %v4998_v56 = vmul.f32 %v6680_v44, %v10059_v43  ;;  %v4997_v55 = vmul.f32 %v6680_v44, %v10057_v37 }
 0xa3f   : > { %v5040_v41 = vpack.c.bf16 %v5000_v52, %v4998_v56  ;;  %v5039_v36 = vpack.c.bf16 %v4999_v27, %v4997_v55 }
 0xa40   : > { %v4908_v12 = vpop.xlane.xlu1 %4907 }
 0xa41   : > { %6685 = vrcp.f32 %v4908_v12 }
 0xa42   : > { %6687 = vrcp.f32 %v4905_v62 }
 0xa43   : > { %v6682_v51 = vpop.eup %6681  ;;  %5070 = vmatpush1.bf16.xpose.msra.mxu0 %v5037_v46 }
 0xa44   : > { %5071 = vmatprep.subr.bf16.mxu0 %v5040_v41  ;;  %v6684_v60 = vpop.eup %6683  ;;  %v5004_v39 = vmul.f32 %v6682_v51, %v10103_v35  ;;  %v5003_v48 = vmul.f32 %v6682_v51, %v10101_v54 }
 0xa45   : > { %v5002_v28 = vmul.f32 %v6684_v60, %v10079_v63  ;;  %v5001_v59 = vmul.f32 %v6684_v60, %v10077_v23  ;;  %v10697_v63 = vld [vmem:[#allocation51_spill] sm:$0xff]  ;;  %v10700_v60 = vld [vmem:[#allocation5_spill] sm:$0xff] }
 0xa47   : > { %v5042_v14 = vpack.c.bf16 %v5004_v39, %v5002_v28  ;;  %v5041_v9 = vpack.c.bf16 %v5003_v48, %v5001_v59  ;;  %v10701_v28 = vld [vmem:[#allocation3_spill] sm:$0xff]  ;;  %v10703_v48 = vld [vmem:[#allocation4_spill] sm:$0xff] }
 0xa4b   : > { %v6686_v57 = vpop.eup %6685  ;;  %5072 = vmatpush1.bf16.xpose.msra.mxu0 %v5039_v36 }
 0xa4c   : > { %5073 = vmatprep.subr.bf16.mxu0 %v5042_v14  ;;  %v6688_v43 = vpop.eup %6687  ;;  %v5008_v50 = vmul.f32 %v6686_v57, %v10113_v0  ;;  %v5007_v37 = vmul.f32 %v6686_v57, %v10111_v21  ;;  %v10702_v57 = vld [vmem:[#allocation2_spill] sm:$0xff] }
 0xa4d   : > { %v5006_v33 = vmul.f32 %v6688_v43, %v10097_v20  ;;  %v5005_v40 = vmul.f32 %v6688_v43, %v10697_v63 }
 0xa4f   : > { %v5044_v35 = vpack.c.bf16 %v5008_v50, %v5006_v33  ;;  %v5043_v58 = vpack.c.bf16 %v5007_v37, %v5005_v40 }
 0xa53   : > { %5074 = vmatpush1.bf16.xpose.msra.mxu0 %v5041_v9 }
 0xa54   : > { %5075 = vmatprep.subr.bf16.mxu0 %v5044_v35 }
 0xa5b   : > { %5076 = vmatpush1.bf16.xpose.msra.mxu0 %v5043_v58 }
 0xa84   : > { %v4911_v8 = vpop.xlane.xlu0 %4910 }
 0xa85   : > { %6689 = vrcp.f32 %v4911_v8 }
 0xa88   : > { %v4914_v49 = vpop.xlane.xlu1 %4913 }
 0xa89   : > { %6691 = vrcp.f32 %v4914_v49 }
 0xa8c   : > { %v4917_v54 = vpop.xlane.xlu0 %4916 }
 0xa8d   : > { %6693 = vrcp.f32 %v4917_v54 }
 0xa8f   : > { %v6690_v0 = vpop.eup %6689 }
 0xa90   : > { %v5010_v20 = vmul.f32 %v6690_v0, %v10143_v7  ;;  %v5009_v4 = vmul.f32 %v6690_v0, %v10141_v42 }
 0xa93   : > { %v6692_v1 = vpop.eup %6691 }
 0xa94   : > { %v3195_v23 = vpop.permute.xlu0 %3194  ;;  %v5012_v26 = vmul.f32 %v6692_v1, %v10149_v3  ;;  %v5011_v21 = vmul.f32 %v6692_v1, %v10147_v16 }
 0xa95   : > { %v3282_v38 = vadd.f32 %v10698_v61, %v3195_v23  ;;  %v3280_v47 = vadd.f32 %v10699_v32, %v3195_v23 }
 0xa96   : > { %v5046_v11 = vpack.c.bf16 %v5012_v26, %v5010_v20  ;;  %v5045_v17 = vpack.c.bf16 %v5011_v21, %v5009_v4 }
 0xa97   : > { %v4193_v6 = vpack.c.bf16 %v3282_v38, %v3282_v38  ;;  %v6694_v22 = vpop.eup %6693  ;;  %v4192_v24 = vpack.c.bf16 %v3280_v47, %v3280_v47 }
 0xa98   : > { %5077 = vmatprep.subr.bf16.mxu0 %v5046_v11  ;;  %v5014_v3 = vmul.f32 %v6694_v22, %v10155_v19  ;;  %v5013_v16 = vmul.f32 %v6694_v22, %v10153_v5 }
 0xa99   : > { %5078 = vmatpush1.bf16.xpose.msra.mxu0 %v5045_v17  ;;  %5081 = vmatprep.mubr.bf16.mxu0 %v4193_v6 }
 0xab2   : > { %v4920_v34 = vpop.xlane.xlu1 %4919 }
 0xab3   : > { %6695 = vrcp.f32 %v4920_v34 }
 0xab6   : > { %v5099_v25 = vpop.permute.xlu1 %5098 }
 0xaba   : > { %v5104_v46 = vpop.permute.xlu1 %5103 }
 0xabd   : > { %v6696_v30 = vpop.eup %6695 }
 0xabe   : > { %v4181_v7 = vpop.f32.mrb[52].mxu0  ;;  %v5016_v42 = vmul.f32 %v6696_v30, %v10186_v53  ;;  %v5015_v45 = vmul.f32 %v6696_v30, %v10184_v10  ;;  %v6296_v10 = vld [vmem:[%s10259_s9] sm:$0xff]  }
 0xabf   : > { %v4183_v13 = vpop.f32.mrb[53].mxu0 }
 0xac0   : > { %v4185_v18 = vpop.f32.mrb[54].mxu0  ;;  %v5048_v15 = vpack.c.bf16 %v5016_v42, %v5014_v3  ;;  %v5047_v31 = vpack.c.bf16 %v5015_v45, %v5013_v16 }
 0xac1   : > { %v4186_v29 = vpop.f32.mrb[55].mxu0 }
 0xac2   : > { %5079 = vmatprep.subr.bf16.mxu0 %v5048_v15 }
 0xac3   : > { %5080 = vmatpush1.bf16.xpose.msra.mxu0 %v5047_v31 }
 0xaca   : > { %5082 = vmatmul.mubr.bf16.vlgmr.msra.gmra.mrb[56].mxu0 %v4192_v24 }
 0xb9d   : > { %v5083_v44 = vpop.f32.mrb[56].mxu0 }
 0xb9e   : > { %v5092_v19 = vpack.c.bf16 %v5083_v44, %v4181_v7  ;;  %v5085_v2 = vpop.f32.mrb[57].mxu0 }
 0xb9f   : > { %v5093_v53 = vpack.c.bf16 %v5085_v2, %v4183_v13  ;;  %v5087_v52 = vpop.f32.mrb[58].mxu0 }
 0xba0   : > { %v5088_v5 = vpop.f32.mrb[59].mxu0 }
 0xba1   : > { %5114 = vmatprep.subr.bf16.mxu1 %v5093_v53 }
 0xba2   : > { %5115 = vmatpush1.bf16.msra.mxu1 %v5092_v19 }
 0xba5   : > { %5838 = vmatmul.mubr.msk.bf16.vlgmr.msra.gmra.mrb[168].mxu1 %vm2578_vm0, %v6296_v10 }
 0xc78   : > { %v5148_v62 = vpop.f32.mrb[168].mxu1 }
 0xc79   : > { %v5149_v12 = vadd.f32 %v5148_v62, %v5099_v25  ;;  %v5150_v56 = vpop.f32.mrb[169].mxu1 }
 0xc7a   : > { %v5151_v41 = vadd.f32 %v5150_v56, %v5099_v25  ;;  %v5152_v51 = vpop.f32.mrb[170].mxu1 }
 0xc7b   : > { %v5157_v27 = vadd.f32 %v5149_v12, %v10700_v60  ;;  %v5153_v39 = vadd.f32 %v5152_v51, %v5104_v46  ;;  %v5154_v55 = vpop.f32.mrb[171].mxu1 }
 0xc7c   : > { %v5158_v36 = vadd.f32 %v5151_v41, %v10701_v28  ;;  %v5155_v14 = vadd.f32 %v5154_v55, %v5104_v46 }
 0xc7d   : > { %5161 = vst [vmem:[%s406_s19] sm:$0xff] %v5157_v27  ;;  %v5159_v43 = vadd.f32 %v5153_v39, %v10702_v57 }
 0xc7e   : > { %5162 = vst [vmem:[%s406_s19 + $0x8] sm:$0xff] %v5158_v36  ;;  %v5160_v50 = vadd.f32 %v5155_v14, %v10703_v48 }
 0xc7f   : > { %5163 = vst [vmem:[%s406_s19 + $0x10] sm:$0xff] %v5159_v43 }
 0xc80   : > { %5164 = vst [vmem:[%s406_s19 + $0x18] sm:$0xff] %v5160_v50 }
 0xc81 PF: > { %s21_s17 = sadd.s32 1, %s6939_s17  }
 0xc82   : > { %p18_p4 = scmp.ge.s32.totalorder %s21_s17, 4  }
 0xc84   :  { %20 = sbr.rel (!%p18_p4) target bundleno = 1 (0x1), region = 105 }

</bundles_post_ra>
